<compile_context>
chip_gen: v7x
topology: tpu7x:2x2x1
jax: 0.10.0
libtpu: 0.0.40
codegen_flags: <defaults>
</compile_context>

<pallas_src>
import functools

import numpy as np
import jax
import jax.numpy as jnp
from jax import lax
from jax.experimental import pallas as pl
from jax.experimental.pallas import tpu as pltpu


_SQRT_HALF = 0.7071067811865476


def _erf_poly(x):
    """erf via Abramowitz & Stegun 7.1.26 (|err| < 1.5e-7): only mul/add/exp/where."""
    a1, a2, a3, a4, a5 = (0.254829592, -0.284496736, 1.421413741,
                          -1.453152027, 1.061405429)
    p = 0.3275911
    ax = jnp.abs(x)
    t = 1.0 / (1.0 + p * ax)
    poly = ((((a5 * t + a4) * t + a3) * t + a2) * t + a1) * t
    y = 1.0 - poly * jnp.exp(-ax * ax)
    return jnp.where(x >= 0.0, y, -y)


def _gelu_exact(x):
    # torch.nn.GELU() default (erf-based), computed with Pallas-safe primitives.
    return 0.5 * x * (1.0 + _erf_poly(x * _SQRT_HALF))


def _layernorm(x, g, b, eps):
    mu = jnp.mean(x, axis=-1, keepdims=True)
    d = x - mu
    var = jnp.mean(d * d, axis=-1, keepdims=True)
    return d * lax.rsqrt(var + eps) * g + b


def mhsa_stage_kernel(
    x_ref, t3_ref, t7_ref, hmask_ref,
    cpe_w_ref, cpe_b_ref, crpe_w_ref, crpe_b_ref,
    n1g_ref, n1b_ref, qkv_w_ref, qkv_b_ref, proj_w_ref, proj_b_ref,
    n2g_ref, n2b_ref, fc1_w_ref, fc1_b_ref, fc2_w_ref, fc2_b_ref,
    o_ref, *, scale, eps):
    """Grid = (batch_tiles, num_layers).  One invocation = one SerialBlock applied to one
    (Bt, N, C) batch tile; the activation is carried across the layer axis in o_ref."""
    Bt, N, C = o_ref.shape

    # First layer of this batch tile: seed the resident carry from the input.
    @pl.when(pl.program_id(1) == 0)
    def _():
        o_ref[...] = x_ref[...]

    x3 = o_ref[...]                                   # (Bt, N, C) f32, VMEM-resident carry

    def dwconv(y3, taps_ref, w_ref, b_ref):
        """Depthwise 'same' conv on (N, C) tokens: one (T*N, N)@(N, C) MXU dot per batch
        element, then a per-channel tap-weighted VPU sum.  taps: precomputed 0/1
        shift-selection rows; w: (T, 1, C) per-channel taps; b: (1, C) bias."""
        taps = taps_ref[...]                          # (T*N, N)
        w = w_ref[...]                                # (T, 1, C)
        bias = b_ref[...]                             # (1, C)
        T = w.shape[0]
        outs = []
        for bi in range(Bt):
            s = jnp.dot(taps, y3[bi], preferred_element_type=jnp.float32)   # (T*N, C)
            s = s.reshape(T, N, C)
            outs.append(jnp.sum(s * w, axis=0) + bias)                      # (N, C)
        if Bt == 1:
            return outs[0].reshape(1, N, C)
        return jnp.stack(outs, axis=0)

    # ---- ConvPosEnc (shared): depthwise 3x3 (+bias) + residual -----------------
    x3 = x3 + dwconv(x3, t3_ref, cpe_w_ref, cpe_b_ref)
    x = x3.reshape(Bt * N, C)                         # flatten batch into tokens (bigger M)

    # ---- norm1 + FactorAtt_ConvRelPosEnc ----------------------------------------
    cur = _layernorm(x, n1g_ref[0], n1b_ref[0], eps)

    qkv_w = qkv_w_ref[0]                              # (3, C, C)  (in, out) layout
    qkv_b = qkv_b_ref[0]                              # (3, 1, C)
    q = jnp.dot(cur, qkv_w[0], preferred_element_type=jnp.float32) + qkv_b[0]
    k = jnp.dot(cur, qkv_w[1], preferred_element_type=jnp.float32) + qkv_b[1]
    v = jnp.dot(cur, qkv_w[2], preferred_element_type=jnp.float32) + qkv_b[2]

    q3 = q.reshape(Bt, N, C)
    k3 = k.reshape(Bt, N, C)
    v3 = v.reshape(Bt, N, C)

    # softmax over the token axis (per batch, per channel = per head / per head-dim)
    k_max = jnp.max(k3, axis=1, keepdims=True)
    k_exp = jnp.exp(k3 - k_max)
    k_soft = k_exp / jnp.sum(k_exp, axis=1, keepdims=True)

    # factorized attention: per-head (k_soft^T v) then q @ (.), done on the full channel
    # dim with a block-diagonal head mask (no per-head slicing / 4-D transposes).
    kv = jnp.einsum('bnc,bnd->bcd', k_soft, v3, preferred_element_type=jnp.float32)
    kv = kv * hmask_ref[...]
    fa = jnp.einsum('bnc,bcd->bnd', q3, kv, preferred_element_type=jnp.float32)

    # conv relative position encoding: merged 7x7 depthwise conv on v, gated by q
    conv_v = dwconv(v3, t7_ref, crpe_w_ref, crpe_b_ref)
    attn = (scale * fa + q3 * conv_v).reshape(Bt * N, C)
    attn = jnp.dot(attn, proj_w_ref[0], preferred_element_type=jnp.float32) + proj_b_ref[0]
    x = x + attn

    # ---- norm2 + MLP (GELU) -------------------------------------------------------
    cur = _layernorm(x, n2g_ref[0], n2b_ref[0], eps)
    h = jnp.dot(cur, fc1_w_ref[0], preferred_element_type=jnp.float32) + fc1_b_ref[0]
    h = _gelu_exact(h)
    mlp = jnp.dot(h, fc2_w_ref[0], preferred_element_type=jnp.float32) + fc2_b_ref[0]

    o_ref[...] = (x + mlp).reshape(Bt, N, C).astype(o_ref.dtype)
    # TODO(synk): DropPath / Dropout are identities at this module config (rates 0.0); not emitted.


# -----------------------------------------------------------------------------
# host-side parameter preparation (layout plumbing only)
# -----------------------------------------------------------------------------

def _shift_matrix_flat(H, W, k):
    """(k*k*N, N) 0/1 matrix: row t*N + n selects the source token of output token n
    under tap t of a 'same'-padded k x k window (zeros at image boundaries)."""
    p = k // 2
    N = H * W
    T = np.zeros((k * k, N, N), np.float32)
    for dy in range(k):
        for dx in range(k):
            t = dy * k + dx
            for y in range(H):
                yy = y + dy - p
                if yy < 0 or yy >= H:
                    continue
                for xo in range(W):
                    xx = xo + dx - p
                    if xx < 0 or xx >= W:
                        continue
                    T[t, y * W + xo, yy * W + xx] = 1.0
    return jnp.asarray(T.reshape(k * k * N, N))


def _head_block_mask(C, num_heads):
    Ch = C // num_heads
    m = np.zeros((C, C), np.float32)
    for h in range(num_heads):
        m[h * Ch:(h + 1) * Ch, h * Ch:(h + 1) * Ch] = 1.0
    return jnp.asarray(m)


def _merge_crpe_weights(crpe_params, windows, C):
    """Embed the {3,5,7} per-group depthwise kernels into one centered 7x7 kernel."""
    W7 = np.zeros((49, C), np.float32)
    Bm = np.zeros((C,), np.float32)
    start = 0
    for kw, (w, b) in zip(windows, crpe_params):
        w = np.asarray(w)
        b = np.asarray(b)
        ch = w.shape[0]
        off = (7 - kw) // 2
        for dy in range(kw):
            for dx in range(kw):
                t = (dy + off) * 7 + (dx + off)
                W7[t, start:start + ch] = w[:, 0, dy, dx]
        Bm[start:start + ch] = b
        start += ch
    return jnp.asarray(W7.reshape(49, 1, C)), jnp.asarray(Bm.reshape(1, C))


def _stack_block_params(blocks, C):
    """Stack per-layer parameters with a leading L axis (selected by the layer grid dim)."""
    def st(fn):
        return jnp.stack([fn(b) for b in blocks], axis=0)

    return dict(
        n1g=st(lambda b: jnp.asarray(b["n1g"]).reshape(1, C)),
        n1b=st(lambda b: jnp.asarray(b["n1b"]).reshape(1, C)),
        qkv_w=st(lambda b: jnp.transpose(jnp.asarray(b["qkv_w"]).reshape(3, C, C), (0, 2, 1))),
        qkv_b=st(lambda b: jnp.asarray(b["qkv_b"]).reshape(3, 1, C)),
        proj_w=st(lambda b: jnp.transpose(jnp.asarray(b["proj_w"]), (1, 0))),
        proj_b=st(lambda b: jnp.asarray(b["proj_b"]).reshape(1, C)),
        n2g=st(lambda b: jnp.asarray(b["n2g"]).reshape(1, C)),
        n2b=st(lambda b: jnp.asarray(b["n2b"]).reshape(1, C)),
        fc1_w=st(lambda b: jnp.transpose(jnp.asarray(b["fc1_w"]), (1, 0))),
        fc1_b=st(lambda b: jnp.asarray(b["fc1_b"]).reshape(1, -1)),
        fc2_w=st(lambda b: jnp.transpose(jnp.asarray(b["fc2_w"]), (1, 0))),
        fc2_b=st(lambda b: jnp.asarray(b["fc2_b"]).reshape(1, C)),
    )


def mhsa_stage_pallas(x, params, H, W, *, num_heads, eps=1e-5):
    """MHSA_stage forward: (B, N, C) -> (B, N, C), single fused Pallas call."""
    B, N, C = x.shape
    assert N == H * W
    L = len(params["blocks"])
    scale = float((C // num_heads) ** -0.5)

    # Shared constants (DMA'd once, VMEM-resident across the whole grid).
    t3 = _shift_matrix_flat(H, W, 3)                    # (9*N, N)
    t7 = _shift_matrix_flat(H, W, 7)                    # (49*N, N)
    hmask = _head_block_mask(C, num_heads)
    cpe_w = jnp.asarray(
        np.transpose(np.asarray(params["cpe"]["w"]).reshape(C, 9), (1, 0)).reshape(9, 1, C))
    cpe_b = jnp.asarray(np.asarray(params["cpe"]["b"]).reshape(1, C))
    crpe_w, crpe_b = _merge_crpe_weights(params["crpe"], params["crpe_windows"], C)
    blk = _stack_block_params(params["blocks"], C)

    # Batch tiling: keep >=2 batch tiles when possible so v7x megacore gets parallel work,
    # otherwise fold the whole batch into one block for maximum MXU fill.
    bt = B // 2 if (B % 2 == 0 and B > 1) else 1
    n_bt = B // bt
    grid = (n_bt, L)

    def const_spec(a):
        nd = a.ndim
        return pl.BlockSpec(a.shape, lambda b, l, _nd=nd: (0,) * _nd)

    def layer_spec(a):
        nd = a.ndim
        return pl.BlockSpec((1,) + a.shape[1:],
                            lambda b, l, _nd=nd: (l,) + (0,) * (_nd - 1))

    consts = [t3, t7, hmask, cpe_w, cpe_b, crpe_w, crpe_b]
    layer_params = [blk["n1g"], blk["n1b"], blk["qkv_w"], blk["qkv_b"],
                    blk["proj_w"], blk["proj_b"],
                    blk["n2g"], blk["n2b"],
                    blk["fc1_w"], blk["fc1_b"], blk["fc2_w"], blk["fc2_b"]]

    in_specs = ([pl.BlockSpec((bt, N, C), lambda b, l: (b, 0, 0))]
                + [const_spec(a) for a in consts]
                + [layer_spec(a) for a in layer_params])

    kernel = functools.partial(mhsa_stage_kernel, scale=scale, eps=eps)

    return pl.pallas_call(
        kernel,
        grid=grid,
        in_specs=in_specs,
        out_specs=pl.BlockSpec((bt, N, C), lambda b, l: (b, 0, 0)),
        out_shape=jax.ShapeDtypeStruct((B, N, C), jnp.float32),
        compiler_params=pltpu.CompilerParams(
            dimension_semantics=("parallel", "arbitrary")),
    )(x.astype(jnp.float32), *consts, *layer_params)


# -----------------------------------------------------------------------------
# pure-JAX reference mirroring the PyTorch forward (validation only)
# -----------------------------------------------------------------------------

def mhsa_stage_reference(x, params, H, W, *, num_heads, eps=1e-5):
    B, N, C = x.shape
    Ch = C // num_heads
    scale = Ch ** -0.5
    hp = jax.lax.Precision.HIGHEST

    def dwconv(img, w, b, k):
        pad = k // 2
        dn = jax.lax.conv_dimension_numbers(img.shape, w.shape, ('NCHW', 'OIHW', 'NCHW'))
        y = jax.lax.conv_general_dilated(img, w, (1, 1), [(pad, pad), (pad, pad)],
                                         dimension_numbers=dn,
                                         feature_group_count=img.shape[1],
                                         precision=hp)
        return y + b.reshape(1, -1, 1, 1)

    def layernorm(t, g, b):
        mu = jnp.mean(t, axis=-1, keepdims=True)
        var = jnp.mean((t - mu) ** 2, axis=-1, keepdims=True)
        return (t - mu) / jnp.sqrt(var + eps) * g + b

    def gelu(t):
        return 0.5 * t * (1.0 + jax.scipy.special.erf(t * _SQRT_HALF))

    def cpe(t):
        img = jnp.transpose(t, (0, 2, 1)).reshape(B, C, H, W)
        y = dwconv(img, params["cpe"]["w"], params["cpe"]["b"], 3) + img
        return jnp.transpose(y.reshape(B, C, N), (0, 2, 1))

    def crpe(q, v):                                   # q, v: (B, h, N, Ch)
        v_img = jnp.transpose(v, (0, 1, 3, 2)).reshape(B, C, H, W)
        outs, start = [], 0
        for kw, (cw, cb) in zip(params["crpe_windows"], params["crpe"]):
            ch = cw.shape[0]
            outs.append(dwconv(v_img[:, start:start + ch], cw, cb, kw))
            start += ch
        conv_v = jnp.concatenate(outs, axis=1)
        conv_v = jnp.transpose(conv_v.reshape(B, num_heads, Ch, N), (0, 1, 3, 2))
        return q * conv_v

    def factoratt(xn, blk):
        qkv = jnp.dot(xn, blk["qkv_w"].T, precision=hp) + blk["qkv_b"]
        qkv = jnp.transpose(qkv.reshape(B, N, 3, num_heads, Ch), (2, 0, 3, 1, 4))
        q, k, v = qkv[0], qkv[1], qkv[2]
        k_soft = jax.nn.softmax(k, axis=2)
        fa = jnp.einsum('bhnc,bhnd->bhcd', k_soft, v, precision=hp)
        fa = jnp.einsum('bhnc,bhcd->bhnd', q, fa, precision=hp)
        out = scale * fa + crpe(q, v)
        out = jnp.transpose(out, (0, 2, 1, 3)).reshape(B, N, C)
        return jnp.dot(out, blk["proj_w"].T, precision=hp) + blk["proj_b"]

    def mlp(t, blk):
        h1 = gelu(jnp.dot(t, blk["fc1_w"].T, precision=hp) + blk["fc1_b"])
        return jnp.dot(h1, blk["fc2_w"].T, precision=hp) + blk["fc2_b"]

    for blk in params["blocks"]:
        x = cpe(x)
        x = x + factoratt(layernorm(x, blk["n1g"], blk["n1b"]), blk)
        x = x + mlp(layernorm(x, blk["n2g"], blk["n2b"]), blk)
    return x


if __name__ == "__main__":
    B = 2
    dim = 32
    num_heads = 8                       # must match crpe_window head splits {3:2, 5:3, 7:3}
    num_layers = 2
    mlp_ratio = 4.0
    H = W = 8
    N = H * W
    Ch = dim // num_heads
    hidden = int(dim * mlp_ratio)
    windows = {3: 2, 5: 3, 7: 3}

    keys = iter(jax.random.split(jax.random.PRNGKey(0), 64))

    def nrm(shape, s=0.02):
        return s * jax.random.normal(next(keys), shape, jnp.float32)

    x = jax.random.normal(next(keys), (B, N, dim), jnp.float32)

    params = {
        "cpe": {"w": nrm((dim, 1, 3, 3), 1.0 / 3.0), "b": nrm((dim,), 0.02)},
        "crpe_windows": list(windows.keys()),
        "crpe": [],
        "blocks": [],
    }
    for kw, hs in windows.items():
        ch = hs * Ch
        params["crpe"].append((nrm((ch, 1, kw, kw), 1.0 / kw), nrm((ch,), 0.02)))
    for _ in range(num_layers):
        params["blocks"].append(dict(
            n1g=1.0 + nrm((dim,), 0.1), n1b=nrm((dim,), 0.1),
            qkv_w=nrm((3 * dim, dim), dim ** -0.5), qkv_b=nrm((3 * dim,), 0.02),
            proj_w=nrm((dim, dim), dim ** -0.5), proj_b=nrm((dim,), 0.02),
            n2g=1.0 + nrm((dim,), 0.1), n2b=nrm((dim,), 0.1),
            fc1_w=nrm((hidden, dim), dim ** -0.5), fc1_b=nrm((hidden,), 0.02),
            fc2_w=nrm((dim, hidden), hidden ** -0.5), fc2_b=nrm((dim,), 0.02),
        ))

    out = mhsa_stage_pallas(x, params, H, W, num_heads=num_heads)
    out = jax.block_until_ready(out)

    ref = mhsa_stage_reference(x, params, H, W, num_heads=num_heads)
    assert out.shape == (B, N, dim), out.shape
    max_err = float(jnp.max(jnp.abs(out - ref)))
    assert jnp.allclose(out, ref, atol=3e-3, rtol=3e-3), max_err

    print("KERNEL_OK")
</pallas_src>

<mosaic_0001>
module attributes {stable_mosaic.version = 11 : i64} {
  func.func @mhsa_stage_kernel(%arg0: i32, %arg1: i32, %arg2: memref<1x64x32xf32, #tpu.memory_space<vmem>>, %arg3: memref<576x64xf32, #tpu.memory_space<vmem>>, %arg4: memref<3136x64xf32, #tpu.memory_space<vmem>>, %arg5: memref<32x32xf32, #tpu.memory_space<vmem>>, %arg6: memref<9x1x32xf32, #tpu.memory_space<vmem>>, %arg7: memref<1x32xf32, #tpu.memory_space<vmem>>, %arg8: memref<49x1x32xf32, #tpu.memory_space<vmem>>, %arg9: memref<1x32xf32, #tpu.memory_space<vmem>>, %arg10: memref<1x1x32xf32, #tpu.memory_space<vmem>>, %arg11: memref<1x1x32xf32, #tpu.memory_space<vmem>>, %arg12: memref<1x3x32x32xf32, #tpu.memory_space<vmem>>, %arg13: memref<1x3x1x32xf32, #tpu.memory_space<vmem>>, %arg14: memref<1x32x32xf32, #tpu.memory_space<vmem>>, %arg15: memref<1x1x32xf32, #tpu.memory_space<vmem>>, %arg16: memref<1x1x32xf32, #tpu.memory_space<vmem>>, %arg17: memref<1x1x32xf32, #tpu.memory_space<vmem>>, %arg18: memref<1x32x128xf32, #tpu.memory_space<vmem>>, %arg19: memref<1x1x128xf32, #tpu.memory_space<vmem>>, %arg20: memref<1x128x32xf32, #tpu.memory_space<vmem>>, %arg21: memref<1x1x32xf32, #tpu.memory_space<vmem>>, %arg22: memref<1x64x32xf32, #tpu.memory_space<vmem>>) attributes {dimension_semantics = [#tpu.dimension_semantics<parallel>, #tpu.dimension_semantics<arbitrary>], iteration_bounds = array<i64: 2, 2>, scalar_prefetch = 0 : i64, scratch_operands = 0 : i64, tpu.core_type = #tpu.core_type<tc>, window_params = [{transform_indices = @transform_0, window_bounds = array<i64: 1, 64, 32>}, {pipeline_mode = #tpu.pipeline_mode<synchronous>, transform_indices = @transform_1, window_bounds = array<i64: 576, 64>}, {pipeline_mode = #tpu.pipeline_mode<synchronous>, transform_indices = @transform_2, window_bounds = array<i64: 3136, 64>}, {pipeline_mode = #tpu.pipeline_mode<synchronous>, transform_indices = @transform_3, window_bounds = array<i64: 32, 32>}, {pipeline_mode = #tpu.pipeline_mode<synchronous>, transform_indices = @transform_4, window_bounds = array<i64: 9, 1, 32>}, {pipeline_mode = #tpu.pipeline_mode<synchronous>, transform_indices = @transform_5, window_bounds = array<i64: 1, 32>}, {pipeline_mode = #tpu.pipeline_mode<synchronous>, transform_indices = @transform_6, window_bounds = array<i64: 49, 1, 32>}, {pipeline_mode = #tpu.pipeline_mode<synchronous>, transform_indices = @transform_7, window_bounds = array<i64: 1, 32>}, {transform_indices = @transform_8, window_bounds = array<i64: 1, 1, 32>}, {transform_indices = @transform_9, window_bounds = array<i64: 1, 1, 32>}, {transform_indices = @transform_10, window_bounds = array<i64: 1, 3, 32, 32>}, {transform_indices = @transform_11, window_bounds = array<i64: 1, 3, 1, 32>}, {transform_indices = @transform_12, window_bounds = array<i64: 1, 32, 32>}, {transform_indices = @transform_13, window_bounds = array<i64: 1, 1, 32>}, {transform_indices = @transform_14, window_bounds = array<i64: 1, 1, 32>}, {transform_indices = @transform_15, window_bounds = array<i64: 1, 1, 32>}, {transform_indices = @transform_16, window_bounds = array<i64: 1, 32, 128>}, {transform_indices = @transform_17, window_bounds = array<i64: 1, 1, 128>}, {transform_indices = @transform_18, window_bounds = array<i64: 1, 128, 32>}, {transform_indices = @transform_19, window_bounds = array<i64: 1, 1, 32>}, {transform_indices = @transform_20, window_bounds = array<i64: 1, 64, 32>}]} {
    %c0_i32 = arith.constant 0 : i32
    %0 = arith.cmpi eq, %arg1, %c0_i32 : i32
    %1 = arith.extui %0 : i1 to i32
    %c0_i32_0 = arith.constant 0 : i32
    %2 = arith.cmpi ne, %1, %c0_i32_0 : i32
    scf.if %2 {
      %c0_99 = arith.constant 0 : index
      %c0_100 = arith.constant 0 : index
      %c0_101 = arith.constant 0 : index
      %190 = vector.load %arg2[%c0_99, %c0_100, %c0_101] : memref<1x64x32xf32, #tpu.memory_space<vmem>>, vector<1x64x32xf32>
      %c0_102 = arith.constant 0 : index
      %c0_103 = arith.constant 0 : index
      %c0_104 = arith.constant 0 : index
      %191 = vector.load %arg22[%c0_102, %c0_103, %c0_104] : memref<1x64x32xf32, #tpu.memory_space<vmem>>, vector<1x64x32xf32>
      tpu.vector_store %arg22[%c0_102, %c0_103, %c0_104], %190 {strides = array<i32>} : memref<1x64x32xf32, #tpu.memory_space<vmem>>, vector<1x64x32xf32>,
    } else {
    }
    %c0 = arith.constant 0 : index
    %c0_1 = arith.constant 0 : index
    %c0_2 = arith.constant 0 : index
    %3 = vector.load %arg22[%c0, %c0_1, %c0_2] : memref<1x64x32xf32, #tpu.memory_space<vmem>>, vector<1x64x32xf32>
    %c0_3 = arith.constant 0 : index
    %c0_4 = arith.constant 0 : index
    %4 = vector.load %arg3[%c0_3, %c0_4] : memref<576x64xf32, #tpu.memory_space<vmem>>, vector<576x64xf32>
    %c0_5 = arith.constant 0 : index
    %c0_6 = arith.constant 0 : index
    %c0_7 = arith.constant 0 : index
    %5 = vector.load %arg6[%c0_5, %c0_6, %c0_7] : memref<9x1x32xf32, #tpu.memory_space<vmem>>, vector<9x1x32xf32>
    %c0_8 = arith.constant 0 : index
    %c0_9 = arith.constant 0 : index
    %6 = vector.load %arg7[%c0_8, %c0_9] : memref<1x32xf32, #tpu.memory_space<vmem>>, vector<1x32xf32>
    %7 = vector.shape_cast %3 : vector<1x64x32xf32> to vector<64x32xf32>
    %cst = arith.constant dense<0.000000e+00> : vector<576x32xf32>
    %8 = tpu.matmul %4, %7, %cst {dimension_numbers = #tpu.dot_dimension_numbers<[1], [0], [0], [1], [0, 0, 1, 1], [], []>} : vector<576x64xf32>, vector<64x32xf32>, vector<576x32xf32> -> vector<576x32xf32>
    %9 = vector.shape_cast %8 : vector<576x32xf32> to vector<9x64x32xf32>
    %10 = vector.broadcast %5 : vector<9x1x32xf32> to vector<9x64x32xf32>
    %11 = arith.mulf %9, %10 : vector<9x64x32xf32>
    %cst_10 = arith.constant dense<0.000000e+00> : vector<64x32xf32>
    %12 = vector.multi_reduction <add>, %11, %cst_10 [0] : vector<9x64x32xf32> to vector<64x32xf32>
    %13 = vector.broadcast %6 : vector<1x32xf32> to vector<64x32xf32>
    %14 = arith.addf %12, %13 : vector<64x32xf32>
    %15 = vector.shape_cast %14 : vector<64x32xf32> to vector<1x64x32xf32>
    %16 = arith.addf %3, %15 : vector<1x64x32xf32>
    %17 = vector.shape_cast %16 : vector<1x64x32xf32> to vector<64x32xf32>
    %c0_11 = arith.constant 0 : index
    %c0_12 = arith.constant 0 : index
    %c0_13 = arith.constant 0 : index
    %18 = vector.load %arg10[%c0_11, %c0_12, %c0_13] : memref<1x1x32xf32, #tpu.memory_space<vmem>>, vector<1x1x32xf32>
    %19 = vector.shape_cast %18 : vector<1x1x32xf32> to vector<1x32xf32>
    %c0_14 = arith.constant 0 : index
    %c0_15 = arith.constant 0 : index
    %c0_16 = arith.constant 0 : index
    %20 = vector.load %arg11[%c0_14, %c0_15, %c0_16] : memref<1x1x32xf32, #tpu.memory_space<vmem>>, vector<1x1x32xf32>
    %21 = vector.shape_cast %20 : vector<1x1x32xf32> to vector<1x32xf32>
    %cst_17 = arith.constant dense<0.000000e+00> : vector<64xf32>
    %22 = vector.multi_reduction <add>, %17, %cst_17 [1] : vector<64x32xf32> to vector<64xf32>
    %23 = vector.shape_cast %22 : vector<64xf32> to vector<64x1xf32>
    %cst_18 = arith.constant 3.200000e+01 : f32
    %24 = vector.broadcast %cst_18 : f32 to vector<64x1xf32>
    %25 = arith.divf %23, %24 : vector<64x1xf32>
    %26 = vector.broadcast %25 : vector<64x1xf32> to vector<64x32xf32>
    %27 = arith.subf %17, %26 : vector<64x32xf32>
    %28 = arith.mulf %27, %27 : vector<64x32xf32>
    %cst_19 = arith.constant dense<0.000000e+00> : vector<64xf32>
    %29 = vector.multi_reduction <add>, %28, %cst_19 [1] : vector<64x32xf32> to vector<64xf32>
    %30 = vector.shape_cast %29 : vector<64xf32> to vector<64x1xf32>
    %cst_20 = arith.constant 3.200000e+01 : f32
    %31 = vector.broadcast %cst_20 : f32 to vector<64x1xf32>
    %32 = arith.divf %30, %31 : vector<64x1xf32>
    %cst_21 = arith.constant 9.99999974E-6 : f32
    %33 = vector.broadcast %cst_21 : f32 to vector<64x1xf32>
    %34 = arith.addf %32, %33 : vector<64x1xf32>
    %35 = math.rsqrt %34 : vector<64x1xf32>
    %36 = vector.broadcast %35 : vector<64x1xf32> to vector<64x32xf32>
    %37 = arith.mulf %27, %36 : vector<64x32xf32>
    %38 = vector.broadcast %19 : vector<1x32xf32> to vector<64x32xf32>
    %39 = arith.mulf %37, %38 : vector<64x32xf32>
    %40 = vector.broadcast %21 : vector<1x32xf32> to vector<64x32xf32>
    %41 = arith.addf %39, %40 : vector<64x32xf32>
    %c0_22 = arith.constant 0 : index
    %c0_23 = arith.constant 0 : index
    %c0_24 = arith.constant 0 : index
    %c0_25 = arith.constant 0 : index
    %42 = vector.load %arg12[%c0_22, %c0_23, %c0_24, %c0_25] : memref<1x3x32x32xf32, #tpu.memory_space<vmem>>, vector<1x3x32x32xf32>
    %43 = vector.shape_cast %42 : vector<1x3x32x32xf32> to vector<3x32x32xf32>
    %c0_26 = arith.constant 0 : index
    %c0_27 = arith.constant 0 : index
    %c0_28 = arith.constant 0 : index
    %c0_29 = arith.constant 0 : index
    %44 = vector.load %arg13[%c0_26, %c0_27, %c0_28, %c0_29] : memref<1x3x1x32xf32, #tpu.memory_space<vmem>>, vector<1x3x1x32xf32>
    %45 = vector.shape_cast %44 : vector<1x3x1x32xf32> to vector<3x1x32xf32>
    %46 = vector.extract_strided_slice %43 {offsets = [0, 0, 0], sizes = [1, 32, 32], strides = [1, 1, 1]} : vector<3x32x32xf32> to vector<1x32x32xf32>
    %47 = vector.shape_cast %46 : vector<1x32x32xf32> to vector<32x32xf32>
    %cst_30 = arith.constant dense<0.000000e+00> : vector<64x32xf32>
    %48 = tpu.matmul %41, %47, %cst_30 {dimension_numbers = #tpu.dot_dimension_numbers<[1], [0], [0], [1], [0, 0, 1, 1], [], []>} : vector<64x32xf32>, vector<32x32xf32>, vector<64x32xf32> -> vector<64x32xf32>
    %49 = vector.extract_strided_slice %45 {offsets = [0, 0, 0], sizes = [1, 1, 32], strides = [1, 1, 1]} : vector<3x1x32xf32> to vector<1x1x32xf32>
    %50 = vector.shape_cast %49 : vector<1x1x32xf32> to vector<1x32xf32>
    %51 = vector.broadcast %50 : vector<1x32xf32> to vector<64x32xf32>
    %52 = arith.addf %48, %51 : vector<64x32xf32>
    %53 = vector.extract_strided_slice %43 {offsets = [1, 0, 0], sizes = [1, 32, 32], strides = [1, 1, 1]} : vector<3x32x32xf32> to vector<1x32x32xf32>
    %54 = vector.shape_cast %53 : vector<1x32x32xf32> to vector<32x32xf32>
    %cst_31 = arith.constant dense<0.000000e+00> : vector<64x32xf32>
    %55 = tpu.matmul %41, %54, %cst_31 {dimension_numbers = #tpu.dot_dimension_numbers<[1], [0], [0], [1], [0, 0, 1, 1], [], []>} : vector<64x32xf32>, vector<32x32xf32>, vector<64x32xf32> -> vector<64x32xf32>
    %56 = vector.extract_strided_slice %45 {offsets = [1, 0, 0], sizes = [1, 1, 32], strides = [1, 1, 1]} : vector<3x1x32xf32> to vector<1x1x32xf32>
    %57 = vector.shape_cast %56 : vector<1x1x32xf32> to vector<1x32xf32>
    %58 = vector.broadcast %57 : vector<1x32xf32> to vector<64x32xf32>
    %59 = arith.addf %55, %58 : vector<64x32xf32>
    %60 = vector.extract_strided_slice %43 {offsets = [2, 0, 0], sizes = [1, 32, 32], strides = [1, 1, 1]} : vector<3x32x32xf32> to vector<1x32x32xf32>
    %61 = vector.shape_cast %60 : vector<1x32x32xf32> to vector<32x32xf32>
    %cst_32 = arith.constant dense<0.000000e+00> : vector<64x32xf32>
    %62 = tpu.matmul %41, %61, %cst_32 {dimension_numbers = #tpu.dot_dimension_numbers<[1], [0], [0], [1], [0, 0, 1, 1], [], []>} : vector<64x32xf32>, vector<32x32xf32>, vector<64x32xf32> -> vector<64x32xf32>
    %63 = vector.extract_strided_slice %45 {offsets = [2, 0, 0], sizes = [1, 1, 32], strides = [1, 1, 1]} : vector<3x1x32xf32> to vector<1x1x32xf32>
    %64 = vector.shape_cast %63 : vector<1x1x32xf32> to vector<1x32xf32>
    %65 = vector.broadcast %64 : vector<1x32xf32> to vector<64x32xf32>
    %66 = arith.addf %62, %65 : vector<64x32xf32>
    %67 = vector.shape_cast %52 : vector<64x32xf32> to vector<1x64x32xf32>
    %68 = vector.shape_cast %59 : vector<64x32xf32> to vector<1x64x32xf32>
    %69 = vector.shape_cast %66 : vector<64x32xf32> to vector<1x64x32xf32>
    %cst_33 = arith.constant dense<0xFF800000> : vector<1x32xf32>
    %70 = vector.multi_reduction <maximumf>, %68, %cst_33 [1] : vector<1x64x32xf32> to vector<1x32xf32>
    %71 = vector.shape_cast %70 : vector<1x32xf32> to vector<1x1x32xf32>
    %72 = vector.broadcast %71 : vector<1x1x32xf32> to vector<1x64x32xf32>
    %73 = arith.subf %68, %72 : vector<1x64x32xf32>
    %74 = math.exp %73 : vector<1x64x32xf32>
    %cst_34 = arith.constant dense<0.000000e+00> : vector<1x32xf32>
    %75 = vector.multi_reduction <add>, %74, %cst_34 [1] : vector<1x64x32xf32> to vector<1x32xf32>
    %76 = vector.shape_cast %75 : vector<1x32xf32> to vector<1x1x32xf32>
    %77 = vector.broadcast %76 : vector<1x1x32xf32> to vector<1x64x32xf32>
    %78 = arith.divf %74, %77 : vector<1x64x32xf32>
    "tpu.trace_start"() <{level = 10 : i32, message = "bnc,bnd->bcd"}> : () -> ()
    %cst_35 = arith.constant dense<0.000000e+00> : vector<1x32x32xf32>
    %79 = tpu.matmul %78, %69, %cst_35 {dimension_numbers = #tpu.dot_dimension_numbers<[1], [1], [2], [2], [0, 0, 0, 2, 1, 2], [0], [0]>} : vector<1x64x32xf32>, vector<1x64x32xf32>, vector<1x32x32xf32> -> vector<1x32x32xf32>
    "tpu.trace_stop"() : () -> ()
    %c0_36 = arith.constant 0 : index
    %c0_37 = arith.constant 0 : index
    %80 = vector.load %arg5[%c0_36, %c0_37] : memref<32x32xf32, #tpu.memory_space<vmem>>, vector<32x32xf32>
    %81 = vector.shape_cast %80 : vector<32x32xf32> to vector<1x32x32xf32>
    %82 = arith.mulf %79, %81 : vector<1x32x32xf32>
    "tpu.trace_start"() <{level = 10 : i32, message = "bnc,bcd->bnd"}> : () -> ()
    %cst_38 = arith.constant dense<0.000000e+00> : vector<1x64x32xf32>
    %83 = tpu.matmul %67, %82, %cst_38 {dimension_numbers = #tpu.dot_dimension_numbers<[2], [1], [1], [2], [0, 0, 0, 1, 1, 2], [0], [0]>} : vector<1x64x32xf32>, vector<1x32x32xf32>, vector<1x64x32xf32> -> vector<1x64x32xf32>
    "tpu.trace_stop"() : () -> ()
    %c0_39 = arith.constant 0 : index
    %c0_40 = arith.constant 0 : index
    %84 = vector.load %arg4[%c0_39, %c0_40] : memref<3136x64xf32, #tpu.memory_space<vmem>>, vector<3136x64xf32>
    %c0_41 = arith.constant 0 : index
    %c0_42 = arith.constant 0 : index
    %c0_43 = arith.constant 0 : index
    %85 = vector.load %arg8[%c0_41, %c0_42, %c0_43] : memref<49x1x32xf32, #tpu.memory_space<vmem>>, vector<49x1x32xf32>
    %c0_44 = arith.constant 0 : index
    %c0_45 = arith.constant 0 : index
    %86 = vector.load %arg9[%c0_44, %c0_45] : memref<1x32xf32, #tpu.memory_space<vmem>>, vector<1x32xf32>
    %87 = vector.shape_cast %69 : vector<1x64x32xf32> to vector<64x32xf32>
    %cst_46 = arith.constant dense<0.000000e+00> : vector<3136x32xf32>
    %88 = tpu.matmul %84, %87, %cst_46 {dimension_numbers = #tpu.dot_dimension_numbers<[1], [0], [0], [1], [0, 0, 1, 1], [], []>} : vector<3136x64xf32>, vector<64x32xf32>, vector<3136x32xf32> -> vector<3136x32xf32>
    %89 = vector.shape_cast %88 : vector<3136x32xf32> to vector<49x64x32xf32>
    %90 = vector.broadcast %85 : vector<49x1x32xf32> to vector<49x64x32xf32>
    %91 = arith.mulf %89, %90 : vector<49x64x32xf32>
    %cst_47 = arith.constant dense<0.000000e+00> : vector<64x32xf32>
    %92 = vector.multi_reduction <add>, %91, %cst_47 [0] : vector<49x64x32xf32> to vector<64x32xf32>
    %93 = vector.broadcast %86 : vector<1x32xf32> to vector<64x32xf32>
    %94 = arith.addf %92, %93 : vector<64x32xf32>
    %95 = vector.shape_cast %94 : vector<64x32xf32> to vector<1x64x32xf32>
    %cst_48 = arith.constant 5.000000e-01 : f32
    %96 = vector.broadcast %cst_48 : f32 to vector<1x64x32xf32>
    %97 = arith.mulf %96, %83 : vector<1x64x32xf32>
    %98 = arith.mulf %67, %95 : vector<1x64x32xf32>
    %99 = arith.addf %97, %98 : vector<1x64x32xf32>
    %100 = vector.shape_cast %99 : vector<1x64x32xf32> to vector<64x32xf32>
    %c0_49 = arith.constant 0 : index
    %c0_50 = arith.constant 0 : index
    %c0_51 = arith.constant 0 : index
    %101 = vector.load %arg14[%c0_49, %c0_50, %c0_51] : memref<1x32x32xf32, #tpu.memory_space<vmem>>, vector<1x32x32xf32>
    %102 = vector.shape_cast %101 : vector<1x32x32xf32> to vector<32x32xf32>
    %cst_52 = arith.constant dense<0.000000e+00> : vector<64x32xf32>
    %103 = tpu.matmul %100, %102, %cst_52 {dimension_numbers = #tpu.dot_dimension_numbers<[1], [0], [0], [1], [0, 0, 1, 1], [], []>} : vector<64x32xf32>, vector<32x32xf32>, vector<64x32xf32> -> vector<64x32xf32>
    %c0_53 = arith.constant 0 : index
    %c0_54 = arith.constant 0 : index
    %c0_55 = arith.constant 0 : index
    %104 = vector.load %arg15[%c0_53, %c0_54, %c0_55] : memref<1x1x32xf32, #tpu.memory_space<vmem>>, vector<1x1x32xf32>
    %105 = vector.shape_cast %104 : vector<1x1x32xf32> to vector<1x32xf32>
    %106 = vector.broadcast %105 : vector<1x32xf32> to vector<64x32xf32>
    %107 = arith.addf %103, %106 : vector<64x32xf32>
    %108 = arith.addf %17, %107 : vector<64x32xf32>
    %c0_56 = arith.constant 0 : index
    %c0_57 = arith.constant 0 : index
    %c0_58 = arith.constant 0 : index
    %109 = vector.load %arg16[%c0_56, %c0_57, %c0_58] : memref<1x1x32xf32, #tpu.memory_space<vmem>>, vector<1x1x32xf32>
    %110 = vector.shape_cast %109 : vector<1x1x32xf32> to vector<1x32xf32>
    %c0_59 = arith.constant 0 : index
    %c0_60 = arith.constant 0 : index
    %c0_61 = arith.constant 0 : index
    %111 = vector.load %arg17[%c0_59, %c0_60, %c0_61] : memref<1x1x32xf32, #tpu.memory_space<vmem>>, vector<1x1x32xf32>
    %112 = vector.shape_cast %111 : vector<1x1x32xf32> to vector<1x32xf32>
    %cst_62 = arith.constant dense<0.000000e+00> : vector<64xf32>
    %113 = vector.multi_reduction <add>, %108, %cst_62 [1] : vector<64x32xf32> to vector<64xf32>
    %114 = vector.shape_cast %113 : vector<64xf32> to vector<64x1xf32>
    %cst_63 = arith.constant 3.200000e+01 : f32
    %115 = vector.broadcast %cst_63 : f32 to vector<64x1xf32>
    %116 = arith.divf %114, %115 : vector<64x1xf32>
    %117 = vector.broadcast %116 : vector<64x1xf32> to vector<64x32xf32>
    %118 = arith.subf %108, %117 : vector<64x32xf32>
    %119 = arith.mulf %118, %118 : vector<64x32xf32>
    %cst_64 = arith.constant dense<0.000000e+00> : vector<64xf32>
    %120 = vector.multi_reduction <add>, %119, %cst_64 [1] : vector<64x32xf32> to vector<64xf32>
    %121 = vector.shape_cast %120 : vector<64xf32> to vector<64x1xf32>
    %cst_65 = arith.constant 3.200000e+01 : f32
    %122 = vector.broadcast %cst_65 : f32 to vector<64x1xf32>
    %123 = arith.divf %121, %122 : vector<64x1xf32>
    %cst_66 = arith.constant 9.99999974E-6 : f32
    %124 = vector.broadcast %cst_66 : f32 to vector<64x1xf32>
    %125 = arith.addf %123, %124 : vector<64x1xf32>
    %126 = math.rsqrt %125 : vector<64x1xf32>
    %127 = vector.broadcast %126 : vector<64x1xf32> to vector<64x32xf32>
    %128 = arith.mulf %118, %127 : vector<64x32xf32>
    %129 = vector.broadcast %110 : vector<1x32xf32> to vector<64x32xf32>
    %130 = arith.mulf %128, %129 : vector<64x32xf32>
    %131 = vector.broadcast %112 : vector<1x32xf32> to vector<64x32xf32>
    %132 = arith.addf %130, %131 : vector<64x32xf32>
    %c0_67 = arith.constant 0 : index
    %c0_68 = arith.constant 0 : index
    %c0_69 = arith.constant 0 : index
    %133 = vector.load %arg18[%c0_67, %c0_68, %c0_69] : memref<1x32x128xf32, #tpu.memory_space<vmem>>, vector<1x32x128xf32>
    %134 = vector.shape_cast %133 : vector<1x32x128xf32> to vector<32x128xf32>
    %cst_70 = arith.constant dense<0.000000e+00> : vector<64x128xf32>
    %135 = tpu.matmul %132, %134, %cst_70 {dimension_numbers = #tpu.dot_dimension_numbers<[1], [0], [0], [1], [0, 0, 1, 1], [], []>} : vector<64x32xf32>, vector<32x128xf32>, vector<64x128xf32> -> vector<64x128xf32>
    %c0_71 = arith.constant 0 : index
    %c0_72 = arith.constant 0 : index
    %c0_73 = arith.constant 0 : index
    %136 = vector.load %arg19[%c0_71, %c0_72, %c0_73] : memref<1x1x128xf32, #tpu.memory_space<vmem>>, vector<1x1x128xf32>
    %137 = vector.shape_cast %136 : vector<1x1x128xf32> to vector<1x128xf32>
    %138 = vector.broadcast %137 : vector<1x128xf32> to vector<64x128xf32>
    %139 = arith.addf %135, %138 : vector<64x128xf32>
    %cst_74 = arith.constant 5.000000e-01 : f32
    %140 = vector.broadcast %cst_74 : f32 to vector<64x128xf32>
    %141 = arith.mulf %140, %139 : vector<64x128xf32>
    %cst_75 = arith.constant 0.707106769 : f32
    %142 = vector.broadcast %cst_75 : f32 to vector<64x128xf32>
    %143 = arith.mulf %139, %142 : vector<64x128xf32>
    %144 = math.absf %143 : vector<64x128xf32>
    %cst_76 = arith.constant 0.327591091 : f32
    %145 = vector.broadcast %cst_76 : f32 to vector<64x128xf32>
    %146 = arith.mulf %145, %144 : vector<64x128xf32>
    %cst_77 = arith.constant 1.000000e+00 : f32
    %147 = vector.broadcast %cst_77 : f32 to vector<64x128xf32>
    %148 = arith.addf %147, %146 : vector<64x128xf32>
    %cst_78 = arith.constant 1.000000e+00 : f32
    %149 = vector.broadcast %cst_78 : f32 to vector<64x128xf32>
    %150 = arith.divf %149, %148 : vector<64x128xf32>
    %cst_79 = arith.constant 1.06140542 : f32
    %151 = vector.broadcast %cst_79 : f32 to vector<64x128xf32>
    %152 = arith.mulf %151, %150 : vector<64x128xf32>
    %cst_80 = arith.constant -1.45315206 : f32
    %153 = vector.broadcast %cst_80 : f32 to vector<64x128xf32>
    %154 = arith.addf %152, %153 : vector<64x128xf32>
    %155 = arith.mulf %154, %150 : vector<64x128xf32>
    %cst_81 = arith.constant 1.42141378 : f32
    %156 = vector.broadcast %cst_81 : f32 to vector<64x128xf32>
    %157 = arith.addf %155, %156 : vector<64x128xf32>
    %158 = arith.mulf %157, %150 : vector<64x128xf32>
    %cst_82 = arith.constant -0.284496725 : f32
    %159 = vector.broadcast %cst_82 : f32 to vector<64x128xf32>
    %160 = arith.addf %158, %159 : vector<64x128xf32>
    %161 = arith.mulf %160, %150 : vector<64x128xf32>
    %cst_83 = arith.constant 0.254829586 : f32
    %162 = vector.broadcast %cst_83 : f32 to vector<64x128xf32>
    %163 = arith.addf %161, %162 : vector<64x128xf32>
    %164 = arith.mulf %163, %150 : vector<64x128xf32>
    %cst_84 = arith.constant 0.000000e+00 : f32
    %165 = vector.broadcast %cst_84 : f32 to vector<64x128xf32>
    %166 = arith.subf %165, %144 : vector<64x128xf32>
    %167 = arith.mulf %166, %144 : vector<64x128xf32>
    %168 = math.exp %167 : vector<64x128xf32>
    %169 = arith.mulf %164, %168 : vector<64x128xf32>
    %cst_85 = arith.constant 1.000000e+00 : f32
    %170 = vector.broadcast %cst_85 : f32 to vector<64x128xf32>
    %171 = arith.subf %170, %169 : vector<64x128xf32>
    %cst_86 = arith.constant 0.000000e+00 : f32
    %172 = vector.broadcast %cst_86 : f32 to vector<64x128xf32>
    %173 = arith.cmpf oge, %143, %172 : vector<64x128xf32>
    %cst_87 = arith.constant 0.000000e+00 : f32
    %174 = vector.broadcast %cst_87 : f32 to vector<64x128xf32>
    %175 = arith.subf %174, %171 : vector<64x128xf32>
    %176 = arith.select %173, %171, %175 : vector<64x128xi1>, vector<64x128xf32>
    %cst_88 = arith.constant 1.000000e+00 : f32
    %177 = vector.broadcast %cst_88 : f32 to vector<64x128xf32>
    %178 = arith.addf %177, %176 : vector<64x128xf32>
    %179 = arith.mulf %141, %178 : vector<64x128xf32>
    %c0_89 = arith.constant 0 : index
    %c0_90 = arith.constant 0 : index
    %c0_91 = arith.constant 0 : index
    %180 = vector.load %arg20[%c0_89, %c0_90, %c0_91] : memref<1x128x32xf32, #tpu.memory_space<vmem>>, vector<1x128x32xf32>
    %181 = vector.shape_cast %180 : vector<1x128x32xf32> to vector<128x32xf32>
    %cst_92 = arith.constant dense<0.000000e+00> : vector<64x32xf32>
    %182 = tpu.matmul %179, %181, %cst_92 {dimension_numbers = #tpu.dot_dimension_numbers<[1], [0], [0], [1], [0, 0, 1, 1], [], []>} : vector<64x128xf32>, vector<128x32xf32>, vector<64x32xf32> -> vector<64x32xf32>
    %c0_93 = arith.constant 0 : index
    %c0_94 = arith.constant 0 : index
    %c0_95 = arith.constant 0 : index
    %183 = vector.load %arg21[%c0_93, %c0_94, %c0_95] : memref<1x1x32xf32, #tpu.memory_space<vmem>>, vector<1x1x32xf32>
    %184 = vector.shape_cast %183 : vector<1x1x32xf32> to vector<1x32xf32>
    %185 = vector.broadcast %184 : vector<1x32xf32> to vector<64x32xf32>
    %186 = arith.addf %182, %185 : vector<64x32xf32>
    %187 = arith.addf %108, %186 : vector<64x32xf32>
    %188 = vector.shape_cast %187 : vector<64x32xf32> to vector<1x64x32xf32>
    %c0_96 = arith.constant 0 : index
    %c0_97 = arith.constant 0 : index
    %c0_98 = arith.constant 0 : index
    %189 = vector.load %arg22[%c0_96, %c0_97, %c0_98] : memref<1x64x32xf32, #tpu.memory_space<vmem>>, vector<1x64x32xf32>
    tpu.vector_store %arg22[%c0_96, %c0_97, %c0_98], %188 {strides = array<i32>} : memref<1x64x32xf32, #tpu.memory_space<vmem>>, vector<1x64x32xf32>,
    return
  }
  func.func @transform_0(%arg0: i32, %arg1: i32) -> (i32, i32, i32) {
    %c0_i32 = arith.constant 0 : i32
    %c0_i32_0 = arith.constant 0 : i32
    %c0_i32_1 = arith.constant 0 : i32
    return %arg0, %c0_i32, %c0_i32_0 : i32, i32, i32
  }
  func.func @transform_1(%arg0: i32, %arg1: i32) -> (i32, i32) {
    %c0_i32 = arith.constant 0 : i32
    %c0_i32_0 = arith.constant 0 : i32
    %c0_i32_1 = arith.constant 0 : i32
    return %c0_i32, %c0_i32_0 : i32, i32
  }
  func.func @transform_2(%arg0: i32, %arg1: i32) -> (i32, i32) {
    %c0_i32 = arith.constant 0 : i32
    %c0_i32_0 = arith.constant 0 : i32
    %c0_i32_1 = arith.constant 0 : i32
    return %c0_i32, %c0_i32_0 : i32, i32
  }
  func.func @transform_3(%arg0: i32, %arg1: i32) -> (i32, i32) {
    %c0_i32 = arith.constant 0 : i32
    %c0_i32_0 = arith.constant 0 : i32
    %c0_i32_1 = arith.constant 0 : i32
    return %c0_i32, %c0_i32_0 : i32, i32
  }
  func.func @transform_4(%arg0: i32, %arg1: i32) -> (i32, i32, i32) {
    %c0_i32 = arith.constant 0 : i32
    %c0_i32_0 = arith.constant 0 : i32
    %c0_i32_1 = arith.constant 0 : i32
    %c0_i32_2 = arith.constant 0 : i32
    return %c0_i32, %c0_i32_0, %c0_i32_1 : i32, i32, i32
  }
  func.func @transform_5(%arg0: i32, %arg1: i32) -> (i32, i32) {
    %c0_i32 = arith.constant 0 : i32
    %c0_i32_0 = arith.constant 0 : i32
    %c0_i32_1 = arith.constant 0 : i32
    return %c0_i32, %c0_i32_0 : i32, i32
  }
  func.func @transform_6(%arg0: i32, %arg1: i32) -> (i32, i32, i32) {
    %c0_i32 = arith.constant 0 : i32
    %c0_i32_0 = arith.constant 0 : i32
    %c0_i32_1 = arith.constant 0 : i32
    %c0_i32_2 = arith.constant 0 : i32
    return %c0_i32, %c0_i32_0, %c0_i32_1 : i32, i32, i32
  }
  func.func @transform_7(%arg0: i32, %arg1: i32) -> (i32, i32) {
    %c0_i32 = arith.constant 0 : i32
    %c0_i32_0 = arith.constant 0 : i32
    %c0_i32_1 = arith.constant 0 : i32
    return %c0_i32, %c0_i32_0 : i32, i32
  }
  func.func @transform_8(%arg0: i32, %arg1: i32) -> (i32, i32, i32) {
    %c0_i32 = arith.constant 0 : i32
    %c0_i32_0 = arith.constant 0 : i32
    %c0_i32_1 = arith.constant 0 : i32
    return %arg1, %c0_i32, %c0_i32_0 : i32, i32, i32
  }
  func.func @transform_9(%arg0: i32, %arg1: i32) -> (i32, i32, i32) {
    %c0_i32 = arith.constant 0 : i32
    %c0_i32_0 = arith.constant 0 : i32
    %c0_i32_1 = arith.constant 0 : i32
    return %arg1, %c0_i32, %c0_i32_0 : i32, i32, i32
  }
  func.func @transform_10(%arg0: i32, %arg1: i32) -> (i32, i32, i32, i32) {
    %c0_i32 = arith.constant 0 : i32
    %c0_i32_0 = arith.constant 0 : i32
    %c0_i32_1 = arith.constant 0 : i32
    %c0_i32_2 = arith.constant 0 : i32
    return %arg1, %c0_i32, %c0_i32_0, %c0_i32_1 : i32, i32, i32, i32
  }
  func.func @transform_11(%arg0: i32, %arg1: i32) -> (i32, i32, i32, i32) {
    %c0_i32 = arith.constant 0 : i32
    %c0_i32_0 = arith.constant 0 : i32
    %c0_i32_1 = arith.constant 0 : i32
    %c0_i32_2 = arith.constant 0 : i32
    return %arg1, %c0_i32, %c0_i32_0, %c0_i32_1 : i32, i32, i32, i32
  }
  func.func @transform_12(%arg0: i32, %arg1: i32) -> (i32, i32, i32) {
    %c0_i32 = arith.constant 0 : i32
    %c0_i32_0 = arith.constant 0 : i32
    %c0_i32_1 = arith.constant 0 : i32
    return %arg1, %c0_i32, %c0_i32_0 : i32, i32, i32
  }
  func.func @transform_13(%arg0: i32, %arg1: i32) -> (i32, i32, i32) {
    %c0_i32 = arith.constant 0 : i32
    %c0_i32_0 = arith.constant 0 : i32
    %c0_i32_1 = arith.constant 0 : i32
    return %arg1, %c0_i32, %c0_i32_0 : i32, i32, i32
  }
  func.func @transform_14(%arg0: i32, %arg1: i32) -> (i32, i32, i32) {
    %c0_i32 = arith.constant 0 : i32
    %c0_i32_0 = arith.constant 0 : i32
    %c0_i32_1 = arith.constant 0 : i32
    return %arg1, %c0_i32, %c0_i32_0 : i32, i32, i32
  }
  func.func @transform_15(%arg0: i32, %arg1: i32) -> (i32, i32, i32) {
    %c0_i32 = arith.constant 0 : i32
    %c0_i32_0 = arith.constant 0 : i32
    %c0_i32_1 = arith.constant 0 : i32
    return %arg1, %c0_i32, %c0_i32_0 : i32, i32, i32
  }
  func.func @transform_16(%arg0: i32, %arg1: i32) -> (i32, i32, i32) {
    %c0_i32 = arith.constant 0 : i32
    %c0_i32_0 = arith.constant 0 : i32
    %c0_i32_1 = arith.constant 0 : i32
    return %arg1, %c0_i32, %c0_i32_0 : i32, i32, i32
  }
  func.func @transform_17(%arg0: i32, %arg1: i32) -> (i32, i32, i32) {
    %c0_i32 = arith.constant 0 : i32
    %c0_i32_0 = arith.constant 0 : i32
    %c0_i32_1 = arith.constant 0 : i32
    return %arg1, %c0_i32, %c0_i32_0 : i32, i32, i32
  }
  func.func @transform_18(%arg0: i32, %arg1: i32) -> (i32, i32, i32) {
    %c0_i32 = arith.constant 0 : i32
    %c0_i32_0 = arith.constant 0 : i32
    %c0_i32_1 = arith.constant 0 : i32
    return %arg1, %c0_i32, %c0_i32_0 : i32, i32, i32
  }
  func.func @transform_19(%arg0: i32, %arg1: i32) -> (i32, i32, i32) {
    %c0_i32 = arith.constant 0 : i32
    %c0_i32_0 = arith.constant 0 : i32
    %c0_i32_1 = arith.constant 0 : i32
    return %arg1, %c0_i32, %c0_i32_0 : i32, i32, i32
  }
  func.func @transform_20(%arg0: i32, %arg1: i32) -> (i32, i32, i32) {
    %c0_i32 = arith.constant 0 : i32
    %c0_i32_0 = arith.constant 0 : i32
    %c0_i32_1 = arith.constant 0 : i32
    return %arg0, %c0_i32, %c0_i32_0 : i32, i32, i32
  }
}

</mosaic_0001>

<bundles_post_ra>
// kernel: tpu_custom_call.1
= control target key start
LH: loop header
LB: loop body
LE: loop exit
PB: predicated region body
PF: predicated region fallthrough
CT: control target
= control target key end

     0   :  { %s11357_s22 = smov 0   ;;  %s11359_s23 = smov 0   ;;  %s14707_s0 = inlined_call_operand.vmem [shape: f32[2,64,32], index: 0, kind: input, shape index: {}]   ;;  %s14708_s1 = inlined_call_operand.vmem [shape: f32[576,64], index: 1, kind: input, shape index: {}]   ;;  %s14709_s2 = inlined_call_operand.vmem [shape: f32[3136,64], index: 2, kind: input, shape index: {}]   ;;  %s14710_s3 = inlined_call_operand.vmem [shape: f32[32,32], index: 3, kind: input, shape index: {}]   ;;  %s14711_s4 = inlined_call_operand.vmem [shape: f32[9,1,32], index: 4, kind: input, shape index: {}]   ;;  %s14712_s5 = inlined_call_operand.vmem [shape: f32[1,32], index: 5, kind: input, shape index: {}]   ;;  %s14713_s6 = inlined_call_operand.vmem [shape: f32[49,1,32], index: 6, kind: input, shape index: {}]   ;;  %s14714_s7 = inlined_call_operand.vmem [shape: f32[1,32], index: 7, kind: input, shape index: {}]   ;;  %s14715_s8 = inlined_call_operand.vmem [shape: f32[2,1,32], index: 8, kind: input, shape index: {}]   ;;  %s14716_s9 = inlined_call_operand.vmem [shape: f32[2,1,32], index: 9, kind: input, shape index: {}]   ;;  %s14717_s10 = inlined_call_operand.vmem [shape: f32[2,3,32,32], index: 10, kind: input, shape index: {}]   ;;  %s14718_s11 = inlined_call_operand.vmem [shape: f32[2,3,1,32], index: 11, kind: input, shape index: {}]   ;;  %s14719_s12 = inlined_call_operand.vmem [shape: f32[2,32,32], index: 12, kind: input, shape index: {}]   ;;  %s14720_s13 = inlined_call_operand.vmem [shape: f32[2,1,32], index: 13, kind: input, shape index: {}]   ;;  %s14721_s14 = inlined_call_operand.vmem [shape: f32[2,1,32], index: 14, kind: input, shape index: {}]   ;;  %s14722_s15 = inlined_call_operand.vmem [shape: f32[2,1,32], index: 15, kind: input, shape index: {}]   ;;  %s14723_s16 = inlined_call_operand.vmem [shape: f32[2,32,128], index: 16, kind: input, shape index: {}]   ;;  %s14724_s17 = inlined_call_operand.vmem [shape: f32[2,1,128], index: 17, kind: input, shape index: {}]   ;;  %s14725_s18 = inlined_call_operand.vmem [shape: f32[2,128,32], index: 18, kind: input, shape index: {}]   ;;  %s14726_s19 = inlined_call_operand.vmem [shape: f32[2,1,32], index: 19, kind: input, shape index: {}]   ;;  %s14727_s20 = inlined_call_operand.vmem [shape: f32[2,64,32], index: 20, kind: output, shape index: {}]  }
   0x1   :  { %14738 = sst [smem:[#allocation9_spill]] %s14707_s0  ;;  %s11361_s24 = smov 0  }
   0x2   :  { %14739 = sst [smem:[#allocation10_spill]] %s14708_s1  ;;  %s11355_s1 = smov 0  }
   0x3   :  { %14740 = sst [smem:[#allocation11_spill]] %s14709_s2  ;;  %s11363_s2 = smov 0  }
   0x4   :  { %14741 = sst [smem:[#allocation12_spill]] %s14710_s3 }
   0x5   :  { %14742 = sst [smem:[#allocation13_spill]] %s14711_s4 }
   0x6   :  { %14743 = sst [smem:[#allocation14_spill]] %s14712_s5 }
   0x7   :  { %14744 = sst [smem:[#allocation15_spill]] %s14713_s6 }
   0x8   :  { %14745 = sst [smem:[#allocation16_spill]] %s14714_s7 }
   0x9   :  { %14746 = sst [smem:[#allocation17_spill]] %s14716_s9 }
   0xa   :  { %14747 = sst [smem:[#allocation18_spill]] %s14717_s10 }
   0xb   :  { %14748 = sst [smem:[#allocation19_spill]] %s14718_s11 }
   0xc   :  { %14749 = sst [smem:[#allocation20_spill]] %s14719_s12 }
   0xd LB: > { %14750 = sst [smem:[#allocation2_spill]] %s11232_s1  ;;  %s39_s25 = sadd.s32 1, %s11240_s23  ;;  %s11248_s2 = sphi %s11363_s2, %s30_s2   ;;  %s11244_s24 = sphi %s11361_s24, %s14782_s24   ;;  %s11240_s23 = sphi %s11359_s23, %s14781_s23   ;;  %s11236_s22 = sphi %s11357_s22, %s14780_s22   ;;  %s11232_s1 = sphi %s11355_s1, %s14779_s1  }
   0xe   : > { %14751 = sst [smem:[#allocation3_spill]] %s11240_s23  ;;  %s42_s3 = sadd.s32 1, %s11244_s24 }
   0xf   : > { %14752 = sst [smem:[#allocation4_spill]] %s11244_s24  ;;  %p40_p0 = scmp.ge.s32.totalorder %s39_s25, 2 }
  0x10   : > { %14753 = sst [smem:[#allocation5_spill]] %s11248_s2  ;;  %p8841_p1 = scmp.ge.s32.totalorder %s11248_s2, 1 }
  0x11   : > { %p679_p2 = scmp.lt.s32.totalorder %s11248_s2, 5  ;;  %s14784_s25 = smov (%p40_p0, %s39_s25), 0 }
  0x12   : > { %14754 = sst [smem:[#allocation6_spill]] %s14784_s25  ;;  %s14786_s3 = smov (!%p40_p0, %s42_s3), %s11244_s24 }
  0x13   : > { %p680_p3 = pnand %p8841_p1, %p679_p2  ;;  %p44_p4 = scmp.ge.s32.totalorder %s14786_s3, 2 }
  0x15   : > { %s14788_s3 = smov (%p44_p4, %s14786_s3), 0  ;;  %683 = sbr.rel (%p680_p3) target bundleno = 3159 (0xc57), region = 100 }
  0x16   : > { %14755 = sst [smem:[#allocation7_spill]] %s14788_s3 }
  0x1c   : > { %p782_p5 = scmp.lt.s32.totalorder %s11236_s22, 1  ;;  %p787_p6 = scmp.lt.s32.totalorder %s11232_s1, 1 }
  0x1d   : > { %s14756_s29 = sld [smem:[#allocation9_spill]]  ;;  %s14759_s10 = sld [smem:[#allocation18_spill]] }
  0x1e   : > { %s14790_s22 = smov (!%p782_p5, %s11236_s22), 1  ;;  %s14760_s12 = sld [smem:[#allocation20_spill]] }
  0x1f   : > { %s11389_s26 = scalar_select %p787_p6, %s11232_s1, 1 }
  0x20   : > { %s9442_s27 = sshll.u32 %s14790_s22, 6  ;;  %s14761_s11 = sld [smem:[#allocation19_spill]] }
  0x21   : > { %s11085_s2 = smul.u32 96, %s11389_s26  ;;  %s9443_s6 = sshll.u32 %s11389_s26, 5 }
  0x22   : > { %s11086_s7 = smul.u32 3, %s11389_s26  ;;  %s823_s0 = scalar_lea.vmem %s14724_s17, %s11389_s26 }
  0x23   : > { %s11394_s30 = scalar_lea.vmem %s14756_s29, %s9442_s27  ;;  %s11410_s22 = scalar_lea.vmem %s14759_s10, %s11085_s2 }
  0x24   : > { %14757 = sst [smem:[#allocation8_spill]] %s11394_s30  ;;  %s11415_s29 = scalar_lea.vmem %s14760_s12, %s9443_s6 }
  0x25   : > { %s815_s10 = scalar_lea.vmem %s14722_s15, %s11389_s26  ;;  %s11437_s12 = scalar_lea.vmem %s14723_s16, %s9443_s6 }
  0x26   : > { %s11420_s21 = scalar_lea.vmem %s14761_s11, %s11086_s7  ;;  %s9445_s11 = sshll.u32 %s11389_s26, 7 }
  0x27   : > { %s831_s23 = scalar_lea.vmem %s14726_s19, %s11389_s26  ;;  %s11451_s5 = scalar_lea.vmem %s14725_s18, %s9445_s11 }
  0x28   : > { %s11456_s28 = scalar_lea.vmem %s14727_s20, %s9442_s27  ;;  %s14762_s6 = sld [smem:[#allocation2_spill]] }
  0x2e   : > { %p8853_p7 = scmp.ne.s32.totalorder %s14762_s6, 0 }
  0x2f   : > { %s14763_s4 = sld [smem:[#allocation8_spill]] (!%p8853_p7)  ;;  %vm849_vm0 = vcmask (!%p8853_p7), 261120  }
  0x30   : > { %840 = sbr.rel (%p8853_p7) target bundleno = 58 (0x3a), region = 104 }
  0x35   : > { %v841_v0 = vld [vmem:[%s14763_s4] sm:$0xff] (!%p8853_p7)  ;;  %v842_v1 = vld [vmem:[%s14763_s4 + $0x8] sm:$0xff] (!%p8853_p7)  ;;  %v843_v2 = vld [vmem:[%s14763_s4 + $0x10] sm:$0xff] (!%p8853_p7) }
  0x36   : > { %850 = vst.msk [vmem:[%s11456_s28] sm:$0xff] (!%p8853_p7), %vm849_vm0, %v841_v0  ;;  %851 = vst.msk [vmem:[%s11456_s28 + $0x8] sm:$0xff] (!%p8853_p7), %vm849_vm0, %v842_v1  ;;  %v844_v3 = vld [vmem:[%s14763_s4 + $0x18] sm:$0xff] (!%p8853_p7)  ;;  %v845_v4 = vld [vmem:[%s14763_s4 + $0x20] sm:$0xff] (!%p8853_p7) }
  0x37   : > { %852 = vst.msk [vmem:[%s11456_s28 + $0x10] sm:$0xff] %vm849_vm0, %v843_v2  ;;  %v846_v5 = vld [vmem:[%s14763_s4 + $0x28] sm:$0xff]  ;;  %853 = vst.msk [vmem:[%s11456_s28 + $0x18] sm:$0xff] %vm849_vm0, %v844_v3  ;;  %v847_v6 = vld [vmem:[%s14763_s4 + $0x30] sm:$0xff] }
  0x38   : > { %854 = vst.msk [vmem:[%s11456_s28 + $0x20] sm:$0xff] %vm849_vm0, %v845_v4  ;;  %855 = vst.msk [vmem:[%s11456_s28 + $0x28] sm:$0xff] %vm849_vm0, %v846_v5  ;;  %v848_v7 = vld [vmem:[%s14763_s4 + $0x38] sm:$0xff] }
  0x39   : > { %856 = vst.msk [vmem:[%s11456_s28 + $0x30] sm:$0xff] %vm849_vm0, %v847_v6  ;;  %857 = vst.msk [vmem:[%s11456_s28 + $0x38] sm:$0xff] %vm849_vm0, %v848_v7 }
  0x3a PF: > { %vm948_vm1 = vcmask 523264   ;;  %s14764_s30 = sld [smem:[#allocation10_spill]]  ;;  %s14765_s24 = sld [smem:[#allocation13_spill]]  ;;  %vm1716_vm2 = vcmask 261120  }
  0x3b   : > { %s14767_s7 = sld [smem:[#allocation14_spill]]  ;;  %s14768_s3 = scalar_lea.vmem %s14715_s8, %s11389_s26 }
  0x3c   : > { %s14769_s6 = sld [smem:[#allocation17_spill]]  ;;  %s14771_s27 = sld [smem:[#allocation11_spill]] }
  0x3f   : > { %v11492_v14 = vld [vmem:[%s11456_s28 + $0x20] sm:$0xff]  ;;  %v11495_v15 = vld [vmem:[%s11456_s28 + $0x28] sm:$0xff] }
  0x40   : > { %v11476_v8 = vld [vmem:[%s11456_s28] sm:$0xff]  ;;  %v11479_v9 = vld [vmem:[%s11456_s28 + $0x8] sm:$0xff]  ;;  %v10957_v17 = vpack.c.bf16 %v11495_v15, %v11492_v14  ;;  %v11504_v18 = vld [vmem:[%s11456_s28 + $0x30] sm:$0xff]  ;;  %s14766_s25 = smov %s14765_s24 }
  0x41   : > { %v11482_v10 = vld [vmem:[%s11456_s28 + $0x10] sm:$0xff]  ;;  %v10949_v11 = vpack.c.bf16 %v11479_v9, %v11476_v8  ;;  %v11487_v12 = vld [vmem:[%s11456_s28 + $0x18] sm:$0xff]  ;;  %v866_v16 = vld [vmem:[%s14764_s30] sm:$0xff] }
  0x42   : > { %v10953_v13 = vpack.c.bf16 %v11487_v12, %v11482_v10  ;;  %10051 = vmatprep.mubr.msk.f32.mxu0 %vm948_vm1, %v866_v16  ;;  %v11507_v19 = vld [vmem:[%s11456_s28 + $0x38] sm:$0xff]  ;;  %v867_v21 = vld [vmem:[%s14764_s30 + $0x8] sm:$0xff]  ;;  %v868_v22 = vld [vmem:[%s14764_s30 + $0x10] sm:$0xff]  ;;  %s14770_s4 = scalar_lea.vmem %s14769_s6, %s11389_s26  ;;  %s14776_s6 = scalar_lea.vmem %s14720_s13, %s11389_s26 }
  0x43   : > { %10950 = vmatprep.subr.bf16.mxu0 %v10949_v11  ;;  %v10961_v20 = vpack.c.bf16 %v11507_v19, %v11504_v18  ;;  %v869_v23 = vld [vmem:[%s14764_s30 + $0x18] sm:$0xff]  ;;  %v870_v24 = vld [vmem:[%s14764_s30 + $0x20] sm:$0xff]  ;;  %v871_v25 = vld [vmem:[%s14764_s30 + $0x28] sm:$0xff] }
  0x44   : > { %10952 = vmatpush3.bf16.msra.mxu0 %v10949_v11  ;;  %v872_v26 = vld [vmem:[%s14764_s30 + $0x30] sm:$0xff]  ;;  %v873_v27 = vld [vmem:[%s14764_s30 + $0x38] sm:$0xff]  ;;  %v874_v28 = vld [vmem:[%s14764_s30 + $0x40] sm:$0xff] }
  0x45   : > { %10954 = vmatprep.subr.bf16.mxu0 %v10953_v13  ;;  %v875_v29 = vld [vmem:[%s14764_s30 + $0x48] sm:$0xff]  ;;  %v876_v30 = vld [vmem:[%s14764_s30 + $0x50] sm:$0xff]  ;;  %v877_v31 = vld [vmem:[%s14764_s30 + $0x58] sm:$0xff] }
  0x46   : > { %v878_v32 = vld [vmem:[%s14764_s30 + $0x60] sm:$0xff]  ;;  %v879_v33 = vld [vmem:[%s14764_s30 + $0x68] sm:$0xff]  ;;  %v880_v34 = vld [vmem:[%s14764_s30 + $0x70] sm:$0xff] }
  0x47   : > { %v881_v35 = vld [vmem:[%s14764_s30 + $0x78] sm:$0xff]  ;;  %v882_v36 = vld [vmem:[%s14764_s30 + $0x80] sm:$0xff]  ;;  %v883_v37 = vld [vmem:[%s14764_s30 + $0x88] sm:$0xff] }
  0x48   : > { %10956 = vmatpush3.bf16.msra.mxu0 %v10953_v13  ;;  %v884_v38 = vld [vmem:[%s14764_s30 + $0x90] sm:$0xff]  ;;  %v885_v39 = vld [vmem:[%s14764_s30 + $0x98] sm:$0xff]  ;;  %v886_v40 = vld [vmem:[%s14764_s30 + $0xa0] sm:$0xff] }
  0x49   : > { %10958 = vmatprep.subr.bf16.mxu0 %v10957_v17  ;;  %v887_v41 = vld [vmem:[%s14764_s30 + $0xa8] sm:$0xff]  ;;  %v888_v42 = vld [vmem:[%s14764_s30 + $0xb0] sm:$0xff]  ;;  %v889_v43 = vld [vmem:[%s14764_s30 + $0xb8] sm:$0xff] }
  0x4a   : > { %v890_v44 = vld [vmem:[%s14764_s30 + $0xc0] sm:$0xff]  ;;  %v891_v45 = vld [vmem:[%s14764_s30 + $0xc8] sm:$0xff]  ;;  %v892_v46 = vld [vmem:[%s14764_s30 + $0xd0] sm:$0xff] }
  0x4b   : > { %v893_v47 = vld [vmem:[%s14764_s30 + $0xd8] sm:$0xff]  ;;  %v894_v48 = vld [vmem:[%s14764_s30 + $0xe0] sm:$0xff]  ;;  %v895_v49 = vld [vmem:[%s14764_s30 + $0xe8] sm:$0xff] }
  0x4c   : > { %10960 = vmatpush3.bf16.msra.mxu0 %v10957_v17  ;;  %v896_v50 = vld [vmem:[%s14764_s30 + $0xf0] sm:$0xff]  ;;  %v897_v51 = vld [vmem:[%s14764_s30 + $0xf8] sm:$0xff]  ;;  %v898_v52 = vld [vmem:[%s14764_s30 + $0x100] sm:$0xff] }
  0x4d   : > { %10962 = vmatprep.subr.bf16.mxu0 %v10961_v20  ;;  %v899_v53 = vld [vmem:[%s14764_s30 + $0x108] sm:$0xff]  ;;  %v900_v54 = vld [vmem:[%s14764_s30 + $0x110] sm:$0xff]  ;;  %v901_v55 = vld [vmem:[%s14764_s30 + $0x118] sm:$0xff] }
  0x4e   : > { %v902_v56 = vld [vmem:[%s14764_s30 + $0x120] sm:$0xff]  ;;  %v903_v57 = vld [vmem:[%s14764_s30 + $0x128] sm:$0xff]  ;;  %v904_v58 = vld [vmem:[%s14764_s30 + $0x130] sm:$0xff] }
  0x4f   : > { %v905_v59 = vld [vmem:[%s14764_s30 + $0x138] sm:$0xff]  ;;  %v906_v60 = vld [vmem:[%s14764_s30 + $0x140] sm:$0xff]  ;;  %v907_v61 = vld [vmem:[%s14764_s30 + $0x148] sm:$0xff] }
  0x50   : > { %10964 = vmatpush3.bf16.msra.mxu0 %v10961_v20  ;;  %v908_v62 = vld [vmem:[%s14764_s30 + $0x150] sm:$0xff]  ;;  %v909_v63 = vld [vmem:[%s14764_s30 + $0x158] sm:$0xff]  ;;  %v910_v0 = vld [vmem:[%s14764_s30 + $0x160] sm:$0xff] }
  0x51   : > { %v911_v1 = vld [vmem:[%s14764_s30 + $0x168] sm:$0xff]  ;;  %v912_v2 = vld [vmem:[%s14764_s30 + $0x170] sm:$0xff]  ;;  %v913_v3 = vld [vmem:[%s14764_s30 + $0x178] sm:$0xff] }
  0x52   : > { %v914_v4 = vld [vmem:[%s14764_s30 + $0x180] sm:$0xff]  ;;  %v915_v5 = vld [vmem:[%s14764_s30 + $0x188] sm:$0xff]  ;;  %v916_v6 = vld [vmem:[%s14764_s30 + $0x190] sm:$0xff] }
  0x53   : > { %10052 = vmatmul.mubr.msk.f32.vlgmr.msra.gmra.mrb[0].mxu0 %vm948_vm1, %v867_v21  ;;  %v917_v7 = vld [vmem:[%s14764_s30 + $0x198] sm:$0xff]  ;;  %v918_v11 = vld [vmem:[%s14764_s30 + $0x1a0] sm:$0xff]  ;;  %v919_v13 = vld [vmem:[%s14764_s30 + $0x1a8] sm:$0xff] }
  0x54   : > { %10054 = vmatprep.mubr.msk.f32.mxu0 %vm948_vm1, %v868_v22  ;;  %v920_v16 = vld [vmem:[%s14764_s30 + $0x1b0] sm:$0xff]  ;;  %v921_v17 = vld [vmem:[%s14764_s30 + $0x1b8] sm:$0xff]  ;;  %v922_v20 = vld [vmem:[%s14764_s30 + $0x1c0] sm:$0xff] }
  0x55   : > { %v923_v21 = vld [vmem:[%s14764_s30 + $0x1c8] sm:$0xff]  ;;  %v924_v22 = vld [vmem:[%s14764_s30 + $0x1d0] sm:$0xff] }
  0x57   : > { %10055 = vmatmul.mubr.msk.f32.gmra.mrb[2].mxu0 %vm948_vm1, %v869_v23  ;;  %v925_v23 = vld [vmem:[%s14764_s30 + $0x1d8] sm:$0xff] }
  0x58   : > { %10057 = vmatprep.mubr.msk.f32.mxu0 %vm948_vm1, %v870_v24  ;;  %v926_v24 = vld [vmem:[%s14764_s30 + $0x1e0] sm:$0xff] }
  0x5b   : > { %10058 = vmatmul.mubr.msk.f32.gmra.mrb[4].mxu0 %vm948_vm1, %v871_v25  ;;  %v927_v25 = vld [vmem:[%s14764_s30 + $0x1e8] sm:$0xff] }
  0x5c   : > { %10060 = vmatprep.mubr.msk.f32.mxu0 %vm948_vm1, %v872_v26  ;;  %v928_v26 = vld [vmem:[%s14764_s30 + $0x1f0] sm:$0xff] }
  0x5f   : > { %10061 = vmatmul.mubr.msk.f32.gmra.mrb[6].mxu0 %vm948_vm1, %v873_v27  ;;  %v929_v27 = vld [vmem:[%s14764_s30 + $0x1f8] sm:$0xff] }
  0x60   : > { %10063 = vmatprep.mubr.msk.f32.mxu0 %vm948_vm1, %v874_v28  ;;  %v930_v28 = vld [vmem:[%s14764_s30 + $0x200] sm:$0xff] }
  0x63   : > { %10064 = vmatmul.mubr.msk.f32.gmra.mrb[8].mxu0 %vm948_vm1, %v875_v29  ;;  %v931_v29 = vld [vmem:[%s14764_s30 + $0x208] sm:$0xff] }
  0x64   : > { %10066 = vmatprep.mubr.msk.f32.mxu0 %vm948_vm1, %v876_v30  ;;  %v932_v30 = vld [vmem:[%s14764_s30 + $0x210] sm:$0xff] }
  0x67   : > { %10067 = vmatmul.mubr.msk.f32.gmra.mrb[10].mxu0 %vm948_vm1, %v877_v31  ;;  %v933_v31 = vld [vmem:[%s14764_s30 + $0x218] sm:$0xff] }
  0x68   : > { %10069 = vmatprep.mubr.msk.f32.mxu0 %vm948_vm1, %v878_v32  ;;  %v934_v32 = vld [vmem:[%s14764_s30 + $0x220] sm:$0xff] }
  0x6b   : > { %10070 = vmatmul.mubr.msk.f32.gmra.mrb[12].mxu0 %vm948_vm1, %v879_v33  ;;  %v935_v33 = vld [vmem:[%s14764_s30 + $0x228] sm:$0xff] }
  0x6c   : > { %10072 = vmatprep.mubr.msk.f32.mxu0 %vm948_vm1, %v880_v34  ;;  %v936_v34 = vld [vmem:[%s14764_s30 + $0x230] sm:$0xff] }
  0x6f   : > { %10073 = vmatmul.mubr.msk.f32.gmra.mrb[14].mxu0 %vm948_vm1, %v881_v35  ;;  %v937_v35 = vld [vmem:[%s14764_s30 + $0x238] sm:$0xff] }
  0x70   : > { %10075 = vmatprep.mubr.msk.f32.mxu0 %vm948_vm1, %v882_v36 }
  0x73   : > { %10076 = vmatmul.mubr.msk.f32.gmra.mrb[16].mxu0 %vm948_vm1, %v883_v37 }
  0x74   : > { %10078 = vmatprep.mubr.msk.f32.mxu0 %vm948_vm1, %v884_v38 }
  0x77   : > { %10079 = vmatmul.mubr.msk.f32.gmra.mrb[18].mxu0 %vm948_vm1, %v885_v39 }
  0x78   : > { %10081 = vmatprep.mubr.msk.f32.mxu0 %vm948_vm1, %v886_v40 }
  0x7b   : > { %10082 = vmatmul.mubr.msk.f32.gmra.mrb[20].mxu0 %vm948_vm1, %v887_v41 }
  0x7c   : > { %10084 = vmatprep.mubr.msk.f32.mxu0 %vm948_vm1, %v888_v42  ;;  %v8926_v42 = vld [vmem:[%s14765_s24] ss:$0 sm:$0xff]  ;;  %s14773_s24 = sld [smem:[#allocation12_spill]] }
  0x7f   : > { %10085 = vmatmul.mubr.msk.f32.gmra.mrb[22].mxu0 %vm948_vm1, %v889_v43 }
  0x80   : > { %10087 = vmatprep.mubr.msk.f32.mxu0 %vm948_vm1, %v890_v44 }
  0x82   : > { %s14774_s9 = smov %s14773_s24 }
  0x83   : > { %10088 = vmatmul.mubr.msk.f32.gmra.mrb[24].mxu0 %vm948_vm1, %v891_v45  ;;  %v8927_v45 = vld [vmem:[%s14766_s25 + $0x1] ss:$0 sm:$0xff] }
  0x84   : > { %10090 = vmatprep.mubr.msk.f32.mxu0 %vm948_vm1, %v892_v46 }
  0x87   : > { %10091 = vmatmul.mubr.msk.f32.gmra.mrb[26].mxu0 %vm948_vm1, %v893_v47 }
  0x88   : > { %10093 = vmatprep.mubr.msk.f32.mxu0 %vm948_vm1, %v894_v48 }
  0x8b   : > { %10094 = vmatmul.mubr.msk.f32.gmra.mrb[28].mxu0 %vm948_vm1, %v895_v49 }
  0x8c   : > { %10096 = vmatprep.mubr.msk.f32.mxu0 %vm948_vm1, %v896_v50 }
  0x8f   : > { %10097 = vmatmul.mubr.msk.f32.gmra.mrb[30].mxu0 %vm948_vm1, %v897_v51 }
  0x90   : > { %10099 = vmatprep.mubr.msk.f32.mxu0 %vm948_vm1, %v898_v52 }
  0x93   : > { %10100 = vmatmul.mubr.msk.f32.gmra.mrb[32].mxu0 %vm948_vm1, %v899_v53 }
  0x94   : > { %10102 = vmatprep.mubr.msk.f32.mxu0 %vm948_vm1, %v900_v54 }
  0x97   : > { %10103 = vmatmul.mubr.msk.f32.gmra.mrb[34].mxu0 %vm948_vm1, %v901_v55 }
  0x98   : > { %10105 = vmatprep.mubr.msk.f32.mxu0 %vm948_vm1, %v902_v56 }
  0x9b   : > { %10106 = vmatmul.mubr.msk.f32.gmra.mrb[36].mxu0 %vm948_vm1, %v903_v57 }
  0x9c   : > { %10108 = vmatprep.mubr.msk.f32.mxu0 %vm948_vm1, %v904_v58 }
  0x9f   : > { %10109 = vmatmul.mubr.msk.f32.gmra.mrb[38].mxu0 %vm948_vm1, %v905_v59 }
  0xa0   : > { %10111 = vmatprep.mubr.msk.f32.mxu0 %vm948_vm1, %v906_v60 }
  0xa3   : > { %10112 = vmatmul.mubr.msk.f32.gmra.mrb[40].mxu0 %vm948_vm1, %v907_v61 }
  0xa4   : > { %10114 = vmatprep.mubr.msk.f32.mxu0 %vm948_vm1, %v908_v62 }
  0xa7   : > { %10115 = vmatmul.mubr.msk.f32.gmra.mrb[42].mxu0 %vm948_vm1, %v909_v63 }
  0xa8   : > { %10117 = vmatprep.mubr.msk.f32.mxu0 %vm948_vm1, %v910_v0 }
  0xab   : > { %10118 = vmatmul.mubr.msk.f32.gmra.mrb[44].mxu0 %vm948_vm1, %v911_v1 }
  0xac   : > { %10120 = vmatprep.mubr.msk.f32.mxu0 %vm948_vm1, %v912_v2 }
  0xaf   : > { %10121 = vmatmul.mubr.msk.f32.gmra.mrb[46].mxu0 %vm948_vm1, %v913_v3 }
  0xb0   : > { %10123 = vmatprep.mubr.msk.f32.mxu0 %vm948_vm1, %v914_v4 }
  0xb3   : > { %10124 = vmatmul.mubr.msk.f32.gmra.mrb[48].mxu0 %vm948_vm1, %v915_v5 }
  0xb4   : > { %10126 = vmatprep.mubr.msk.f32.mxu0 %vm948_vm1, %v916_v6 }
  0xb7   : > { %10127 = vmatmul.mubr.msk.f32.gmra.mrb[50].mxu0 %vm948_vm1, %v917_v7 }
  0xb8   : > { %10129 = vmatprep.mubr.msk.f32.mxu0 %vm948_vm1, %v918_v11 }
  0xbb   : > { %10130 = vmatmul.mubr.msk.f32.gmra.mrb[52].mxu0 %vm948_vm1, %v919_v13 }
  0xbc   : > { %10132 = vmatprep.mubr.msk.f32.mxu0 %vm948_vm1, %v920_v16 }
  0xbf   : > { %10133 = vmatmul.mubr.msk.f32.gmra.mrb[54].mxu0 %vm948_vm1, %v921_v17 }
  0xc0   : > { %10135 = vmatprep.mubr.msk.f32.mxu0 %vm948_vm1, %v922_v20 }
  0xc3   : > { %10136 = vmatmul.mubr.msk.f32.gmra.mrb[56].mxu0 %vm948_vm1, %v923_v21 }
  0xc4   : > { %10138 = vmatprep.mubr.msk.f32.mxu0 %vm948_vm1, %v924_v22 }
  0xc7   : > { %10139 = vmatmul.mubr.msk.f32.gmra.mrb[58].mxu0 %vm948_vm1, %v925_v23 }
  0xc8   : > { %10141 = vmatprep.mubr.msk.f32.mxu0 %vm948_vm1, %v926_v24 }
  0xcb   : > { %10142 = vmatmul.mubr.msk.f32.gmra.mrb[60].mxu0 %vm948_vm1, %v927_v25 }
  0xcc   : > { %10144 = vmatprep.mubr.msk.f32.mxu0 %vm948_vm1, %v928_v26 }
  0xcf   : > { %10145 = vmatmul.mubr.msk.f32.gmra.mrb[62].mxu0 %vm948_vm1, %v929_v27 }
  0xd0   : > { %10147 = vmatprep.mubr.msk.f32.mxu0 %vm948_vm1, %v930_v28 }
  0xd3   : > { %10148 = vmatmul.mubr.msk.f32.gmra.mrb[64].mxu0 %vm948_vm1, %v931_v29 }
  0xd4   : > { %10150 = vmatprep.mubr.msk.f32.mxu0 %vm948_vm1, %v932_v30 }
  0xd7   : > { %10151 = vmatmul.mubr.msk.f32.gmra.mrb[66].mxu0 %vm948_vm1, %v933_v31 }
  0xd8   : > { %10153 = vmatprep.mubr.msk.f32.mxu0 %vm948_vm1, %v934_v32  ;;  %v8928_v32 = vld [vmem:[%s14766_s25 + $0x2] ss:$0 sm:$0xff] }
  0xdb   : > { %10154 = vmatmul.mubr.msk.f32.gmra.mrb[68].mxu0 %vm948_vm1, %v935_v33 }
  0xdc   : > { %10156 = vmatprep.mubr.msk.f32.mxu0 %vm948_vm1, %v936_v34 }
  0xdf   : > { %10157 = vmatmul.mubr.msk.f32.gmra.mrb[70].mxu0 %vm948_vm1, %v937_v35 }
 0x126   : > { %v10053_v36 = vpop.f32.mrb[0].mxu0 }
 0x127   : > { %v1231_v37 = vpop.f32.mrb[1].mxu0  ;;  %v1645_v46 = vmul.f32 %v10053_v36, %v8926_v42 }
 0x128   : > { %v1644_v47 = vmul.f32 %v8926_v42, %v1231_v37 }
 0x129   : > { %v1734_v52 = vsel %vm1716_vm2, %v1645_v46, 0.0 }
 0x12a   : > { %v10056_v38 = vpop.f32.mrb[2].mxu0  ;;  %v1717_v55 = vsel %vm1716_vm2, %v1644_v47, 0.0 }
 0x12b   : > { %v1241_v39 = vpop.f32.mrb[3].mxu0  ;;  %v1647_v53 = vmul.f32 %v10056_v38, %v8926_v42 }
 0x12c   : > { %v1646_v56 = vmul.f32 %v8926_v42, %v1241_v39 }
 0x12d   : > { %v1768_v0 = vsel %vm1716_vm2, %v1647_v53, 0.0 }
 0x12e   : > { %v10059_v40 = vpop.f32.mrb[4].mxu0  ;;  %v1751_v3 = vsel %vm1716_vm2, %v1646_v56, 0.0 }
 0x12f   : > { %v1251_v41 = vpop.f32.mrb[5].mxu0  ;;  %v1649_v1 = vmul.f32 %v10059_v40, %v8926_v42 }
 0x130   : > { %v1648_v4 = vmul.f32 %v8926_v42, %v1251_v41 }
 0x131   : > { %v1802_v20 = vsel %vm1716_vm2, %v1649_v1, 0.0 }
 0x132   : > { %v10062_v43 = vpop.f32.mrb[6].mxu0  ;;  %v1785_v23 = vsel %vm1716_vm2, %v1648_v4, 0.0 }
 0x133   : > { %v1261_v44 = vpop.f32.mrb[7].mxu0  ;;  %v1651_v21 = vmul.f32 %v10062_v43, %v8926_v42 }
 0x134   : > { %v1650_v24 = vmul.f32 %v8926_v42, %v1261_v44 }
 0x135   : > { %v1836_v33 = vsel %vm1716_vm2, %v1651_v21, 0.0 }
 0x136   : > { %v10065_v48 = vpop.f32.mrb[8].mxu0  ;;  %v1819_v35 = vsel %vm1716_vm2, %v1650_v24, 0.0 }
 0x137   : > { %v1653_v49 = vmul.f32 %v10065_v48, %v8927_v45  ;;  %v1271_v50 = vpop.f32.mrb[9].mxu0 }
 0x138   : > { %v1652_v51 = vmul.f32 %v8927_v45, %v1271_v50 }
 0x139   : > { %v1735_v54 = vsel %vm1716_vm2, %v1653_v49, 0.0 }
 0x13a   : > { %v1736_v57 = vadd.f32 %v1735_v54, %v1734_v52  ;;  %v1718_v58 = vsel %vm1716_vm2, %v1652_v51, 0.0  ;;  %v10068_v59 = vpop.f32.mrb[10].mxu0 }
 0x13b   : > { %v1719_v60 = vadd.f32 %v1718_v58, %v1717_v55  ;;  %v1655_v61 = vmul.f32 %v10068_v59, %v8927_v45  ;;  %v1281_v62 = vpop.f32.mrb[11].mxu0 }
 0x13c   : > { %v1654_v63 = vmul.f32 %v8927_v45, %v1281_v62 }
 0x13d   : > { %v1769_v2 = vsel %vm1716_vm2, %v1655_v61, 0.0 }
 0x13e   : > { %v1770_v5 = vadd.f32 %v1769_v2, %v1768_v0  ;;  %v1752_v6 = vsel %vm1716_vm2, %v1654_v63, 0.0  ;;  %v10071_v7 = vpop.f32.mrb[12].mxu0 }
 0x13f   : > { %v1753_v11 = vadd.f32 %v1752_v6, %v1751_v3  ;;  %v1657_v13 = vmul.f32 %v10071_v7, %v8927_v45  ;;  %v1291_v16 = vpop.f32.mrb[13].mxu0  ;;  %v8929_v3 = vld [vmem:[%s14766_s25 + $0x3] ss:$0 sm:$0xff] }
 0x140   : > { %v1656_v17 = vmul.f32 %v8927_v45, %v1291_v16 }
 0x141   : > { %v1803_v22 = vsel %vm1716_vm2, %v1657_v13, 0.0 }
 0x142   : > { %v1804_v25 = vadd.f32 %v1803_v22, %v1802_v20  ;;  %v1786_v26 = vsel %vm1716_vm2, %v1656_v17, 0.0  ;;  %v10074_v27 = vpop.f32.mrb[14].mxu0 }
 0x143   : > { %v1787_v28 = vadd.f32 %v1786_v26, %v1785_v23  ;;  %v1659_v29 = vmul.f32 %v10074_v27, %v8927_v45  ;;  %v1301_v30 = vpop.f32.mrb[15].mxu0 }
 0x144   : > { %v1658_v31 = vmul.f32 %v8927_v45, %v1301_v30 }
 0x145   : > { %v1837_v34 = vsel %vm1716_vm2, %v1659_v29, 0.0 }
 0x146   : > { %v1838_v36 = vadd.f32 %v1837_v34, %v1836_v33  ;;  %v1820_v37 = vsel %vm1716_vm2, %v1658_v31, 0.0  ;;  %v10077_v38 = vpop.f32.mrb[16].mxu0 }
 0x147   : > { %v1821_v39 = vadd.f32 %v1820_v37, %v1819_v35  ;;  %v1661_v40 = vmul.f32 %v10077_v38, %v8928_v32  ;;  %v1311_v41 = vpop.f32.mrb[17].mxu0 }
 0x148   : > { %v1660_v42 = vmul.f32 %v8928_v32, %v1311_v41 }
 0x149   : > { %v1737_v43 = vsel %vm1716_vm2, %v1661_v40, 0.0 }
 0x14a   : > { %v1738_v44 = vadd.f32 %v1737_v43, %v1736_v57  ;;  %v1720_v45 = vsel %vm1716_vm2, %v1660_v42, 0.0  ;;  %v10080_v46 = vpop.f32.mrb[18].mxu0 }
 0x14b   : > { %v1721_v47 = vadd.f32 %v1720_v45, %v1719_v60  ;;  %v1663_v48 = vmul.f32 %v10080_v46, %v8928_v32  ;;  %v1321_v49 = vpop.f32.mrb[19].mxu0 }
 0x14c   : > { %v1662_v50 = vmul.f32 %v8928_v32, %v1321_v49 }
 0x14d   : > { %v1771_v51 = vsel %vm1716_vm2, %v1663_v48, 0.0 }
 0x14e   : > { %v1772_v52 = vadd.f32 %v1771_v51, %v1770_v5  ;;  %v1754_v53 = vsel %vm1716_vm2, %v1662_v50, 0.0  ;;  %v10083_v54 = vpop.f32.mrb[20].mxu0 }
 0x14f   : > { %v1755_v55 = vadd.f32 %v1754_v53, %v1753_v11  ;;  %v1665_v56 = vmul.f32 %v10083_v54, %v8928_v32  ;;  %v1331_v58 = vpop.f32.mrb[21].mxu0 }
 0x150   : > { %v1664_v59 = vmul.f32 %v8928_v32, %v1331_v58 }
 0x151   : > { %v1805_v61 = vsel %vm1716_vm2, %v1665_v56, 0.0 }
 0x152   : > { %v1806_v57 = vadd.f32 %v1805_v61, %v1804_v25  ;;  %v1788_v62 = vsel %vm1716_vm2, %v1664_v59, 0.0  ;;  %v10086_v63 = vpop.f32.mrb[22].mxu0 }
 0x153   : > { %v1789_v60 = vadd.f32 %v1788_v62, %v1787_v28  ;;  %v1667_v0 = vmul.f32 %v10086_v63, %v8928_v32  ;;  %v1341_v1 = vpop.f32.mrb[23].mxu0 }
 0x154   : > { %v1666_v2 = vmul.f32 %v8928_v32, %v1341_v1 }
 0x155   : > { %v1839_v4 = vsel %vm1716_vm2, %v1667_v0, 0.0 }
 0x156   : > { %v1840_v5 = vadd.f32 %v1839_v4, %v1838_v36  ;;  %v1822_v6 = vsel %vm1716_vm2, %v1666_v2, 0.0  ;;  %v10089_v7 = vpop.f32.mrb[24].mxu0 }
 0x157   : > { %v1823_v11 = vadd.f32 %v1822_v6, %v1821_v39  ;;  %v1669_v13 = vmul.f32 %v10089_v7, %v8929_v3  ;;  %v1351_v16 = vpop.f32.mrb[25].mxu0 }
 0x158   : > { %v1668_v17 = vmul.f32 %v8929_v3, %v1351_v16 }
 0x159   : > { %v1739_v20 = vsel %vm1716_vm2, %v1669_v13, 0.0 }
 0x15a   : > { %v1740_v21 = vadd.f32 %v1739_v20, %v1738_v44  ;;  %v1722_v22 = vsel %vm1716_vm2, %v1668_v17, 0.0  ;;  %v10092_v23 = vpop.f32.mrb[26].mxu0  ;;  %v8930_v44 = vld [vmem:[%s14766_s25 + $0x4] ss:$0 sm:$0xff] }
 0x15b   : > { %v1723_v24 = vadd.f32 %v1722_v22, %v1721_v47  ;;  %v1671_v25 = vmul.f32 %v10092_v23, %v8929_v3  ;;  %v1361_v26 = vpop.f32.mrb[27].mxu0 }
 0x15c   : > { %v1670_v27 = vmul.f32 %v8929_v3, %v1361_v26 }
 0x15d   : > { %v1773_v28 = vsel %vm1716_vm2, %v1671_v25, 0.0 }
 0x15e   : > { %v1774_v29 = vadd.f32 %v1773_v28, %v1772_v52  ;;  %v1756_v30 = vsel %vm1716_vm2, %v1670_v27, 0.0  ;;  %v10095_v31 = vpop.f32.mrb[28].mxu0 }
 0x15f   : > { %v1757_v32 = vadd.f32 %v1756_v30, %v1755_v55  ;;  %v1673_v33 = vmul.f32 %v10095_v31, %v8929_v3  ;;  %v1371_v34 = vpop.f32.mrb[29].mxu0 }
 0x160   : > { %v1672_v35 = vmul.f32 %v8929_v3, %v1371_v34 }
 0x161   : > { %v1807_v36 = vsel %vm1716_vm2, %v1673_v33, 0.0 }
 0x162   : > { %v1808_v37 = vadd.f32 %v1807_v36, %v1806_v57  ;;  %v1790_v38 = vsel %vm1716_vm2, %v1672_v35, 0.0  ;;  %v10098_v39 = vpop.f32.mrb[30].mxu0 }
 0x163   : > { %v1791_v40 = vadd.f32 %v1790_v38, %v1789_v60  ;;  %v1675_v41 = vmul.f32 %v10098_v39, %v8929_v3  ;;  %v1381_v42 = vpop.f32.mrb[31].mxu0 }
 0x164   : > { %v1674_v43 = vmul.f32 %v8929_v3, %v1381_v42 }
 0x165   : > { %v1841_v45 = vsel %vm1716_vm2, %v1675_v41, 0.0 }
 0x166   : > { %v1842_v46 = vadd.f32 %v1841_v45, %v1840_v5  ;;  %v1824_v47 = vsel %vm1716_vm2, %v1674_v43, 0.0  ;;  %v10101_v48 = vpop.f32.mrb[32].mxu0 }
 0x167   : > { %v1825_v49 = vadd.f32 %v1824_v47, %v1823_v11  ;;  %v1677_v50 = vmul.f32 %v10101_v48, %v8930_v44  ;;  %v1391_v51 = vpop.f32.mrb[33].mxu0 }
 0x168   : > { %v1676_v52 = vmul.f32 %v8930_v44, %v1391_v51 }
 0x169   : > { %v1741_v53 = vsel %vm1716_vm2, %v1677_v50, 0.0 }
 0x16a   : > { %v1742_v54 = vadd.f32 %v1741_v53, %v1740_v21  ;;  %v1724_v55 = vsel %vm1716_vm2, %v1676_v52, 0.0  ;;  %v10104_v56 = vpop.f32.mrb[34].mxu0  ;;  %v8931_v21 = vld [vmem:[%s14766_s25 + $0x5] ss:$0 sm:$0xff] }
 0x16b   : > { %v1725_v58 = vadd.f32 %v1724_v55, %v1723_v24  ;;  %v1679_v59 = vmul.f32 %v10104_v56, %v8930_v44  ;;  %v1401_v61 = vpop.f32.mrb[35].mxu0 }
 0x16c   : > { %v1678_v57 = vmul.f32 %v8930_v44, %v1401_v61 }
 0x16d   : > { %v1775_v62 = vsel %vm1716_vm2, %v1679_v59, 0.0 }
 0x16e   : > { %v1776_v63 = vadd.f32 %v1775_v62, %v1774_v29  ;;  %v1758_v60 = vsel %vm1716_vm2, %v1678_v57, 0.0  ;;  %v10107_v0 = vpop.f32.mrb[36].mxu0 }
 0x16f   : > { %v1759_v1 = vadd.f32 %v1758_v60, %v1757_v32  ;;  %v1681_v2 = vmul.f32 %v10107_v0, %v8930_v44  ;;  %v1411_v3 = vpop.f32.mrb[37].mxu0 }
 0x170   : > { %v1680_v4 = vmul.f32 %v8930_v44, %v1411_v3 }
 0x171   : > { %v1809_v5 = vsel %vm1716_vm2, %v1681_v2, 0.0 }
 0x172   : > { %v1810_v6 = vadd.f32 %v1809_v5, %v1808_v37  ;;  %v1792_v7 = vsel %vm1716_vm2, %v1680_v4, 0.0  ;;  %v10110_v11 = vpop.f32.mrb[38].mxu0 }
 0x173   : > { %v1793_v13 = vadd.f32 %v1792_v7, %v1791_v40  ;;  %v1683_v16 = vmul.f32 %v10110_v11, %v8930_v44  ;;  %v1421_v17 = vpop.f32.mrb[39].mxu0 }
 0x174   : > { %v1682_v20 = vmul.f32 %v8930_v44, %v1421_v17 }
 0x175   : > { %v1843_v22 = vsel %vm1716_vm2, %v1683_v16, 0.0 }
 0x176   : > { %v1844_v23 = vadd.f32 %v1843_v22, %v1842_v46  ;;  %v1826_v24 = vsel %vm1716_vm2, %v1682_v20, 0.0  ;;  %v10113_v25 = vpop.f32.mrb[40].mxu0 }
 0x177   : > { %v1827_v26 = vadd.f32 %v1826_v24, %v1825_v49  ;;  %v1685_v27 = vmul.f32 %v10113_v25, %v8931_v21  ;;  %v1431_v28 = vpop.f32.mrb[41].mxu0 }
 0x178   : > { %v1684_v29 = vmul.f32 %v8931_v21, %v1431_v28 }
 0x179   : > { %v1743_v30 = vsel %vm1716_vm2, %v1685_v27, 0.0 }
 0x17a   : > { %v1744_v31 = vadd.f32 %v1743_v30, %v1742_v54  ;;  %v1726_v32 = vsel %vm1716_vm2, %v1684_v29, 0.0  ;;  %v10116_v33 = vpop.f32.mrb[42].mxu0  ;;  %v8932_v54 = vld [vmem:[%s14766_s25 + $0x6] ss:$0 sm:$0xff] }
 0x17b   : > { %v1727_v34 = vadd.f32 %v1726_v32, %v1725_v58  ;;  %v1687_v35 = vmul.f32 %v10116_v33, %v8931_v21  ;;  %v1441_v36 = vpop.f32.mrb[43].mxu0 }
 0x17c   : > { %v1686_v37 = vmul.f32 %v8931_v21, %v1441_v36 }
 0x17d   : > { %v1777_v38 = vsel %vm1716_vm2, %v1687_v35, 0.0 }
 0x17e   : > { %v1778_v39 = vadd.f32 %v1777_v38, %v1776_v63  ;;  %v1760_v40 = vsel %vm1716_vm2, %v1686_v37, 0.0  ;;  %v10119_v41 = vpop.f32.mrb[44].mxu0 }
 0x17f   : > { %v1761_v42 = vadd.f32 %v1760_v40, %v1759_v1  ;;  %v1689_v43 = vmul.f32 %v10119_v41, %v8931_v21  ;;  %v1451_v44 = vpop.f32.mrb[45].mxu0 }
 0x180   : > { %v1688_v45 = vmul.f32 %v8931_v21, %v1451_v44 }
 0x181   : > { %v1811_v46 = vsel %vm1716_vm2, %v1689_v43, 0.0 }
 0x182   : > { %v1812_v47 = vadd.f32 %v1811_v46, %v1810_v6  ;;  %v1794_v48 = vsel %vm1716_vm2, %v1688_v45, 0.0  ;;  %v10122_v49 = vpop.f32.mrb[46].mxu0 }
 0x183   : > { %v1795_v50 = vadd.f32 %v1794_v48, %v1793_v13  ;;  %v1691_v51 = vmul.f32 %v10122_v49, %v8931_v21  ;;  %v1461_v52 = vpop.f32.mrb[47].mxu0 }
 0x184   : > { %v1690_v53 = vmul.f32 %v8931_v21, %v1461_v52 }
 0x185   : > { %v1845_v55 = vsel %vm1716_vm2, %v1691_v51, 0.0 }
 0x186   : > { %v1846_v56 = vadd.f32 %v1845_v55, %v1844_v23  ;;  %v1828_v58 = vsel %vm1716_vm2, %v1690_v53, 0.0  ;;  %v10125_v59 = vpop.f32.mrb[48].mxu0 }
 0x187   : > { %v1829_v61 = vadd.f32 %v1828_v58, %v1827_v26  ;;  %v1693_v57 = vmul.f32 %v10125_v59, %v8932_v54  ;;  %v1471_v62 = vpop.f32.mrb[49].mxu0 }
 0x188   : > { %v1692_v63 = vmul.f32 %v8932_v54, %v1471_v62 }
 0x189   : > { %v1745_v60 = vsel %vm1716_vm2, %v1693_v57, 0.0 }
 0x18a   : > { %v1746_v0 = vadd.f32 %v1745_v60, %v1744_v31  ;;  %v1728_v1 = vsel %vm1716_vm2, %v1692_v63, 0.0  ;;  %v10128_v2 = vpop.f32.mrb[50].mxu0  ;;  %v8933_v31 = vld [vmem:[%s14766_s25 + $0x7] ss:$0 sm:$0xff] }
 0x18b   : > { %v1729_v3 = vadd.f32 %v1728_v1, %v1727_v34  ;;  %v1695_v4 = vmul.f32 %v10128_v2, %v8932_v54  ;;  %v1481_v5 = vpop.f32.mrb[51].mxu0 }
 0x18c   : > { %v1694_v6 = vmul.f32 %v8932_v54, %v1481_v5 }
 0x18d   : > { %v1779_v7 = vsel %vm1716_vm2, %v1695_v4, 0.0 }
 0x18e   : > { %v1780_v11 = vadd.f32 %v1779_v7, %v1778_v39  ;;  %v1762_v13 = vsel %vm1716_vm2, %v1694_v6, 0.0  ;;  %v10131_v16 = vpop.f32.mrb[52].mxu0 }
 0x18f   : > { %v1763_v17 = vadd.f32 %v1762_v13, %v1761_v42  ;;  %v1697_v20 = vmul.f32 %v10131_v16, %v8932_v54  ;;  %v1491_v21 = vpop.f32.mrb[53].mxu0  ;;  %v8935_v13 = vld [vmem:[%s14767_s7] ss:$0 sm:$0xff]  ;;  %s14772_s7 = sld [smem:[#allocation15_spill]] }
 0x190   : > { %v1696_v22 = vmul.f32 %v8932_v54, %v1491_v21 }
 0x191   : > { %v1813_v23 = vsel %vm1716_vm2, %v1697_v20, 0.0 }
 0x192   : > { %v1814_v24 = vadd.f32 %v1813_v23, %v1812_v47  ;;  %v1796_v25 = vsel %vm1716_vm2, %v1696_v22, 0.0  ;;  %v10134_v26 = vpop.f32.mrb[54].mxu0 }
 0x193   : > { %v1797_v27 = vadd.f32 %v1796_v25, %v1795_v50  ;;  %v1699_v28 = vmul.f32 %v10134_v26, %v8932_v54  ;;  %v1501_v29 = vpop.f32.mrb[55].mxu0 }
 0x194   : > { %v1698_v30 = vmul.f32 %v8932_v54, %v1501_v29 }
 0x195   : > { %v1847_v32 = vsel %vm1716_vm2, %v1699_v28, 0.0 }
 0x196   : > { %v1848_v33 = vadd.f32 %v1847_v32, %v1846_v56  ;;  %v1830_v34 = vsel %vm1716_vm2, %v1698_v30, 0.0  ;;  %v10137_v35 = vpop.f32.mrb[56].mxu0 }
 0x197   : > { %v1831_v36 = vadd.f32 %v1830_v34, %v1829_v61  ;;  %v1701_v37 = vmul.f32 %v10137_v35, %v8933_v31  ;;  %v1511_v38 = vpop.f32.mrb[57].mxu0 }
 0x198   : > { %v1700_v39 = vmul.f32 %v8933_v31, %v1511_v38 }
 0x199   : > { %v1747_v40 = vsel %vm1716_vm2, %v1701_v37, 0.0 }
 0x19a   : > { %v1748_v41 = vadd.f32 %v1747_v40, %v1746_v0  ;;  %v1730_v42 = vsel %vm1716_vm2, %v1700_v39, 0.0  ;;  %v10140_v43 = vpop.f32.mrb[58].mxu0  ;;  %v8934_v0 = vld [vmem:[%s14766_s25 + $0x8] ss:$0 sm:$0xff] }
 0x19b   : > { %v1731_v44 = vadd.f32 %v1730_v42, %v1729_v3  ;;  %v1703_v45 = vmul.f32 %v10140_v43, %v8933_v31  ;;  %v1521_v46 = vpop.f32.mrb[59].mxu0 }
 0x19c   : > { %v1702_v47 = vmul.f32 %v8933_v31, %v1521_v46 }
 0x19d   : > { %v1781_v48 = vsel %vm1716_vm2, %v1703_v45, 0.0 }
 0x19e   : > { %v1782_v49 = vadd.f32 %v1781_v48, %v1780_v11  ;;  %v1764_v50 = vsel %vm1716_vm2, %v1702_v47, 0.0  ;;  %v10143_v51 = vpop.f32.mrb[60].mxu0 }
 0x19f   : > { %v1765_v52 = vadd.f32 %v1764_v50, %v1763_v17  ;;  %v1705_v53 = vmul.f32 %v10143_v51, %v8933_v31  ;;  %v1531_v54 = vpop.f32.mrb[61].mxu0 }
 0x1a0   : > { %v1704_v55 = vmul.f32 %v8933_v31, %v1531_v54 }
 0x1a1   : > { %v1815_v56 = vsel %vm1716_vm2, %v1705_v53, 0.0 }
 0x1a2   : > { %v1816_v58 = vadd.f32 %v1815_v56, %v1814_v24  ;;  %v1798_v59 = vsel %vm1716_vm2, %v1704_v55, 0.0  ;;  %v10146_v61 = vpop.f32.mrb[62].mxu0 }
 0x1a3   : > { %v1799_v57 = vadd.f32 %v1798_v59, %v1797_v27  ;;  %v1707_v62 = vmul.f32 %v10146_v61, %v8933_v31  ;;  %v1541_v63 = vpop.f32.mrb[63].mxu0 }
 0x1a4   : > { %v1706_v60 = vmul.f32 %v8933_v31, %v1541_v63 }
 0x1a5   : > { %v1849_v1 = vsel %vm1716_vm2, %v1707_v62, 0.0 }
 0x1a6   : > { %v1850_v2 = vadd.f32 %v1849_v1, %v1848_v33  ;;  %v1832_v3 = vsel %vm1716_vm2, %v1706_v60, 0.0  ;;  %v10149_v4 = vpop.f32.mrb[64].mxu0 }
 0x1a7   : > { %v1833_v5 = vadd.f32 %v1832_v3, %v1831_v36  ;;  %v1709_v6 = vmul.f32 %v10149_v4, %v8934_v0  ;;  %v1551_v7 = vpop.f32.mrb[65].mxu0 }
 0x1a8   : > { %v1708_v11 = vmul.f32 %v8934_v0, %v1551_v7 }
 0x1a9   : > { %v1749_v16 = vsel %vm1716_vm2, %v1709_v6, 0.0 }
 0x1aa   : > { %v1750_v17 = vadd.f32 %v1749_v16, %v1748_v41  ;;  %v1732_v20 = vsel %vm1716_vm2, %v1708_v11, 0.0  ;;  %v10152_v21 = vpop.f32.mrb[66].mxu0 }
 0x1ab   : > { %v1733_v22 = vadd.f32 %v1732_v20, %v1731_v44  ;;  %v1711_v23 = vmul.f32 %v10152_v21, %v8934_v0  ;;  %v1561_v24 = vpop.f32.mrb[67].mxu0 }
 0x1ac   : > { %v1860_v25 = vadd.f32 %v8935_v13, %v1750_v17  ;;  %v1710_v26 = vmul.f32 %v8934_v0, %v1561_v24 }
 0x1ad   : > { %v1859_v27 = vadd.f32 %v8935_v13, %v1733_v22  ;;  %v1783_v28 = vsel %vm1716_vm2, %v1711_v23, 0.0 }
 0x1ae   : > { %v1784_v29 = vadd.f32 %v1783_v28, %v1782_v49  ;;  %v1766_v30 = vsel %vm1716_vm2, %v1710_v26, 0.0  ;;  %v10155_v31 = vpop.f32.mrb[68].mxu0  ;;  %v11897_v38 = vadd.f32 %v1860_v25, %v11479_v9 }
 0x1af   : > { %v1767_v32 = vadd.f32 %v1766_v30, %v1765_v52  ;;  %v1713_v33 = vmul.f32 %v10155_v31, %v8934_v0  ;;  %v1571_v34 = vpop.f32.mrb[69].mxu0  ;;  %v11894_v35 = vadd.f32 %v1859_v27, %v11476_v8 }
 0x1b0   : > { %v1862_v36 = vadd.f32 %v8935_v13, %v1784_v29  ;;  %v1712_v37 = vmul.f32 %v8934_v0, %v1571_v34  ;;  %v1880_v9 = vsel %vm1716_vm2, %v11897_v38, 0.0 }
 0x1b1   : > { %v1861_v39 = vadd.f32 %v8935_v13, %v1767_v32  ;;  %v1817_v40 = vsel %vm1716_vm2, %v1713_v33, 0.0  ;;  %v1877_v41 = vsel %vm1716_vm2, %v11894_v35, 0.0 }
 0x1b2   : > { %v1818_v42 = vadd.f32 %v1817_v40, %v1816_v58  ;;  %v1800_v43 = vsel %vm1716_vm2, %v1712_v37, 0.0  ;;  %1878 = vadd.xlane.f32.xlu0 %v1877_v41  ;;  %v10158_v44 = vpop.f32.mrb[70].mxu0  ;;  %v11909_v49 = vadd.f32 %v1862_v36, %v11487_v12 }
 0x1b3   : > { %v1801_v45 = vadd.f32 %v1800_v43, %v1799_v57  ;;  %v1715_v46 = vmul.f32 %v10158_v44, %v8934_v0  ;;  %v1581_v8 = vpop.f32.mrb[71].mxu0  ;;  %v11904_v47 = vadd.f32 %v1861_v39, %v11482_v10 }
 0x1b4   : > { %v1714_v48 = vmul.f32 %v8934_v0, %v1581_v8  ;;  %v1864_v50 = vadd.f32 %v8935_v13, %v1818_v42  ;;  %v1886_v12 = vsel %vm1716_vm2, %v11909_v49, 0.0 }
 0x1b5   : > { %v1863_v51 = vadd.f32 %v8935_v13, %v1801_v45  ;;  %v1851_v52 = vsel %vm1716_vm2, %v1715_v46, 0.0  ;;  %v1883_v53 = vsel %vm1716_vm2, %v11904_v47, 0.0 }
 0x1b6   : > { %v1852_v54 = vadd.f32 %v1851_v52, %v1850_v2  ;;  %v1834_v55 = vsel %vm1716_vm2, %v1714_v48, 0.0  ;;  %1881 = vadd.xlane.f32.xlu0 %v1880_v9  ;;  %1884 = vadd.xlane.f32.xlu1 %v1883_v53  ;;  %v11923_v57 = vadd.f32 %v1864_v50, %v11495_v15  ;;  %v2010_v48 = vld [vmem:[%s11410_s22] sm:$0xff]  ;;  %v2011_v9 = vld [vmem:[%s11410_s22 + $0x8] sm:$0xff]  ;;  %v2013_v52 = vld [vmem:[%s11410_s22 + $0x18] sm:$0xff] }
 0x1b7   : > { %v1835_v10 = vadd.f32 %v1834_v55, %v1833_v5  ;;  %v11916_v56 = vadd.f32 %v1863_v51, %v11492_v14  ;;  %v10965_v50 = vpack.c.bf16 %v2011_v9, %v2010_v48  ;;  %v2012_v51 = vld [vmem:[%s11410_s22 + $0x10] sm:$0xff]  ;;  %v2015_v55 = vld [vmem:[%s11410_s22 + $0x28] sm:$0xff] }
 0x1b8   : > { %v1866_v58 = vadd.f32 %v8935_v13, %v1852_v54  ;;  %v1892_v14 = vsel %vm1716_vm2, %v11923_v57, 0.0  ;;  %v10969_v53 = vpack.c.bf16 %v2013_v52, %v2012_v51  ;;  %v2014_v54 = vld [vmem:[%s11410_s22 + $0x20] sm:$0xff] }
 0x1b9   : > { %v1865_v59 = vadd.f32 %v8935_v13, %v1835_v10  ;;  %v1889_v61 = vsel %vm1716_vm2, %v11916_v56, 0.0  ;;  %10966 = vmatprep.subr.bf16.mxu1 %v10965_v50  ;;  %v10973_v10 = vpack.c.bf16 %v2015_v55, %v2014_v54 }
 0x1ba   : > { %1887 = vadd.xlane.f32.xlu1 %v1886_v12  ;;  %1890 = vadd.xlane.f32.xlu0 %v1889_v61  ;;  %v11933_v60 = vadd.f32 %v1866_v58, %v11507_v19 }
 0x1bb   : > { %v11926_v62 = vadd.f32 %v1865_v59, %v11504_v18  ;;  %10968 = vmatpush3.bf16.msra.mxu1 %v10965_v50 }
 0x1bc   : > { %v1898_v15 = vsel %vm1716_vm2, %v11933_v60, 0.0  ;;  %10970 = vmatprep.subr.bf16.mxu1 %v10969_v53 }
 0x1bd   : > { %v1895_v63 = vsel %vm1716_vm2, %v11926_v62, 0.0 }
 0x1be   : > { %1893 = vadd.xlane.f32.xlu1 %v1892_v14  ;;  %1896 = vadd.xlane.f32.xlu0 %v1895_v63 }
 0x1bf   : > { %10972 = vmatpush3.bf16.msra.mxu1 %v10969_v53  ;;  %v2019_v53 = vld [vmem:[%s11410_s22 + $0x48] sm:$0xff] }
 0x1c0   : > { %10974 = vmatprep.subr.bf16.mxu1 %v10973_v10 }
 0x1c2   : > { %1899 = vadd.xlane.f32.xlu1 %v1898_v15 }
 0x23f   : > { %v1879_v0 = vpop.xlane.xlu0 %1878 }
 0x240   : > { %v1902_v1 = vmul.f32 0.03125, %v1879_v0 }
 0x242   : > { %v11938_v18 = vsub.f32 %v11894_v35, %v1902_v1 }
 0x243   : > { %v1882_v2 = vpop.xlane.xlu0 %1881  ;;  %v1885_v3 = vpop.xlane.xlu1 %1884 }
 0x244   : > { %v1903_v4 = vmul.f32 0.03125, %v1882_v2  ;;  %v1904_v5 = vmul.f32 0.03125, %v1885_v3  ;;  %v1918_v6 = vmul.f32 %v11938_v18, %v11938_v18 }
 0x246   : > { %v11943_v19 = vsub.f32 %v11897_v38, %v1903_v4  ;;  %v11946_v7 = vsub.f32 %v11904_v47, %v1904_v5  ;;  %v1926_v11 = vsel %vm1716_vm2, %v1918_v6, 0.0 }
 0x247   : > { %v1888_v13 = vpop.xlane.xlu1 %1887  ;;  %v1891_v16 = vpop.xlane.xlu0 %1890  ;;  %1927 = vadd.xlane.f32.xlu0 %v1926_v11 }
 0x248   : > { %v1905_v17 = vmul.f32 0.03125, %v1888_v13  ;;  %v1906_v20 = vmul.f32 0.03125, %v1891_v16  ;;  %v1919_v21 = vmul.f32 %v11943_v19, %v11943_v19  ;;  %v1920_v22 = vmul.f32 %v11946_v7, %v11946_v7 }
 0x24a   : > { %v11954_v23 = vsub.f32 %v11909_v49, %v1905_v17  ;;  %v11957_v24 = vsub.f32 %v11916_v56, %v1906_v20  ;;  %v1929_v25 = vsel %vm1716_vm2, %v1919_v21, 0.0  ;;  %v1932_v26 = vsel %vm1716_vm2, %v1920_v22, 0.0 }
 0x24b   : > { %v1894_v27 = vpop.xlane.xlu1 %1893  ;;  %1930 = vadd.xlane.f32.xlu1 %v1929_v25  ;;  %1933 = vadd.xlane.f32.xlu0 %v1932_v26  ;;  %v1897_v28 = vpop.xlane.xlu0 %1896  ;;  %v8936_v26 = vld [vmem:[%s14768_s3] ss:$0 sm:$0xff]  ;;  %s14775_s3 = sld [smem:[#allocation16_spill]] }
 0x24c   : > { %v1907_v29 = vmul.f32 0.03125, %v1894_v27  ;;  %v1908_v30 = vmul.f32 0.03125, %v1897_v28  ;;  %v1921_v31 = vmul.f32 %v11954_v23, %v11954_v23  ;;  %v1922_v32 = vmul.f32 %v11957_v24, %v11957_v24 }
 0x24e   : > { %v11966_v33 = vsub.f32 %v11923_v57, %v1907_v29  ;;  %v11969_v34 = vsub.f32 %v11926_v62, %v1908_v30  ;;  %v1935_v36 = vsel %vm1716_vm2, %v1921_v31, 0.0  ;;  %v1938_v37 = vsel %vm1716_vm2, %v1922_v32, 0.0  ;;  %v8937_v30 = vld [vmem:[%s14770_s4] ss:$0 sm:$0xff] }
 0x24f   : > { %1936 = vadd.xlane.f32.xlu1 %v1935_v36  ;;  %v1900_v39 = vpop.xlane.xlu1 %1899  ;;  %1939 = vadd.xlane.f32.xlu0 %v1938_v37 }
 0x250   : > { %v1909_v40 = vmul.f32 0.03125, %v1900_v39  ;;  %v1923_v41 = vmul.f32 %v11966_v33, %v11966_v33  ;;  %v1924_v42 = vmul.f32 %v11969_v34, %v11969_v34 }
 0x252   : > { %v11978_v43 = vsub.f32 %v11933_v60, %v1909_v40  ;;  %v1941_v44 = vsel %vm1716_vm2, %v1923_v41, 0.0  ;;  %v1944_v45 = vsel %vm1716_vm2, %v1924_v42, 0.0  ;;  %v2016_v41 = vld [vmem:[%s11410_s22 + $0x30] sm:$0xff]  ;;  %v2017_v42 = vld [vmem:[%s11410_s22 + $0x38] sm:$0xff] }
 0x253   : > { %1942 = vadd.xlane.f32.xlu1 %v1941_v44  ;;  %1945 = vadd.xlane.f32.xlu0 %v1944_v45  ;;  %v10977_v50 = vpack.c.bf16 %v2017_v42, %v2016_v41 }
 0x254   : > { %v1925_v46 = vmul.f32 %v11978_v43, %v11978_v43 }
 0x256   : > { %v1947_v8 = vsel %vm1716_vm2, %v1925_v46, 0.0 }
 0x257   : > { %1948 = vadd.xlane.f32.xlu1 %v1947_v8 }
 0x2d4   : > { %v1928_v12 = vpop.xlane.xlu0 %1927 }
 0x2d5   : > { %v1950_v58 = vmul.f32 0.03125, %v1928_v12 }
 0x2d7   : > { %v1958_v59 = vadd.f32 1e-05, %v1950_v58 }
 0x2d8   : > { %v1931_v61 = vpop.xlane.xlu1 %1930  ;;  %v1934_v14 = vpop.xlane.xlu0 %1933 }
 0x2d9   : > { %11128 = vrsqrt.f32 %v1958_v59  ;;  %v1951_v63 = vmul.f32 0.03125, %v1931_v61  ;;  %v1952_v15 = vmul.f32 0.03125, %v1934_v14 }
 0x2db   : > { %v1959_v0 = vadd.f32 1e-05, %v1951_v63  ;;  %v1960_v1 = vadd.f32 1e-05, %v1952_v15 }
 0x2dc   : > { %v1937_v2 = vpop.xlane.xlu1 %1936  ;;  %v1940_v3 = vpop.xlane.xlu0 %1939 }
 0x2dd   : > { %11130 = vrsqrt.f32 %v1959_v0  ;;  %v1953_v4 = vmul.f32 0.03125, %v1937_v2  ;;  %v1954_v5 = vmul.f32 0.03125, %v1940_v3  ;;  %v2020_v2 = vld [vmem:[%s11410_s22 + $0x50] sm:$0xff]  ;;  %v2021_v3 = vld [vmem:[%s11410_s22 + $0x58] sm:$0xff] }
 0x2de   : > { %11132 = vrsqrt.f32 %v1960_v1 }
 0x2df   : > { %v1961_v6 = vadd.f32 1e-05, %v1953_v4  ;;  %v1962_v11 = vadd.f32 1e-05, %v1954_v5  ;;  %v10985_v4 = vpack.c.bf16 %v2021_v3, %v2020_v2 }
 0x2e0   : > { %v1943_v13 = vpop.xlane.xlu1 %1942  ;;  %v1946_v16 = vpop.xlane.xlu0 %1945 }
 0x2e1   : > { %11134 = vrsqrt.f32 %v1961_v6  ;;  %v1955_v17 = vmul.f32 0.03125, %v1943_v13  ;;  %v1956_v20 = vmul.f32 0.03125, %v1946_v16 }
 0x2e2   : > { %11136 = vrsqrt.f32 %v1962_v11 }
 0x2e3   : > { %v11129_v21 = vpop.eup %11128  ;;  %v1963_v22 = vadd.f32 1e-05, %v1955_v17  ;;  %v1964_v25 = vadd.f32 1e-05, %v1956_v20 }
 0x2e4   : > { %v1949_v27 = vpop.xlane.xlu1 %1948  ;;  %v1974_v28 = vmul.f32 %v11129_v21, %v11938_v18 }
 0x2e5   : > { %11138 = vrsqrt.f32 %v1963_v22  ;;  %v1957_v29 = vmul.f32 0.03125, %v1949_v27 }
 0x2e6   : > { %11140 = vrsqrt.f32 %v1964_v25  ;;  %v1988_v31 = vmul.f32 %v8936_v26, %v1974_v28 }
 0x2e7   : > { %v11131_v32 = vpop.eup %11130  ;;  %v1965_v36 = vadd.f32 1e-05, %v1957_v29 }
 0x2e8   : > { %v11133_v37 = vpop.eup %11132  ;;  %v2002_v39 = vadd.f32 %v8937_v30, %v1988_v31  ;;  %v1975_v40 = vmul.f32 %v11131_v32, %v11943_v19  ;;  %v2018_v19 = vld [vmem:[%s11410_s22 + $0x40] sm:$0xff]  ;;  %s14777_s22 = scalar_lea.vmem %s14721_s14, %s11389_s26 }
 0x2e9   : > { %11142 = vrsqrt.f32 %v1965_v36  ;;  %v1976_v18 = vmul.f32 %v11133_v37, %v11946_v7  ;;  %v8947_v37 = vld [vmem:[%s11420_s21 + $0x1] ss:$0 sm:$0xff] }
 0x2ea   : > { %10167 = vmatprep.mubr.msk.f32.mxu1 %vm1716_vm2, %v2002_v39  ;;  %v1989_v44 = vmul.f32 %v8936_v26, %v1975_v40 }
 0x2eb   : > { %v11135_v45 = vpop.eup %11134  ;;  %v1990_v46 = vmul.f32 %v8936_v26, %v1976_v18 }
 0x2ec   : > { %v11137_v8 = vpop.eup %11136  ;;  %v2003_v48 = vadd.f32 %v8937_v30, %v1989_v44  ;;  %v1977_v9 = vmul.f32 %v11135_v45, %v11954_v23  ;;  %v10981_v23 = vpack.c.bf16 %v2019_v53, %v2018_v19 }
 0x2ed   : > { %v2004_v51 = vadd.f32 %v8937_v30, %v1990_v46  ;;  %v1978_v52 = vmul.f32 %v11137_v8, %v11957_v24 }
 0x2ee   : > { %10168 = vmatmul.mubr.msk.f32.vlgmr.msra.gmra.mrb[0].mxu1 %vm1716_vm2, %v2003_v48  ;;  %v1991_v7 = vmul.f32 %v8936_v26, %v1977_v9 }
 0x2ef   : > { %v11139_v54 = vpop.eup %11138  ;;  %10170 = vmatprep.mubr.msk.f32.mxu1 %vm1716_vm2, %v2004_v51  ;;  %10976 = vmatpush3.bf16.msra.mxu1 %v10973_v10  ;;  %v1992_v55 = vmul.f32 %v8936_v26, %v1978_v52 }
 0x2f0   : > { %v11141_v12 = vpop.eup %11140  ;;  %v2005_v58 = vadd.f32 %v8937_v30, %v1991_v7  ;;  %v1979_v59 = vmul.f32 %v11139_v54, %v11966_v33  ;;  %10978 = vmatprep.subr.bf16.mxu1 %v10977_v50 }
 0x2f1   : > { %v2006_v61 = vadd.f32 %v8937_v30, %v1992_v55  ;;  %v1980_v24 = vmul.f32 %v11141_v12, %v11969_v34 }
 0x2f2   : > { %10171 = vmatmul.mubr.msk.f32.gmra.mrb[2].mxu1 %vm1716_vm2, %v2005_v58  ;;  %v1993_v14 = vmul.f32 %v8936_v26, %v1979_v59 }
 0x2f3   : > { %v11143_v63 = vpop.eup %11142  ;;  %10173 = vmatprep.mubr.msk.f32.mxu1 %vm1716_vm2, %v2006_v61  ;;  %v1994_v15 = vmul.f32 %v8936_v26, %v1980_v24  ;;  %10980 = vmatpush3.bf16.msra.mxu1 %v10977_v50 }
 0x2f4   : > { %v2007_v10 = vadd.f32 %v8937_v30, %v1993_v14  ;;  %v1981_v0 = vmul.f32 %v11143_v63, %v11978_v43  ;;  %10982 = vmatprep.subr.bf16.mxu1 %v10981_v23  ;;  %v12040_v43 = vld [vmem:[%s11420_s21] ss:$0 sm:$0xff] }
 0x2f5   : > { %v2008_v33 = vadd.f32 %v8937_v30, %v1994_v15 }
 0x2f6   : > { %10174 = vmatmul.mubr.msk.f32.gmra.mrb[4].mxu1 %vm1716_vm2, %v2007_v10  ;;  %v1995_v1 = vmul.f32 %v8936_v26, %v1981_v0  ;;  %v2723_v26 = vld [vmem:[%s14771_s27] sm:$0xff] }
 0x2f7   : > { %10176 = vmatprep.mubr.msk.f32.mxu1 %vm1716_vm2, %v2008_v33  ;;  %10277 = vmatprep.mubr.msk.f32.mxu0 %vm948_vm1, %v2723_v26 }
 0x2f8   : > { %v2009_v34 = vadd.f32 %v8937_v30, %v1995_v1 }
 0x2fa   : > { %10177 = vmatmul.mubr.msk.f32.gmra.mrb[6].mxu1 %vm1716_vm2, %v2009_v34 }
 0x2fb   : > { %10187 = vmatprep.mubr.msk.f32.mxu1 %vm1716_vm2, %v2002_v39 }
 0x2fe   : > { %10188 = vmatmul.mubr.msk.f32.vlgmr.msra.gmra.mrb[8].mxu1 %vm1716_vm2, %v2003_v48 }
 0x2ff   : > { %10190 = vmatprep.mubr.msk.f32.mxu1 %vm1716_vm2, %v2004_v51  ;;  %10984 = vmatpush3.bf16.msra.mxu1 %v10981_v23 }
 0x300   : > { %10986 = vmatprep.subr.bf16.mxu1 %v10985_v4 }
 0x302   : > { %10191 = vmatmul.mubr.msk.f32.gmra.mrb[10].mxu1 %vm1716_vm2, %v2005_v58 }
 0x303   : > { %10193 = vmatprep.mubr.msk.f32.mxu1 %vm1716_vm2, %v2006_v61  ;;  %10988 = vmatpush3.bf16.msra.mxu1 %v10985_v4 }
 0x306   : > { %10194 = vmatmul.mubr.msk.f32.gmra.mrb[12].mxu1 %vm1716_vm2, %v2007_v10 }
 0x307   : > { %10196 = vmatprep.mubr.msk.f32.mxu1 %vm1716_vm2, %v2008_v33 }
 0x30a   : > { %10197 = vmatmul.mubr.msk.f32.gmra.mrb[14].mxu1 %vm1716_vm2, %v2009_v34 }
 0x30b   : > { %10207 = vmatprep.mubr.msk.f32.mxu1 %vm1716_vm2, %v2002_v39 }
 0x30e   : > { %10208 = vmatmul.mubr.msk.f32.vlgmr.msra.gmra.mrb[16].mxu1 %vm1716_vm2, %v2003_v48 }
 0x30f   : > { %10210 = vmatprep.mubr.msk.f32.mxu1 %vm1716_vm2, %v2004_v51 }
 0x312   : > { %10211 = vmatmul.mubr.msk.f32.gmra.mrb[18].mxu1 %vm1716_vm2, %v2005_v58  ;;  %v8956_v58 = vld [vmem:[%s11420_s21 + $0x2] ss:$0 sm:$0xff] }
 0x313   : > { %10213 = vmatprep.mubr.msk.f32.mxu1 %vm1716_vm2, %v2006_v61 }
 0x316   : > { %10214 = vmatmul.mubr.msk.f32.gmra.mrb[20].mxu1 %vm1716_vm2, %v2007_v10 }
 0x317   : > { %10216 = vmatprep.mubr.msk.f32.mxu1 %vm1716_vm2, %v2008_v33 }
 0x31a   : > { %10217 = vmatmul.mubr.msk.f32.gmra.mrb[22].mxu1 %vm1716_vm2, %v2009_v34 }
 0x3c1   : > { %v10169_v5 = vpop.f32.mrb[0].mxu1 }
 0x3c2   : > { %v12043_v6 = vadd.f32 %v10169_v5, %v12040_v43  ;;  %v12045_v11 = vpop.f32.mrb[1].mxu1 }
 0x3c5   : > { %v10172_v13 = vpop.f32.mrb[2].mxu1 }
 0x3c6   : > { %v12048_v16 = vadd.f32 %v10172_v13, %v12040_v43  ;;  %v2131_v17 = vpop.f32.mrb[3].mxu1 }
 0x3c7   : > { %v12051_v20 = vadd.f32 %v12040_v43, %v2131_v17 }
 0x3c9   : > { %v10175_v21 = vpop.f32.mrb[4].mxu1 }
 0x3ca   : > { %v12054_v22 = vadd.f32 %v10175_v21, %v12040_v43  ;;  %v2141_v25 = vpop.f32.mrb[5].mxu1 }
 0x3cb   : > { %v12060_v27 = vadd.f32 %v12040_v43, %v2141_v25 }
 0x3cd   : > { %v10178_v28 = vpop.f32.mrb[6].mxu1 }
 0x3ce   : > { %v12064_v29 = vadd.f32 %v10178_v28, %v12040_v43  ;;  %v2151_v30 = vpop.f32.mrb[7].mxu1 }
 0x3cf   : > { %v12067_v31 = vadd.f32 %v12040_v43, %v2151_v30 }
 0x3d1   : > { %v10189_v32 = vpop.f32.mrb[8].mxu1 }
 0x3d2   : > { %v2232_v36 = vpop.f32.mrb[9].mxu1  ;;  %v12070_v18 = vadd.f32 %v10189_v32, %v8947_v37 }
 0x3d3   : > { %v12072_v41 = vadd.f32 %v8947_v37, %v2232_v36 }
 0x3d4   : > { %v2383_v48 = vsel %vm1716_vm2, %v12070_v18, -inf }
 0x3d5   : > { %v10192_v39 = vpop.f32.mrb[10].mxu1  ;;  %v2382_v52 = vsel %vm1716_vm2, %v12072_v41, -inf }
 0x3d6   : > { %v2242_v40 = vpop.f32.mrb[11].mxu1  ;;  %v12078_v8 = vadd.f32 %v10192_v39, %v8947_v37 }
 0x3d7   : > { %v12084_v50 = vadd.f32 %v8947_v37, %v2242_v40 }
 0x3d8   : > { %v2385_v23 = vsel %vm1716_vm2, %v12078_v8, -inf }
 0x3d9   : > { %v10195_v42 = vpop.f32.mrb[12].mxu1  ;;  %v2384_v14 = vsel %vm1716_vm2, %v12084_v50, -inf }
 0x3da   : > { %v12074_v44 = vadd.f32 %v10195_v42, %v8947_v37  ;;  %v2252_v45 = vpop.f32.mrb[13].mxu1 }
 0x3db   : > { %v12076_v46 = vadd.f32 %v8947_v37, %v2252_v45 }
 0x3dc   : > { %v2388_v9 = vsel %vm1716_vm2, %v12074_v44, -inf }
 0x3dd   : > { %v2389_v51 = vmax.f32 %v2383_v48, %v2388_v9  ;;  %v2386_v19 = vsel %vm1716_vm2, %v12076_v46, -inf  ;;  %v10198_v53 = vpop.f32.mrb[14].mxu1 }
 0x3de   : > { %v2387_v7 = vmax.f32 %v2382_v52, %v2386_v19  ;;  %v12090_v54 = vadd.f32 %v10198_v53, %v8947_v37  ;;  %v2262_v55 = vpop.f32.mrb[15].mxu1 }
 0x3df   : > { %v12092_v12 = vadd.f32 %v8947_v37, %v2262_v55 }
 0x3e0   : > { %v2394_v59 = vmax.f32 %v2387_v7, %v2389_v51  ;;  %v2392_v61 = vsel %vm1716_vm2, %v12090_v54, -inf }
 0x3e1   : > { %v2393_v24 = vmax.f32 %v2385_v23, %v2392_v61  ;;  %v2390_v63 = vsel %vm1716_vm2, %v12092_v12, -inf  ;;  %v10209_v15 = vpop.f32.mrb[16].mxu1 }
 0x3e2   : > { %v2391_v10 = vmax.f32 %v2384_v14, %v2390_v63  ;;  %v2349_v0 = vadd.f32 %v10209_v15, %v8956_v58  ;;  %v2343_v33 = vpop.f32.mrb[17].mxu1 }
 0x3e3   : > { %v2344_v1 = vadd.f32 %v8956_v58, %v2343_v33  ;;  %v2730_v33 = vld [vmem:[%s14771_s27 + $0x38] sm:$0xff] }
 0x3e4   : > { %v2395_v34 = vmax.f32 %v2391_v10, %v2393_v24  ;;  %v2729_v10 = vld [vmem:[%s14771_s27 + $0x30] sm:$0xff] }
 0x3e5   : > { %v12103_v2 = vpack.c.bf16 %v2349_v0, %v2344_v1  ;;  %v10212_v3 = vpop.f32.mrb[18].mxu1 }
 0x3e6   : > { %v2396_v4 = vmax.f32 %v2394_v59, %v2395_v34  ;;  %v2359_v5 = vadd.f32 %v10212_v3, %v8956_v58  ;;  %v2353_v13 = vpop.f32.mrb[19].mxu1  ;;  %v2731_v34 = vld [vmem:[%s14771_s27 + $0x40] sm:$0xff] }
 0x3e7   : > { %v2354_v17 = vadd.f32 %v8956_v58, %v2353_v13  ;;  %10990 = vmatprep.subr.bf16.mxu1 %v12103_v2  ;;  %11014 = vmatprep.subr.bf16.mxu0 %v12103_v2 }
 0x3e8   : > { %v2397_v21 = vrot.slane %v2396_v4, 4  ;;  %10992 = vmatpush3.bf16.msra.mxu1 %v12103_v2  ;;  %11016 = vmatpush3.bf16.msra.mxu0 %v12103_v2 }
 0x3e9   : > { %v12109_v25 = vpack.c.bf16 %v2359_v5, %v2354_v17  ;;  %v10215_v26 = vpop.f32.mrb[20].mxu1  ;;  %v2733_v17 = vld [vmem:[%s14771_s27 + $0x50] sm:$0xff] }
 0x3ea   : > { %v2398_v28 = vmax.f32 %v2396_v4, %v2397_v21  ;;  %v2369_v30 = vadd.f32 %v10215_v26, %v8956_v58  ;;  %v2363_v32 = vpop.f32.mrb[21].mxu1  ;;  %v2732_v4 = vld [vmem:[%s14771_s27 + $0x48] sm:$0xff] }
 0x3eb   : > { %v2364_v36 = vadd.f32 %v8956_v58, %v2363_v32  ;;  %10994 = vmatprep.subr.bf16.mxu1 %v12109_v25  ;;  %11018 = vmatprep.subr.bf16.mxu0 %v12109_v25 }
 0x3ec   : > { %v2399_v37 = vrot.slane %v2398_v28, 2  ;;  %10996 = vmatpush3.bf16.msra.mxu1 %v12109_v25  ;;  %11020 = vmatpush3.bf16.msra.mxu0 %v12109_v25 }
 0x3ed   : > { %v12115_v39 = vpack.c.bf16 %v2369_v30, %v2364_v36  ;;  %v10218_v40 = vpop.f32.mrb[22].mxu1  ;;  %v2734_v36 = vld [vmem:[%s14771_s27 + $0x58] sm:$0xff] }
 0x3ee   : > { %v2400_v42 = vmax.f32 %v2398_v28, %v2399_v37  ;;  %v2379_v45 = vadd.f32 %v10218_v40, %v8956_v58  ;;  %v2373_v48 = vpop.f32.mrb[23].mxu1 }
 0x3ef   : > { %v2374_v9 = vadd.f32 %v8956_v58, %v2373_v48  ;;  %10998 = vmatprep.subr.bf16.mxu1 %v12115_v39  ;;  %11022 = vmatprep.subr.bf16.mxu0 %v12115_v39  ;;  %v2724_v58 = vld [vmem:[%s14771_s27 + $0x8] sm:$0xff] }
 0x3f0   : > { %v2401_v51 = vrot.slane %v2400_v42, 1  ;;  %11000 = vmatpush3.bf16.msra.mxu1 %v12115_v39  ;;  %11024 = vmatpush3.bf16.msra.mxu0 %v12115_v39 }
 0x3f1   : > { %v12121_v52 = vpack.c.bf16 %v2379_v45, %v2374_v9 }
 0x3f2   : > { %v2402_v19 = vmax.f32 %v2400_v42, %v2401_v51  ;;  %v2735_v42 = vld [vmem:[%s14771_s27 + $0x60] sm:$0xff] }
 0x3f3   : > { %11002 = vmatprep.subr.bf16.mxu1 %v12121_v52  ;;  %11026 = vmatprep.subr.bf16.mxu0 %v12121_v52 }
 0x3f4   : > { %v2409_v53 = vsub.f32 %v12092_v12, %v2402_v19  ;;  %v2410_v7 = vsub.f32 %v12090_v54, %v2402_v19  ;;  %11004 = vmatpush3.bf16.msra.mxu1 %v12121_v52  ;;  %11028 = vmatpush3.bf16.msra.mxu0 %v12121_v52  ;;  %v2403_v55 = vsub.f32 %v12072_v41, %v2402_v19  ;;  %v2725_v54 = vld [vmem:[%s14771_s27 + $0x10] sm:$0xff] }
 0x3f5   : > { %v2404_v59 = vsub.f32 %v12070_v18, %v2402_v19  ;;  %v2405_v23 = vsub.f32 %v12084_v50, %v2402_v19  ;;  %v2406_v61 = vsub.f32 %v12078_v8, %v2402_v19  ;;  %v2407_v12 = vsub.f32 %v12076_v46, %v2402_v19  ;;  %v2726_v18 = vld [vmem:[%s14771_s27 + $0x18] sm:$0xff]  ;;  %v2727_v46 = vld [vmem:[%s14771_s27 + $0x20] sm:$0xff] }
 0x3f6   : > { %v2408_v24 = vsub.f32 %v12074_v44, %v2402_v19  ;;  %v2411_v14 = vmul.f32 1.442695, %v2403_v55  ;;  %v2728_v44 = vld [vmem:[%s14771_s27 + $0x28] sm:$0xff]  ;;  %v2423_v0 = vmul.f32 1.442695, %v2409_v53  ;;  %v2737_v55 = vld [vmem:[%s14771_s27 + $0x70] sm:$0xff] }
 0x3f7   : > { %v2413_v41 = vmul.f32 1.442695, %v2404_v59  ;;  %10278 = vmatmul.mubr.msk.f32.vlgmr.msra.gmra.mrb[72].mxu0 %vm948_vm1, %v2724_v58  ;;  %v2415_v63 = vmul.f32 1.442695, %v2405_v23  ;;  %v2417_v8 = vmul.f32 1.442695, %v2406_v61 }
 0x3f8   : > { %10280 = vmatprep.mubr.msk.f32.mxu0 %vm948_vm1, %v2725_v54  ;;  %11144 = vpow2.f32 %v2411_v14  ;;  %v2419_v50 = vmul.f32 1.442695, %v2407_v12  ;;  %v2421_v15 = vmul.f32 1.442695, %v2408_v24  ;;  %v2425_v1 = vmul.f32 1.442695, %v2410_v7 }
 0x3f9   : > { %11146 = vpow2.f32 %v2413_v41  ;;  %v2736_v19 = vld [vmem:[%s14771_s27 + $0x68] sm:$0xff]  ;;  %v2738_v12 = vld [vmem:[%s14771_s27 + $0x78] sm:$0xff]  ;;  %v2739_v24 = vld [vmem:[%s14771_s27 + $0x80] sm:$0xff] }
 0x3fa   : > { %11148 = vpow2.f32 %v2415_v63  ;;  %v2740_v63 = vld [vmem:[%s14771_s27 + $0x88] sm:$0xff] }
 0x3fb   : > { %10281 = vmatmul.mubr.msk.f32.gmra.mrb[74].mxu0 %vm948_vm1, %v2726_v18  ;;  %11150 = vpow2.f32 %v2417_v8  ;;  %v2741_v8 = vld [vmem:[%s14771_s27 + $0x90] sm:$0xff] }
 0x3fc   : > { %10283 = vmatprep.mubr.msk.f32.mxu0 %vm948_vm1, %v2727_v46  ;;  %11152 = vpow2.f32 %v2419_v50  ;;  %v2742_v50 = vld [vmem:[%s14771_s27 + $0x98] sm:$0xff] }
 0x3fd   : > { %11154 = vpow2.f32 %v2421_v15  ;;  %v2743_v15 = vld [vmem:[%s14771_s27 + $0xa0] sm:$0xff] }
 0x3fe   : > { %11156 = vpow2.f32 %v2423_v0  ;;  %v2744_v0 = vld [vmem:[%s14771_s27 + $0xa8] sm:$0xff] }
 0x3ff   : > { %10284 = vmatmul.mubr.msk.f32.gmra.mrb[76].mxu0 %vm948_vm1, %v2728_v44  ;;  %11158 = vpow2.f32 %v2425_v1  ;;  %v2745_v1 = vld [vmem:[%s14771_s27 + $0xb0] sm:$0xff] }
 0x400   : > { %10286 = vmatprep.mubr.msk.f32.mxu0 %vm948_vm1, %v2729_v10 }
 0x402   : > { %v12166_v3 = vpop.eup %11144 }
 0x403   : > { %10287 = vmatmul.mubr.msk.f32.gmra.mrb[78].mxu0 %vm948_vm1, %v2730_v33  ;;  %v12172_v5 = vpop.eup %11146  ;;  %v2427_v13 = vsel %vm1716_vm2, %v12166_v3, 0.0 }
 0x404   : > { %10289 = vmatprep.mubr.msk.f32.mxu0 %vm948_vm1, %v2731_v34  ;;  %v12179_v21 = vpop.eup %11148  ;;  %v2428_v26 = vsel %vm1716_vm2, %v12172_v5, 0.0 }
 0x405   : > { %v12183_v28 = vpop.eup %11150  ;;  %v2429_v30 = vadd.f32 %v2428_v26, %v2427_v13  ;;  %v2430_v32 = vsel %vm1716_vm2, %v12179_v21, 0.0  ;;  %v2747_v13 = vld [vmem:[%s14771_s27 + $0xc0] sm:$0xff]  ;;  %v2749_v26 = vld [vmem:[%s14771_s27 + $0xd0] sm:$0xff] }
 0x406   : > { %v12192_v37 = vpop.eup %11152  ;;  %v2432_v45 = vsel %vm1716_vm2, %v12183_v28, 0.0 }
 0x407   : > { %10290 = vmatmul.mubr.msk.f32.gmra.mrb[80].mxu0 %vm948_vm1, %v2732_v4  ;;  %v2431_v40 = vadd.f32 %v2430_v32, %v2429_v30  ;;  %v11155_v48 = vpop.eup %11154  ;;  %v2434_v51 = vsel %vm1716_vm2, %v12192_v37, 0.0  ;;  %v2746_v4 = vld [vmem:[%s14771_s27 + $0xb8] sm:$0xff]  ;;  %v2751_v32 = vld [vmem:[%s14771_s27 + $0xe0] sm:$0xff] }
 0x408   : > { %10292 = vmatprep.mubr.msk.f32.mxu0 %vm948_vm1, %v2733_v17  ;;  %v11157_v53 = vpop.eup %11156  ;;  %v2436_v58 = vsel %vm1716_vm2, %v11155_v48, 0.0  ;;  %v2748_v17 = vld [vmem:[%s14771_s27 + $0xc8] sm:$0xff]  ;;  %v2750_v30 = vld [vmem:[%s14771_s27 + $0xd8] sm:$0xff] }
 0x409   : > { %v2433_v9 = vadd.f32 %v2432_v45, %v2431_v40  ;;  %v11159_v59 = vpop.eup %11158  ;;  %v2438_v61 = vsel %vm1716_vm2, %v11157_v53, 0.0 }
 0x40a   : > { %v2440_v14 = vsel %vm1716_vm2, %v11159_v59, 0.0 }
 0x40b   : > { %10293 = vmatmul.mubr.msk.f32.gmra.mrb[82].mxu0 %vm948_vm1, %v2734_v36  ;;  %v2435_v7 = vadd.f32 %v2434_v51, %v2433_v9  ;;  %v2752_v51 = vld [vmem:[%s14771_s27 + $0xe8] sm:$0xff] }
 0x40c   : > { %10295 = vmatprep.mubr.msk.f32.mxu0 %vm948_vm1, %v2735_v42 }
 0x40d   : > { %v2437_v23 = vadd.f32 %v2436_v58, %v2435_v7 }
 0x40f   : > { %10296 = vmatmul.mubr.msk.f32.gmra.mrb[84].mxu0 %vm948_vm1, %v2736_v19  ;;  %v2439_v54 = vadd.f32 %v2438_v61, %v2437_v23  ;;  %v2761_v23 = vld [vmem:[%s14771_s27 + $0x130] sm:$0xff]  ;;  %v2762_v61 = vld [vmem:[%s14771_s27 + $0x138] sm:$0xff] }
 0x410   : > { %10298 = vmatprep.mubr.msk.f32.mxu0 %vm948_vm1, %v2737_v55 }
 0x411   : > { %v2441_v41 = vadd.f32 %v2440_v14, %v2439_v54  ;;  %v2764_v54 = vld [vmem:[%s14771_s27 + $0x148] sm:$0xff]  ;;  %v2766_v14 = vld [vmem:[%s14771_s27 + $0x158] sm:$0xff] }
 0x413   : > { %10299 = vmatmul.mubr.msk.f32.gmra.mrb[86].mxu0 %vm948_vm1, %v2738_v12  ;;  %v2442_v18 = vrot.slane %v2441_v41, 4  ;;  %v2763_v12 = vld [vmem:[%s14771_s27 + $0x140] sm:$0xff] }
 0x414   : > { %10301 = vmatprep.mubr.msk.f32.mxu0 %vm948_vm1, %v2739_v24  ;;  %v2765_v24 = vld [vmem:[%s14771_s27 + $0x150] sm:$0xff] }
 0x415   : > { %v2443_v46 = vadd.f32 %v2442_v18, %v2441_v41  ;;  %v2767_v41 = vld [vmem:[%s14771_s27 + $0x160] sm:$0xff]  ;;  %v2769_v18 = vld [vmem:[%s14771_s27 + $0x170] sm:$0xff] }
 0x417   : > { %10302 = vmatmul.mubr.msk.f32.gmra.mrb[88].mxu0 %vm948_vm1, %v2740_v63  ;;  %v2444_v44 = vrot.slane %v2443_v46, 2  ;;  %v2768_v63 = vld [vmem:[%s14771_s27 + $0x168] sm:$0xff] }
 0x418   : > { %10304 = vmatprep.mubr.msk.f32.mxu0 %vm948_vm1, %v2741_v8  ;;  %v2770_v8 = vld [vmem:[%s14771_s27 + $0x178] sm:$0xff] }
 0x419   : > { %v2445_v10 = vadd.f32 %v2444_v44, %v2443_v46  ;;  %v2771_v46 = vld [vmem:[%s14771_s27 + $0x180] sm:$0xff]  ;;  %v2773_v44 = vld [vmem:[%s14771_s27 + $0x190] sm:$0xff] }
 0x41b   : > { %10305 = vmatmul.mubr.msk.f32.gmra.mrb[90].mxu0 %vm948_vm1, %v2742_v50  ;;  %v2446_v33 = vrot.slane %v2445_v10, 1  ;;  %v2772_v50 = vld [vmem:[%s14771_s27 + $0x188] sm:$0xff] }
 0x41c   : > { %10307 = vmatprep.mubr.msk.f32.mxu0 %vm948_vm1, %v2743_v15  ;;  %v2774_v15 = vld [vmem:[%s14771_s27 + $0x198] sm:$0xff] }
 0x41d   : > { %v2447_v34 = vadd.f32 %v2446_v33, %v2445_v10  ;;  %v2775_v10 = vld [vmem:[%s14771_s27 + $0x1a0] sm:$0xff]  ;;  %v2777_v33 = vld [vmem:[%s14771_s27 + $0x1b0] sm:$0xff] }
 0x41f   : > { %10308 = vmatmul.mubr.msk.f32.gmra.mrb[92].mxu0 %vm948_vm1, %v2744_v0  ;;  %11160 = vrcp.f32 %v2447_v34  ;;  %v2776_v0 = vld [vmem:[%s14771_s27 + $0x1a8] sm:$0xff]  ;;  %v2779_v34 = vld [vmem:[%s14771_s27 + $0x1c0] sm:$0xff] }
 0x420   : > { %10310 = vmatprep.mubr.msk.f32.mxu0 %vm948_vm1, %v2745_v1  ;;  %v2778_v1 = vld [vmem:[%s14771_s27 + $0x1b8] sm:$0xff] }
 0x423   : > { %10311 = vmatmul.mubr.msk.f32.gmra.mrb[94].mxu0 %vm948_vm1, %v2746_v4  ;;  %v2780_v4 = vld [vmem:[%s14771_s27 + $0x1c8] sm:$0xff] }
 0x424   : > { %10313 = vmatprep.mubr.msk.f32.mxu0 %vm948_vm1, %v2747_v13  ;;  %v2781_v13 = vld [vmem:[%s14771_s27 + $0x1d0] sm:$0xff] }
 0x427   : > { %10314 = vmatmul.mubr.msk.f32.gmra.mrb[96].mxu0 %vm948_vm1, %v2748_v17  ;;  %v2782_v17 = vld [vmem:[%s14771_s27 + $0x1d8] sm:$0xff] }
 0x428   : > { %10316 = vmatprep.mubr.msk.f32.mxu0 %vm948_vm1, %v2749_v26  ;;  %v2783_v26 = vld [vmem:[%s14771_s27 + $0x1e0] sm:$0xff] }
 0x429   : > { %v11161_v36 = vpop.eup %11160 }
 0x42a   : > { %v2449_v40 = vmul.f32 %v11161_v36, %v12166_v3  ;;  %v2450_v42 = vmul.f32 %v11161_v36, %v12172_v5  ;;  %v2451_v45 = vmul.f32 %v11161_v36, %v12179_v21  ;;  %v2452_v9 = vmul.f32 %v11161_v36, %v12183_v28  ;;  %v2753_v3 = vld [vmem:[%s14771_s27 + $0xf0] sm:$0xff]  ;;  %v2754_v5 = vld [vmem:[%s14771_s27 + $0xf8] sm:$0xff]  ;;  %v2755_v21 = vld [vmem:[%s14771_s27 + $0x100] sm:$0xff] }
 0x42b   : > { %10317 = vmatmul.mubr.msk.f32.gmra.mrb[98].mxu0 %vm948_vm1, %v2750_v30  ;;  %v2453_v19 = vmul.f32 %v11161_v36, %v12192_v37  ;;  %v2454_v7 = vmul.f32 %v11161_v36, %v11155_v48  ;;  %v2455_v55 = vmul.f32 %v11161_v36, %v11157_v53  ;;  %v2456_v58 = vmul.f32 %v11161_v36, %v11159_v59  ;;  %v2756_v28 = vld [vmem:[%s14771_s27 + $0x108] sm:$0xff]  ;;  %v2757_v37 = vld [vmem:[%s14771_s27 + $0x110] sm:$0xff]  ;;  %v2758_v48 = vld [vmem:[%s14771_s27 + $0x118] sm:$0xff] }
 0x42c   : > { %10319 = vmatprep.mubr.msk.f32.mxu0 %vm948_vm1, %v2751_v32  ;;  %2457 = vxpose.xlu0.b32.start [1/8] (short) (narrow) %v2449_v40, 32  ;;  %v2759_v53 = vld [vmem:[%s14771_s27 + $0x120] sm:$0xff]  ;;  %v2760_v59 = vld [vmem:[%s14771_s27 + $0x128] sm:$0xff]  ;;  %v2785_v32 = vld [vmem:[%s14771_s27 + $0x1f0] sm:$0xff] }
 0x42d   : > { %v2784_v30 = vld [vmem:[%s14771_s27 + $0x1e8] sm:$0xff]  ;;  %v2786_v36 = vld [vmem:[%s14771_s27 + $0x1f8] sm:$0xff]  ;;  %v2787_v40 = vld [vmem:[%s14771_s27 + $0x200] sm:$0xff] }
 0x42f   : > { %10320 = vmatmul.mubr.msk.f32.gmra.mrb[100].mxu0 %vm948_vm1, %v2752_v51  ;;  %v2791_v51 = vld [vmem:[%s14771_s27 + $0x220] sm:$0xff] }
 0x430   : > { %10322 = vmatprep.mubr.msk.f32.mxu0 %vm948_vm1, %v2753_v3  ;;  %2458 = vxpose.xlu0.b32.cont [2/8] (short) (narrow) %v2450_v42, 32  ;;  %v2788_v42 = vld [vmem:[%s14771_s27 + $0x208] sm:$0xff] }
 0x431   : > { %v2796_v3 = vld [vmem:[%s14771_s27 + $0x248] sm:$0xff] }
 0x433   : > { %10323 = vmatmul.mubr.msk.f32.gmra.mrb[102].mxu0 %vm948_vm1, %v2754_v5  ;;  %v2797_v5 = vld [vmem:[%s14771_s27 + $0x250] sm:$0xff] }
 0x434   : > { %10325 = vmatprep.mubr.msk.f32.mxu0 %vm948_vm1, %v2755_v21  ;;  %2459 = vxpose.xlu0.b32.cont [3/8] (short) (narrow) %v2451_v45, 32  ;;  %v2789_v45 = vld [vmem:[%s14771_s27 + $0x210] sm:$0xff]  ;;  %v2798_v21 = vld [vmem:[%s14771_s27 + $0x258] sm:$0xff] }
 0x437   : > { %10326 = vmatmul.mubr.msk.f32.gmra.mrb[104].mxu0 %vm948_vm1, %v2756_v28  ;;  %v2799_v28 = vld [vmem:[%s14771_s27 + $0x260] sm:$0xff] }
 0x438   : > { %10328 = vmatprep.mubr.msk.f32.mxu0 %vm948_vm1, %v2757_v37  ;;  %2460 = vxpose.xlu0.b32.cont [4/8] (short) (narrow) %v2452_v9, 32  ;;  %v2790_v9 = vld [vmem:[%s14771_s27 + $0x218] sm:$0xff]  ;;  %v2800_v37 = vld [vmem:[%s14771_s27 + $0x268] sm:$0xff] }
 0x43b   : > { %10329 = vmatmul.mubr.msk.f32.gmra.mrb[106].mxu0 %vm948_vm1, %v2758_v48  ;;  %v2801_v48 = vld [vmem:[%s14771_s27 + $0x270] sm:$0xff] }
 0x43c   : > { %10331 = vmatprep.mubr.msk.f32.mxu0 %vm948_vm1, %v2759_v53  ;;  %2461 = vxpose.xlu0.b32.cont [5/8] (short) (narrow) %v2453_v19, 32  ;;  %v2792_v19 = vld [vmem:[%s14771_s27 + $0x228] sm:$0xff]  ;;  %v2802_v53 = vld [vmem:[%s14771_s27 + $0x278] sm:$0xff] }
 0x43f   : > { %10332 = vmatmul.mubr.msk.f32.gmra.mrb[108].mxu0 %vm948_vm1, %v2760_v59  ;;  %v2803_v59 = vld [vmem:[%s14771_s27 + $0x280] sm:$0xff] }
 0x440   : > { %10334 = vmatprep.mubr.msk.f32.mxu0 %vm948_vm1, %v2761_v23  ;;  %2462 = vxpose.xlu0.b32.cont [6/8] (short) (narrow) %v2454_v7, 32  ;;  %v2793_v7 = vld [vmem:[%s14771_s27 + $0x230] sm:$0xff]  ;;  %v2804_v23 = vld [vmem:[%s14771_s27 + $0x288] sm:$0xff] }
 0x443   : > { %10335 = vmatmul.mubr.msk.f32.gmra.mrb[110].mxu0 %vm948_vm1, %v2762_v61  ;;  %v2805_v61 = vld [vmem:[%s14771_s27 + $0x290] sm:$0xff] }
 0x444   : > { %10337 = vmatprep.mubr.msk.f32.mxu0 %vm948_vm1, %v2763_v12  ;;  %2463 = vxpose.xlu0.b32.cont [7/8] (short) (narrow) %v2455_v55, 32  ;;  %v2794_v55 = vld [vmem:[%s14771_s27 + $0x238] sm:$0xff] }
 0x445   : > { %v2806_v12 = vld [vmem:[%s14771_s27 + $0x298] sm:$0xff] }
 0x447   : > { %10338 = vmatmul.mubr.msk.f32.gmra.mrb[112].mxu0 %vm948_vm1, %v2764_v54  ;;  %v2807_v54 = vld [vmem:[%s14771_s27 + $0x2a0] sm:$0xff] }
 0x448   : > { %10340 = vmatprep.mubr.msk.f32.mxu0 %vm948_vm1, %v2765_v24  ;;  %2464 = vxpose.xlu0.b32.end [8/8] (short) (narrow) %v2456_v58, 32  ;;  %v2795_v58 = vld [vmem:[%s14771_s27 + $0x240] sm:$0xff]  ;;  %v2808_v24 = vld [vmem:[%s14771_s27 + $0x2a8] sm:$0xff] }
 0x44b   : > { %10341 = vmatmul.mubr.msk.f32.gmra.mrb[114].mxu0 %vm948_vm1, %v2766_v14  ;;  %v2809_v14 = vld [vmem:[%s14771_s27 + $0x2b0] sm:$0xff] }
 0x44c   : > { %10343 = vmatprep.mubr.msk.f32.mxu0 %vm948_vm1, %v2767_v41  ;;  %v2810_v41 = vld [vmem:[%s14771_s27 + $0x2b8] sm:$0xff] }
 0x44f   : > { %10344 = vmatmul.mubr.msk.f32.gmra.mrb[116].mxu0 %vm948_vm1, %v2768_v63  ;;  %v2811_v63 = vld [vmem:[%s14771_s27 + $0x2c0] sm:$0xff] }
 0x450   : > { %10346 = vmatprep.mubr.msk.f32.mxu0 %vm948_vm1, %v2769_v18  ;;  %v2812_v18 = vld [vmem:[%s14771_s27 + $0x2c8] sm:$0xff] }
 0x453   : > { %10347 = vmatmul.mubr.msk.f32.gmra.mrb[118].mxu0 %vm948_vm1, %v2770_v8  ;;  %v2813_v8 = vld [vmem:[%s14771_s27 + $0x2d0] sm:$0xff] }
 0x454   : > { %10349 = vmatprep.mubr.msk.f32.mxu0 %vm948_vm1, %v2771_v46  ;;  %v2814_v46 = vld [vmem:[%s14771_s27 + $0x2d8] sm:$0xff] }
 0x457   : > { %10350 = vmatmul.mubr.msk.f32.gmra.mrb[120].mxu0 %vm948_vm1, %v2772_v50  ;;  %v2815_v50 = vld [vmem:[%s14771_s27 + $0x2e0] sm:$0xff] }
 0x458   : > { %10352 = vmatprep.mubr.msk.f32.mxu0 %vm948_vm1, %v2773_v44  ;;  %v2816_v44 = vld [vmem:[%s14771_s27 + $0x2e8] sm:$0xff] }
 0x45b   : > { %10353 = vmatmul.mubr.msk.f32.gmra.mrb[122].mxu0 %vm948_vm1, %v2774_v15  ;;  %v2817_v15 = vld [vmem:[%s14771_s27 + $0x2f0] sm:$0xff] }
 0x45c   : > { %10355 = vmatprep.mubr.msk.f32.mxu0 %vm948_vm1, %v2775_v10 }
 0x45f   : > { %10356 = vmatmul.mubr.msk.f32.gmra.mrb[124].mxu0 %vm948_vm1, %v2776_v0  ;;  %v2818_v0 = vld [vmem:[%s14771_s27 + $0x2f8] sm:$0xff] }
 0x460   : > { %10358 = vmatprep.mubr.msk.f32.mxu0 %vm948_vm1, %v2777_v33  ;;  %v2819_v33 = vld [vmem:[%s14771_s27 + $0x300] sm:$0xff] }
 0x463   : > { %10359 = vmatmul.mubr.msk.f32.gmra.mrb[126].mxu0 %vm948_vm1, %v2778_v1 }
 0x464   : > { %10361 = vmatprep.mubr.msk.f32.mxu0 %vm948_vm1, %v2779_v34  ;;  %v2820_v34 = vld [vmem:[%s14771_s27 + $0x308] sm:$0xff] }
 0x467   : > { %10362 = vmatmul.mubr.msk.f32.gmra.mrb[128].mxu0 %vm948_vm1, %v2780_v4  ;;  %v2821_v4 = vld [vmem:[%s14771_s27 + $0x310] sm:$0xff] }
 0x468   : > { %10364 = vmatprep.mubr.msk.f32.mxu0 %vm948_vm1, %v2781_v13 }
 0x46b   : > { %10365 = vmatmul.mubr.msk.f32.gmra.mrb[130].mxu0 %vm948_vm1, %v2782_v17  ;;  %v2822_v17 = vld [vmem:[%s14771_s27 + $0x318] sm:$0xff] }
 0x46c   : > { %10367 = vmatprep.mubr.msk.f32.mxu0 %vm948_vm1, %v2783_v26  ;;  %v2823_v26 = vld [vmem:[%s14771_s27 + $0x320] sm:$0xff] }
 0x46f   : > { %10368 = vmatmul.mubr.msk.f32.gmra.mrb[132].mxu0 %vm948_vm1, %v2784_v30  ;;  %v12566_v30 = vadd.f32 %v12040_v43, %v12045_v11  ;;  %v2826_v43 = vld [vmem:[%s14771_s27 + $0x338] sm:$0xff]  ;;  %v2827_v11 = vld [vmem:[%s14771_s27 + $0x340] sm:$0xff] }
 0x470   : > { %10370 = vmatprep.mubr.msk.f32.mxu0 %vm948_vm1, %v2785_v32 }
 0x473   : > { %10371 = vmatmul.mubr.msk.f32.gmra.mrb[134].mxu0 %vm948_vm1, %v2786_v36  ;;  %v2824_v36 = vld [vmem:[%s14771_s27 + $0x328] sm:$0xff] }
 0x474   : > { %10373 = vmatprep.mubr.msk.f32.mxu0 %vm948_vm1, %v2787_v40  ;;  %v2825_v40 = vld [vmem:[%s14771_s27 + $0x330] sm:$0xff] }
 0x477   : > { %10374 = vmatmul.mubr.msk.f32.gmra.mrb[136].mxu0 %vm948_vm1, %v2788_v42  ;;  %v2828_v42 = vld [vmem:[%s14771_s27 + $0x348] sm:$0xff] }
 0x478   : > { %10376 = vmatprep.mubr.msk.f32.mxu0 %vm948_vm1, %v2789_v45  ;;  %v2829_v45 = vld [vmem:[%s14771_s27 + $0x350] sm:$0xff] }
 0x47b   : > { %10377 = vmatmul.mubr.msk.f32.gmra.mrb[138].mxu0 %vm948_vm1, %v2790_v9  ;;  %v2830_v9 = vld [vmem:[%s14771_s27 + $0x358] sm:$0xff] }
 0x47c   : > { %10379 = vmatprep.mubr.msk.f32.mxu0 %vm948_vm1, %v2791_v51  ;;  %v2831_v51 = vld [vmem:[%s14771_s27 + $0x360] sm:$0xff] }
 0x47f   : > { %10380 = vmatmul.mubr.msk.f32.gmra.mrb[140].mxu0 %vm948_vm1, %v2792_v19  ;;  %v2832_v19 = vld [vmem:[%s14771_s27 + $0x368] sm:$0xff] }
 0x480   : > { %10382 = vmatprep.mubr.msk.f32.mxu0 %vm948_vm1, %v2793_v7  ;;  %v2833_v7 = vld [vmem:[%s14771_s27 + $0x370] sm:$0xff] }
 0x483   : > { %10383 = vmatmul.mubr.msk.f32.gmra.mrb[142].mxu0 %vm948_vm1, %v2794_v55  ;;  %v2834_v55 = vld [vmem:[%s14771_s27 + $0x378] sm:$0xff] }
 0x484   : > { %10385 = vmatprep.mubr.msk.f32.mxu0 %vm948_vm1, %v2795_v58  ;;  %v2835_v58 = vld [vmem:[%s14771_s27 + $0x380] sm:$0xff] }
 0x487   : > { %10386 = vmatmul.mubr.msk.f32.gmra.mrb[144].mxu0 %vm948_vm1, %v2796_v3  ;;  %v2836_v3 = vld [vmem:[%s14771_s27 + $0x388] sm:$0xff] }
 0x488   : > { %10388 = vmatprep.mubr.msk.f32.mxu0 %vm948_vm1, %v2797_v5  ;;  %v2837_v5 = vld [vmem:[%s14771_s27 + $0x390] sm:$0xff] }
 0x48b   : > { %10389 = vmatmul.mubr.msk.f32.gmra.mrb[146].mxu0 %vm948_vm1, %v2798_v21  ;;  %v2838_v21 = vld [vmem:[%s14771_s27 + $0x398] sm:$0xff] }
 0x48c   : > { %10391 = vmatprep.mubr.msk.f32.mxu0 %vm948_vm1, %v2799_v28  ;;  %v2839_v28 = vld [vmem:[%s14771_s27 + $0x3a0] sm:$0xff] }
 0x48f   : > { %10392 = vmatmul.mubr.msk.f32.gmra.mrb[148].mxu0 %vm948_vm1, %v2800_v37  ;;  %v2840_v37 = vld [vmem:[%s14771_s27 + $0x3a8] sm:$0xff] }
 0x490   : > { %10394 = vmatprep.mubr.msk.f32.mxu0 %vm948_vm1, %v2801_v48  ;;  %v2841_v48 = vld [vmem:[%s14771_s27 + $0x3b0] sm:$0xff] }
 0x493   : > { %10395 = vmatmul.mubr.msk.f32.gmra.mrb[150].mxu0 %vm948_vm1, %v2802_v53  ;;  %v2842_v53 = vld [vmem:[%s14771_s27 + $0x3b8] sm:$0xff] }
 0x494   : > { %10397 = vmatprep.mubr.msk.f32.mxu0 %vm948_vm1, %v2803_v59  ;;  %v2843_v59 = vld [vmem:[%s14771_s27 + $0x3c0] sm:$0xff] }
 0x497   : > { %10398 = vmatmul.mubr.msk.f32.gmra.mrb[152].mxu0 %vm948_vm1, %v2804_v23  ;;  %v2844_v23 = vld [vmem:[%s14771_s27 + $0x3c8] sm:$0xff] }
 0x498   : > { %10400 = vmatprep.mubr.msk.f32.mxu0 %vm948_vm1, %v2805_v61  ;;  %v2845_v61 = vld [vmem:[%s14771_s27 + $0x3d0] sm:$0xff] }
 0x49b   : > { %10401 = vmatmul.mubr.msk.f32.gmra.mrb[154].mxu0 %vm948_vm1, %v2806_v12  ;;  %v2846_v12 = vld [vmem:[%s14771_s27 + $0x3d8] sm:$0xff] }
 0x49c   : > { %10403 = vmatprep.mubr.msk.f32.mxu0 %vm948_vm1, %v2807_v54  ;;  %v2847_v54 = vld [vmem:[%s14771_s27 + $0x3e0] sm:$0xff] }
 0x49f   : > { %10404 = vmatmul.mubr.msk.f32.gmra.mrb[156].mxu0 %vm948_vm1, %v2808_v24  ;;  %v2848_v24 = vld [vmem:[%s14771_s27 + $0x3e8] sm:$0xff] }
 0x4a0   : > { %10406 = vmatprep.mubr.msk.f32.mxu0 %vm948_vm1, %v2809_v14  ;;  %v2849_v14 = vld [vmem:[%s14771_s27 + $0x3f0] sm:$0xff] }
 0x4a3   : > { %10407 = vmatmul.mubr.msk.f32.gmra.mrb[158].mxu0 %vm948_vm1, %v2810_v41  ;;  %v2850_v41 = vld [vmem:[%s14771_s27 + $0x3f8] sm:$0xff] }
 0x4a4   : > { %10409 = vmatprep.mubr.msk.f32.mxu0 %vm948_vm1, %v2811_v63  ;;  %v2851_v63 = vld [vmem:[%s14771_s27 + $0x400] sm:$0xff] }
 0x4a7   : > { %10410 = vmatmul.mubr.msk.f32.gmra.mrb[160].mxu0 %vm948_vm1, %v2812_v18  ;;  %v2852_v18 = vld [vmem:[%s14771_s27 + $0x408] sm:$0xff] }
 0x4a8   : > { %10412 = vmatprep.mubr.msk.f32.mxu0 %vm948_vm1, %v2813_v8  ;;  %v2853_v8 = vld [vmem:[%s14771_s27 + $0x410] sm:$0xff] }
 0x4ab   : > { %10413 = vmatmul.mubr.msk.f32.gmra.mrb[162].mxu0 %vm948_vm1, %v2814_v46  ;;  %v2854_v46 = vld [vmem:[%s14771_s27 + $0x418] sm:$0xff] }
 0x4ac   : > { %10415 = vmatprep.mubr.msk.f32.mxu0 %vm948_vm1, %v2815_v50  ;;  %v2473_v10 = vpop.trf.xlu0  ;;  %v2855_v50 = vld [vmem:[%s14771_s27 + $0x420] sm:$0xff] }
 0x4ad   : > { %10235 = vmatprep.mubr.msk.f32.mxu1 %vm948_vm1, %v2473_v10  ;;  %v2858_v10 = vld [vmem:[%s14771_s27 + $0x438] sm:$0xff] }
 0x4af   : > { %10416 = vmatmul.mubr.msk.f32.gmra.mrb[164].mxu0 %vm948_vm1, %v2816_v44  ;;  %v2856_v44 = vld [vmem:[%s14771_s27 + $0x428] sm:$0xff] }
 0x4b0   : > { %10418 = vmatprep.mubr.msk.f32.mxu0 %vm948_vm1, %v2817_v15  ;;  %v2474_v1 = vpop.trf.xlu0  ;;  %v2857_v15 = vld [vmem:[%s14771_s27 + $0x430] sm:$0xff] }
 0x4b1   : > { %10236 = vmatmul.mubr.msk.f32.vlgmr.msra.gmra.mrb[24].mxu1 %vm948_vm1, %v2474_v1  ;;  %v2861_v1 = vld [vmem:[%s14771_s27 + $0x450] sm:$0xff] }
 0x4b3   : > { %10419 = vmatmul.mubr.msk.f32.gmra.mrb[166].mxu0 %vm948_vm1, %v2818_v0  ;;  %v2859_v0 = vld [vmem:[%s14771_s27 + $0x440] sm:$0xff] }
 0x4b4   : > { %10421 = vmatprep.mubr.msk.f32.mxu0 %vm948_vm1, %v2819_v33  ;;  %v2475_v13 = vpop.trf.xlu0  ;;  %v2860_v33 = vld [vmem:[%s14771_s27 + $0x448] sm:$0xff] }
 0x4b5   : > { %10238 = vmatprep.mubr.msk.f32.mxu1 %vm948_vm1, %v2475_v13  ;;  %v2864_v13 = vld [vmem:[%s14771_s27 + $0x468] sm:$0xff] }
 0x4b7   : > { %10422 = vmatmul.mubr.msk.f32.gmra.mrb[168].mxu0 %vm948_vm1, %v2820_v34  ;;  %v2862_v34 = vld [vmem:[%s14771_s27 + $0x458] sm:$0xff] }
 0x4b8   : > { %10424 = vmatprep.mubr.msk.f32.mxu0 %vm948_vm1, %v2821_v4  ;;  %v2476_v32 = vpop.trf.xlu0  ;;  %v2863_v4 = vld [vmem:[%s14771_s27 + $0x460] sm:$0xff] }
 0x4b9   : > { %10239 = vmatmul.mubr.msk.f32.gmra.mrb[26].mxu1 %vm948_vm1, %v2476_v32  ;;  %v2867_v32 = vld [vmem:[%s14771_s27 + $0x480] sm:$0xff] }
 0x4ba   : > { %10249 = vmatprep.mubr.msk.f32.mxu1 %vm1716_vm2, %v12566_v30 }
 0x4bb   : > { %10425 = vmatmul.mubr.msk.f32.gmra.mrb[170].mxu0 %vm948_vm1, %v2822_v17  ;;  %v2865_v17 = vld [vmem:[%s14771_s27 + $0x470] sm:$0xff] }
 0x4bc   : > { %10427 = vmatprep.mubr.msk.f32.mxu0 %vm948_vm1, %v2823_v26  ;;  %v2866_v26 = vld [vmem:[%s14771_s27 + $0x478] sm:$0xff] }
 0x4bf   : > { %10428 = vmatmul.mubr.msk.f32.gmra.mrb[172].mxu0 %vm948_vm1, %v2824_v36  ;;  %v2868_v36 = vld [vmem:[%s14771_s27 + $0x488] sm:$0xff] }
 0x4c0   : > { %10430 = vmatprep.mubr.msk.f32.mxu0 %vm948_vm1, %v2825_v40  ;;  %v2869_v40 = vld [vmem:[%s14771_s27 + $0x490] sm:$0xff] }
 0x4c3   : > { %10431 = vmatmul.mubr.msk.f32.gmra.mrb[174].mxu0 %vm948_vm1, %v2826_v43  ;;  %v2870_v43 = vld [vmem:[%s14771_s27 + $0x498] sm:$0xff] }
 0x4c4   : > { %10433 = vmatprep.mubr.msk.f32.mxu0 %vm948_vm1, %v2827_v11  ;;  %v2871_v11 = vld [vmem:[%s14771_s27 + $0x4a0] sm:$0xff] }
 0x4c7   : > { %10434 = vmatmul.mubr.msk.f32.gmra.mrb[176].mxu0 %vm948_vm1, %v2828_v42  ;;  %v2872_v42 = vld [vmem:[%s14771_s27 + $0x4a8] sm:$0xff] }
 0x4c8   : > { %10436 = vmatprep.mubr.msk.f32.mxu0 %vm948_vm1, %v2829_v45  ;;  %v2873_v45 = vld [vmem:[%s14771_s27 + $0x4b0] sm:$0xff] }
 0x4cb   : > { %10437 = vmatmul.mubr.msk.f32.gmra.mrb[178].mxu0 %vm948_vm1, %v2830_v9  ;;  %v2874_v9 = vld [vmem:[%s14771_s27 + $0x4b8] sm:$0xff] }
 0x4cc   : > { %10439 = vmatprep.mubr.msk.f32.mxu0 %vm948_vm1, %v2831_v51  ;;  %v2875_v51 = vld [vmem:[%s14771_s27 + $0x4c0] sm:$0xff] }
 0x4cf   : > { %10440 = vmatmul.mubr.msk.f32.gmra.mrb[180].mxu0 %vm948_vm1, %v2832_v19  ;;  %v2876_v19 = vld [vmem:[%s14771_s27 + $0x4c8] sm:$0xff] }
 0x4d0   : > { %10442 = vmatprep.mubr.msk.f32.mxu0 %vm948_vm1, %v2833_v7  ;;  %v2877_v7 = vld [vmem:[%s14771_s27 + $0x4d0] sm:$0xff] }
 0x4d3   : > { %10443 = vmatmul.mubr.msk.f32.gmra.mrb[182].mxu0 %vm948_vm1, %v2834_v55  ;;  %v2878_v55 = vld [vmem:[%s14771_s27 + $0x4d8] sm:$0xff] }
 0x4d4   : > { %10445 = vmatprep.mubr.msk.f32.mxu0 %vm948_vm1, %v2835_v58  ;;  %v2879_v58 = vld [vmem:[%s14771_s27 + $0x4e0] sm:$0xff] }
 0x4d7   : > { %10446 = vmatmul.mubr.msk.f32.gmra.mrb[184].mxu0 %vm948_vm1, %v2836_v3  ;;  %v2880_v3 = vld [vmem:[%s14771_s27 + $0x4e8] sm:$0xff] }
 0x4d8   : > { %10448 = vmatprep.mubr.msk.f32.mxu0 %vm948_vm1, %v2837_v5  ;;  %v2881_v5 = vld [vmem:[%s14771_s27 + $0x4f0] sm:$0xff] }
 0x4db   : > { %10449 = vmatmul.mubr.msk.f32.gmra.mrb[186].mxu0 %vm948_vm1, %v2838_v21  ;;  %v2882_v21 = vld [vmem:[%s14771_s27 + $0x4f8] sm:$0xff] }
 0x4dc   : > { %10451 = vmatprep.mubr.msk.f32.mxu0 %vm948_vm1, %v2839_v28  ;;  %v10279_v28 = vpop.f32.mrb[72].mxu0 }
 0x4df   : > { %10452 = vmatmul.mubr.msk.f32.gmra.mrb[188].mxu0 %vm948_vm1, %v2840_v37  ;;  %v4407_v37 = vpop.f32.mrb[73].mxu0 }
 0x4e0   : > { %10454 = vmatprep.mubr.msk.f32.mxu0 %vm948_vm1, %v2841_v48  ;;  %v9369_v48 = vld [vmem:[%s14772_s7] ss:$0 sm:$0xff] }
 0x4e3   : > { %10455 = vmatmul.mubr.msk.f32.gmra.mrb[190].mxu0 %vm948_vm1, %v2842_v53  ;;  %v10282_v53 = vpop.f32.mrb[74].mxu0 }
 0x4e4   : > { %10457 = vmatprep.mubr.msk.f32.mxu0 %vm948_vm1, %v2843_v59  ;;  %v4417_v59 = vpop.f32.mrb[75].mxu0 }
 0x4e7   : > { %10458 = vmatmul.mubr.msk.f32.gmra.mrb[192].mxu0 %vm948_vm1, %v2844_v23  ;;  %v10285_v23 = vpop.f32.mrb[76].mxu0 }
 0x4e8   : > { %10460 = vmatprep.mubr.msk.f32.mxu0 %vm948_vm1, %v2845_v61  ;;  %v6661_v61 = vmul.f32 %v10279_v28, %v9369_v48 }
 0x4eb   : > { %10461 = vmatmul.mubr.msk.f32.gmra.mrb[194].mxu0 %vm948_vm1, %v2846_v12  ;;  %v4427_v12 = vpop.f32.mrb[77].mxu0 }
 0x4ec   : > { %10463 = vmatprep.mubr.msk.f32.mxu0 %vm948_vm1, %v2847_v54  ;;  %v6660_v54 = vmul.f32 %v9369_v48, %v4407_v37 }
 0x4ef   : > { %10464 = vmatmul.mubr.msk.f32.gmra.mrb[196].mxu0 %vm948_vm1, %v2848_v24  ;;  %v6663_v24 = vmul.f32 %v10282_v53, %v9369_v48 }
 0x4f0   : > { %10466 = vmatprep.mubr.msk.f32.mxu0 %vm948_vm1, %v2849_v14  ;;  %v10288_v14 = vpop.f32.mrb[78].mxu0 }
 0x4f3   : > { %10467 = vmatmul.mubr.msk.f32.gmra.mrb[198].mxu0 %vm948_vm1, %v2850_v41  ;;  %v6662_v41 = vmul.f32 %v9369_v48, %v4417_v59 }
 0x4f4   : > { %10469 = vmatprep.mubr.msk.f32.mxu0 %vm948_vm1, %v2851_v63  ;;  %v4437_v63 = vpop.f32.mrb[79].mxu0 }
 0x4f7   : > { %10470 = vmatmul.mubr.msk.f32.gmra.mrb[200].mxu0 %vm948_vm1, %v2852_v18  ;;  %v9370_v18 = vld [vmem:[%s14772_s7 + $0x1] ss:$0 sm:$0xff] }
 0x4f8   : > { %10472 = vmatprep.mubr.msk.f32.mxu0 %vm948_vm1, %v2853_v8  ;;  %v10291_v8 = vpop.f32.mrb[80].mxu0 }
 0x4fb   : > { %10473 = vmatmul.mubr.msk.f32.gmra.mrb[202].mxu0 %vm948_vm1, %v2854_v46  ;;  %v7149_v46 = vsel %vm1716_vm2, %v6661_v61, 0.0 }
 0x4fc   : > { %10475 = vmatprep.mubr.msk.f32.mxu0 %vm948_vm1, %v2855_v50  ;;  %v6665_v50 = vmul.f32 %v10285_v23, %v9369_v48 }
 0x4ff   : > { %10476 = vmatmul.mubr.msk.f32.gmra.mrb[204].mxu0 %vm948_vm1, %v2856_v44  ;;  %v6669_v44 = vmul.f32 %v10291_v8, %v9370_v18 }
 0x500   : > { %10478 = vmatprep.mubr.msk.f32.mxu0 %vm948_vm1, %v2857_v15  ;;  %v4447_v15 = vpop.f32.mrb[81].mxu0 }
 0x503   : > { %10479 = vmatmul.mubr.msk.f32.gmra.mrb[206].mxu0 %vm948_vm1, %v2858_v10  ;;  %v7052_v10 = vsel %vm1716_vm2, %v6660_v54, 0.0 }
 0x504   : > { %10481 = vmatprep.mubr.msk.f32.mxu0 %vm948_vm1, %v2859_v0  ;;  %v7343_v0 = vsel %vm1716_vm2, %v6663_v24, 0.0  ;;  %v9371_v24 = vld [vmem:[%s14772_s7 + $0x2] ss:$0 sm:$0xff] }
 0x507   : > { %10482 = vmatmul.mubr.msk.f32.gmra.mrb[208].mxu0 %vm948_vm1, %v2860_v33  ;;  %v6664_v33 = vmul.f32 %v9369_v48, %v4427_v12 }
 0x508   : > { %10484 = vmatprep.mubr.msk.f32.mxu0 %vm948_vm1, %v2861_v1  ;;  %v6668_v1 = vmul.f32 %v9370_v18, %v4447_v15 }
 0x50b   : > { %10485 = vmatmul.mubr.msk.f32.gmra.mrb[210].mxu0 %vm948_vm1, %v2862_v34  ;;  %v10294_v34 = vpop.f32.mrb[82].mxu0 }
 0x50c   : > { %10487 = vmatprep.mubr.msk.f32.mxu0 %vm948_vm1, %v2863_v4  ;;  %v7246_v4 = vsel %vm1716_vm2, %v6662_v41, 0.0 }
 0x50f   : > { %10488 = vmatmul.mubr.msk.f32.gmra.mrb[212].mxu0 %vm948_vm1, %v2864_v13  ;;  %v6667_v13 = vmul.f32 %v10288_v14, %v9369_v48 }
 0x510   : > { %10490 = vmatprep.mubr.msk.f32.mxu0 %vm948_vm1, %v2865_v17  ;;  %v7150_v17 = vsel %vm1716_vm2, %v6669_v44, 0.0 }
 0x511   : > { %v7731_v28 = vsel %vm1716_vm2, %v6667_v13, 0.0 }
 0x513   : > { %10491 = vmatmul.mubr.msk.f32.gmra.mrb[214].mxu0 %vm948_vm1, %v2866_v26  ;;  %v6671_v26 = vmul.f32 %v10294_v34, %v9370_v18 }
 0x514   : > { %10493 = vmatprep.mubr.msk.f32.mxu0 %vm948_vm1, %v2867_v32  ;;  %v4457_v32 = vpop.f32.mrb[83].mxu0 }
 0x517   : > { %10494 = vmatmul.mubr.msk.f32.gmra.mrb[216].mxu0 %vm948_vm1, %v2868_v36  ;;  %v6666_v36 = vmul.f32 %v9369_v48, %v4437_v63 }
 0x518   : > { %10496 = vmatprep.mubr.msk.f32.mxu0 %vm948_vm1, %v2869_v40  ;;  %v7151_v40 = vadd.f32 %v7150_v17, %v7149_v46 }
 0x519   : > { %v7634_v23 = vsel %vm1716_vm2, %v6666_v36, 0.0 }
 0x51b   : > { %10497 = vmatmul.mubr.msk.f32.gmra.mrb[218].mxu0 %vm948_vm1, %v2870_v43  ;;  %v7053_v43 = vsel %vm1716_vm2, %v6668_v1, 0.0 }
 0x51c   : > { %10499 = vmatprep.mubr.msk.f32.mxu0 %vm948_vm1, %v2871_v11  ;;  %v6670_v11 = vmul.f32 %v9370_v18, %v4457_v32 }
 0x51f   : > { %10500 = vmatmul.mubr.msk.f32.gmra.mrb[220].mxu0 %vm948_vm1, %v2872_v42  ;;  %v10297_v42 = vpop.f32.mrb[84].mxu0 }
 0x520   : > { %10502 = vmatprep.mubr.msk.f32.mxu0 %vm948_vm1, %v2873_v45  ;;  %v7537_v45 = vsel %vm1716_vm2, %v6665_v50, 0.0 }
 0x523   : > { %10503 = vmatmul.mubr.msk.f32.gmra.mrb[222].mxu0 %vm948_vm1, %v2874_v9  ;;  %v7054_v9 = vadd.f32 %v7053_v43, %v7052_v10 }
 0x524   : > { %10505 = vmatprep.mubr.msk.f32.mxu0 %vm948_vm1, %v2875_v51  ;;  %v7344_v51 = vsel %vm1716_vm2, %v6671_v26, 0.0 }
 0x527   : > { %10506 = vmatmul.mubr.msk.f32.gmra.mrb[224].mxu0 %vm948_vm1, %v2876_v19  ;;  %v6673_v19 = vmul.f32 %v10297_v42, %v9370_v18 }
 0x528   : > { %10508 = vmatprep.mubr.msk.f32.mxu0 %vm948_vm1, %v2877_v7  ;;  %v4467_v7 = vpop.f32.mrb[85].mxu0 }
 0x529   : > { %v7538_v48 = vsel %vm1716_vm2, %v6673_v19, 0.0 }
 0x52a   : > { %v7539_v61 = vadd.f32 %v7538_v48, %v7537_v45 }
 0x52b   : > { %10509 = vmatmul.mubr.msk.f32.gmra.mrb[226].mxu0 %vm948_vm1, %v2878_v55  ;;  %v7440_v55 = vsel %vm1716_vm2, %v6664_v33, 0.0 }
 0x52c   : > { %10511 = vmatprep.mubr.msk.f32.mxu0 %vm948_vm1, %v2879_v58  ;;  %v7345_v58 = vadd.f32 %v7344_v51, %v7343_v0 }
 0x52f   : > { %10512 = vmatmul.mubr.msk.f32.gmra.mrb[228].mxu0 %vm948_vm1, %v2880_v3  ;;  %v7247_v3 = vsel %vm1716_vm2, %v6670_v11, 0.0 }
 0x530   : > { %10514 = vmatprep.mubr.msk.f32.mxu0 %vm948_vm1, %v2881_v5  ;;  %v6672_v5 = vmul.f32 %v9370_v18, %v4467_v7  ;;  %v7248_v37 = vadd.f32 %v7247_v3, %v7246_v4 }
 0x532   : > { %v7441_v12 = vsel %vm1716_vm2, %v6672_v5, 0.0 }
 0x533   : > { %10515 = vmatmul.mubr.msk.f32.gmra.mrb[230].mxu0 %vm948_vm1, %v2882_v21  ;;  %v10300_v21 = vpop.f32.mrb[86].mxu0  ;;  %v7442_v41 = vadd.f32 %v7441_v12, %v7440_v55 }
 0x534   : > { %v6675_v53 = vmul.f32 %v10300_v21, %v9370_v18  ;;  %v4477_v59 = vpop.f32.mrb[87].mxu0 }
 0x535   : > { %v6674_v54 = vmul.f32 %v9370_v18, %v4477_v59  ;;  %v10303_v14 = vpop.f32.mrb[88].mxu0 }
 0x536   : > { %v7732_v63 = vsel %vm1716_vm2, %v6675_v53, 0.0  ;;  %v6677_v8 = vmul.f32 %v10303_v14, %v9371_v24  ;;  %v4487_v46 = vpop.f32.mrb[89].mxu0 }
 0x537   : > { %v7733_v50 = vadd.f32 %v7732_v63, %v7731_v28  ;;  %v7635_v44 = vsel %vm1716_vm2, %v6674_v54, 0.0  ;;  %v6676_v15 = vmul.f32 %v9371_v24, %v4487_v46  ;;  %v10306_v10 = vpop.f32.mrb[90].mxu0 }
 0x538   : > { %v7636_v0 = vadd.f32 %v7635_v44, %v7634_v23  ;;  %v7152_v33 = vsel %vm1716_vm2, %v6677_v8, 0.0  ;;  %v6679_v1 = vmul.f32 %v10306_v10, %v9371_v24  ;;  %v4497_v18 = vpop.f32.mrb[91].mxu0 }
 0x539   : > { %v7153_v34 = vadd.f32 %v7152_v33, %v7151_v40  ;;  %v7055_v4 = vsel %vm1716_vm2, %v6676_v15, 0.0  ;;  %v6678_v13 = vmul.f32 %v9371_v24, %v4497_v18  ;;  %v10309_v17 = vpop.f32.mrb[92].mxu0 }
 0x53a   : > { %v7056_v26 = vadd.f32 %v7055_v4, %v7054_v9  ;;  %v7346_v32 = vsel %vm1716_vm2, %v6679_v1, 0.0  ;;  %v6681_v36 = vmul.f32 %v10309_v17, %v9371_v24  ;;  %v4507_v43 = vpop.f32.mrb[93].mxu0  ;;  %v9372_v9 = vld [vmem:[%s14772_s7 + $0x3] ss:$0 sm:$0xff] }
 0x53b   : > { %v7347_v11 = vadd.f32 %v7346_v32, %v7345_v58  ;;  %v7249_v42 = vsel %vm1716_vm2, %v6678_v13, 0.0  ;;  %v6680_v45 = vmul.f32 %v9371_v24, %v4507_v43  ;;  %v10312_v51 = vpop.f32.mrb[94].mxu0 }
 0x53c   : > { %v7250_v19 = vadd.f32 %v7249_v42, %v7248_v37  ;;  %v7540_v7 = vsel %vm1716_vm2, %v6681_v36, 0.0  ;;  %v6683_v55 = vmul.f32 %v10312_v51, %v9371_v24  ;;  %v4517_v3 = vpop.f32.mrb[95].mxu0 }
 0x53d   : > { %v7541_v40 = vadd.f32 %v7540_v7, %v7539_v61  ;;  %v7443_v5 = vsel %vm1716_vm2, %v6680_v45, 0.0  ;;  %v6682_v21 = vmul.f32 %v9371_v24, %v4517_v3  ;;  %v10315_v28 = vpop.f32.mrb[96].mxu0 }
 0x53e   : > { %v7444_v48 = vadd.f32 %v7443_v5, %v7442_v41  ;;  %v7734_v58 = vsel %vm1716_vm2, %v6683_v55, 0.0  ;;  %v6685_v53 = vmul.f32 %v10315_v28, %v9372_v9  ;;  %v4527_v59 = vpop.f32.mrb[97].mxu0 }
 0x53f   : > { %v7735_v23 = vadd.f32 %v7734_v58, %v7733_v50  ;;  %v7637_v37 = vsel %vm1716_vm2, %v6682_v21, 0.0  ;;  %v6684_v12 = vmul.f32 %v9372_v9, %v4527_v59  ;;  %v10318_v54 = vpop.f32.mrb[98].mxu0 }
 0x540   : > { %v7638_v14 = vadd.f32 %v7637_v37, %v7636_v0  ;;  %v7154_v61 = vsel %vm1716_vm2, %v6685_v53, 0.0  ;;  %v6687_v63 = vmul.f32 %v10318_v54, %v9372_v9  ;;  %v4537_v24 = vpop.f32.mrb[99].mxu0  ;;  %v2587_v53 = vld [vmem:[%s14773_s24 + $0x8] sm:$0xff] }
 0x541   : > { %v7155_v8 = vadd.f32 %v7154_v61, %v7153_v34  ;;  %v7057_v46 = vsel %vm1716_vm2, %v6684_v12, 0.0  ;;  %v6686_v44 = vmul.f32 %v9372_v9, %v4537_v24  ;;  %v10321_v15 = vpop.f32.mrb[100].mxu0 }
 0x542   : > { %v7058_v41 = vadd.f32 %v7057_v46, %v7056_v26  ;;  %v7348_v10 = vsel %vm1716_vm2, %v6687_v63, 0.0  ;;  %v6689_v33 = vmul.f32 %v10321_v15, %v9372_v9  ;;  %v4547_v1 = vpop.f32.mrb[101].mxu0  ;;  %v9373_v26 = vld [vmem:[%s14772_s7 + $0x4] ss:$0 sm:$0xff] }
 0x543   : > { %v7349_v50 = vadd.f32 %v7348_v10, %v7347_v11  ;;  %v7251_v18 = vsel %vm1716_vm2, %v6686_v44, 0.0  ;;  %v6688_v4 = vmul.f32 %v9372_v9, %v4547_v1  ;;  %v10324_v13 = vpop.f32.mrb[102].mxu0 }
 0x544   : > { %v7252_v0 = vadd.f32 %v7251_v18, %v7250_v19  ;;  %v7542_v17 = vsel %vm1716_vm2, %v6689_v33, 0.0  ;;  %v6691_v32 = vmul.f32 %v10324_v13, %v9372_v9  ;;  %v4557_v36 = vpop.f32.mrb[103].mxu0 }
 0x545   : > { %v7543_v34 = vadd.f32 %v7542_v17, %v7541_v40  ;;  %v7445_v43 = vsel %vm1716_vm2, %v6688_v4, 0.0  ;;  %v6690_v42 = vmul.f32 %v9372_v9, %v4557_v36  ;;  %v10327_v45 = vpop.f32.mrb[104].mxu0 }
 0x546   : > { %v7446_v51 = vadd.f32 %v7445_v43, %v7444_v48  ;;  %v7736_v11 = vsel %vm1716_vm2, %v6691_v32, 0.0  ;;  %v6693_v7 = vmul.f32 %v10327_v45, %v9373_v26  ;;  %v4567_v55 = vpop.f32.mrb[105].mxu0 }
 0x547   : > { %v7737_v3 = vadd.f32 %v7736_v11, %v7735_v23  ;;  %v7639_v19 = vsel %vm1716_vm2, %v6690_v42, 0.0  ;;  %v6692_v5 = vmul.f32 %v9373_v26, %v4567_v55  ;;  %v10330_v21 = vpop.f32.mrb[106].mxu0  ;;  %v2586_v23 = vld [vmem:[%s14774_s9] sm:$0xff] }
 0x548   : > { %v7640_v28 = vadd.f32 %v7639_v19, %v7638_v14  ;;  %v7156_v40 = vsel %vm1716_vm2, %v6693_v7, 0.0  ;;  %v6695_v58 = vmul.f32 %v10330_v21, %v9373_v26  ;;  %v4577_v9 = vpop.f32.mrb[107].mxu0 }
 0x549   : > { %v7157_v59 = vadd.f32 %v7156_v40, %v7155_v8  ;;  %v7059_v48 = vsel %vm1716_vm2, %v6692_v5, 0.0  ;;  %v6694_v37 = vmul.f32 %v9373_v26, %v4577_v9  ;;  %v10333_v12 = vpop.f32.mrb[108].mxu0 }
 0x54a   : > { %v7060_v54 = vadd.f32 %v7059_v48, %v7058_v41  ;;  %v7350_v14 = vsel %vm1716_vm2, %v6695_v58, 0.0  ;;  %v6697_v61 = vmul.f32 %v10333_v12, %v9373_v26  ;;  %v4587_v63 = vpop.f32.mrb[109].mxu0 }
 0x54b   : > { %v7351_v46 = vadd.f32 %v7350_v14, %v7349_v50  ;;  %v7253_v44 = vsel %vm1716_vm2, %v6694_v37, 0.0  ;;  %v6696_v15 = vmul.f32 %v9373_v26, %v4587_v63  ;;  %v10336_v10 = vpop.f32.mrb[110].mxu0  ;;  %v9374_v50 = vld [vmem:[%s14772_s7 + $0x5] ss:$0 sm:$0xff] }
 0x54c   : > { %v7254_v1 = vadd.f32 %v7253_v44, %v7252_v0  ;;  %v7544_v18 = vsel %vm1716_vm2, %v6697_v61, 0.0  ;;  %v6699_v4 = vmul.f32 %v10336_v10, %v9373_v26  ;;  %v4597_v13 = vpop.f32.mrb[111].mxu0 }
 0x54d   : > { %v7545_v32 = vadd.f32 %v7544_v18, %v7543_v34  ;;  %v7447_v41 = vsel %vm1716_vm2, %v6696_v15, 0.0  ;;  %v6698_v36 = vmul.f32 %v9373_v26, %v4597_v13  ;;  %v10339_v43 = vpop.f32.mrb[112].mxu0 }
 0x54e   : > { %v7448_v42 = vadd.f32 %v7447_v41, %v7446_v51  ;;  %v7738_v45 = vsel %vm1716_vm2, %v6699_v4, 0.0  ;;  %v6701_v11 = vmul.f32 %v10339_v43, %v9374_v50  ;;  %v4607_v7 = vpop.f32.mrb[113].mxu0  ;;  %v2589_v51 = vld [vmem:[%s14774_s9 + $0x18] sm:$0xff] }
 0x54f   : > { %v7739_v55 = vadd.f32 %v7738_v45, %v7737_v3  ;;  %v7641_v19 = vsel %vm1716_vm2, %v6698_v36, 0.0  ;;  %v6700_v5 = vmul.f32 %v9374_v50, %v4607_v7  ;;  %v10342_v21 = vpop.f32.mrb[114].mxu0  ;;  %v2588_v3 = vld [vmem:[%s14774_s9 + $0x10] sm:$0xff] }
 0x550   : > { %v7642_v34 = vadd.f32 %v7641_v19, %v7640_v28  ;;  %v7158_v40 = vsel %vm1716_vm2, %v6701_v11, 0.0  ;;  %v6703_v26 = vmul.f32 %v10342_v21, %v9374_v50  ;;  %v4617_v58 = vpop.f32.mrb[115].mxu0 }
 0x551   : > { %v7159_v9 = vadd.f32 %v7158_v40, %v7157_v59  ;;  %v6702_v48 = vmul.f32 %v9374_v50, %v4617_v58  ;;  %v10345_v37 = vpop.f32.mrb[116].mxu0 }
 0x552   : > { %v7352_v12 = vsel %vm1716_vm2, %v6703_v26, 0.0  ;;  %v4627_v14 = vpop.f32.mrb[117].mxu0 }
 0x553   : > { %v7353_v63 = vadd.f32 %v7352_v12, %v7351_v46  ;;  %v6704_v44 = vmul.f32 %v9374_v50, %v4627_v14  ;;  %v10348_v59 = vpop.f32.mrb[118].mxu0  ;;  %v9375_v46 = vld [vmem:[%s14772_s7 + $0x6] ss:$0 sm:$0xff] }
 0x554   : > { %v6707_v18 = vmul.f32 %v10348_v59, %v9374_v50  ;;  %v4637_v4 = vpop.f32.mrb[119].mxu0 }
 0x555   : > { %v6706_v41 = vmul.f32 %v9374_v50, %v4637_v4  ;;  %v10351_v36 = vpop.f32.mrb[120].mxu0 }
 0x556   : > { %v7740_v45 = vsel %vm1716_vm2, %v6707_v18, 0.0  ;;  %v6709_v11 = vmul.f32 %v10351_v36, %v9375_v46  ;;  %v4647_v7 = vpop.f32.mrb[121].mxu0 }
 0x557   : > { %v7643_v19 = vsel %vm1716_vm2, %v6706_v41, 0.0  ;;  %v10354_v21 = vpop.f32.mrb[122].mxu0 }
 0x558   : > { %v7160_v40 = vsel %vm1716_vm2, %v6709_v11, 0.0  ;;  %v4657_v26 = vpop.f32.mrb[123].mxu0 }
 0x559   : > { %v7161_v58 = vadd.f32 %v7160_v40, %v7159_v9 }
 0x584   : > { %v10237_v24 = vpop.f32.mrb[24].mxu1 }
 0x585   : > { %v2591_v8 = vmul.f32 %v10237_v24, %v2587_v53  ;;  %v2567_v33 = vpop.f32.mrb[25].mxu1  ;;  %v7061_v53 = vsel %vm1716_vm2, %v6700_v5, 0.0  ;;  %v7255_v24 = vsel %vm1716_vm2, %v6702_v48, 0.0  ;;  %v6708_v5 = vmul.f32 %v9375_v46, %v4647_v7 }
 0x586   : > { %v2590_v17 = vmul.f32 %v2586_v23, %v2567_v33  ;;  %v7062_v28 = vadd.f32 %v7061_v53, %v7060_v54  ;;  %v6705_v23 = vmul.f32 %v10345_v37, %v9374_v50  ;;  %v7449_v54 = vsel %vm1716_vm2, %v6704_v44, 0.0  ;;  %v10357_v53 = vpop.f32.mrb[124].mxu0 }
 0x587   : > { %v7450_v43 = vadd.f32 %v7449_v54, %v7448_v42  ;;  %v6711_v50 = vmul.f32 %v10354_v21, %v9375_v46  ;;  %v6710_v42 = vmul.f32 %v9375_v46, %v4657_v26 }
 0x588   : > { %v11005_v0 = vpack.c.bf16 %v2591_v8, %v2590_v17  ;;  %v7256_v8 = vadd.f32 %v7255_v24, %v7254_v1  ;;  %v7546_v33 = vsel %vm1716_vm2, %v6705_v23, 0.0 }
 0x589   : > { %v7547_v17 = vadd.f32 %v7546_v33, %v7545_v32  ;;  %v7644_v32 = vadd.f32 %v7643_v19, %v7642_v34  ;;  %v7354_v37 = vsel %vm1716_vm2, %v6711_v50, 0.0  ;;  %v7257_v34 = vsel %vm1716_vm2, %v6710_v42, 0.0 }
 0x58a   : > { %11006 = vmatprep.subr.bf16.mxu1 %v11005_v0  ;;  %v7355_v12 = vadd.f32 %v7354_v37, %v7353_v63  ;;  %v9376_v63 = vld [vmem:[%s14772_s7 + $0x7] ss:$0 sm:$0xff] }
 0x58b   : > { %11008 = vmatpush3.bf16.msra.mxu1 %v11005_v0  ;;  %v7741_v0 = vadd.f32 %v7740_v45, %v7739_v55  ;;  %v6713_v55 = vmul.f32 %v10357_v53, %v9375_v46 }
 0x58c   : > { %v10240_v61 = vpop.f32.mrb[26].mxu1 }
 0x58d   : > { %v2593_v15 = vmul.f32 %v10240_v61, %v2589_v51  ;;  %v2577_v10 = vpop.f32.mrb[27].mxu1  ;;  %v7063_v51 = vsel %vm1716_vm2, %v6708_v5, 0.0  ;;  %v7258_v61 = vadd.f32 %v7257_v34, %v7256_v8  ;;  %v7548_v9 = vsel %vm1716_vm2, %v6713_v55, 0.0  ;;  %v9377_v55 = vld [vmem:[%s14772_s7 + $0x8] ss:$0 sm:$0xff] }
 0x58e   : > { %v2592_v13 = vmul.f32 %v2588_v3, %v2577_v10  ;;  %v7064_v48 = vadd.f32 %v7063_v51, %v7062_v28  ;;  %v4667_v3 = vpop.f32.mrb[125].mxu0  ;;  %v7549_v28 = vadd.f32 %v7548_v9, %v7547_v17 }
 0x58f   : > { %v6712_v23 = vmul.f32 %v9375_v46, %v4667_v3  ;;  %v10360_v14 = vpop.f32.mrb[126].mxu0 }
 0x590   : > { %v11009_v1 = vpack.c.bf16 %v2593_v15, %v2592_v13  ;;  %v6715_v24 = vmul.f32 %v10360_v14, %v9375_v46  ;;  %v4677_v44 = vpop.f32.mrb[127].mxu0 }
 0x591   : > { %v7451_v59 = vsel %vm1716_vm2, %v6712_v23, 0.0  ;;  %v6714_v15 = vmul.f32 %v9375_v46, %v4677_v44  ;;  %v10363_v10 = vpop.f32.mrb[128].mxu0 }
 0x592   : > { %11010 = vmatprep.subr.bf16.mxu1 %v11009_v1  ;;  %v7452_v8 = vadd.f32 %v7451_v59, %v7450_v43  ;;  %v7742_v33 = vsel %vm1716_vm2, %v6715_v24, 0.0  ;;  %v6717_v18 = vmul.f32 %v10363_v10, %v9376_v63  ;;  %v4687_v4 = vpop.f32.mrb[129].mxu0 }
 0x593   : > { %11012 = vmatpush3.bf16.msra.mxu1 %v11009_v1  ;;  %v7743_v13 = vadd.f32 %v7742_v33, %v7741_v0  ;;  %v7645_v17 = vsel %vm1716_vm2, %v6714_v15, 0.0  ;;  %v6716_v54 = vmul.f32 %v9376_v63, %v4687_v4  ;;  %v10366_v41 = vpop.f32.mrb[130].mxu0  ;;  %v2884_v4 = vld [vmem:[%s14771_s27 + $0x508] sm:$0xff] }
 0x594   : > { %11077 = vmatprep.subr.bf16.mxu1 %v12103_v2  ;;  %v7646_v46 = vadd.f32 %v7645_v17, %v7644_v32  ;;  %v7162_v36 = vsel %vm1716_vm2, %v6717_v18, 0.0  ;;  %v6719_v45 = vmul.f32 %v10366_v41, %v9376_v63  ;;  %v4697_v11 = vpop.f32.mrb[131].mxu0 }
 0x595   : > { %v7065_v43 = vsel %vm1716_vm2, %v6716_v54, 0.0  ;;  %v6718_v7 = vmul.f32 %v9376_v63, %v4697_v11  ;;  %v10369_v1 = vpop.f32.mrb[132].mxu0 }
 0x596   : > { %10250 = vmatmul.mubr.msk.f32.vlgmr.msra.gmra.mrb[28].mxu1 %vm1716_vm2, %v12043_v6  ;;  %v7066_v0 = vadd.f32 %v7065_v43, %v7064_v48  ;;  %v7356_v19 = vsel %vm1716_vm2, %v6719_v45, 0.0  ;;  %v6721_v5 = vmul.f32 %v10369_v1, %v9376_v63  ;;  %v4707_v21 = vpop.f32.mrb[133].mxu0 }
 0x597   : > { %10252 = vmatprep.mubr.msk.f32.mxu1 %vm1716_vm2, %v12051_v20  ;;  %11081 = vmatpush3.bf16.msra.mxu1 %v12103_v2  ;;  %v7163_v2 = vadd.f32 %v7162_v36, %v7161_v58  ;;  %v7357_v32 = vadd.f32 %v7356_v19, %v7355_v12  ;;  %v7259_v40 = vsel %vm1716_vm2, %v6718_v7, 0.0  ;;  %v6720_v50 = vmul.f32 %v9376_v63, %v4707_v21  ;;  %v10372_v26 = vpop.f32.mrb[134].mxu0  ;;  %v9378_v21 = vld [vmem:[%s14772_s7 + $0x9] ss:$0 sm:$0xff] }
 0x598   : > { %11078 = vmatprep.subr.bf16.mxu1 %v12109_v25  ;;  %v7260_v58 = vadd.f32 %v7259_v40, %v7258_v61  ;;  %v7550_v51 = vsel %vm1716_vm2, %v6721_v5, 0.0  ;;  %v6723_v42 = vmul.f32 %v10372_v26, %v9376_v63  ;;  %v4717_v53 = vpop.f32.mrb[135].mxu0  ;;  %v2883_v61 = vld [vmem:[%s14771_s27 + $0x500] sm:$0xff]  ;;  %v2886_v40 = vld [vmem:[%s14771_s27 + $0x518] sm:$0xff] }
 0x599   : > { %v7453_v48 = vsel %vm1716_vm2, %v6720_v50, 0.0  ;;  %v6722_v37 = vmul.f32 %v9376_v63, %v4717_v53  ;;  %v10375_v3 = vpop.f32.mrb[136].mxu0 }
 0x59a   : > { %10253 = vmatmul.mubr.msk.f32.gmra.mrb[30].mxu1 %vm1716_vm2, %v12048_v16  ;;  %v7454_v12 = vadd.f32 %v7453_v48, %v7452_v8  ;;  %v7744_v34 = vsel %vm1716_vm2, %v6723_v42, 0.0  ;;  %v6725_v23 = vmul.f32 %v10375_v3, %v9377_v55  ;;  %v4727_v14 = vpop.f32.mrb[137].mxu0  ;;  %v2887_v42 = vld [vmem:[%s14771_s27 + $0x520] sm:$0xff] }
 0x59b   : > { %10255 = vmatprep.mubr.msk.f32.mxu1 %vm1716_vm2, %v12060_v27  ;;  %11082 = vmatpush3.bf16.msra.mxu1 %v12109_v25  ;;  %v7551_v25 = vadd.f32 %v7550_v51, %v7549_v28  ;;  %v7745_v9 = vadd.f32 %v7744_v34, %v7743_v13  ;;  %v7647_v24 = vsel %vm1716_vm2, %v6722_v37, 0.0  ;;  %v6724_v44 = vmul.f32 %v9377_v55, %v4727_v14  ;;  %v10378_v28 = vpop.f32.mrb[138].mxu0 }
 0x59c   : > { %11079 = vmatprep.subr.bf16.mxu1 %v12115_v39  ;;  %v7648_v59 = vadd.f32 %v7647_v24, %v7646_v46  ;;  %v7164_v15 = vsel %vm1716_vm2, %v6725_v23, 0.0  ;;  %v4737_v63 = vpop.f32.mrb[139].mxu0  ;;  %v2885_v46 = vld [vmem:[%s14771_s27 + $0x510] sm:$0xff] }
 0x59d   : > { %v7165_v10 = vadd.f32 %v7164_v15, %v7163_v2  ;;  %v7067_v8 = vsel %vm1716_vm2, %v6724_v44, 0.0  ;;  %v6726_v33 = vmul.f32 %v9377_v55, %v4737_v63  ;;  %v10381_v18 = vpop.f32.mrb[140].mxu0 }
 0x59e   : > { %10256 = vmatmul.mubr.msk.f32.gmra.mrb[32].mxu1 %vm1716_vm2, %v12054_v22  ;;  %v7068_v13 = vadd.f32 %v7067_v8, %v7066_v0  ;;  %v6729_v54 = vmul.f32 %v10381_v18, %v9377_v55  ;;  %v4747_v41 = vpop.f32.mrb[141].mxu0 }
 0x59f   : > { %10258 = vmatprep.mubr.msk.f32.mxu1 %vm1716_vm2, %v12067_v31  ;;  %11083 = vmatpush3.bf16.msra.mxu1 %v12115_v39  ;;  %v6727_v39 = vmul.f32 %v10378_v28, %v9377_v55  ;;  %v7261_v45 = vsel %vm1716_vm2, %v6726_v33, 0.0  ;;  %v6728_v11 = vmul.f32 %v9377_v55, %v4747_v41 }
 0x5a0   : > { %11080 = vmatprep.subr.bf16.mxu1 %v12121_v52  ;;  %v7262_v2 = vadd.f32 %v7261_v45, %v7260_v58  ;;  %v7552_v43 = vsel %vm1716_vm2, %v6729_v54, 0.0  ;;  %v9379_v45 = vld [vmem:[%s14772_s7 + $0xa] ss:$0 sm:$0xff] }
 0x5a1   : > { %v7358_v17 = vsel %vm1716_vm2, %v6727_v39, 0.0  ;;  %v7553_v0 = vadd.f32 %v7552_v43, %v7551_v25  ;;  %v7455_v19 = vsel %vm1716_vm2, %v6728_v11, 0.0  ;;  %v2889_v39 = vld [vmem:[%s14771_s27 + $0x530] sm:$0xff]  ;;  %v2890_v11 = vld [vmem:[%s14771_s27 + $0x538] sm:$0xff] }
 0x5a2   : > { %10259 = vmatmul.mubr.msk.f32.gmra.mrb[34].mxu1 %vm1716_vm2, %v12064_v29  ;;  %v7359_v36 = vadd.f32 %v7358_v17, %v7357_v32  ;;  %v7456_v50 = vadd.f32 %v7455_v19, %v7454_v12 }
 0x5a3   : > { %11084 = vmatpush3.bf16.msra.mxu1 %v12121_v52  ;;  %10517 = vmatprep.mubr.msk.f32.mxu1 %vm948_vm1, %v2883_v61  ;;  %v10384_v52 = vpop.f32.mrb[142].mxu0 }
 0x5a4   : > { %v6731_v7 = vmul.f32 %v10384_v52, %v9377_v55  ;;  %v4757_v1 = vpop.f32.mrb[143].mxu0 }
 0x5a5   : > { %v6730_v5 = vmul.f32 %v9377_v55, %v4757_v1  ;;  %v10387_v32 = vpop.f32.mrb[144].mxu0  ;;  %v2891_v1 = vld [vmem:[%s14771_s27 + $0x540] sm:$0xff] }
 0x5a6   : > { %10518 = vmatmul.mubr.msk.f32.vlgmr.msra.gmra.mrb[36].mxu1 %vm948_vm1, %v2884_v4  ;;  %v7746_v26 = vsel %vm1716_vm2, %v6731_v7, 0.0  ;;  %v6733_v58 = vmul.f32 %v10387_v32, %v9378_v21  ;;  %v4767_v51 = vpop.f32.mrb[145].mxu0 }
 0x5a7   : > { %10520 = vmatprep.mubr.msk.f32.mxu1 %vm948_vm1, %v2885_v46  ;;  %v7747_v53 = vadd.f32 %v7746_v26, %v7745_v9  ;;  %v7649_v25 = vsel %vm1716_vm2, %v6730_v5, 0.0  ;;  %v6732_v48 = vmul.f32 %v9378_v21, %v4767_v51  ;;  %v10390_v37 = vpop.f32.mrb[146].mxu0  ;;  %v2888_v9 = vld [vmem:[%s14771_s27 + $0x528] sm:$0xff] }
 0x5a8   : > { %v7650_v55 = vadd.f32 %v7649_v25, %v7648_v59  ;;  %v7166_v3 = vsel %vm1716_vm2, %v6733_v58, 0.0  ;;  %v6735_v34 = vmul.f32 %v10390_v37, %v9378_v21  ;;  %v4777_v23 = vpop.f32.mrb[147].mxu0 }
 0x5a9   : > { %v7167_v12 = vadd.f32 %v7166_v3, %v7165_v10  ;;  %v7069_v14 = vsel %vm1716_vm2, %v6732_v48, 0.0  ;;  %v6734_v61 = vmul.f32 %v9378_v21, %v4777_v23  ;;  %v10393_v24 = vpop.f32.mrb[148].mxu0 }
 0x5aa   : > { %10521 = vmatmul.mubr.msk.f32.gmra.mrb[38].mxu1 %vm948_vm1, %v2886_v40  ;;  %v7070_v44 = vadd.f32 %v7069_v14, %v7068_v13  ;;  %v7360_v28 = vsel %vm1716_vm2, %v6735_v34, 0.0  ;;  %v6737_v59 = vmul.f32 %v10393_v24, %v9378_v21  ;;  %v4787_v15 = vpop.f32.mrb[149].mxu0  ;;  %v2893_v34 = vld [vmem:[%s14771_s27 + $0x550] sm:$0xff] }
 0x5ab   : > { %10523 = vmatprep.mubr.msk.f32.mxu1 %vm948_vm1, %v2887_v42  ;;  %v7361_v63 = vadd.f32 %v7360_v28, %v7359_v36  ;;  %v7263_v10 = vsel %vm1716_vm2, %v6734_v61, 0.0  ;;  %v6736_v8 = vmul.f32 %v9378_v21, %v4787_v15  ;;  %v10396_v33 = vpop.f32.mrb[150].mxu0 }
 0x5ac   : > { %v7264_v18 = vadd.f32 %v7263_v10, %v7262_v2  ;;  %v7554_v4 = vsel %vm1716_vm2, %v6737_v59, 0.0  ;;  %v6739_v17 = vmul.f32 %v10396_v33, %v9378_v21  ;;  %v4797_v54 = vpop.f32.mrb[151].mxu0  ;;  %v9380_v10 = vld [vmem:[%s14772_s7 + $0xb] ss:$0 sm:$0xff] }
 0x5ad   : > { %v7555_v13 = vadd.f32 %v7554_v4, %v7553_v0  ;;  %v7457_v41 = vsel %vm1716_vm2, %v6736_v8, 0.0  ;;  %v6738_v46 = vmul.f32 %v9378_v21, %v4797_v54  ;;  %v10399_v36 = vpop.f32.mrb[152].mxu0  ;;  %v2894_v8 = vld [vmem:[%s14771_s27 + $0x558] sm:$0xff]  ;;  %v2895_v54 = vld [vmem:[%s14771_s27 + $0x560] sm:$0xff] }
 0x5ae   : > { %10524 = vmatmul.mubr.msk.f32.gmra.mrb[40].mxu1 %vm948_vm1, %v2888_v9  ;;  %v7458_v52 = vadd.f32 %v7457_v41, %v7456_v50  ;;  %v7748_v2 = vsel %vm1716_vm2, %v6739_v17, 0.0  ;;  %v6741_v43 = vmul.f32 %v10399_v36, %v9379_v45  ;;  %v4807_v7 = vpop.f32.mrb[153].mxu0 }
 0x5af   : > { %10526 = vmatprep.mubr.msk.f32.mxu1 %vm948_vm1, %v2889_v39  ;;  %v7749_v0 = vadd.f32 %v7748_v2, %v7747_v53  ;;  %v7651_v19 = vsel %vm1716_vm2, %v6738_v46, 0.0  ;;  %v6740_v5 = vmul.f32 %v9379_v45, %v4807_v7  ;;  %v10402_v21 = vpop.f32.mrb[154].mxu0  ;;  %v2892_v53 = vld [vmem:[%s14771_s27 + $0x548] sm:$0xff] }
 0x5b0   : > { %v7652_v32 = vadd.f32 %v7651_v19, %v7650_v55  ;;  %v7168_v40 = vsel %vm1716_vm2, %v6741_v43, 0.0  ;;  %v6743_v26 = vmul.f32 %v10402_v21, %v9379_v45  ;;  %v4817_v58 = vpop.f32.mrb[155].mxu0 }
 0x5b1   : > { %v7169_v50 = vadd.f32 %v7168_v40, %v7167_v12  ;;  %v7071_v51 = vsel %vm1716_vm2, %v6740_v5, 0.0  ;;  %v6742_v42 = vmul.f32 %v9379_v45, %v4817_v58  ;;  %v10405_v25 = vpop.f32.mrb[156].mxu0 }
 0x5b2   : > { %10527 = vmatmul.mubr.msk.f32.gmra.mrb[42].mxu1 %vm948_vm1, %v2890_v11  ;;  %v7072_v48 = vadd.f32 %v7071_v51, %v7070_v44  ;;  %v7362_v37 = vsel %vm1716_vm2, %v6743_v26, 0.0  ;;  %v6745_v55 = vmul.f32 %v10405_v25, %v9379_v45  ;;  %v4827_v3 = vpop.f32.mrb[157].mxu0  ;;  %v2897_v26 = vld [vmem:[%s14771_s27 + $0x570] sm:$0xff] }
 0x5b3   : > { %10529 = vmatprep.mubr.msk.f32.mxu1 %vm948_vm1, %v2891_v1  ;;  %v7363_v23 = vadd.f32 %v7362_v37, %v7361_v63  ;;  %v7265_v12 = vsel %vm1716_vm2, %v6742_v42, 0.0  ;;  %v6744_v14 = vmul.f32 %v9379_v45, %v4827_v3  ;;  %v10408_v61 = vpop.f32.mrb[158].mxu0 }
 0x5b4   : > { %v7266_v24 = vadd.f32 %v7265_v12, %v7264_v18  ;;  %v7556_v9 = vsel %vm1716_vm2, %v6745_v55, 0.0  ;;  %v6747_v28 = vmul.f32 %v10408_v61, %v9379_v45  ;;  %v4837_v59 = vpop.f32.mrb[159].mxu0  ;;  %v9381_v12 = vld [vmem:[%s14772_s7 + $0xc] ss:$0 sm:$0xff] }
 0x5b5   : > { %v7557_v44 = vadd.f32 %v7556_v9, %v7555_v13  ;;  %v7459_v15 = vsel %vm1716_vm2, %v6744_v14, 0.0  ;;  %v6746_v39 = vmul.f32 %v9379_v45, %v4837_v59  ;;  %v10411_v63 = vpop.f32.mrb[160].mxu0  ;;  %v2898_v14 = vld [vmem:[%s14771_s27 + $0x578] sm:$0xff]  ;;  %v2899_v59 = vld [vmem:[%s14771_s27 + $0x580] sm:$0xff] }
 0x5b6   : > { %10530 = vmatmul.mubr.msk.f32.gmra.mrb[44].mxu1 %vm948_vm1, %v2892_v53  ;;  %v7460_v33 = vadd.f32 %v7459_v15, %v7458_v52  ;;  %v7750_v18 = vsel %vm1716_vm2, %v6747_v28, 0.0  ;;  %v6749_v4 = vmul.f32 %v10411_v63, %v9380_v10  ;;  %v4847_v17 = vpop.f32.mrb[161].mxu0 }
 0x5b7   : > { %10532 = vmatprep.mubr.msk.f32.mxu1 %vm948_vm1, %v2893_v34  ;;  %v7751_v13 = vadd.f32 %v7750_v18, %v7749_v0  ;;  %v7653_v41 = vsel %vm1716_vm2, %v6746_v39, 0.0  ;;  %v6748_v46 = vmul.f32 %v9380_v10, %v4847_v17  ;;  %v10414_v45 = vpop.f32.mrb[162].mxu0  ;;  %v2896_v0 = vld [vmem:[%s14771_s27 + $0x568] sm:$0xff] }
 0x5b8   : > { %v7654_v36 = vadd.f32 %v7653_v41, %v7652_v32  ;;  %v7170_v11 = vsel %vm1716_vm2, %v6749_v4, 0.0  ;;  %v6751_v2 = vmul.f32 %v10414_v45, %v9380_v10  ;;  %v4857_v43 = vpop.f32.mrb[163].mxu0 }
 0x5b9   : > { %v7171_v52 = vadd.f32 %v7170_v11, %v7169_v50  ;;  %v7073_v7 = vsel %vm1716_vm2, %v6748_v46, 0.0  ;;  %v6750_v1 = vmul.f32 %v9380_v10, %v4857_v43  ;;  %v10417_v19 = vpop.f32.mrb[164].mxu0 }
 0x5ba   : > { %10533 = vmatmul.mubr.msk.f32.gmra.mrb[46].mxu1 %vm948_vm1, %v2894_v8  ;;  %v7074_v5 = vadd.f32 %v7073_v7, %v7072_v48  ;;  %v7364_v21 = vsel %vm1716_vm2, %v6751_v2, 0.0  ;;  %v6753_v32 = vmul.f32 %v10417_v19, %v9380_v10  ;;  %v4867_v40 = vpop.f32.mrb[165].mxu0  ;;  %v2901_v2 = vld [vmem:[%s14771_s27 + $0x590] sm:$0xff] }
 0x5bb   : > { %10535 = vmatprep.mubr.msk.f32.mxu1 %vm948_vm1, %v2895_v54  ;;  %v7365_v58 = vadd.f32 %v7364_v21, %v7363_v23  ;;  %v7267_v50 = vsel %vm1716_vm2, %v6750_v1, 0.0  ;;  %v6752_v51 = vmul.f32 %v9380_v10, %v4867_v40  ;;  %v10420_v42 = vpop.f32.mrb[166].mxu0 }
 0x5bc   : > { %v7268_v25 = vadd.f32 %v7267_v50, %v7266_v24  ;;  %v7558_v53 = vsel %vm1716_vm2, %v6753_v32, 0.0  ;;  %v6755_v37 = vmul.f32 %v10420_v42, %v9380_v10  ;;  %v4877_v55 = vpop.f32.mrb[167].mxu0  ;;  %v9382_v50 = vld [vmem:[%s14772_s7 + $0xd] ss:$0 sm:$0xff] }
 0x5bd   : > { %v7559_v48 = vadd.f32 %v7558_v53, %v7557_v44  ;;  %v7461_v3 = vsel %vm1716_vm2, %v6752_v51, 0.0  ;;  %v6754_v34 = vmul.f32 %v9380_v10, %v4877_v55  ;;  %v10423_v23 = vpop.f32.mrb[168].mxu0  ;;  %v2902_v51 = vld [vmem:[%s14771_s27 + $0x598] sm:$0xff]  ;;  %v2903_v55 = vld [vmem:[%s14771_s27 + $0x5a0] sm:$0xff] }
 0x5be   : > { %10536 = vmatmul.mubr.msk.f32.gmra.mrb[48].mxu1 %vm948_vm1, %v2896_v0  ;;  %v7462_v61 = vadd.f32 %v7461_v3, %v7460_v33  ;;  %v7752_v24 = vsel %vm1716_vm2, %v6755_v37, 0.0  ;;  %v6757_v9 = vmul.f32 %v10423_v23, %v9381_v12  ;;  %v4887_v28 = vpop.f32.mrb[169].mxu0 }
 0x5bf   : > { %10538 = vmatprep.mubr.msk.f32.mxu1 %vm948_vm1, %v2897_v26  ;;  %v7753_v44 = vadd.f32 %v7752_v24, %v7751_v13  ;;  %v7655_v15 = vsel %vm1716_vm2, %v6754_v34, 0.0  ;;  %v6756_v39 = vmul.f32 %v9381_v12, %v4887_v28  ;;  %v10426_v10 = vpop.f32.mrb[170].mxu0  ;;  %v2900_v13 = vld [vmem:[%s14771_s27 + $0x588] sm:$0xff] }
 0x5c0   : > { %v7656_v63 = vadd.f32 %v7655_v15, %v7654_v36  ;;  %v7172_v8 = vsel %vm1716_vm2, %v6757_v9, 0.0  ;;  %v6759_v18 = vmul.f32 %v10426_v10, %v9381_v12  ;;  %v4897_v4 = vpop.f32.mrb[171].mxu0 }
 0x5c1   : > { %v7173_v33 = vadd.f32 %v7172_v8, %v7171_v52  ;;  %v7075_v17 = vsel %vm1716_vm2, %v6756_v39, 0.0  ;;  %v6758_v54 = vmul.f32 %v9381_v12, %v4897_v4  ;;  %v10429_v41 = vpop.f32.mrb[172].mxu0 }
 0x5c2   : > { %10539 = vmatmul.mubr.msk.f32.gmra.mrb[50].mxu1 %vm948_vm1, %v2898_v14  ;;  %v7076_v46 = vadd.f32 %v7075_v17, %v7074_v5  ;;  %v7366_v45 = vsel %vm1716_vm2, %v6759_v18, 0.0  ;;  %v6761_v36 = vmul.f32 %v10429_v41, %v9381_v12  ;;  %v4907_v11 = vpop.f32.mrb[173].mxu0  ;;  %v2905_v18 = vld [vmem:[%s14771_s27 + $0x5b0] sm:$0xff] }
 0x5c3   : > { %10541 = vmatprep.mubr.msk.f32.mxu1 %vm948_vm1, %v2899_v59  ;;  %v7367_v43 = vadd.f32 %v7366_v45, %v7365_v58  ;;  %v7269_v52 = vsel %vm1716_vm2, %v6758_v54, 0.0  ;;  %v6760_v7 = vmul.f32 %v9381_v12, %v4907_v11  ;;  %v10432_v1 = vpop.f32.mrb[174].mxu0 }
 0x5c4   : > { %v7270_v19 = vadd.f32 %v7269_v52, %v7268_v25  ;;  %v7560_v0 = vsel %vm1716_vm2, %v6761_v36, 0.0  ;;  %v6763_v21 = vmul.f32 %v10432_v1, %v9381_v12  ;;  %v4917_v32 = vpop.f32.mrb[175].mxu0  ;;  %v9383_v52 = vld [vmem:[%s14772_s7 + $0xe] ss:$0 sm:$0xff] }
 0x5c5   : > { %v7561_v5 = vadd.f32 %v7560_v0, %v7559_v48  ;;  %v7463_v40 = vsel %vm1716_vm2, %v6760_v7, 0.0  ;;  %v6762_v26 = vmul.f32 %v9381_v12, %v4917_v32  ;;  %v10435_v58 = vpop.f32.mrb[176].mxu0  ;;  %v2906_v7 = vld [vmem:[%s14771_s27 + $0x5b8] sm:$0xff]  ;;  %v2907_v32 = vld [vmem:[%s14771_s27 + $0x5c0] sm:$0xff] }
 0x5c6   : > { %10542 = vmatmul.mubr.msk.f32.gmra.mrb[52].mxu1 %vm948_vm1, %v2900_v13  ;;  %v7464_v42 = vadd.f32 %v7463_v40, %v7462_v61  ;;  %v7754_v25 = vsel %vm1716_vm2, %v6763_v21, 0.0  ;;  %v6765_v53 = vmul.f32 %v10435_v58, %v9382_v50  ;;  %v4927_v37 = vpop.f32.mrb[177].mxu0 }
 0x5c7   : > { %10544 = vmatprep.mubr.msk.f32.mxu1 %vm948_vm1, %v2901_v2  ;;  %v7755_v48 = vadd.f32 %v7754_v25, %v7753_v44  ;;  %v7657_v3 = vsel %vm1716_vm2, %v6762_v26, 0.0  ;;  %v6764_v34 = vmul.f32 %v9382_v50, %v4927_v37  ;;  %v10438_v12 = vpop.f32.mrb[178].mxu0  ;;  %v2904_v44 = vld [vmem:[%s14771_s27 + $0x5a8] sm:$0xff] }
 0x5c8   : > { %v7658_v23 = vadd.f32 %v7657_v3, %v7656_v63  ;;  %v7174_v14 = vsel %vm1716_vm2, %v6765_v53, 0.0  ;;  %v6767_v24 = vmul.f32 %v10438_v12, %v9382_v50  ;;  %v4937_v9 = vpop.f32.mrb[179].mxu0 }
 0x5c9   : > { %v7175_v61 = vadd.f32 %v7174_v14, %v7173_v33  ;;  %v7077_v28 = vsel %vm1716_vm2, %v6764_v34, 0.0  ;;  %v6766_v59 = vmul.f32 %v9382_v50, %v4937_v9  ;;  %v10441_v15 = vpop.f32.mrb[180].mxu0 }
 0x5ca   : > { %10545 = vmatmul.mubr.msk.f32.gmra.mrb[54].mxu1 %vm948_vm1, %v2902_v51  ;;  %v7078_v39 = vadd.f32 %v7077_v28, %v7076_v46  ;;  %v7368_v10 = vsel %vm1716_vm2, %v6767_v24, 0.0  ;;  %v6769_v63 = vmul.f32 %v10441_v15, %v9382_v50  ;;  %v4947_v8 = vpop.f32.mrb[181].mxu0  ;;  %v2909_v24 = vld [vmem:[%s14771_s27 + $0x5d0] sm:$0xff] }
 0x5cb   : > { %10547 = vmatprep.mubr.msk.f32.mxu1 %vm948_vm1, %v2903_v55  ;;  %v7369_v4 = vadd.f32 %v7368_v10, %v7367_v43  ;;  %v7271_v33 = vsel %vm1716_vm2, %v6766_v59, 0.0  ;;  %v6768_v17 = vmul.f32 %v9382_v50, %v4947_v8  ;;  %v10444_v54 = vpop.f32.mrb[182].mxu0 }
 0x5cc   : > { %v7272_v41 = vadd.f32 %v7271_v33, %v7270_v19  ;;  %v7562_v13 = vsel %vm1716_vm2, %v6769_v63, 0.0  ;;  %v6771_v45 = vmul.f32 %v10444_v54, %v9382_v50  ;;  %v4957_v36 = vpop.f32.mrb[183].mxu0  ;;  %v9384_v33 = vld [vmem:[%s14772_s7 + $0xf] ss:$0 sm:$0xff] }
 0x5cd   : > { %v7563_v46 = vadd.f32 %v7562_v13, %v7561_v5  ;;  %v7465_v11 = vsel %vm1716_vm2, %v6768_v17, 0.0  ;;  %v6770_v2 = vmul.f32 %v9382_v50, %v4957_v36  ;;  %v10447_v43 = vpop.f32.mrb[184].mxu0  ;;  %v2910_v17 = vld [vmem:[%s14771_s27 + $0x5d8] sm:$0xff]  ;;  %v2911_v36 = vld [vmem:[%s14771_s27 + $0x5e0] sm:$0xff] }
 0x5ce   : > { %10548 = vmatmul.mubr.msk.f32.gmra.mrb[56].mxu1 %vm948_vm1, %v2904_v44  ;;  %v7466_v1 = vadd.f32 %v7465_v11, %v7464_v42  ;;  %v7756_v19 = vsel %vm1716_vm2, %v6771_v45, 0.0  ;;  %v6773_v0 = vmul.f32 %v10447_v43, %v9383_v52  ;;  %v4967_v21 = vpop.f32.mrb[185].mxu0 }
 0x5cf   : > { %10550 = vmatprep.mubr.msk.f32.mxu1 %vm948_vm1, %v2905_v18  ;;  %v7757_v5 = vadd.f32 %v7756_v19, %v7755_v48  ;;  %v7659_v40 = vsel %vm1716_vm2, %v6770_v2, 0.0  ;;  %v6772_v26 = vmul.f32 %v9383_v52, %v4967_v21  ;;  %v10450_v50 = vpop.f32.mrb[186].mxu0  ;;  %v2908_v48 = vld [vmem:[%s14771_s27 + $0x5c8] sm:$0xff] }
 0x5d0   : > { %v7660_v58 = vadd.f32 %v7659_v40, %v7658_v23  ;;  %v7176_v51 = vsel %vm1716_vm2, %v6773_v0, 0.0  ;;  %v6775_v25 = vmul.f32 %v10450_v50, %v9383_v52  ;;  %v4977_v53 = vpop.f32.mrb[187].mxu0 }
 0x5d1   : > { %v7177_v42 = vadd.f32 %v7176_v51, %v7175_v61  ;;  %v7079_v37 = vsel %vm1716_vm2, %v6772_v26, 0.0  ;;  %v6774_v55 = vmul.f32 %v9383_v52, %v4977_v53  ;;  %v10453_v3 = vpop.f32.mrb[188].mxu0 }
 0x5d2   : > { %10551 = vmatmul.mubr.msk.f32.gmra.mrb[58].mxu1 %vm948_vm1, %v2906_v7  ;;  %v7080_v34 = vadd.f32 %v7079_v37, %v7078_v39  ;;  %v7370_v12 = vsel %vm1716_vm2, %v6775_v25, 0.0  ;;  %v6777_v23 = vmul.f32 %v10453_v3, %v9383_v52  ;;  %v4987_v14 = vpop.f32.mrb[189].mxu0  ;;  %v2913_v25 = vld [vmem:[%s14771_s27 + $0x5f0] sm:$0xff] }
 0x5d3   : > { %10553 = vmatprep.mubr.msk.f32.mxu1 %vm948_vm1, %v2907_v32  ;;  %v7371_v9 = vadd.f32 %v7370_v12, %v7369_v4  ;;  %v7273_v61 = vsel %vm1716_vm2, %v6774_v55, 0.0  ;;  %v6776_v28 = vmul.f32 %v9383_v52, %v4987_v14  ;;  %v10456_v59 = vpop.f32.mrb[190].mxu0 }
 0x5d4   : > { %v7274_v15 = vadd.f32 %v7273_v61, %v7272_v41  ;;  %v7564_v44 = vsel %vm1716_vm2, %v6777_v23, 0.0  ;;  %v6779_v10 = vmul.f32 %v10456_v59, %v9383_v52  ;;  %v4997_v63 = vpop.f32.mrb[191].mxu0  ;;  %v9385_v61 = vld [vmem:[%s14772_s7 + $0x10] ss:$0 sm:$0xff] }
 0x5d5   : > { %v7565_v39 = vadd.f32 %v7564_v44, %v7563_v46  ;;  %v7467_v8 = vsel %vm1716_vm2, %v6776_v28, 0.0  ;;  %v6778_v18 = vmul.f32 %v9383_v52, %v4997_v63  ;;  %v10459_v4 = vpop.f32.mrb[192].mxu0  ;;  %v2914_v28 = vld [vmem:[%s14771_s27 + $0x5f8] sm:$0xff]  ;;  %v2915_v63 = vld [vmem:[%s14771_s27 + $0x600] sm:$0xff] }
 0x5d6   : > { %10554 = vmatmul.mubr.msk.f32.gmra.mrb[60].mxu1 %vm948_vm1, %v2908_v48  ;;  %v7468_v54 = vadd.f32 %v7467_v8, %v7466_v1  ;;  %v7758_v41 = vsel %vm1716_vm2, %v6779_v10, 0.0  ;;  %v6781_v13 = vmul.f32 %v10459_v4, %v9384_v33  ;;  %v5007_v45 = vpop.f32.mrb[193].mxu0 }
 0x5d7   : > { %10556 = vmatprep.mubr.msk.f32.mxu1 %vm948_vm1, %v2909_v24  ;;  %v7759_v46 = vadd.f32 %v7758_v41, %v7757_v5  ;;  %v7661_v11 = vsel %vm1716_vm2, %v6778_v18, 0.0  ;;  %v6780_v2 = vmul.f32 %v9384_v33, %v5007_v45  ;;  %v10462_v52 = vpop.f32.mrb[194].mxu0  ;;  %v2912_v5 = vld [vmem:[%s14771_s27 + $0x5e8] sm:$0xff] }
 0x5d8   : > { %v7662_v43 = vadd.f32 %v7661_v11, %v7660_v58  ;;  %v7178_v7 = vsel %vm1716_vm2, %v6781_v13, 0.0  ;;  %v6783_v19 = vmul.f32 %v10462_v52, %v9384_v33  ;;  %v5017_v0 = vpop.f32.mrb[195].mxu0 }
 0x5d9   : > { %v7179_v1 = vadd.f32 %v7178_v7, %v7177_v42  ;;  %v7081_v21 = vsel %vm1716_vm2, %v6780_v2, 0.0  ;;  %v6782_v32 = vmul.f32 %v9384_v33, %v5017_v0  ;;  %v10465_v40 = vpop.f32.mrb[196].mxu0 }
 0x5da   : > { %10557 = vmatmul.mubr.msk.f32.gmra.mrb[62].mxu1 %vm948_vm1, %v2910_v17  ;;  %v7082_v26 = vadd.f32 %v7081_v21, %v7080_v34  ;;  %v7372_v50 = vsel %vm1716_vm2, %v6783_v19, 0.0  ;;  %v6785_v58 = vmul.f32 %v10465_v40, %v9384_v33  ;;  %v5027_v51 = vpop.f32.mrb[197].mxu0  ;;  %v2917_v19 = vld [vmem:[%s14771_s27 + $0x610] sm:$0xff] }
 0x5db   : > { %10559 = vmatprep.mubr.msk.f32.mxu1 %vm948_vm1, %v2911_v36  ;;  %v7373_v53 = vadd.f32 %v7372_v50, %v7371_v9  ;;  %v7275_v42 = vsel %vm1716_vm2, %v6782_v32, 0.0  ;;  %v6784_v37 = vmul.f32 %v9384_v33, %v5027_v51  ;;  %v10468_v55 = vpop.f32.mrb[198].mxu0 }
 0x5dc   : > { %v7276_v3 = vadd.f32 %v7275_v42, %v7274_v15  ;;  %v7566_v48 = vsel %vm1716_vm2, %v6785_v58, 0.0  ;;  %v6787_v12 = vmul.f32 %v10468_v55, %v9384_v33  ;;  %v5037_v23 = vpop.f32.mrb[199].mxu0  ;;  %v9386_v42 = vld [vmem:[%s14772_s7 + $0x11] ss:$0 sm:$0xff] }
 0x5dd   : > { %v7567_v34 = vadd.f32 %v7566_v48, %v7565_v39  ;;  %v7469_v14 = vsel %vm1716_vm2, %v6784_v37, 0.0  ;;  %v6786_v24 = vmul.f32 %v9384_v33, %v5037_v23  ;;  %v10471_v9 = vpop.f32.mrb[200].mxu0  ;;  %v2918_v37 = vld [vmem:[%s14771_s27 + $0x618] sm:$0xff]  ;;  %v2919_v23 = vld [vmem:[%s14771_s27 + $0x620] sm:$0xff] }
 0x5de   : > { %10560 = vmatmul.mubr.msk.f32.gmra.mrb[64].mxu1 %vm948_vm1, %v2912_v5  ;;  %v7470_v59 = vadd.f32 %v7469_v14, %v7468_v54  ;;  %v7760_v15 = vsel %vm1716_vm2, %v6787_v12, 0.0  ;;  %v6789_v44 = vmul.f32 %v10471_v9, %v9385_v61  ;;  %v5047_v10 = vpop.f32.mrb[201].mxu0 }
 0x5df   : > { %10562 = vmatprep.mubr.msk.f32.mxu1 %vm948_vm1, %v2913_v25  ;;  %v7761_v39 = vadd.f32 %v7760_v15, %v7759_v46  ;;  %v7663_v8 = vsel %vm1716_vm2, %v6786_v24, 0.0  ;;  %v6788_v18 = vmul.f32 %v9385_v61, %v5047_v10  ;;  %v10474_v33 = vpop.f32.mrb[202].mxu0  ;;  %v2916_v46 = vld [vmem:[%s14771_s27 + $0x608] sm:$0xff] }
 0x5e0   : > { %v7664_v4 = vadd.f32 %v7663_v8, %v7662_v43  ;;  %v7180_v17 = vsel %vm1716_vm2, %v6789_v44, 0.0  ;;  %v6791_v41 = vmul.f32 %v10474_v33, %v9385_v61  ;;  %v5057_v13 = vpop.f32.mrb[203].mxu0  ;;  %v2920_v44 = vld [vmem:[%s14771_s27 + $0x628] sm:$0xff]  ;;  %v2921_v8 = vld [vmem:[%s14771_s27 + $0x630] sm:$0xff] }
 0x5e1   : > { %v7181_v54 = vadd.f32 %v7180_v17, %v7179_v1  ;;  %v7083_v45 = vsel %vm1716_vm2, %v6788_v18, 0.0  ;;  %v6790_v36 = vmul.f32 %v9385_v61, %v5057_v13  ;;  %v10477_v11 = vpop.f32.mrb[204].mxu0 }
 0x5e2   : > { %10563 = vmatmul.mubr.msk.f32.gmra.mrb[66].mxu1 %vm948_vm1, %v2914_v28  ;;  %v7084_v2 = vadd.f32 %v7083_v45, %v7082_v26  ;;  %v7374_v52 = vsel %vm1716_vm2, %v6791_v41, 0.0  ;;  %v6793_v43 = vmul.f32 %v10477_v11, %v9385_v61  ;;  %v5067_v7 = vpop.f32.mrb[205].mxu0  ;;  %v2922_v11 = vld [vmem:[%s14771_s27 + $0x638] sm:$0xff] }
 0x5e3   : > { %10565 = vmatprep.mubr.msk.f32.mxu1 %vm948_vm1, %v2915_v63  ;;  %v7375_v0 = vadd.f32 %v7374_v52, %v7373_v53  ;;  %v7277_v1 = vsel %vm1716_vm2, %v6790_v36, 0.0  ;;  %v6792_v21 = vmul.f32 %v9385_v61, %v5067_v7  ;;  %v10480_v32 = vpop.f32.mrb[206].mxu0  ;;  %v9387_v7 = vld [vmem:[%s14772_s7 + $0x12] ss:$0 sm:$0xff] }
 0x5e4   : > { %v7278_v40 = vadd.f32 %v7277_v1, %v7276_v3  ;;  %v7568_v5 = vsel %vm1716_vm2, %v6793_v43, 0.0  ;;  %v6795_v50 = vmul.f32 %v10480_v32, %v9385_v61  ;;  %v5077_v58 = vpop.f32.mrb[207].mxu0 }
 0x5e5   : > { %v7569_v26 = vadd.f32 %v7568_v5, %v7567_v34  ;;  %v7471_v51 = vsel %vm1716_vm2, %v6792_v21, 0.0  ;;  %v6794_v25 = vmul.f32 %v9385_v61, %v5077_v58  ;;  %v10483_v53 = vpop.f32.mrb[208].mxu0 }
 0x5e6   : > { %10566 = vmatmul.mubr.msk.f32.gmra.mrb[68].mxu1 %vm948_vm1, %v2916_v46  ;;  %v7472_v55 = vadd.f32 %v7471_v51, %v7470_v59  ;;  %v7762_v3 = vsel %vm1716_vm2, %v6795_v50, 0.0  ;;  %v6797_v48 = vmul.f32 %v10483_v53, %v9386_v42  ;;  %v5087_v12 = vpop.f32.mrb[209].mxu0 }
 0x5e7   : > { %10568 = vmatprep.mubr.msk.f32.mxu1 %vm948_vm1, %v2917_v19  ;;  %v7763_v34 = vadd.f32 %v7762_v3, %v7761_v39  ;;  %v7665_v14 = vsel %vm1716_vm2, %v6794_v25, 0.0  ;;  %v6796_v24 = vmul.f32 %v9386_v42, %v5087_v12  ;;  %v10486_v15 = vpop.f32.mrb[210].mxu0  ;;  %v2923_v19 = vld [vmem:[%s14771_s27 + $0x640] sm:$0xff]  ;;  %v2925_v12 = vld [vmem:[%s14771_s27 + $0x650] sm:$0xff] }
 0x5e8   : > { %v7666_v61 = vadd.f32 %v7665_v14, %v7664_v4  ;;  %v7182_v9 = vsel %vm1716_vm2, %v6797_v48, 0.0  ;;  %v6799_v63 = vmul.f32 %v10486_v15, %v9386_v42  ;;  %v5097_v39 = vpop.f32.mrb[211].mxu0 }
 0x5e9   : > { %v7183_v28 = vadd.f32 %v7182_v9, %v7181_v54  ;;  %v7085_v59 = vsel %vm1716_vm2, %v6796_v24, 0.0  ;;  %v6798_v18 = vmul.f32 %v9386_v42, %v5097_v39  ;;  %v10489_v33 = vpop.f32.mrb[212].mxu0 }
 0x5ea   : > { %10569 = vmatmul.mubr.msk.f32.gmra.mrb[70].mxu1 %vm948_vm1, %v2918_v37  ;;  %v7086_v10 = vadd.f32 %v7085_v59, %v7084_v2  ;;  %v7376_v4 = vsel %vm1716_vm2, %v6799_v63, 0.0  ;;  %v6801_v17 = vmul.f32 %v10489_v33, %v9386_v42  ;;  %v5107_v41 = vpop.f32.mrb[213].mxu0 }
 0x5eb   : > { %10571 = vmatprep.mubr.msk.f32.mxu1 %vm948_vm1, %v2919_v23  ;;  %v7377_v13 = vadd.f32 %v7376_v4, %v7375_v0  ;;  %v7279_v54 = vsel %vm1716_vm2, %v6798_v18, 0.0  ;;  %v6800_v45 = vmul.f32 %v9386_v42, %v5107_v41  ;;  %v10492_v36 = vpop.f32.mrb[214].mxu0  ;;  %v2927_v41 = vld [vmem:[%s14771_s27 + $0x660] sm:$0xff] }
 0x5ec   : > { %v7280_v46 = vadd.f32 %v7279_v54, %v7278_v40  ;;  %v7570_v2 = vsel %vm1716_vm2, %v6801_v17, 0.0  ;;  %v6803_v52 = vmul.f32 %v10492_v36, %v9386_v42  ;;  %v5117_v43 = vpop.f32.mrb[215].mxu0  ;;  %v9388_v17 = vld [vmem:[%s14772_s7 + $0x13] ss:$0 sm:$0xff] }
 0x5ed   : > { %v7571_v0 = vadd.f32 %v7570_v2, %v7569_v26  ;;  %v7473_v1 = vsel %vm1716_vm2, %v6800_v45, 0.0  ;;  %v6802_v21 = vmul.f32 %v9386_v42, %v5117_v43  ;;  %v10495_v32 = vpop.f32.mrb[216].mxu0  ;;  %v2924_v26 = vld [vmem:[%s14771_s27 + $0x648] sm:$0xff] }
 0x5ee   : > { %10572 = vmatmul.mubr.msk.f32.gmra.mrb[72].mxu1 %vm948_vm1, %v2920_v44  ;;  %v7474_v5 = vadd.f32 %v7473_v1, %v7472_v55  ;;  %v7764_v40 = vsel %vm1716_vm2, %v6803_v52, 0.0  ;;  %v6805_v50 = vmul.f32 %v10495_v32, %v9387_v7  ;;  %v5127_v58 = vpop.f32.mrb[217].mxu0 }
 0x5ef   : > { %10574 = vmatprep.mubr.msk.f32.mxu1 %vm948_vm1, %v2921_v8  ;;  %v7765_v51 = vadd.f32 %v7764_v40, %v7763_v34  ;;  %v7667_v25 = vsel %vm1716_vm2, %v6802_v21, 0.0  ;;  %v6804_v53 = vmul.f32 %v9387_v7, %v5127_v58  ;;  %v10498_v37 = vpop.f32.mrb[218].mxu0 }
 0x5f0   : > { %v7668_v42 = vadd.f32 %v7667_v25, %v7666_v61  ;;  %v7184_v55 = vsel %vm1716_vm2, %v6805_v50, 0.0  ;;  %v6807_v3 = vmul.f32 %v10498_v37, %v9387_v7  ;;  %v5137_v48 = vpop.f32.mrb[219].mxu0  ;;  %v2931_v37 = vld [vmem:[%s14771_s27 + $0x680] sm:$0xff] }
 0x5f1   : > { %v7185_v23 = vadd.f32 %v7184_v55, %v7183_v28  ;;  %v7087_v34 = vsel %vm1716_vm2, %v6804_v53, 0.0  ;;  %v6806_v14 = vmul.f32 %v9387_v7, %v5137_v48  ;;  %v2926_v28 = vld [vmem:[%s14771_s27 + $0x658] sm:$0xff] }
 0x5f2   : > { %10575 = vmatmul.mubr.msk.f32.gmra.mrb[74].mxu1 %vm948_vm1, %v2922_v11  ;;  %v10501_v24 = vpop.f32.mrb[220].mxu0  ;;  %v7088_v9 = vadd.f32 %v7087_v34, %v7086_v10  ;;  %v7378_v59 = vsel %vm1716_vm2, %v6807_v3, 0.0 }
 0x5f3   : > { %10577 = vmatprep.mubr.msk.f32.mxu1 %vm948_vm1, %v2923_v19  ;;  %v6809_v15 = vmul.f32 %v10501_v24, %v9387_v7  ;;  %v5147_v44 = vpop.f32.mrb[221].mxu0  ;;  %v7379_v61 = vadd.f32 %v7378_v59, %v7377_v13  ;;  %v7281_v63 = vsel %vm1716_vm2, %v6806_v14, 0.0  ;;  %v2933_v24 = vld [vmem:[%s14771_s27 + $0x690] sm:$0xff] }
 0x5f4   : > { %v6808_v39 = vmul.f32 %v9387_v7, %v5147_v44  ;;  %v7282_v18 = vadd.f32 %v7281_v63, %v7280_v46  ;;  %v2934_v63 = vld [vmem:[%s14771_s27 + $0x698] sm:$0xff] }
 0x5f5   : > { %v7572_v10 = vsel %vm1716_vm2, %v6809_v15, 0.0 }
 0x5f6   : > { %10578 = vmatmul.mubr.msk.f32.gmra.mrb[76].mxu1 %vm948_vm1, %v2924_v26  ;;  %v10504_v8 = vpop.f32.mrb[222].mxu0  ;;  %v7573_v13 = vadd.f32 %v7572_v10, %v7571_v0  ;;  %v7475_v54 = vsel %vm1716_vm2, %v6808_v39, 0.0  ;;  %v2928_v0 = vld [vmem:[%s14771_s27 + $0x668] sm:$0xff] }
 0x5f7   : > { %10580 = vmatprep.mubr.msk.f32.mxu1 %vm948_vm1, %v2925_v12  ;;  %v6811_v33 = vmul.f32 %v10504_v8, %v9387_v7  ;;  %v5157_v4 = vpop.f32.mrb[223].mxu0  ;;  %v7476_v36 = vadd.f32 %v7475_v54, %v7474_v5  ;;  %v2932_v12 = vld [vmem:[%s14771_s27 + $0x688] sm:$0xff] }
 0x5f8   : > { %v6810_v45 = vmul.f32 %v9387_v7, %v5157_v4  ;;  %v2929_v7 = vld [vmem:[%s14771_s27 + $0x670] sm:$0xff] }
 0x5f9   : > { %v7766_v11 = vsel %vm1716_vm2, %v6811_v33, 0.0 }
 0x5fa   : > { %v10507_v46 = vpop.f32.mrb[224].mxu0  ;;  %10581 = vmatmul.mubr.msk.f32.gmra.mrb[78].mxu1 %vm948_vm1, %v2926_v28  ;;  %v7767_v2 = vadd.f32 %v7766_v11, %v7765_v51  ;;  %v7669_v52 = vsel %vm1716_vm2, %v6810_v45, 0.0  ;;  %v2930_v51 = vld [vmem:[%s14771_s27 + $0x678] sm:$0xff]  ;;  %v2940_v11 = vld [vmem:[%s14771_s27 + $0x6c8] sm:$0xff] }
 0x5fb   : > { %v6813_v43 = vmul.f32 %v10507_v46, %v9388_v17  ;;  %v5167_v19 = vpop.f32.mrb[225].mxu0  ;;  %10583 = vmatprep.mubr.msk.f32.mxu1 %vm948_vm1, %v2927_v41  ;;  %v7670_v1 = vadd.f32 %v7669_v52, %v7668_v42  ;;  %v2938_v45 = vld [vmem:[%s14771_s27 + $0x6b8] sm:$0xff]  ;;  %v2941_v46 = vld [vmem:[%s14771_s27 + $0x6d0] sm:$0xff]  ;;  %v2943_v52 = vld [vmem:[%s14771_s27 + $0x6e0] sm:$0xff] }
 0x5fc   : > { %v6812_v21 = vmul.f32 %v9388_v17, %v5167_v19  ;;  %v2945_v19 = vld [vmem:[%s14771_s27 + $0x6f0] sm:$0xff] }
 0x5fd   : > { %v7186_v32 = vsel %vm1716_vm2, %v6813_v43, 0.0  ;;  %v2944_v43 = vld [vmem:[%s14771_s27 + $0x6e8] sm:$0xff] }
 0x5fe   : > { %v13242_v5 = vadd.f32 %v7186_v32, %v7185_v23  ;;  %v7089_v40 = vsel %vm1716_vm2, %v6812_v21, 0.0  ;;  %10584 = vmatmul.mubr.msk.f32.gmra.mrb[80].mxu1 %vm948_vm1, %v2928_v0  ;;  %v10510_v58 = vpop.f32.mrb[226].mxu0  ;;  %v2946_v0 = vld [vmem:[%s14771_s27 + $0x6f8] sm:$0xff]  ;;  %v2948_v21 = vld [vmem:[%s14771_s27 + $0x708] sm:$0xff] }
 0x5ff   : > { %v13246_v50 = vadd.f32 %v7089_v40, %v7088_v9  ;;  %10586 = vmatprep.mubr.msk.f32.mxu1 %vm948_vm1, %v2929_v7  ;;  %v6815_v25 = vmul.f32 %v10510_v58, %v9388_v17  ;;  %v5177_v53 = vpop.f32.mrb[227].mxu0  ;;  %v2949_v7 = vld [vmem:[%s14771_s27 + $0x710] sm:$0xff]  ;;  %v2950_v32 = vld [vmem:[%s14771_s27 + $0x718] sm:$0xff]  ;;  %v2951_v40 = vld [vmem:[%s14771_s27 + $0x720] sm:$0xff] }
 0x600   : > { %v6814_v26 = vmul.f32 %v9388_v17, %v5177_v53  ;;  %v2952_v58 = vld [vmem:[%s14771_s27 + $0x728] sm:$0xff]  ;;  %v2955_v53 = vld [vmem:[%s14771_s27 + $0x740] sm:$0xff] }
 0x601   : > { %v7380_v42 = vsel %vm1716_vm2, %v6815_v25, 0.0  ;;  %v2954_v25 = vld [vmem:[%s14771_s27 + $0x738] sm:$0xff] }
 0x602   : > { %10587 = vmatmul.mubr.msk.f32.gmra.mrb[82].mxu1 %vm948_vm1, %v2930_v51  ;;  %v13257_v55 = vadd.f32 %v7380_v42, %v7379_v61  ;;  %v7283_v3 = vsel %vm1716_vm2, %v6814_v26, 0.0  ;;  %v10513_v48 = vpop.f32.mrb[228].mxu0  ;;  %v2953_v51 = vld [vmem:[%s14771_s27 + $0x730] sm:$0xff]  ;;  %v2958_v42 = vld [vmem:[%s14771_s27 + $0x758] sm:$0xff] }
 0x603   : > { %10589 = vmatprep.mubr.msk.f32.mxu1 %vm948_vm1, %v2931_v37  ;;  %v13264_v23 = vadd.f32 %v7283_v3, %v7282_v18  ;;  %v6817_v34 = vmul.f32 %v10513_v48, %v9388_v17  ;;  %v5187_v14 = vpop.f32.mrb[229].mxu0  ;;  %v2935_v18 = vld [vmem:[%s14771_s27 + $0x6a0] sm:$0xff]  ;;  %v2956_v37 = vld [vmem:[%s14771_s27 + $0x748] sm:$0xff]  ;;  %v2957_v26 = vld [vmem:[%s14771_s27 + $0x750] sm:$0xff] }
 0x604   : > { %v6816_v9 = vmul.f32 %v9388_v17, %v5187_v14  ;;  %v2959_v3 = vld [vmem:[%s14771_s27 + $0x760] sm:$0xff]  ;;  %v2960_v48 = vld [vmem:[%s14771_s27 + $0x768] sm:$0xff] }
 0x605   : > { %v7574_v59 = vsel %vm1716_vm2, %v6817_v34, 0.0  ;;  %v2962_v34 = vld [vmem:[%s14771_s27 + $0x778] sm:$0xff]  ;;  %v2963_v14 = vld [vmem:[%s14771_s27 + $0x780] sm:$0xff] }
 0x606   : > { %10590 = vmatmul.mubr.msk.f32.gmra.mrb[84].mxu1 %vm948_vm1, %v2932_v12  ;;  %v13271_v15 = vadd.f32 %v7574_v59, %v7573_v13  ;;  %v7477_v44 = vsel %vm1716_vm2, %v6816_v9, 0.0  ;;  %v10516_v61 = vpop.f32.mrb[230].mxu0  ;;  %v2936_v13 = vld [vmem:[%s14771_s27 + $0x6a8] sm:$0xff]  ;;  %v2961_v12 = vld [vmem:[%s14771_s27 + $0x770] sm:$0xff]  ;;  %v2966_v59 = vld [vmem:[%s14771_s27 + $0x798] sm:$0xff] }
 0x607   : > { %10592 = vmatprep.mubr.msk.f32.mxu1 %vm948_vm1, %v2933_v24  ;;  %v13278_v39 = vadd.f32 %v7477_v44, %v7476_v36  ;;  %v6819_v8 = vmul.f32 %v10516_v61, %v9388_v17  ;;  %v5197_v28 = vpop.f32.mrb[231].mxu0  ;;  %v2939_v36 = vld [vmem:[%s14771_s27 + $0x6c0] sm:$0xff]  ;;  %v2964_v24 = vld [vmem:[%s14771_s27 + $0x788] sm:$0xff]  ;;  %v2965_v9 = vld [vmem:[%s14771_s27 + $0x790] sm:$0xff] }
 0x608   : > { %v6818_v10 = vmul.f32 %v9388_v17, %v5197_v28  ;;  %v2937_v17 = vld [vmem:[%s14771_s27 + $0x6b0] sm:$0xff]  ;;  %v2967_v44 = vld [vmem:[%s14771_s27 + $0x7a0] sm:$0xff]  ;;  %v2968_v61 = vld [vmem:[%s14771_s27 + $0x7a8] sm:$0xff] }
 0x609   : > { %v7768_v33 = vsel %vm1716_vm2, %v6819_v8, 0.0  ;;  %v2970_v8 = vld [vmem:[%s14771_s27 + $0x7b8] sm:$0xff]  ;;  %v2971_v28 = vld [vmem:[%s14771_s27 + $0x7c0] sm:$0xff] }
 0x60a   : > { %10593 = vmatmul.mubr.msk.f32.gmra.mrb[86].mxu1 %vm948_vm1, %v2934_v63  ;;  %v13285_v4 = vadd.f32 %v7768_v33, %v7767_v2  ;;  %v7671_v41 = vsel %vm1716_vm2, %v6818_v10, 0.0  ;;  %v2942_v2 = vld [vmem:[%s14771_s27 + $0x6d8] sm:$0xff]  ;;  %v2969_v63 = vld [vmem:[%s14771_s27 + $0x7b0] sm:$0xff] }
 0x60b   : > { %10595 = vmatprep.mubr.msk.f32.mxu1 %vm948_vm1, %v2935_v18  ;;  %v13292_v54 = vadd.f32 %v7671_v41, %v7670_v1  ;;  %v2947_v1 = vld [vmem:[%s14771_s27 + $0x700] sm:$0xff]  ;;  %v2972_v18 = vld [vmem:[%s14771_s27 + $0x7c8] sm:$0xff]  ;;  %v2973_v10 = vld [vmem:[%s14771_s27 + $0x7d0] sm:$0xff] }
 0x60c   : > { %v2974_v33 = vld [vmem:[%s14771_s27 + $0x7d8] sm:$0xff]  ;;  %v2975_v41 = vld [vmem:[%s14771_s27 + $0x7e0] sm:$0xff] }
 0x60e   : > { %10596 = vmatmul.mubr.msk.f32.gmra.mrb[88].mxu1 %vm948_vm1, %v2936_v13  ;;  %v2976_v13 = vld [vmem:[%s14771_s27 + $0x7e8] sm:$0xff] }
 0x60f   : > { %10598 = vmatprep.mubr.msk.f32.mxu1 %vm948_vm1, %v2937_v17  ;;  %v2977_v17 = vld [vmem:[%s14771_s27 + $0x7f0] sm:$0xff] }
 0x612   : > { %10599 = vmatmul.mubr.msk.f32.gmra.mrb[90].mxu1 %vm948_vm1, %v2938_v45  ;;  %v2978_v45 = vld [vmem:[%s14771_s27 + $0x7f8] sm:$0xff] }
 0x613   : > { %10601 = vmatprep.mubr.msk.f32.mxu1 %vm948_vm1, %v2939_v36  ;;  %v2979_v36 = vld [vmem:[%s14771_s27 + $0x800] sm:$0xff] }
 0x616   : > { %10602 = vmatmul.mubr.msk.f32.gmra.mrb[92].mxu1 %vm948_vm1, %v2940_v11  ;;  %v2980_v11 = vld [vmem:[%s14771_s27 + $0x808] sm:$0xff] }
 0x617   : > { %10604 = vmatprep.mubr.msk.f32.mxu1 %vm948_vm1, %v2941_v46  ;;  %v2981_v46 = vld [vmem:[%s14771_s27 + $0x810] sm:$0xff] }
 0x61a   : > { %10605 = vmatmul.mubr.msk.f32.gmra.mrb[94].mxu1 %vm948_vm1, %v2942_v2  ;;  %v2982_v2 = vld [vmem:[%s14771_s27 + $0x818] sm:$0xff] }
 0x61b   : > { %10607 = vmatprep.mubr.msk.f32.mxu1 %vm948_vm1, %v2943_v52  ;;  %v2983_v52 = vld [vmem:[%s14771_s27 + $0x820] sm:$0xff] }
 0x61e   : > { %10608 = vmatmul.mubr.msk.f32.gmra.mrb[96].mxu1 %vm948_vm1, %v2944_v43 }
 0x61f   : > { %10610 = vmatprep.mubr.msk.f32.mxu1 %vm948_vm1, %v2945_v19 }
 0x622   : > { %10611 = vmatmul.mubr.msk.f32.gmra.mrb[98].mxu1 %vm948_vm1, %v2946_v0  ;;  %v2984_v0 = vld [vmem:[%s14771_s27 + $0x828] sm:$0xff] }
 0x623   : > { %10613 = vmatprep.mubr.msk.f32.mxu1 %vm948_vm1, %v2947_v1  ;;  %v2985_v1 = vld [vmem:[%s14771_s27 + $0x830] sm:$0xff] }
 0x626   : > { %10614 = vmatmul.mubr.msk.f32.gmra.mrb[100].mxu1 %vm948_vm1, %v2948_v21 }
 0x627   : > { %10616 = vmatprep.mubr.msk.f32.mxu1 %vm948_vm1, %v2949_v7 }
 0x62a   : > { %10617 = vmatmul.mubr.msk.f32.gmra.mrb[102].mxu1 %vm948_vm1, %v2950_v32  ;;  %v2986_v32 = vld [vmem:[%s14771_s27 + $0x838] sm:$0xff] }
 0x62b   : > { %10619 = vmatprep.mubr.msk.f32.mxu1 %vm948_vm1, %v2951_v40  ;;  %v2987_v40 = vld [vmem:[%s14771_s27 + $0x840] sm:$0xff] }
 0x62e   : > { %10620 = vmatmul.mubr.msk.f32.gmra.mrb[104].mxu1 %vm948_vm1, %v2952_v58 }
 0x62f   : > { %10622 = vmatprep.mubr.msk.f32.mxu1 %vm948_vm1, %v2953_v51 }
 0x632   : > { %10623 = vmatmul.mubr.msk.f32.gmra.mrb[106].mxu1 %vm948_vm1, %v2954_v25  ;;  %v2988_v25 = vld [vmem:[%s14771_s27 + $0x848] sm:$0xff] }
 0x633   : > { %10625 = vmatprep.mubr.msk.f32.mxu1 %vm948_vm1, %v2955_v53  ;;  %v2989_v53 = vld [vmem:[%s14771_s27 + $0x850] sm:$0xff] }
 0x636   : > { %10626 = vmatmul.mubr.msk.f32.gmra.mrb[108].mxu1 %vm948_vm1, %v2956_v37 }
 0x637   : > { %10628 = vmatprep.mubr.msk.f32.mxu1 %vm948_vm1, %v2957_v26 }
 0x63a   : > { %10629 = vmatmul.mubr.msk.f32.gmra.mrb[110].mxu1 %vm948_vm1, %v2958_v42  ;;  %v9389_v42 = vld [vmem:[%s14772_s7 + $0x14] ss:$0 sm:$0xff] }
 0x63b   : > { %10631 = vmatprep.mubr.msk.f32.mxu1 %vm948_vm1, %v2959_v3  ;;  %v2990_v3 = vld [vmem:[%s14771_s27 + $0x858] sm:$0xff] }
 0x63e   : > { %10632 = vmatmul.mubr.msk.f32.gmra.mrb[112].mxu1 %vm948_vm1, %v2960_v48  ;;  %v2991_v48 = vld [vmem:[%s14771_s27 + $0x860] sm:$0xff] }
 0x63f   : > { %10634 = vmatprep.mubr.msk.f32.mxu1 %vm948_vm1, %v2961_v12 }
 0x642   : > { %10635 = vmatmul.mubr.msk.f32.gmra.mrb[114].mxu1 %vm948_vm1, %v2962_v34 }
 0x643   : > { %10637 = vmatprep.mubr.msk.f32.mxu1 %vm948_vm1, %v2963_v14 }
 0x646   : > { %10638 = vmatmul.mubr.msk.f32.gmra.mrb[116].mxu1 %vm948_vm1, %v2964_v24 }
 0x647   : > { %10640 = vmatprep.mubr.msk.f32.mxu1 %vm948_vm1, %v2965_v9  ;;  %v2992_v9 = vld [vmem:[%s14771_s27 + $0x868] sm:$0xff] }
 0x64a   : > { %10641 = vmatmul.mubr.msk.f32.gmra.mrb[118].mxu1 %vm948_vm1, %v2966_v59 }
 0x64b   : > { %10643 = vmatprep.mubr.msk.f32.mxu1 %vm948_vm1, %v2967_v44  ;;  %v2993_v44 = vld [vmem:[%s14771_s27 + $0x870] sm:$0xff] }
 0x64e   : > { %10644 = vmatmul.mubr.msk.f32.gmra.mrb[120].mxu1 %vm948_vm1, %v2968_v61 }
 0x64f   : > { %10646 = vmatprep.mubr.msk.f32.mxu1 %vm948_vm1, %v2969_v63 }
 0x652   : > { %10647 = vmatmul.mubr.msk.f32.gmra.mrb[122].mxu1 %vm948_vm1, %v2970_v8 }
 0x653   : > { %10649 = vmatprep.mubr.msk.f32.mxu1 %vm948_vm1, %v2971_v28 }
 0x656   : > { %10650 = vmatmul.mubr.msk.f32.gmra.mrb[124].mxu1 %vm948_vm1, %v2972_v18 }
 0x657   : > { %10652 = vmatprep.mubr.msk.f32.mxu1 %vm948_vm1, %v2973_v10 }
 0x65a   : > { %10653 = vmatmul.mubr.msk.f32.gmra.mrb[126].mxu1 %vm948_vm1, %v2974_v33 }
 0x65b   : > { %10655 = vmatprep.mubr.msk.f32.mxu1 %vm948_vm1, %v2975_v41  ;;  %v2994_v41 = vld [vmem:[%s14771_s27 + $0x878] sm:$0xff] }
 0x65e   : > { %10656 = vmatmul.mubr.msk.f32.gmra.mrb[128].mxu1 %vm948_vm1, %v2976_v13 }
 0x65f   : > { %10658 = vmatprep.mubr.msk.f32.mxu1 %vm948_vm1, %v2977_v17 }
 0x662   : > { %10659 = vmatmul.mubr.msk.f32.gmra.mrb[130].mxu1 %vm948_vm1, %v2978_v45 }
 0x663   : > { %10661 = vmatprep.mubr.msk.f32.mxu1 %vm948_vm1, %v2979_v36 }
 0x666   : > { %10662 = vmatmul.mubr.msk.f32.gmra.mrb[132].mxu1 %vm948_vm1, %v2980_v11 }
 0x667   : > { %10664 = vmatprep.mubr.msk.f32.mxu1 %vm948_vm1, %v2981_v46 }
 0x669   : > { %v13481_v43 = vpop.f32.mrb[28].mxu1 }
 0x66a   : > { %v13483_v19 = vpop.f32.mrb[29].mxu1  ;;  %10665 = vmatmul.mubr.msk.f32.gmra.mrb[134].mxu1 %vm948_vm1, %v2982_v2 }
 0x66b   : > { %10667 = vmatprep.mubr.msk.f32.mxu1 %vm948_vm1, %v2983_v52  ;;  %v2996_v52 = vld [vmem:[%s14771_s27 + $0x888] sm:$0xff] }
 0x66d   : > { %v13493_v21 = vpop.f32.mrb[30].mxu1 }
 0x66e   : > { %v13495_v7 = vpop.f32.mrb[31].mxu1  ;;  %10668 = vmatmul.mubr.msk.f32.gmra.mrb[136].mxu1 %vm948_vm1, %v2984_v0 }
 0x66f   : > { %10670 = vmatprep.mubr.msk.f32.mxu1 %vm948_vm1, %v2985_v1 }
 0x671   : > { %v13505_v58 = vpop.f32.mrb[32].mxu1 }
 0x672   : > { %v13507_v51 = vpop.f32.mrb[33].mxu1  ;;  %10671 = vmatmul.mubr.msk.f32.gmra.mrb[138].mxu1 %vm948_vm1, %v2986_v32 }
 0x673   : > { %10673 = vmatprep.mubr.msk.f32.mxu1 %vm948_vm1, %v2987_v40 }
 0x675   : > { %v13517_v37 = vpop.f32.mrb[34].mxu1 }
 0x676   : > { %v13519_v26 = vpop.f32.mrb[35].mxu1  ;;  %10674 = vmatmul.mubr.msk.f32.gmra.mrb[140].mxu1 %vm948_vm1, %v2988_v25 }
 0x677   : > { %10676 = vmatprep.mubr.msk.f32.mxu1 %vm948_vm1, %v2989_v53 }
 0x679   : > { %v10519_v12 = vpop.f32.mrb[36].mxu1 }
 0x67a   : > { %v6821_v34 = vmul.f32 %v10519_v12, %v9389_v42  ;;  %v5207_v14 = vpop.f32.mrb[37].mxu1  ;;  %10677 = vmatmul.mubr.msk.f32.gmra.mrb[142].mxu1 %vm948_vm1, %v2990_v3 }
 0x67b   : > { %v6820_v24 = vmul.f32 %v9389_v42, %v5207_v14  ;;  %10679 = vmatprep.mubr.msk.f32.mxu1 %vm948_vm1, %v2991_v48  ;;  %v9390_v48 = vld [vmem:[%s14772_s7 + $0x15] ss:$0 sm:$0xff] }
 0x67c   : > { %v7188_v59 = vsel %vm1716_vm2, %v6821_v34, 0.0 }
 0x67d   : > { %v7189_v61 = vadd.f32 %v7188_v59, %v13242_v5  ;;  %v7091_v63 = vsel %vm1716_vm2, %v6820_v24, 0.0  ;;  %v10522_v8 = vpop.f32.mrb[38].mxu1  ;;  %v2995_v5 = vld [vmem:[%s14771_s27 + $0x880] sm:$0xff] }
 0x67e   : > { %v7092_v28 = vadd.f32 %v7091_v63, %v13246_v50  ;;  %v6823_v18 = vmul.f32 %v10522_v8, %v9389_v42  ;;  %v5217_v10 = vpop.f32.mrb[39].mxu1  ;;  %10680 = vmatmul.mubr.msk.f32.gmra.mrb[144].mxu1 %vm948_vm1, %v2992_v9  ;;  %v7867_v63 = vld [vmem:[%s11415_s29 + $0x8] sm:$0xff] }
 0x67f   : > { %v6822_v33 = vmul.f32 %v9389_v42, %v5217_v10  ;;  %10682 = vmatprep.mubr.msk.f32.mxu1 %vm948_vm1, %v2993_v44  ;;  %v7866_v44 = vld [vmem:[%s11415_s29] sm:$0xff] }
 0x680   : > { %v7382_v13 = vsel %vm1716_vm2, %v6823_v18, 0.0  ;;  %v3000_v18 = vld [vmem:[%s14771_s27 + $0x8a8] sm:$0xff]  ;;  %v11029_v10 = vpack.c.bf16 %v7867_v63, %v7866_v44  ;;  %v3006_v44 = vld [vmem:[%s14771_s27 + $0x8d8] sm:$0xff] }
 0x681   : > { %v7383_v17 = vadd.f32 %v7382_v13, %v13257_v55  ;;  %v7285_v50 = vsel %vm1716_vm2, %v6822_v33, 0.0  ;;  %v10525_v45 = vpop.f32.mrb[40].mxu1  ;;  %v2997_v55 = vld [vmem:[%s14771_s27 + $0x890] sm:$0xff] }
 0x682   : > { %v7286_v36 = vadd.f32 %v7285_v50, %v13264_v23  ;;  %v6825_v11 = vmul.f32 %v10525_v45, %v9389_v42  ;;  %v5227_v46 = vpop.f32.mrb[41].mxu1  ;;  %10683 = vmatmul.mubr.msk.f32.gmra.mrb[146].mxu1 %vm948_vm1, %v2994_v41  ;;  %11030 = vmatprep.subr.bf16.mxu0 %v11029_v10 }
 0x683   : > { %v6824_v2 = vmul.f32 %v9389_v42, %v5227_v46  ;;  %10685 = vmatprep.mubr.msk.f32.mxu1 %vm948_vm1, %v2995_v5  ;;  %11032 = vmatpush3.bf16.msra.mxu0 %v11029_v10  ;;  %v3002_v46 = vld [vmem:[%s14771_s27 + $0x8b8] sm:$0xff] }
 0x684   : > { %v7576_v0 = vsel %vm1716_vm2, %v6825_v11, 0.0 }
 0x685   : > { %v7577_v1 = vadd.f32 %v7576_v0, %v13271_v15  ;;  %v7479_v23 = vsel %vm1716_vm2, %v6824_v2, 0.0  ;;  %v10528_v32 = vpop.f32.mrb[42].mxu1  ;;  %v2998_v15 = vld [vmem:[%s14771_s27 + $0x898] sm:$0xff] }
 0x686   : > { %v7480_v40 = vadd.f32 %v7479_v23, %v13278_v39  ;;  %v6827_v25 = vmul.f32 %v10528_v32, %v9389_v42  ;;  %v5237_v53 = vpop.f32.mrb[43].mxu1  ;;  %10686 = vmatmul.mubr.msk.f32.gmra.mrb[148].mxu1 %vm948_vm1, %v2996_v52  ;;  %v2999_v39 = vld [vmem:[%s14771_s27 + $0x8a0] sm:$0xff] }
 0x687   : > { %v6826_v3 = vmul.f32 %v9389_v42, %v5237_v53  ;;  %10688 = vmatprep.mubr.msk.f32.mxu1 %vm948_vm1, %v2997_v55  ;;  %v3004_v53 = vld [vmem:[%s14771_s27 + $0x8c8] sm:$0xff] }
 0x688   : > { %v7770_v12 = vsel %vm1716_vm2, %v6827_v25, 0.0 }
 0x689   : > { %v7771_v34 = vadd.f32 %v7770_v12, %v13285_v4  ;;  %v7673_v42 = vsel %vm1716_vm2, %v6826_v3, 0.0  ;;  %v10531_v14 = vpop.f32.mrb[44].mxu1 }
 0x68a   : > { %v7674_v24 = vadd.f32 %v7673_v42, %v13292_v54  ;;  %v6829_v9 = vmul.f32 %v10531_v14, %v9390_v48  ;;  %v5247_v59 = vpop.f32.mrb[45].mxu1  ;;  %10689 = vmatmul.mubr.msk.f32.gmra.mrb[150].mxu1 %vm948_vm1, %v2998_v15  ;;  %v3001_v54 = vld [vmem:[%s14771_s27 + $0x8b0] sm:$0xff] }
 0x68b   : > { %v6828_v8 = vmul.f32 %v9390_v48, %v5247_v59  ;;  %10691 = vmatprep.mubr.msk.f32.mxu1 %vm948_vm1, %v2999_v39  ;;  %v9391_v59 = vld [vmem:[%s14772_s7 + $0x16] ss:$0 sm:$0xff] }
 0x68c   : > { %v7190_v4 = vsel %vm1716_vm2, %v6829_v9, 0.0 }
 0x68d   : > { %v7191_v33 = vadd.f32 %v7190_v4, %v7189_v61  ;;  %v7093_v41 = vsel %vm1716_vm2, %v6828_v8, 0.0  ;;  %v10534_v13 = vpop.f32.mrb[46].mxu1  ;;  %v3003_v61 = vld [vmem:[%s14771_s27 + $0x8c0] sm:$0xff] }
 0x68e   : > { %v7094_v5 = vadd.f32 %v7093_v41, %v7092_v28  ;;  %v6831_v50 = vmul.f32 %v10534_v13, %v9390_v48  ;;  %v5257_v45 = vpop.f32.mrb[47].mxu1  ;;  %10692 = vmatmul.mubr.msk.f32.gmra.mrb[152].mxu1 %vm948_vm1, %v3000_v18  ;;  %v3008_v41 = vld [vmem:[%s14771_s27 + $0x8e8] sm:$0xff] }
 0x68f   : > { %v6830_v11 = vmul.f32 %v9390_v48, %v5257_v45  ;;  %10694 = vmatprep.mubr.msk.f32.mxu1 %vm948_vm1, %v3001_v54 }
 0x690   : > { %v7384_v2 = vsel %vm1716_vm2, %v6831_v50, 0.0 }
 0x691   : > { %v7385_v52 = vadd.f32 %v7384_v2, %v7383_v17  ;;  %v7287_v28 = vsel %vm1716_vm2, %v6830_v11, 0.0  ;;  %v10537_v0 = vpop.f32.mrb[48].mxu1  ;;  %v3005_v17 = vld [vmem:[%s14771_s27 + $0x8d0] sm:$0xff] }
 0x692   : > { %v7288_v55 = vadd.f32 %v7287_v28, %v7286_v36  ;;  %v6833_v23 = vmul.f32 %v10537_v0, %v9390_v48  ;;  %v5267_v32 = vpop.f32.mrb[49].mxu1  ;;  %10695 = vmatmul.mubr.msk.f32.gmra.mrb[154].mxu1 %vm948_vm1, %v3002_v46  ;;  %v3010_v28 = vld [vmem:[%s14771_s27 + $0x8f8] sm:$0xff] }
 0x693   : > { %v6832_v25 = vmul.f32 %v9390_v48, %v5267_v32  ;;  %10697 = vmatprep.mubr.msk.f32.mxu1 %vm948_vm1, %v3003_v61 }
 0x694   : > { %v7578_v3 = vsel %vm1716_vm2, %v6833_v23, 0.0 }
 0x695   : > { %v7579_v15 = vadd.f32 %v7578_v3, %v7577_v1  ;;  %v7481_v36 = vsel %vm1716_vm2, %v6832_v25, 0.0  ;;  %v10540_v12 = vpop.f32.mrb[50].mxu1 }
 0x696   : > { %v7482_v39 = vadd.f32 %v7481_v36, %v7480_v40  ;;  %v6835_v42 = vmul.f32 %v10540_v12, %v9390_v48  ;;  %v5277_v14 = vpop.f32.mrb[51].mxu1  ;;  %10698 = vmatmul.mubr.msk.f32.gmra.mrb[156].mxu1 %vm948_vm1, %v3004_v53  ;;  %v3007_v40 = vld [vmem:[%s14771_s27 + $0x8e0] sm:$0xff]  ;;  %v3012_v36 = vld [vmem:[%s14771_s27 + $0x908] sm:$0xff] }
 0x697   : > { %v6834_v9 = vmul.f32 %v9390_v48, %v5277_v14  ;;  %10700 = vmatprep.mubr.msk.f32.mxu1 %vm948_vm1, %v3005_v17 }
 0x698   : > { %v7772_v1 = vsel %vm1716_vm2, %v6835_v42, 0.0 }
 0x699   : > { %v7773_v63 = vadd.f32 %v7772_v1, %v7771_v34  ;;  %v7675_v8 = vsel %vm1716_vm2, %v6834_v9, 0.0  ;;  %v10543_v48 = vpop.f32.mrb[52].mxu1  ;;  %v3009_v34 = vld [vmem:[%s14771_s27 + $0x8f0] sm:$0xff] }
 0x69a   : > { %v7676_v18 = vadd.f32 %v7675_v8, %v7674_v24  ;;  %v6837_v10 = vmul.f32 %v10543_v48, %v9391_v59  ;;  %v5287_v4 = vpop.f32.mrb[53].mxu1  ;;  %10701 = vmatmul.mubr.msk.f32.gmra.mrb[158].mxu1 %vm948_vm1, %v3006_v44  ;;  %v9392_v8 = vld [vmem:[%s14772_s7 + $0x17] ss:$0 sm:$0xff]  ;;  %v3014_v48 = vld [vmem:[%s14771_s27 + $0x918] sm:$0xff] }
 0x69b   : > { %v6836_v54 = vmul.f32 %v9391_v59, %v5287_v4  ;;  %10703 = vmatprep.mubr.msk.f32.mxu1 %vm948_vm1, %v3007_v40 }
 0x69c   : > { %v7192_v13 = vsel %vm1716_vm2, %v6837_v10, 0.0 }
 0x69d   : > { %v7193_v50 = vadd.f32 %v7192_v13, %v7191_v33  ;;  %v7095_v24 = vsel %vm1716_vm2, %v6836_v54, 0.0  ;;  %v10546_v45 = vpop.f32.mrb[54].mxu1  ;;  %v3011_v33 = vld [vmem:[%s14771_s27 + $0x900] sm:$0xff] }
 0x69e   : > { %v7096_v11 = vadd.f32 %v7095_v24, %v7094_v5  ;;  %v6839_v46 = vmul.f32 %v10546_v45, %v9391_v59  ;;  %v5297_v2 = vpop.f32.mrb[55].mxu1  ;;  %10704 = vmatmul.mubr.msk.f32.gmra.mrb[160].mxu1 %vm948_vm1, %v3008_v41  ;;  %v3016_v24 = vld [vmem:[%s14771_s27 + $0x928] sm:$0xff] }
 0x69f   : > { %v6838_v61 = vmul.f32 %v9391_v59, %v5297_v2  ;;  %10706 = vmatprep.mubr.msk.f32.mxu1 %vm948_vm1, %v3009_v34 }
 0x6a0   : > { %v7386_v0 = vsel %vm1716_vm2, %v6839_v46, 0.0 }
 0x6a1   : > { %v7387_v23 = vadd.f32 %v7386_v0, %v7385_v52  ;;  %v7289_v5 = vsel %vm1716_vm2, %v6838_v61, 0.0  ;;  %v10549_v32 = vpop.f32.mrb[56].mxu1  ;;  %v3013_v52 = vld [vmem:[%s14771_s27 + $0x910] sm:$0xff] }
 0x6a2   : > { %v7290_v25 = vadd.f32 %v7289_v5, %v7288_v55  ;;  %v6841_v53 = vmul.f32 %v10549_v32, %v9391_v59  ;;  %v5307_v3 = vpop.f32.mrb[57].mxu1  ;;  %10707 = vmatmul.mubr.msk.f32.gmra.mrb[162].mxu1 %vm948_vm1, %v3010_v28  ;;  %v3018_v5 = vld [vmem:[%s14771_s27 + $0x938] sm:$0xff] }
 0x6a3   : > { %v6840_v17 = vmul.f32 %v9391_v59, %v5307_v3  ;;  %10709 = vmatprep.mubr.msk.f32.mxu1 %vm948_vm1, %v3011_v33 }
 0x6a4   : > { %v7580_v12 = vsel %vm1716_vm2, %v6841_v53, 0.0 }
 0x6a5   : > { %v7581_v42 = vadd.f32 %v7580_v12, %v7579_v15  ;;  %v7483_v55 = vsel %vm1716_vm2, %v6840_v17, 0.0  ;;  %v10552_v14 = vpop.f32.mrb[58].mxu1 }
 0x6a6   : > { %v7484_v9 = vadd.f32 %v7483_v55, %v7482_v39  ;;  %v6843_v44 = vmul.f32 %v10552_v14, %v9391_v59  ;;  %v5317_v1 = vpop.f32.mrb[59].mxu1  ;;  %10710 = vmatmul.mubr.msk.f32.gmra.mrb[164].mxu1 %vm948_vm1, %v3012_v36  ;;  %v3015_v39 = vld [vmem:[%s14771_s27 + $0x920] sm:$0xff]  ;;  %v3020_v55 = vld [vmem:[%s14771_s27 + $0x948] sm:$0xff] }
 0x6a7   : > { %v6842_v40 = vmul.f32 %v9391_v59, %v5317_v1  ;;  %10712 = vmatprep.mubr.msk.f32.mxu1 %vm948_vm1, %v3013_v52 }
 0x6a8   : > { %v7774_v15 = vsel %vm1716_vm2, %v6843_v44, 0.0 }
 0x6a9   : > { %v7775_v10 = vadd.f32 %v7774_v15, %v7773_v63  ;;  %v7677_v4 = vsel %vm1716_vm2, %v6842_v40, 0.0  ;;  %v10555_v59 = vpop.f32.mrb[60].mxu1  ;;  %v3017_v63 = vld [vmem:[%s14771_s27 + $0x930] sm:$0xff] }
 0x6aa   : > { %v7678_v54 = vadd.f32 %v7677_v4, %v7676_v18  ;;  %v6845_v41 = vmul.f32 %v10555_v59, %v9392_v8  ;;  %v5327_v13 = vpop.f32.mrb[61].mxu1  ;;  %10713 = vmatmul.mubr.msk.f32.gmra.mrb[166].mxu1 %vm948_vm1, %v3014_v48  ;;  %v9393_v4 = vld [vmem:[%s14772_s7 + $0x18] ss:$0 sm:$0xff] }
 0x6ab   : > { %v6844_v34 = vmul.f32 %v9392_v8, %v5327_v13  ;;  %10715 = vmatprep.mubr.msk.f32.mxu1 %vm948_vm1, %v3015_v39  ;;  %v3022_v59 = vld [vmem:[%s14771_s27 + $0x958] sm:$0xff] }
 0x6ac   : > { %v7194_v45 = vsel %vm1716_vm2, %v6845_v41, 0.0 }
 0x6ad   : > { %v7195_v46 = vadd.f32 %v7194_v45, %v7193_v50  ;;  %v7097_v18 = vsel %vm1716_vm2, %v6844_v34, 0.0  ;;  %v10558_v2 = vpop.f32.mrb[62].mxu1  ;;  %v3019_v50 = vld [vmem:[%s14771_s27 + $0x940] sm:$0xff] }
 0x6ae   : > { %v7098_v61 = vadd.f32 %v7097_v18, %v7096_v11  ;;  %v6847_v28 = vmul.f32 %v10558_v2, %v9392_v8  ;;  %v5337_v0 = vpop.f32.mrb[63].mxu1  ;;  %10716 = vmatmul.mubr.msk.f32.gmra.mrb[168].mxu1 %vm948_vm1, %v3016_v24  ;;  %v3024_v18 = vld [vmem:[%s14771_s27 + $0x968] sm:$0xff] }
 0x6af   : > { %v6846_v33 = vmul.f32 %v9392_v8, %v5337_v0  ;;  %10718 = vmatprep.mubr.msk.f32.mxu1 %vm948_vm1, %v3017_v63 }
 0x6b0   : > { %v7388_v32 = vsel %vm1716_vm2, %v6847_v28, 0.0 }
 0x6b1   : > { %v7389_v53 = vadd.f32 %v7388_v32, %v7387_v23  ;;  %v7291_v11 = vsel %vm1716_vm2, %v6846_v33, 0.0  ;;  %v10561_v3 = vpop.f32.mrb[64].mxu1  ;;  %v3021_v23 = vld [vmem:[%s14771_s27 + $0x950] sm:$0xff] }
 0x6b2   : > { %v7292_v17 = vadd.f32 %v7291_v11, %v7290_v25  ;;  %v6849_v36 = vmul.f32 %v10561_v3, %v9392_v8  ;;  %v5347_v12 = vpop.f32.mrb[65].mxu1  ;;  %10719 = vmatmul.mubr.msk.f32.gmra.mrb[170].mxu1 %vm948_vm1, %v3018_v5  ;;  %v3026_v11 = vld [vmem:[%s14771_s27 + $0x978] sm:$0xff] }
 0x6b3   : > { %v6848_v52 = vmul.f32 %v9392_v8, %v5347_v12  ;;  %10721 = vmatprep.mubr.msk.f32.mxu1 %vm948_vm1, %v3019_v50 }
 0x6b4   : > { %v7582_v14 = vsel %vm1716_vm2, %v6849_v36, 0.0 }
 0x6b5   : > { %v7583_v44 = vadd.f32 %v7582_v14, %v7581_v42  ;;  %v7485_v25 = vsel %vm1716_vm2, %v6848_v52, 0.0  ;;  %v10564_v1 = vpop.f32.mrb[66].mxu1 }
 0x6b6   : > { %v7486_v40 = vadd.f32 %v7485_v25, %v7484_v9  ;;  %v6851_v48 = vmul.f32 %v10564_v1, %v9392_v8  ;;  %v5357_v15 = vpop.f32.mrb[67].mxu1  ;;  %10722 = vmatmul.mubr.msk.f32.gmra.mrb[172].mxu1 %vm948_vm1, %v3020_v55  ;;  %v3023_v9 = vld [vmem:[%s14771_s27 + $0x960] sm:$0xff]  ;;  %v3028_v25 = vld [vmem:[%s14771_s27 + $0x988] sm:$0xff] }
 0x6b7   : > { %v6850_v39 = vmul.f32 %v9392_v8, %v5357_v15  ;;  %10724 = vmatprep.mubr.msk.f32.mxu1 %vm948_vm1, %v3021_v23 }
 0x6b8   : > { %v7776_v42 = vsel %vm1716_vm2, %v6851_v48, 0.0 }
 0x6b9   : > { %v7777_v41 = vadd.f32 %v7776_v42, %v7775_v10  ;;  %v7679_v13 = vsel %vm1716_vm2, %v6850_v39, 0.0  ;;  %v10567_v8 = vpop.f32.mrb[68].mxu1  ;;  %v3025_v10 = vld [vmem:[%s14771_s27 + $0x970] sm:$0xff] }
 0x6ba   : > { %v7680_v34 = vadd.f32 %v7679_v13, %v7678_v54  ;;  %v6853_v24 = vmul.f32 %v10567_v8, %v9393_v4  ;;  %v5367_v45 = vpop.f32.mrb[69].mxu1  ;;  %10725 = vmatmul.mubr.msk.f32.gmra.mrb[174].mxu1 %vm948_vm1, %v3022_v59  ;;  %v9394_v13 = vld [vmem:[%s14772_s7 + $0x19] ss:$0 sm:$0xff] }
 0x6bb   : > { %v6852_v63 = vmul.f32 %v9393_v4, %v5367_v45  ;;  %10727 = vmatprep.mubr.msk.f32.mxu1 %vm948_vm1, %v3023_v9  ;;  %v3030_v8 = vld [vmem:[%s14771_s27 + $0x998] sm:$0xff] }
 0x6bc   : > { %v7196_v2 = vsel %vm1716_vm2, %v6853_v24, 0.0 }
 0x6bd   : > { %v7197_v28 = vadd.f32 %v7196_v2, %v7195_v46  ;;  %v7099_v54 = vsel %vm1716_vm2, %v6852_v63, 0.0  ;;  %v10570_v0 = vpop.f32.mrb[70].mxu1  ;;  %v3027_v46 = vld [vmem:[%s14771_s27 + $0x980] sm:$0xff] }
 0x6be   : > { %v7100_v33 = vadd.f32 %v7099_v54, %v7098_v61  ;;  %v6855_v5 = vmul.f32 %v10570_v0, %v9393_v4  ;;  %v5377_v32 = vpop.f32.mrb[71].mxu1  ;;  %10728 = vmatmul.mubr.msk.f32.gmra.mrb[176].mxu1 %vm948_vm1, %v3024_v18  ;;  %v3032_v54 = vld [vmem:[%s14771_s27 + $0x9a8] sm:$0xff] }
 0x6bf   : > { %v6854_v50 = vmul.f32 %v9393_v4, %v5377_v32  ;;  %10730 = vmatprep.mubr.msk.f32.mxu1 %vm948_vm1, %v3025_v10 }
 0x6c0   : > { %v7390_v3 = vsel %vm1716_vm2, %v6855_v5, 0.0 }
 0x6c1   : > { %v7391_v36 = vadd.f32 %v7390_v3, %v7389_v53  ;;  %v7293_v61 = vsel %vm1716_vm2, %v6854_v50, 0.0  ;;  %v10573_v12 = vpop.f32.mrb[72].mxu1  ;;  %v3029_v53 = vld [vmem:[%s14771_s27 + $0x990] sm:$0xff] }
 0x6c2   : > { %v7294_v52 = vadd.f32 %v7293_v61, %v7292_v17  ;;  %v6857_v55 = vmul.f32 %v10573_v12, %v9393_v4  ;;  %v5387_v14 = vpop.f32.mrb[73].mxu1  ;;  %10731 = vmatmul.mubr.msk.f32.gmra.mrb[178].mxu1 %vm948_vm1, %v3026_v11  ;;  %v3034_v61 = vld [vmem:[%s14771_s27 + $0x9b8] sm:$0xff] }
 0x6c3   : > { %v6856_v23 = vmul.f32 %v9393_v4, %v5387_v14  ;;  %10733 = vmatprep.mubr.msk.f32.mxu1 %vm948_vm1, %v3027_v46 }
 0x6c4   : > { %v7584_v1 = vsel %vm1716_vm2, %v6857_v55, 0.0 }
 0x6c5   : > { %v7585_v48 = vadd.f32 %v7584_v1, %v7583_v44  ;;  %v7487_v17 = vsel %vm1716_vm2, %v6856_v23, 0.0  ;;  %v10576_v15 = vpop.f32.mrb[74].mxu1 }
 0x6c6   : > { %v7488_v39 = vadd.f32 %v7487_v17, %v7486_v40  ;;  %v6859_v59 = vmul.f32 %v10576_v15, %v9393_v4  ;;  %v5397_v42 = vpop.f32.mrb[75].mxu1  ;;  %10734 = vmatmul.mubr.msk.f32.gmra.mrb[180].mxu1 %vm948_vm1, %v3028_v25  ;;  %v3031_v40 = vld [vmem:[%s14771_s27 + $0x9a0] sm:$0xff]  ;;  %v3036_v17 = vld [vmem:[%s14771_s27 + $0x9c8] sm:$0xff] }
 0x6c7   : > { %v6858_v9 = vmul.f32 %v9393_v4, %v5397_v42  ;;  %10736 = vmatprep.mubr.msk.f32.mxu1 %vm948_vm1, %v3029_v53 }
 0x6c8   : > { %v7778_v44 = vsel %vm1716_vm2, %v6859_v59, 0.0 }
 0x6c9   : > { %v7779_v24 = vadd.f32 %v7778_v44, %v7777_v41  ;;  %v7681_v45 = vsel %vm1716_vm2, %v6858_v9, 0.0  ;;  %v10579_v4 = vpop.f32.mrb[76].mxu1  ;;  %v3033_v41 = vld [vmem:[%s14771_s27 + $0x9b0] sm:$0xff] }
 0x6ca   : > { %v7682_v63 = vadd.f32 %v7681_v45, %v7680_v34  ;;  %v6861_v18 = vmul.f32 %v10579_v4, %v9394_v13  ;;  %v5407_v2 = vpop.f32.mrb[77].mxu1  ;;  %10737 = vmatmul.mubr.msk.f32.gmra.mrb[182].mxu1 %vm948_vm1, %v3030_v8  ;;  %v9395_v45 = vld [vmem:[%s14772_s7 + $0x1a] ss:$0 sm:$0xff] }
 0x6cb   : > { %v6860_v10 = vmul.f32 %v9394_v13, %v5407_v2  ;;  %10739 = vmatprep.mubr.msk.f32.mxu1 %vm948_vm1, %v3031_v40  ;;  %v3038_v4 = vld [vmem:[%s14771_s27 + $0x9d8] sm:$0xff] }
 0x6cc   : > { %v7198_v0 = vsel %vm1716_vm2, %v6861_v18, 0.0 }
 0x6cd   : > { %v7199_v5 = vadd.f32 %v7198_v0, %v7197_v28  ;;  %v7101_v34 = vsel %vm1716_vm2, %v6860_v10, 0.0  ;;  %v10582_v32 = vpop.f32.mrb[78].mxu1  ;;  %v3035_v28 = vld [vmem:[%s14771_s27 + $0x9c0] sm:$0xff] }
 0x6ce   : > { %v7102_v50 = vadd.f32 %v7101_v34, %v7100_v33  ;;  %v6863_v11 = vmul.f32 %v10582_v32, %v9394_v13  ;;  %v5417_v3 = vpop.f32.mrb[79].mxu1  ;;  %10740 = vmatmul.mubr.msk.f32.gmra.mrb[184].mxu1 %vm948_vm1, %v3032_v54  ;;  %v3040_v34 = vld [vmem:[%s14771_s27 + $0x9e8] sm:$0xff] }
 0x6cf   : > { %v6862_v46 = vmul.f32 %v9394_v13, %v5417_v3  ;;  %10742 = vmatprep.mubr.msk.f32.mxu1 %vm948_vm1, %v3033_v41 }
 0x6d0   : > { %v7392_v12 = vsel %vm1716_vm2, %v6863_v11, 0.0 }
 0x6d1   : > { %v7393_v55 = vadd.f32 %v7392_v12, %v7391_v36  ;;  %v7295_v33 = vsel %vm1716_vm2, %v6862_v46, 0.0  ;;  %v10585_v14 = vpop.f32.mrb[80].mxu1  ;;  %v3037_v36 = vld [vmem:[%s14771_s27 + $0x9d0] sm:$0xff] }
 0x6d2   : > { %v7296_v23 = vadd.f32 %v7295_v33, %v7294_v52  ;;  %v6865_v25 = vmul.f32 %v10585_v14, %v9394_v13  ;;  %v5427_v1 = vpop.f32.mrb[81].mxu1  ;;  %10743 = vmatmul.mubr.msk.f32.gmra.mrb[186].mxu1 %vm948_vm1, %v3034_v61  ;;  %v3042_v33 = vld [vmem:[%s14771_s27 + $0x9f8] sm:$0xff] }
 0x6d3   : > { %v6864_v53 = vmul.f32 %v9394_v13, %v5427_v1  ;;  %10745 = vmatprep.mubr.msk.f32.mxu1 %vm948_vm1, %v3035_v28 }
 0x6d4   : > { %v7586_v15 = vsel %vm1716_vm2, %v6865_v25, 0.0 }
 0x6d5   : > { %v7587_v59 = vadd.f32 %v7586_v15, %v7585_v48  ;;  %v7489_v52 = vsel %vm1716_vm2, %v6864_v53, 0.0  ;;  %v10588_v42 = vpop.f32.mrb[82].mxu1 }
 0x6d6   : > { %v7490_v9 = vadd.f32 %v7489_v52, %v7488_v39  ;;  %v6867_v8 = vmul.f32 %v10588_v42, %v9394_v13  ;;  %v5437_v44 = vpop.f32.mrb[83].mxu1  ;;  %10746 = vmatmul.mubr.msk.f32.gmra.mrb[188].mxu1 %vm948_vm1, %v3036_v17  ;;  %v3039_v39 = vld [vmem:[%s14771_s27 + $0x9e0] sm:$0xff]  ;;  %v3044_v52 = vld [vmem:[%s14771_s27 + $0xa08] sm:$0xff] }
 0x6d7   : > { %v6866_v40 = vmul.f32 %v9394_v13, %v5437_v44  ;;  %10748 = vmatprep.mubr.msk.f32.mxu1 %vm948_vm1, %v3037_v36 }
 0x6d8   : > { %v7780_v48 = vsel %vm1716_vm2, %v6867_v8, 0.0 }
 0x6d9   : > { %v7781_v18 = vadd.f32 %v7780_v48, %v7779_v24  ;;  %v7683_v2 = vsel %vm1716_vm2, %v6866_v40, 0.0  ;;  %v10591_v13 = vpop.f32.mrb[84].mxu1  ;;  %v3041_v24 = vld [vmem:[%s14771_s27 + $0x9f0] sm:$0xff] }
 0x6da   : > { %v7684_v10 = vadd.f32 %v7683_v2, %v7682_v63  ;;  %v6869_v54 = vmul.f32 %v10591_v13, %v9395_v45  ;;  %v5447_v0 = vpop.f32.mrb[85].mxu1  ;;  %10749 = vmatmul.mubr.msk.f32.gmra.mrb[190].mxu1 %vm948_vm1, %v3038_v4  ;;  %v9396_v2 = vld [vmem:[%s14772_s7 + $0x1b] ss:$0 sm:$0xff] }
 0x6db   : > { %v6868_v41 = vmul.f32 %v9395_v45, %v5447_v0  ;;  %10751 = vmatprep.mubr.msk.f32.mxu1 %vm948_vm1, %v3039_v39  ;;  %v3046_v13 = vld [vmem:[%s14771_s27 + $0xa18] sm:$0xff] }
 0x6dc   : > { %v7200_v32 = vsel %vm1716_vm2, %v6869_v54, 0.0 }
 0x6dd   : > { %v7201_v11 = vadd.f32 %v7200_v32, %v7199_v5  ;;  %v7103_v63 = vsel %vm1716_vm2, %v6868_v41, 0.0  ;;  %v10594_v3 = vpop.f32.mrb[86].mxu1  ;;  %v3043_v5 = vld [vmem:[%s14771_s27 + $0xa00] sm:$0xff] }
 0x6de   : > { %v7104_v46 = vadd.f32 %v7103_v63, %v7102_v50  ;;  %v6871_v61 = vmul.f32 %v10594_v3, %v9395_v45  ;;  %v5457_v12 = vpop.f32.mrb[87].mxu1  ;;  %10752 = vmatmul.mubr.msk.f32.gmra.mrb[192].mxu1 %vm948_vm1, %v3040_v34  ;;  %v3048_v63 = vld [vmem:[%s14771_s27 + $0xa28] sm:$0xff] }
 0x6df   : > { %v6870_v28 = vmul.f32 %v9395_v45, %v5457_v12  ;;  %10754 = vmatprep.mubr.msk.f32.mxu1 %vm948_vm1, %v3041_v24 }
 0x6e0   : > { %v7394_v14 = vsel %vm1716_vm2, %v6871_v61, 0.0 }
 0x6e1   : > { %v7395_v25 = vadd.f32 %v7394_v14, %v7393_v55  ;;  %v7297_v50 = vsel %vm1716_vm2, %v6870_v28, 0.0  ;;  %v10597_v1 = vpop.f32.mrb[88].mxu1  ;;  %v3045_v55 = vld [vmem:[%s14771_s27 + $0xa10] sm:$0xff] }
 0x6e2   : > { %v7298_v53 = vadd.f32 %v7297_v50, %v7296_v23  ;;  %v6873_v17 = vmul.f32 %v10597_v1, %v9395_v45  ;;  %v5467_v15 = vpop.f32.mrb[89].mxu1  ;;  %10755 = vmatmul.mubr.msk.f32.gmra.mrb[194].mxu1 %vm948_vm1, %v3042_v33  ;;  %v3050_v50 = vld [vmem:[%s14771_s27 + $0xa38] sm:$0xff] }
 0x6e3   : > { %v6872_v36 = vmul.f32 %v9395_v45, %v5467_v15  ;;  %10757 = vmatprep.mubr.msk.f32.mxu1 %vm948_vm1, %v3043_v5 }
 0x6e4   : > { %v7588_v42 = vsel %vm1716_vm2, %v6873_v17, 0.0 }
 0x6e5   : > { %v7589_v8 = vadd.f32 %v7588_v42, %v7587_v59  ;;  %v7491_v23 = vsel %vm1716_vm2, %v6872_v36, 0.0  ;;  %v10600_v44 = vpop.f32.mrb[90].mxu1 }
 0x6e6   : > { %v7492_v40 = vadd.f32 %v7491_v23, %v7490_v9  ;;  %v6875_v4 = vmul.f32 %v10600_v44, %v9395_v45  ;;  %v5477_v48 = vpop.f32.mrb[91].mxu1  ;;  %10758 = vmatmul.mubr.msk.f32.gmra.mrb[196].mxu1 %vm948_vm1, %v3044_v52  ;;  %v3047_v9 = vld [vmem:[%s14771_s27 + $0xa20] sm:$0xff]  ;;  %v3052_v23 = vld [vmem:[%s14771_s27 + $0xa48] sm:$0xff] }
 0x6e7   : > { %v6874_v39 = vmul.f32 %v9395_v45, %v5477_v48  ;;  %10760 = vmatprep.mubr.msk.f32.mxu1 %vm948_vm1, %v3045_v55 }
 0x6e8   : > { %v7782_v59 = vsel %vm1716_vm2, %v6875_v4, 0.0 }
 0x6e9   : > { %v7783_v54 = vadd.f32 %v7782_v59, %v7781_v18  ;;  %v7685_v0 = vsel %vm1716_vm2, %v6874_v39, 0.0  ;;  %v10603_v45 = vpop.f32.mrb[92].mxu1  ;;  %v3049_v18 = vld [vmem:[%s14771_s27 + $0xa30] sm:$0xff] }
 0x6ea   : > { %v7686_v41 = vadd.f32 %v7685_v0, %v7684_v10  ;;  %v6877_v34 = vmul.f32 %v10603_v45, %v9396_v2  ;;  %v5487_v32 = vpop.f32.mrb[93].mxu1  ;;  %10761 = vmatmul.mubr.msk.f32.gmra.mrb[198].mxu1 %vm948_vm1, %v3046_v13  ;;  %v9397_v0 = vld [vmem:[%s14772_s7 + $0x1c] ss:$0 sm:$0xff] }
 0x6eb   : > { %v6876_v24 = vmul.f32 %v9396_v2, %v5487_v32  ;;  %10763 = vmatprep.mubr.msk.f32.mxu1 %vm948_vm1, %v3047_v9  ;;  %v3054_v45 = vld [vmem:[%s14771_s27 + $0xa58] sm:$0xff] }
 0x6ec   : > { %v7202_v3 = vsel %vm1716_vm2, %v6877_v34, 0.0 }
 0x6ed   : > { %v7203_v61 = vadd.f32 %v7202_v3, %v7201_v11  ;;  %v7105_v10 = vsel %vm1716_vm2, %v6876_v24, 0.0  ;;  %v10606_v12 = vpop.f32.mrb[94].mxu1  ;;  %v3051_v11 = vld [vmem:[%s14771_s27 + $0xa40] sm:$0xff] }
 0x6ee   : > { %v7106_v28 = vadd.f32 %v7105_v10, %v7104_v46  ;;  %v6879_v33 = vmul.f32 %v10606_v12, %v9396_v2  ;;  %v5497_v14 = vpop.f32.mrb[95].mxu1  ;;  %10764 = vmatmul.mubr.msk.f32.gmra.mrb[200].mxu1 %vm948_vm1, %v3048_v63  ;;  %v3056_v10 = vld [vmem:[%s14771_s27 + $0xa68] sm:$0xff] }
 0x6ef   : > { %v6878_v5 = vmul.f32 %v9396_v2, %v5497_v14  ;;  %10766 = vmatprep.mubr.msk.f32.mxu1 %vm948_vm1, %v3049_v18 }
 0x6f0   : > { %v7396_v1 = vsel %vm1716_vm2, %v6879_v33, 0.0 }
 0x6f1   : > { %v7397_v17 = vadd.f32 %v7396_v1, %v7395_v25  ;;  %v7299_v46 = vsel %vm1716_vm2, %v6878_v5, 0.0  ;;  %v10609_v15 = vpop.f32.mrb[96].mxu1  ;;  %v3053_v25 = vld [vmem:[%s14771_s27 + $0xa50] sm:$0xff] }
 0x6f2   : > { %v7300_v36 = vadd.f32 %v7299_v46, %v7298_v53  ;;  %v6881_v52 = vmul.f32 %v10609_v15, %v9396_v2  ;;  %v5507_v42 = vpop.f32.mrb[97].mxu1  ;;  %10767 = vmatmul.mubr.msk.f32.gmra.mrb[202].mxu1 %vm948_vm1, %v3050_v50  ;;  %v3058_v46 = vld [vmem:[%s14771_s27 + $0xa78] sm:$0xff] }
 0x6f3   : > { %v6880_v55 = vmul.f32 %v9396_v2, %v5507_v42  ;;  %10769 = vmatprep.mubr.msk.f32.mxu1 %vm948_vm1, %v3051_v11 }
 0x6f4   : > { %v7590_v44 = vsel %vm1716_vm2, %v6881_v52, 0.0 }
 0x6f5   : > { %v7591_v4 = vadd.f32 %v7590_v44, %v7589_v8  ;;  %v7493_v53 = vsel %vm1716_vm2, %v6880_v55, 0.0  ;;  %v10612_v48 = vpop.f32.mrb[98].mxu1 }
 0x6f6   : > { %v7494_v39 = vadd.f32 %v7493_v53, %v7492_v40  ;;  %v6883_v13 = vmul.f32 %v10612_v48, %v9396_v2  ;;  %v5517_v59 = vpop.f32.mrb[99].mxu1  ;;  %10770 = vmatmul.mubr.msk.f32.gmra.mrb[204].mxu1 %vm948_vm1, %v3052_v23  ;;  %v3055_v40 = vld [vmem:[%s14771_s27 + $0xa60] sm:$0xff]  ;;  %v3060_v53 = vld [vmem:[%s14771_s27 + $0xa88] sm:$0xff] }
 0x6f7   : > { %v6882_v9 = vmul.f32 %v9396_v2, %v5517_v59  ;;  %10772 = vmatprep.mubr.msk.f32.mxu1 %vm948_vm1, %v3053_v25 }
 0x6f8   : > { %v7784_v8 = vsel %vm1716_vm2, %v6883_v13, 0.0 }
 0x6f9   : > { %v7785_v34 = vadd.f32 %v7784_v8, %v7783_v54  ;;  %v7687_v32 = vsel %vm1716_vm2, %v6882_v9, 0.0  ;;  %v10615_v2 = vpop.f32.mrb[100].mxu1  ;;  %v3057_v54 = vld [vmem:[%s14771_s27 + $0xa70] sm:$0xff] }
 0x6fa   : > { %v7688_v24 = vadd.f32 %v7687_v32, %v7686_v41  ;;  %v6885_v63 = vmul.f32 %v10615_v2, %v9397_v0  ;;  %v5527_v3 = vpop.f32.mrb[101].mxu1  ;;  %10773 = vmatmul.mubr.msk.f32.gmra.mrb[206].mxu1 %vm948_vm1, %v3054_v45  ;;  %v9398_v32 = vld [vmem:[%s14772_s7 + $0x1d] ss:$0 sm:$0xff] }
 0x6fb   : > { %v6884_v18 = vmul.f32 %v9397_v0, %v5527_v3  ;;  %10775 = vmatprep.mubr.msk.f32.mxu1 %vm948_vm1, %v3055_v40  ;;  %v3062_v2 = vld [vmem:[%s14771_s27 + $0xa98] sm:$0xff] }
 0x6fc   : > { %v7204_v12 = vsel %vm1716_vm2, %v6885_v63, 0.0 }
 0x6fd   : > { %v7205_v33 = vadd.f32 %v7204_v12, %v7203_v61  ;;  %v7107_v41 = vsel %vm1716_vm2, %v6884_v18, 0.0  ;;  %v10618_v14 = vpop.f32.mrb[102].mxu1  ;;  %v3059_v61 = vld [vmem:[%s14771_s27 + $0xa80] sm:$0xff] }
 0x6fe   : > { %v7108_v5 = vadd.f32 %v7107_v41, %v7106_v28  ;;  %v6887_v50 = vmul.f32 %v10618_v14, %v9397_v0  ;;  %v5537_v1 = vpop.f32.mrb[103].mxu1  ;;  %10776 = vmatmul.mubr.msk.f32.gmra.mrb[208].mxu1 %vm948_vm1, %v3056_v10  ;;  %v3064_v41 = vld [vmem:[%s14771_s27 + $0xaa8] sm:$0xff] }
 0x6ff   : > { %v6886_v11 = vmul.f32 %v9397_v0, %v5537_v1  ;;  %10778 = vmatprep.mubr.msk.f32.mxu1 %vm948_vm1, %v3057_v54 }
 0x700   : > { %v7398_v15 = vsel %vm1716_vm2, %v6887_v50, 0.0 }
 0x701   : > { %v7399_v52 = vadd.f32 %v7398_v15, %v7397_v17  ;;  %v7301_v28 = vsel %vm1716_vm2, %v6886_v11, 0.0  ;;  %v10621_v42 = vpop.f32.mrb[104].mxu1  ;;  %v3061_v17 = vld [vmem:[%s14771_s27 + $0xa90] sm:$0xff] }
 0x702   : > { %v7302_v55 = vadd.f32 %v7301_v28, %v7300_v36  ;;  %v6889_v23 = vmul.f32 %v10621_v42, %v9397_v0  ;;  %v5547_v44 = vpop.f32.mrb[105].mxu1  ;;  %10779 = vmatmul.mubr.msk.f32.gmra.mrb[210].mxu1 %vm948_vm1, %v3058_v46  ;;  %v3066_v28 = vld [vmem:[%s14771_s27 + $0xab8] sm:$0xff] }
 0x703   : > { %v6888_v25 = vmul.f32 %v9397_v0, %v5547_v44  ;;  %10781 = vmatprep.mubr.msk.f32.mxu1 %vm948_vm1, %v3059_v61 }
 0x704   : > { %v7592_v48 = vsel %vm1716_vm2, %v6889_v23, 0.0 }
 0x705   : > { %v7593_v13 = vadd.f32 %v7592_v48, %v7591_v4  ;;  %v7495_v36 = vsel %vm1716_vm2, %v6888_v25, 0.0  ;;  %v10624_v59 = vpop.f32.mrb[106].mxu1 }
 0x706   : > { %v7496_v9 = vadd.f32 %v7495_v36, %v7494_v39  ;;  %v6891_v45 = vmul.f32 %v10624_v59, %v9397_v0  ;;  %v5557_v8 = vpop.f32.mrb[107].mxu1  ;;  %10782 = vmatmul.mubr.msk.f32.gmra.mrb[212].mxu1 %vm948_vm1, %v3060_v53  ;;  %v3063_v39 = vld [vmem:[%s14771_s27 + $0xaa0] sm:$0xff]  ;;  %v3068_v36 = vld [vmem:[%s14771_s27 + $0xac8] sm:$0xff] }
 0x707   : > { %v6890_v40 = vmul.f32 %v9397_v0, %v5557_v8  ;;  %10784 = vmatprep.mubr.msk.f32.mxu1 %vm948_vm1, %v3061_v17 }
 0x708   : > { %v7786_v4 = vsel %vm1716_vm2, %v6891_v45, 0.0 }
 0x709   : > { %v7787_v63 = vadd.f32 %v7786_v4, %v7785_v34  ;;  %v7689_v3 = vsel %vm1716_vm2, %v6890_v40, 0.0  ;;  %v10627_v0 = vpop.f32.mrb[108].mxu1  ;;  %v3065_v34 = vld [vmem:[%s14771_s27 + $0xab0] sm:$0xff] }
 0x70a   : > { %v7690_v18 = vadd.f32 %v7689_v3, %v7688_v24  ;;  %v6893_v10 = vmul.f32 %v10627_v0, %v9398_v32  ;;  %v5567_v12 = vpop.f32.mrb[109].mxu1  ;;  %10785 = vmatmul.mubr.msk.f32.gmra.mrb[214].mxu1 %vm948_vm1, %v3062_v2  ;;  %v9399_v3 = vld [vmem:[%s14772_s7 + $0x1e] ss:$0 sm:$0xff] }
 0x70b   : > { %v6892_v54 = vmul.f32 %v9398_v32, %v5567_v12  ;;  %10787 = vmatprep.mubr.msk.f32.mxu1 %vm948_vm1, %v3063_v39  ;;  %v3070_v0 = vld [vmem:[%s14771_s27 + $0xad8] sm:$0xff] }
 0x70c   : > { %v7206_v14 = vsel %vm1716_vm2, %v6893_v10, 0.0 }
 0x70d   : > { %v7207_v50 = vadd.f32 %v7206_v14, %v7205_v33  ;;  %v7109_v24 = vsel %vm1716_vm2, %v6892_v54, 0.0  ;;  %v10630_v1 = vpop.f32.mrb[110].mxu1  ;;  %v3067_v33 = vld [vmem:[%s14771_s27 + $0xac0] sm:$0xff] }
 0x70e   : > { %v7110_v11 = vadd.f32 %v7109_v24, %v7108_v5  ;;  %v6895_v46 = vmul.f32 %v10630_v1, %v9398_v32  ;;  %v5577_v15 = vpop.f32.mrb[111].mxu1  ;;  %10788 = vmatmul.mubr.msk.f32.gmra.mrb[216].mxu1 %vm948_vm1, %v3064_v41  ;;  %v3072_v24 = vld [vmem:[%s14771_s27 + $0xae8] sm:$0xff] }
 0x70f   : > { %v6894_v61 = vmul.f32 %v9398_v32, %v5577_v15  ;;  %10790 = vmatprep.mubr.msk.f32.mxu1 %vm948_vm1, %v3065_v34 }
 0x710   : > { %v7400_v42 = vsel %vm1716_vm2, %v6895_v46, 0.0 }
 0x711   : > { %v7401_v23 = vadd.f32 %v7400_v42, %v7399_v52  ;;  %v7303_v5 = vsel %vm1716_vm2, %v6894_v61, 0.0  ;;  %v10633_v44 = vpop.f32.mrb[112].mxu1  ;;  %v3069_v52 = vld [vmem:[%s14771_s27 + $0xad0] sm:$0xff] }
 0x712   : > { %v7304_v25 = vadd.f32 %v7303_v5, %v7302_v55  ;;  %v6897_v53 = vmul.f32 %v10633_v44, %v9398_v32  ;;  %v5587_v48 = vpop.f32.mrb[113].mxu1  ;;  %10791 = vmatmul.mubr.msk.f32.gmra.mrb[218].mxu1 %vm948_vm1, %v3066_v28  ;;  %v3074_v5 = vld [vmem:[%s14771_s27 + $0xaf8] sm:$0xff] }
 0x713   : > { %v6896_v17 = vmul.f32 %v9398_v32, %v5587_v48  ;;  %10793 = vmatprep.mubr.msk.f32.mxu1 %vm948_vm1, %v3067_v33 }
 0x714   : > { %v7594_v59 = vsel %vm1716_vm2, %v6897_v53, 0.0 }
 0x715   : > { %v7595_v45 = vadd.f32 %v7594_v59, %v7593_v13  ;;  %v7497_v55 = vsel %vm1716_vm2, %v6896_v17, 0.0  ;;  %v10636_v8 = vpop.f32.mrb[114].mxu1 }
 0x716   : > { %v7498_v40 = vadd.f32 %v7497_v55, %v7496_v9  ;;  %v6899_v2 = vmul.f32 %v10636_v8, %v9398_v32  ;;  %v5597_v4 = vpop.f32.mrb[115].mxu1  ;;  %10794 = vmatmul.mubr.msk.f32.gmra.mrb[220].mxu1 %vm948_vm1, %v3068_v36  ;;  %v3071_v9 = vld [vmem:[%s14771_s27 + $0xae0] sm:$0xff]  ;;  %v3076_v55 = vld [vmem:[%s14771_s27 + $0xb08] sm:$0xff] }
 0x717   : > { %v6898_v39 = vmul.f32 %v9398_v32, %v5597_v4  ;;  %10796 = vmatprep.mubr.msk.f32.mxu1 %vm948_vm1, %v3069_v52 }
 0x718   : > { %v7788_v13 = vsel %vm1716_vm2, %v6899_v2, 0.0 }
 0x719   : > { %v7789_v10 = vadd.f32 %v7788_v13, %v7787_v63  ;;  %v7691_v12 = vsel %vm1716_vm2, %v6898_v39, 0.0  ;;  %v10639_v32 = vpop.f32.mrb[116].mxu1  ;;  %v3073_v63 = vld [vmem:[%s14771_s27 + $0xaf0] sm:$0xff] }
 0x71a   : > { %v7692_v54 = vadd.f32 %v7691_v12, %v7690_v18  ;;  %v6901_v41 = vmul.f32 %v10639_v32, %v9399_v3  ;;  %v5607_v14 = vpop.f32.mrb[117].mxu1  ;;  %10797 = vmatmul.mubr.msk.f32.gmra.mrb[222].mxu1 %vm948_vm1, %v3070_v0  ;;  %v9400_v12 = vld [vmem:[%s14772_s7 + $0x1f] ss:$0 sm:$0xff] }
 0x71b   : > { %v6900_v34 = vmul.f32 %v9399_v3, %v5607_v14  ;;  %10799 = vmatprep.mubr.msk.f32.mxu1 %vm948_vm1, %v3071_v9 }
 0x71c   : > { %v7208_v1 = vsel %vm1716_vm2, %v6901_v41, 0.0 }
 0x71d   : > { %v7209_v46 = vadd.f32 %v7208_v1, %v7207_v50  ;;  %v7111_v18 = vsel %vm1716_vm2, %v6900_v34, 0.0  ;;  %v10642_v15 = vpop.f32.mrb[118].mxu1  ;;  %v3075_v50 = vld [vmem:[%s14771_s27 + $0xb00] sm:$0xff] }
 0x71e   : > { %v7112_v61 = vadd.f32 %v7111_v18, %v7110_v11  ;;  %v6903_v28 = vmul.f32 %v10642_v15, %v9399_v3  ;;  %v5617_v42 = vpop.f32.mrb[119].mxu1  ;;  %10800 = vmatmul.mubr.msk.f32.gmra.mrb[224].mxu1 %vm948_vm1, %v3072_v24  ;;  %v7869_v18 = vld [vmem:[%s11415_s29 + $0x18] sm:$0xff] }
 0x71f   : > { %v6902_v33 = vmul.f32 %v9399_v3, %v5617_v42  ;;  %10802 = vmatprep.mubr.msk.f32.mxu1 %vm948_vm1, %v3073_v63  ;;  %v7868_v63 = vld [vmem:[%s11415_s29 + $0x10] sm:$0xff] }
 0x720   : > { %v7402_v44 = vsel %vm1716_vm2, %v6903_v28, 0.0  ;;  %v3080_v28 = vld [vmem:[%s14771_s27 + $0xb28] sm:$0xff]  ;;  %v11033_v42 = vpack.c.bf16 %v7869_v18, %v7868_v63  ;;  %v3086_v63 = vld [vmem:[%s14771_s27 + $0xb58] sm:$0xff] }
 0x721   : > { %v7403_v53 = vadd.f32 %v7402_v44, %v7401_v23  ;;  %v7305_v11 = vsel %vm1716_vm2, %v6902_v33, 0.0  ;;  %v10645_v48 = vpop.f32.mrb[120].mxu1  ;;  %v3077_v23 = vld [vmem:[%s14771_s27 + $0xb10] sm:$0xff] }
 0x722   : > { %v7306_v17 = vadd.f32 %v7305_v11, %v7304_v25  ;;  %v6905_v36 = vmul.f32 %v10645_v48, %v9399_v3  ;;  %v5627_v59 = vpop.f32.mrb[121].mxu1  ;;  %10803 = vmatmul.mubr.msk.f32.gmra.mrb[226].mxu1 %vm948_vm1, %v3074_v5  ;;  %11034 = vmatprep.subr.bf16.mxu0 %v11033_v42 }
 0x723   : > { %v6904_v52 = vmul.f32 %v9399_v3, %v5627_v59  ;;  %10805 = vmatprep.mubr.msk.f32.mxu1 %vm948_vm1, %v3075_v50  ;;  %11036 = vmatpush3.bf16.msra.mxu0 %v11033_v42  ;;  %v3082_v59 = vld [vmem:[%s14771_s27 + $0xb38] sm:$0xff] }
 0x724   : > { %v7596_v8 = vsel %vm1716_vm2, %v6905_v36, 0.0 }
 0x725   : > { %v7597_v2 = vadd.f32 %v7596_v8, %v7595_v45  ;;  %v7499_v25 = vsel %vm1716_vm2, %v6904_v52, 0.0  ;;  %v10648_v4 = vpop.f32.mrb[122].mxu1  ;;  %v3078_v45 = vld [vmem:[%s14771_s27 + $0xb18] sm:$0xff] }
 0x726   : > { %v7500_v39 = vadd.f32 %v7499_v25, %v7498_v40  ;;  %v6907_v0 = vmul.f32 %v10648_v4, %v9399_v3  ;;  %v5637_v13 = vpop.f32.mrb[123].mxu1  ;;  %10806 = vmatmul.mubr.msk.f32.gmra.mrb[228].mxu1 %vm948_vm1, %v3076_v55  ;;  %v3079_v40 = vld [vmem:[%s14771_s27 + $0xb20] sm:$0xff] }
 0x727   : > { %v6906_v9 = vmul.f32 %v9399_v3, %v5637_v13  ;;  %10808 = vmatprep.mubr.msk.f32.mxu1 %vm948_vm1, %v3077_v23  ;;  %v3084_v13 = vld [vmem:[%s14771_s27 + $0xb48] sm:$0xff] }
 0x728   : > { %v7790_v32 = vsel %vm1716_vm2, %v6907_v0, 0.0 }
 0x729   : > { %v7791_v41 = vadd.f32 %v7790_v32, %v7789_v10  ;;  %v7693_v14 = vsel %vm1716_vm2, %v6906_v9, 0.0  ;;  %v10651_v3 = vpop.f32.mrb[124].mxu1 }
 0x72a   : > { %v7694_v34 = vadd.f32 %v7693_v14, %v7692_v54  ;;  %v6909_v24 = vmul.f32 %v10651_v3, %v9400_v12  ;;  %v5647_v1 = vpop.f32.mrb[125].mxu1  ;;  %10809 = vmatmul.mubr.msk.f32.gmra.mrb[230].mxu1 %vm948_vm1, %v3078_v45  ;;  %v3081_v54 = vld [vmem:[%s14771_s27 + $0xb30] sm:$0xff] }
 0x72b   : > { %v6908_v15 = vmul.f32 %v9400_v12, %v5647_v1  ;;  %10811 = vmatprep.mubr.msk.f32.mxu1 %vm948_vm1, %v3079_v40  ;;  %v9401_v1 = vld [vmem:[%s14772_s7 + $0x20] ss:$0 sm:$0xff] }
 0x72c   : > { %v7210_v10 = vsel %vm1716_vm2, %v6909_v24, 0.0 }
 0x72d   : > { %v7211_v33 = vadd.f32 %v7210_v10, %v7209_v46  ;;  %v7113_v5 = vsel %vm1716_vm2, %v6908_v15, 0.0  ;;  %v10654_v44 = vpop.f32.mrb[126].mxu1  ;;  %v3083_v46 = vld [vmem:[%s14771_s27 + $0xb40] sm:$0xff] }
 0x72e   : > { %v7114_v50 = vadd.f32 %v7113_v5, %v7112_v61  ;;  %v6911_v11 = vmul.f32 %v10654_v44, %v9400_v12  ;;  %v5657_v48 = vpop.f32.mrb[127].mxu1  ;;  %10812 = vmatmul.mubr.msk.f32.gmra.mrb[232].mxu1 %vm948_vm1, %v3080_v28  ;;  %v3088_v5 = vld [vmem:[%s14771_s27 + $0xb68] sm:$0xff] }
 0x72f   : > { %v6910_v36 = vmul.f32 %v9400_v12, %v5657_v48  ;;  %10814 = vmatprep.mubr.msk.f32.mxu1 %vm948_vm1, %v3081_v54 }
 0x730   : > { %v7404_v52 = vsel %vm1716_vm2, %v6911_v11, 0.0 }
 0x731   : > { %v7405_v55 = vadd.f32 %v7404_v52, %v7403_v53  ;;  %v7307_v61 = vsel %vm1716_vm2, %v6910_v36, 0.0  ;;  %v10657_v8 = vpop.f32.mrb[128].mxu1  ;;  %v3085_v53 = vld [vmem:[%s14771_s27 + $0xb50] sm:$0xff] }
 0x732   : > { %v7308_v23 = vadd.f32 %v7307_v61, %v7306_v17  ;;  %v6913_v25 = vmul.f32 %v10657_v8, %v9400_v12  ;;  %v5667_v4 = vpop.f32.mrb[129].mxu1  ;;  %10815 = vmatmul.mubr.msk.f32.gmra.mrb[234].mxu1 %vm948_vm1, %v3082_v59  ;;  %v3090_v61 = vld [vmem:[%s14771_s27 + $0xb78] sm:$0xff] }
 0x733   : > { %v6912_v0 = vmul.f32 %v9400_v12, %v5667_v4  ;;  %10817 = vmatprep.mubr.msk.f32.mxu1 %vm948_vm1, %v3083_v46 }
 0x734   : > { %v7598_v9 = vsel %vm1716_vm2, %v6913_v25, 0.0 }
 0x735   : > { %v7599_v45 = vadd.f32 %v7598_v9, %v7597_v2  ;;  %v7501_v17 = vsel %vm1716_vm2, %v6912_v0, 0.0  ;;  %v10660_v32 = vpop.f32.mrb[130].mxu1 }
 0x736   : > { %v7502_v40 = vadd.f32 %v7501_v17, %v7500_v39  ;;  %v6915_v14 = vmul.f32 %v10660_v32, %v9400_v12  ;;  %v5677_v3 = vpop.f32.mrb[131].mxu1  ;;  %10818 = vmatmul.mubr.msk.f32.gmra.mrb[236].mxu1 %vm948_vm1, %v3084_v13  ;;  %v3087_v39 = vld [vmem:[%s14771_s27 + $0xb60] sm:$0xff]  ;;  %v3092_v17 = vld [vmem:[%s14771_s27 + $0xb88] sm:$0xff] }
 0x737   : > { %v6914_v24 = vmul.f32 %v9400_v12, %v5677_v3  ;;  %10820 = vmatprep.mubr.msk.f32.mxu1 %vm948_vm1, %v3085_v53 }
 0x738   : > { %v7792_v2 = vsel %vm1716_vm2, %v6915_v14, 0.0 }
 0x739   : > { %v7793_v18 = vadd.f32 %v7792_v2, %v7791_v41  ;;  %v7695_v15 = vsel %vm1716_vm2, %v6914_v24, 0.0  ;;  %v10663_v12 = vpop.f32.mrb[132].mxu1  ;;  %v3089_v41 = vld [vmem:[%s14771_s27 + $0xb70] sm:$0xff] }
 0x73a   : > { %v7696_v28 = vadd.f32 %v7695_v15, %v7694_v34  ;;  %v6917_v42 = vmul.f32 %v10663_v12, %v9401_v1  ;;  %v5687_v10 = vpop.f32.mrb[133].mxu1  ;;  %10821 = vmatmul.mubr.msk.f32.gmra.mrb[238].mxu1 %vm948_vm1, %v3086_v63  ;;  %v9402_v15 = vld [vmem:[%s14772_s7 + $0x21] ss:$0 sm:$0xff]  ;;  %v3094_v12 = vld [vmem:[%s14771_s27 + $0xb98] sm:$0xff] }
 0x73b   : > { %v6916_v54 = vmul.f32 %v9401_v1, %v5687_v10  ;;  %10823 = vmatprep.mubr.msk.f32.mxu1 %vm948_vm1, %v3087_v39 }
 0x73c   : > { %v7212_v44 = vsel %vm1716_vm2, %v6917_v42, 0.0 }
 0x73d   : > { %v7213_v11 = vadd.f32 %v7212_v44, %v7211_v33  ;;  %v7115_v34 = vsel %vm1716_vm2, %v6916_v54, 0.0  ;;  %v10666_v48 = vpop.f32.mrb[134].mxu1  ;;  %v3091_v33 = vld [vmem:[%s14771_s27 + $0xb80] sm:$0xff] }
 0x73e   : > { %v7116_v36 = vadd.f32 %v7115_v34, %v7114_v50  ;;  %v6919_v59 = vmul.f32 %v10666_v48, %v9401_v1  ;;  %v5697_v52 = vpop.f32.mrb[135].mxu1  ;;  %10824 = vmatmul.mubr.msk.f32.gmra.mrb[240].mxu1 %vm948_vm1, %v3088_v5  ;;  %v3096_v34 = vld [vmem:[%s14771_s27 + $0xba8] sm:$0xff] }
 0x73f   : > { %v6918_v46 = vmul.f32 %v9401_v1, %v5697_v52  ;;  %10826 = vmatprep.mubr.msk.f32.mxu1 %vm948_vm1, %v3089_v41 }
 0x740   : > { %v7406_v8 = vsel %vm1716_vm2, %v6919_v59, 0.0 }
 0x741   : > { %v7407_v25 = vadd.f32 %v7406_v8, %v7405_v55  ;;  %v7309_v50 = vsel %vm1716_vm2, %v6918_v46, 0.0  ;;  %v10669_v4 = vpop.f32.mrb[136].mxu1  ;;  %v3093_v55 = vld [vmem:[%s14771_s27 + $0xb90] sm:$0xff] }
 0x742   : > { %v7310_v0 = vadd.f32 %v7309_v50, %v7308_v23  ;;  %v6921_v13 = vmul.f32 %v10669_v4, %v9401_v1  ;;  %v5707_v9 = vpop.f32.mrb[137].mxu1  ;;  %10827 = vmatmul.mubr.msk.f32.gmra.mrb[242].mxu1 %vm948_vm1, %v3090_v61  ;;  %v3098_v50 = vld [vmem:[%s14771_s27 + $0xbb8] sm:$0xff] }
 0x743   : > { %v6920_v53 = vmul.f32 %v9401_v1, %v5707_v9  ;;  %10829 = vmatprep.mubr.msk.f32.mxu1 %vm948_vm1, %v3091_v33 }
 0x744   : > { %v7600_v32 = vsel %vm1716_vm2, %v6921_v13, 0.0 }
 0x745   : > { %v7601_v14 = vadd.f32 %v7600_v32, %v7599_v45  ;;  %v7503_v23 = vsel %vm1716_vm2, %v6920_v53, 0.0  ;;  %v10672_v3 = vpop.f32.mrb[138].mxu1 }
 0x746   : > { %v7504_v24 = vadd.f32 %v7503_v23, %v7502_v40  ;;  %v6923_v63 = vmul.f32 %v10672_v3, %v9401_v1  ;;  %v5717_v2 = vpop.f32.mrb[139].mxu1  ;;  %10830 = vmatmul.mubr.msk.f32.gmra.mrb[244].mxu1 %vm948_vm1, %v3092_v17  ;;  %v3095_v40 = vld [vmem:[%s14771_s27 + $0xba0] sm:$0xff]  ;;  %v3100_v23 = vld [vmem:[%s14771_s27 + $0xbc8] sm:$0xff] }
 0x747   : > { %v6922_v39 = vmul.f32 %v9401_v1, %v5717_v2  ;;  %10832 = vmatprep.mubr.msk.f32.mxu1 %vm948_vm1, %v3093_v55 }
 0x748   : > { %v7794_v45 = vsel %vm1716_vm2, %v6923_v63, 0.0 }
 0x749   : > { %v7795_v42 = vadd.f32 %v7794_v45, %v7793_v18  ;;  %v7697_v10 = vsel %vm1716_vm2, %v6922_v39, 0.0  ;;  %v10675_v1 = vpop.f32.mrb[140].mxu1  ;;  %v3097_v18 = vld [vmem:[%s14771_s27 + $0xbb0] sm:$0xff] }
 0x74a   : > { %v7698_v54 = vadd.f32 %v7697_v10, %v7696_v28  ;;  %v6925_v5 = vmul.f32 %v10675_v1, %v9402_v15  ;;  %v5727_v44 = vpop.f32.mrb[141].mxu1  ;;  %10833 = vmatmul.mubr.msk.f32.gmra.mrb[246].mxu1 %vm948_vm1, %v3094_v12  ;;  %v9403_v10 = vld [vmem:[%s14772_s7 + $0x22] ss:$0 sm:$0xff]  ;;  %v3102_v1 = vld [vmem:[%s14771_s27 + $0xbd8] sm:$0xff] }
 0x74b   : > { %v6924_v41 = vmul.f32 %v9402_v15, %v5727_v44  ;;  %10835 = vmatprep.mubr.msk.f32.mxu1 %vm948_vm1, %v3095_v40 }
 0x74c   : > { %v7214_v48 = vsel %vm1716_vm2, %v6925_v5, 0.0 }
 0x74d   : > { %v7215_v59 = vadd.f32 %v7214_v48, %v7213_v11  ;;  %v7117_v28 = vsel %vm1716_vm2, %v6924_v41, 0.0  ;;  %v10678_v52 = vpop.f32.mrb[142].mxu1  ;;  %v3099_v11 = vld [vmem:[%s14771_s27 + $0xbc0] sm:$0xff] }
 0x74e   : > { %v7118_v46 = vadd.f32 %v7117_v28, %v7116_v36  ;;  %v6927_v61 = vmul.f32 %v10678_v52, %v9402_v15  ;;  %v5737_v8 = vpop.f32.mrb[143].mxu1  ;;  %10836 = vmatmul.mubr.msk.f32.gmra.mrb[248].mxu1 %vm948_vm1, %v3096_v34  ;;  %v3104_v28 = vld [vmem:[%s14771_s27 + $0xbe8] sm:$0xff] }
 0x74f   : > { %v6926_v33 = vmul.f32 %v9402_v15, %v5737_v8  ;;  %10838 = vmatprep.mubr.msk.f32.mxu1 %vm948_vm1, %v3097_v18 }
 0x750   : > { %v7408_v4 = vsel %vm1716_vm2, %v6927_v61, 0.0 }
 0x751   : > { %v7409_v13 = vadd.f32 %v7408_v4, %v7407_v25  ;;  %v7311_v36 = vsel %vm1716_vm2, %v6926_v33, 0.0  ;;  %v10681_v9 = vpop.f32.mrb[144].mxu1  ;;  %v3101_v25 = vld [vmem:[%s14771_s27 + $0xbd0] sm:$0xff] }
 0x752   : > { %v7312_v53 = vadd.f32 %v7311_v36, %v7310_v0  ;;  %v6929_v17 = vmul.f32 %v10681_v9, %v9402_v15  ;;  %v5747_v32 = vpop.f32.mrb[145].mxu1  ;;  %10839 = vmatmul.mubr.msk.f32.gmra.mrb[250].mxu1 %vm948_vm1, %v3098_v50  ;;  %v3106_v36 = vld [vmem:[%s14771_s27 + $0xbf8] sm:$0xff] }
 0x753   : > { %v6928_v55 = vmul.f32 %v9402_v15, %v5747_v32  ;;  %10841 = vmatprep.mubr.msk.f32.mxu1 %vm948_vm1, %v3099_v11 }
 0x754   : > { %v7602_v3 = vsel %vm1716_vm2, %v6929_v17, 0.0 }
 0x755   : > { %v7603_v63 = vadd.f32 %v7602_v3, %v7601_v14  ;;  %v7505_v0 = vsel %vm1716_vm2, %v6928_v55, 0.0  ;;  %v10684_v2 = vpop.f32.mrb[146].mxu1 }
 0x756   : > { %v7506_v39 = vadd.f32 %v7505_v0, %v7504_v24  ;;  %v6931_v12 = vmul.f32 %v10684_v2, %v9402_v15  ;;  %v5757_v45 = vpop.f32.mrb[147].mxu1  ;;  %10842 = vmatmul.mubr.msk.f32.gmra.mrb[252].mxu1 %vm948_vm1, %v3100_v23  ;;  %v3103_v24 = vld [vmem:[%s14771_s27 + $0xbe0] sm:$0xff]  ;;  %v3108_v0 = vld [vmem:[%s14771_s27 + $0xc08] sm:$0xff] }
 0x757   : > { %v6930_v40 = vmul.f32 %v9402_v15, %v5757_v45  ;;  %10844 = vmatprep.mubr.msk.f32.mxu1 %vm948_vm1, %v3101_v25 }
 0x758   : > { %v7796_v14 = vsel %vm1716_vm2, %v6931_v12, 0.0 }
 0x759   : > { %v7797_v5 = vadd.f32 %v7796_v14, %v7795_v42  ;;  %v7699_v44 = vsel %vm1716_vm2, %v6930_v40, 0.0  ;;  %v10687_v15 = vpop.f32.mrb[148].mxu1  ;;  %v3105_v42 = vld [vmem:[%s14771_s27 + $0xbf0] sm:$0xff] }
 0x75a   : > { %v7700_v41 = vadd.f32 %v7699_v44, %v7698_v54  ;;  %v6933_v34 = vmul.f32 %v10687_v15, %v9403_v10  ;;  %v5767_v48 = vpop.f32.mrb[149].mxu1  ;;  %10845 = vmatmul.mubr.msk.f32.gmra.mrb[254].mxu1 %vm948_vm1, %v3102_v1  ;;  %v9404_v44 = vld [vmem:[%s14772_s7 + $0x23] ss:$0 sm:$0xff]  ;;  %v3110_v15 = vld [vmem:[%s14771_s27 + $0xc18] sm:$0xff] }
 0x75b   : > { %v6932_v18 = vmul.f32 %v9403_v10, %v5767_v48  ;;  %10847 = vmatprep.mubr.msk.f32.mxu1 %vm948_vm1, %v3103_v24 }
 0x75c   : > { %v7216_v52 = vsel %vm1716_vm2, %v6933_v34, 0.0 }
 0x75d   : > { %v7217_v61 = vadd.f32 %v7216_v52, %v7215_v59  ;;  %v7119_v54 = vsel %vm1716_vm2, %v6932_v18, 0.0  ;;  %v10690_v8 = vpop.f32.mrb[150].mxu1  ;;  %v3107_v59 = vld [vmem:[%s14771_s27 + $0xc00] sm:$0xff] }
 0x75e   : > { %v7120_v33 = vadd.f32 %v7119_v54, %v7118_v46  ;;  %v6935_v50 = vmul.f32 %v10690_v8, %v9403_v10  ;;  %v5777_v4 = vpop.f32.mrb[151].mxu1  ;;  %10848 = vmatmul.mubr.msk.f32.gmra.mrb[0].mxu1 %vm948_vm1, %v3104_v28  ;;  %v3112_v54 = vld [vmem:[%s14771_s27 + $0xc28] sm:$0xff] }
 0x75f   : > { %v6934_v11 = vmul.f32 %v9403_v10, %v5777_v4  ;;  %10850 = vmatprep.mubr.msk.f32.mxu1 %vm948_vm1, %v3105_v42 }
 0x760   : > { %v7410_v9 = vsel %vm1716_vm2, %v6935_v50, 0.0 }
 0x761   : > { %v7411_v17 = vadd.f32 %v7410_v9, %v7409_v13  ;;  %v7313_v46 = vsel %vm1716_vm2, %v6934_v11, 0.0  ;;  %v10693_v32 = vpop.f32.mrb[152].mxu1  ;;  %v3109_v13 = vld [vmem:[%s14771_s27 + $0xc10] sm:$0xff] }
 0x762   : > { %v7314_v55 = vadd.f32 %v7313_v46, %v7312_v53  ;;  %v6937_v23 = vmul.f32 %v10693_v32, %v9403_v10  ;;  %v5787_v3 = vpop.f32.mrb[153].mxu1  ;;  %10851 = vmatmul.mubr.msk.f32.gmra.mrb[2].mxu1 %vm948_vm1, %v3106_v36  ;;  %v3114_v46 = vld [vmem:[%s14771_s27 + $0xc38] sm:$0xff] }
 0x763   : > { %v6936_v25 = vmul.f32 %v9403_v10, %v5787_v3  ;;  %10853 = vmatprep.mubr.msk.f32.mxu1 %vm948_vm1, %v3107_v59 }
 0x764   : > { %v7604_v2 = vsel %vm1716_vm2, %v6937_v23, 0.0 }
 0x765   : > { %v7605_v12 = vadd.f32 %v7604_v2, %v7603_v63  ;;  %v7507_v53 = vsel %vm1716_vm2, %v6936_v25, 0.0  ;;  %v10696_v45 = vpop.f32.mrb[154].mxu1 }
 0x766   : > { %v7508_v40 = vadd.f32 %v7507_v53, %v7506_v39  ;;  %v6939_v1 = vmul.f32 %v10696_v45, %v9403_v10  ;;  %v5797_v14 = vpop.f32.mrb[155].mxu1  ;;  %10854 = vmatmul.mubr.msk.f32.gmra.mrb[4].mxu1 %vm948_vm1, %v3108_v0  ;;  %v3111_v39 = vld [vmem:[%s14771_s27 + $0xc20] sm:$0xff] }
 0x767   : > { %v6938_v24 = vmul.f32 %v9403_v10, %v5797_v14  ;;  %10856 = vmatprep.mubr.msk.f32.mxu1 %vm948_vm1, %v3109_v13 }
 0x768   : > { %v7798_v63 = vsel %vm1716_vm2, %v6939_v1, 0.0 }
 0x769   : > { %v7799_v34 = vadd.f32 %v7798_v63, %v7797_v5  ;;  %v7701_v48 = vsel %vm1716_vm2, %v6938_v24, 0.0  ;;  %v10699_v10 = vpop.f32.mrb[156].mxu1  ;;  %v3113_v5 = vld [vmem:[%s14771_s27 + $0xc30] sm:$0xff] }
 0x76a   : > { %v7702_v18 = vadd.f32 %v7701_v48, %v7700_v41  ;;  %v6941_v28 = vmul.f32 %v10699_v10, %v9404_v44  ;;  %v5807_v52 = vpop.f32.mrb[157].mxu1  ;;  %10857 = vmatmul.mubr.msk.f32.gmra.mrb[6].mxu1 %vm948_vm1, %v3110_v15 }
 0x76b   : > { %v6940_v42 = vmul.f32 %v9404_v44, %v5807_v52  ;;  %10859 = vmatprep.mubr.msk.f32.mxu1 %vm948_vm1, %v3111_v39 }
 0x76c   : > { %v7218_v8 = vsel %vm1716_vm2, %v6941_v28, 0.0 }
 0x76d   : > { %v7219_v50 = vadd.f32 %v7218_v8, %v7217_v61  ;;  %v7121_v41 = vsel %vm1716_vm2, %v6940_v42, 0.0  ;;  %v10702_v4 = vpop.f32.mrb[158].mxu1 }
 0x76e   : > { %v7122_v11 = vadd.f32 %v7121_v41, %v7120_v33  ;;  %v6943_v36 = vmul.f32 %v10702_v4, %v9404_v44  ;;  %v5817_v9 = vpop.f32.mrb[159].mxu1  ;;  %10860 = vmatmul.mubr.msk.f32.gmra.mrb[8].mxu1 %vm948_vm1, %v3112_v54 }
 0x76f   : > { %v6942_v59 = vmul.f32 %v9404_v44, %v5817_v9  ;;  %10862 = vmatprep.mubr.msk.f32.mxu1 %vm948_vm1, %v3113_v5 }
 0x770   : > { %v7412_v32 = vsel %vm1716_vm2, %v6943_v36, 0.0 }
 0x771   : > { %v7413_v23 = vadd.f32 %v7412_v32, %v7411_v17  ;;  %v7315_v61 = vsel %vm1716_vm2, %v6942_v59, 0.0  ;;  %v10705_v3 = vpop.f32.mrb[160].mxu1  ;;  %v9405_v17 = vld [vmem:[%s14772_s7 + $0x24] ss:$0 sm:$0xff] }
 0x772   : > { %v7316_v25 = vadd.f32 %v7315_v61, %v7314_v55  ;;  %v6945_v0 = vmul.f32 %v10705_v3, %v9404_v44  ;;  %v5827_v33 = vpop.f32.mrb[161].mxu1  ;;  %10863 = vmatmul.mubr.msk.f32.gmra.mrb[10].mxu1 %vm948_vm1, %v3114_v46 }
 0x773   : > { %v6944_v2 = vmul.f32 %v9404_v44, %v5827_v33 }
 0x774   : > { %v7606_v13 = vsel %vm1716_vm2, %v6945_v0, 0.0 }
 0x775   : > { %v7607_v53 = vadd.f32 %v7606_v13, %v7605_v12  ;;  %v7509_v45 = vsel %vm1716_vm2, %v6944_v2, 0.0  ;;  %v10708_v1 = vpop.f32.mrb[162].mxu1 }
 0x776   : > { %v7510_v14 = vadd.f32 %v7509_v45, %v7508_v40  ;;  %v6947_v24 = vmul.f32 %v10708_v1, %v9404_v44  ;;  %v5837_v15 = vpop.f32.mrb[163].mxu1 }
 0x777   : > { %v6946_v63 = vmul.f32 %v9404_v44, %v5837_v15 }
 0x778   : > { %v7800_v55 = vsel %vm1716_vm2, %v6947_v24, 0.0 }
 0x779   : > { %v7801_v39 = vadd.f32 %v7800_v55, %v7799_v34  ;;  %v7703_v48 = vsel %vm1716_vm2, %v6946_v63, 0.0  ;;  %v10711_v10 = vpop.f32.mrb[164].mxu1 }
 0x77a   : > { %v7704_v28 = vadd.f32 %v7703_v48, %v7702_v18  ;;  %v6949_v52 = vmul.f32 %v10711_v10, %v9405_v17  ;;  %v5847_v12 = vpop.f32.mrb[165].mxu1 }
 0x77b   : > { %v6948_v42 = vmul.f32 %v9405_v17, %v5847_v12 }
 0x77c   : > { %v7220_v54 = vsel %vm1716_vm2, %v6949_v52, 0.0 }
 0x77d   : > { %v7221_v40 = vadd.f32 %v7220_v54, %v7219_v50  ;;  %v7123_v8 = vsel %vm1716_vm2, %v6948_v42, 0.0  ;;  %v10714_v44 = vpop.f32.mrb[166].mxu1 }
 0x77e   : > { %v7124_v5 = vadd.f32 %v7123_v8, %v7122_v11  ;;  %v6951_v41 = vmul.f32 %v10714_v44, %v9405_v17  ;;  %v5857_v4 = vpop.f32.mrb[167].mxu1 }
 0x77f   : > { %v6950_v36 = vmul.f32 %v9405_v17, %v5857_v4 }
 0x780   : > { %v7414_v9 = vsel %vm1716_vm2, %v6951_v41, 0.0 }
 0x781   : > { %v7415_v34 = vadd.f32 %v7414_v9, %v7413_v23  ;;  %v7317_v59 = vsel %vm1716_vm2, %v6950_v36, 0.0  ;;  %v10717_v46 = vpop.f32.mrb[168].mxu1  ;;  %v9406_v23 = vld [vmem:[%s14772_s7 + $0x25] ss:$0 sm:$0xff] }
 0x782   : > { %v7318_v18 = vadd.f32 %v7317_v59, %v7316_v25  ;;  %v6953_v32 = vmul.f32 %v10717_v46, %v9405_v17  ;;  %v5867_v61 = vpop.f32.mrb[169].mxu1 }
 0x783   : > { %v6952_v3 = vmul.f32 %v9405_v17, %v5867_v61 }
 0x784   : > { %v7608_v0 = vsel %vm1716_vm2, %v6953_v32, 0.0 }
 0x785   : > { %v7609_v50 = vadd.f32 %v7608_v0, %v7607_v53  ;;  %v7511_v33 = vsel %vm1716_vm2, %v6952_v3, 0.0  ;;  %v10720_v2 = vpop.f32.mrb[170].mxu1 }
 0x786   : > { %v7512_v11 = vadd.f32 %v7511_v33, %v7510_v14  ;;  %v6955_v13 = vmul.f32 %v10720_v2, %v9405_v17  ;;  %v5877_v45 = vpop.f32.mrb[171].mxu1 }
 0x787   : > { %v6954_v1 = vmul.f32 %v9405_v17, %v5877_v45 }
 0x788   : > { %v7802_v24 = vsel %vm1716_vm2, %v6955_v13, 0.0 }
 0x789   : > { %v7803_v25 = vadd.f32 %v7802_v24, %v7801_v39  ;;  %v7705_v15 = vsel %vm1716_vm2, %v6954_v1, 0.0  ;;  %v10723_v63 = vpop.f32.mrb[172].mxu1 }
 0x78a   : > { %v7706_v55 = vadd.f32 %v7705_v15, %v7704_v28  ;;  %v6957_v48 = vmul.f32 %v10723_v63, %v9406_v23  ;;  %v5887_v53 = vpop.f32.mrb[173].mxu1 }
 0x78b   : > { %v6956_v10 = vmul.f32 %v9406_v23, %v5887_v53 }
 0x78c   : > { %v7222_v52 = vsel %vm1716_vm2, %v6957_v48, 0.0 }
 0x78d   : > { %v7223_v14 = vadd.f32 %v7222_v52, %v7221_v40  ;;  %v7125_v12 = vsel %vm1716_vm2, %v6956_v10, 0.0  ;;  %v10726_v17 = vpop.f32.mrb[174].mxu1 }
 0x78e   : > { %v7126_v42 = vadd.f32 %v7125_v12, %v7124_v5  ;;  %v6959_v54 = vmul.f32 %v10726_v17, %v9406_v23  ;;  %v5897_v8 = vpop.f32.mrb[175].mxu1 }
 0x78f   : > { %v6958_v44 = vmul.f32 %v9406_v23, %v5897_v8 }
 0x790   : > { %v7416_v41 = vsel %vm1716_vm2, %v6959_v54, 0.0 }
 0x791   : > { %v7417_v39 = vadd.f32 %v7416_v41, %v7415_v34  ;;  %v7319_v4 = vsel %vm1716_vm2, %v6958_v44, 0.0  ;;  %v10729_v36 = vpop.f32.mrb[176].mxu1  ;;  %v9407_v34 = vld [vmem:[%s14772_s7 + $0x26] ss:$0 sm:$0xff] }
 0x792   : > { %v7320_v28 = vadd.f32 %v7319_v4, %v7318_v18  ;;  %v6961_v9 = vmul.f32 %v10729_v36, %v9406_v23  ;;  %v5907_v59 = vpop.f32.mrb[177].mxu1 }
 0x793   : > { %v6960_v46 = vmul.f32 %v9406_v23, %v5907_v59 }
 0x794   : > { %v7610_v32 = vsel %vm1716_vm2, %v6961_v9, 0.0 }
 0x795   : > { %v7611_v40 = vadd.f32 %v7610_v32, %v7609_v50  ;;  %v7513_v61 = vsel %vm1716_vm2, %v6960_v46, 0.0  ;;  %v10732_v3 = vpop.f32.mrb[178].mxu1 }
 0x796   : > { %v7514_v5 = vadd.f32 %v7513_v61, %v7512_v11  ;;  %v6963_v0 = vmul.f32 %v10732_v3, %v9406_v23  ;;  %v5917_v33 = vpop.f32.mrb[179].mxu1 }
 0x797   : > { %v6962_v2 = vmul.f32 %v9406_v23, %v5917_v33 }
 0x798   : > { %v7804_v13 = vsel %vm1716_vm2, %v6963_v0, 0.0 }
 0x799   : > { %v7805_v18 = vadd.f32 %v7804_v13, %v7803_v25  ;;  %v7707_v45 = vsel %vm1716_vm2, %v6962_v2, 0.0  ;;  %v10735_v1 = vpop.f32.mrb[180].mxu1 }
 0x79a   : > { %v7708_v24 = vadd.f32 %v7707_v45, %v7706_v55  ;;  %v6965_v15 = vmul.f32 %v10735_v1, %v9407_v34  ;;  %v5927_v50 = vpop.f32.mrb[181].mxu1 }
 0x79b   : > { %v6964_v63 = vmul.f32 %v9407_v34, %v5927_v50 }
 0x79c   : > { %v7224_v48 = vsel %vm1716_vm2, %v6965_v15, 0.0 }
 0x79d   : > { %v7225_v11 = vadd.f32 %v7224_v48, %v7223_v14  ;;  %v7127_v53 = vsel %vm1716_vm2, %v6964_v63, 0.0  ;;  %v10738_v23 = vpop.f32.mrb[182].mxu1 }
 0x79e   : > { %v7128_v10 = vadd.f32 %v7127_v53, %v7126_v42  ;;  %v6967_v52 = vmul.f32 %v10738_v23, %v9407_v34  ;;  %v5937_v12 = vpop.f32.mrb[183].mxu1 }
 0x79f   : > { %v6966_v17 = vmul.f32 %v9407_v34, %v5937_v12 }
 0x7a0   : > { %v7418_v54 = vsel %vm1716_vm2, %v6967_v52, 0.0 }
 0x7a1   : > { %v7419_v25 = vadd.f32 %v7418_v54, %v7417_v39  ;;  %v7321_v8 = vsel %vm1716_vm2, %v6966_v17, 0.0  ;;  %v10741_v44 = vpop.f32.mrb[184].mxu1  ;;  %v9408_v39 = vld [vmem:[%s14772_s7 + $0x27] ss:$0 sm:$0xff] }
 0x7a2   : > { %v7322_v55 = vadd.f32 %v7321_v8, %v7320_v28  ;;  %v6969_v41 = vmul.f32 %v10741_v44, %v9407_v34  ;;  %v5947_v4 = vpop.f32.mrb[185].mxu1 }
 0x7a3   : > { %v6968_v36 = vmul.f32 %v9407_v34, %v5947_v4 }
 0x7a4   : > { %v7612_v9 = vsel %vm1716_vm2, %v6969_v41, 0.0 }
 0x7a5   : > { %v7613_v14 = vadd.f32 %v7612_v9, %v7611_v40  ;;  %v7515_v59 = vsel %vm1716_vm2, %v6968_v36, 0.0  ;;  %v10744_v46 = vpop.f32.mrb[186].mxu1 }
 0x7a6   : > { %v7516_v42 = vadd.f32 %v7515_v59, %v7514_v5  ;;  %v6971_v32 = vmul.f32 %v10744_v46, %v9407_v34  ;;  %v5957_v61 = vpop.f32.mrb[187].mxu1 }
 0x7a7   : > { %v6970_v3 = vmul.f32 %v9407_v34, %v5957_v61 }
 0x7a8   : > { %v7806_v0 = vsel %vm1716_vm2, %v6971_v32, 0.0 }
 0x7a9   : > { %v7807_v28 = vadd.f32 %v7806_v0, %v7805_v18  ;;  %v7709_v33 = vsel %vm1716_vm2, %v6970_v3, 0.0  ;;  %v10747_v2 = vpop.f32.mrb[188].mxu1 }
 0x7aa   : > { %v7710_v13 = vadd.f32 %v7709_v33, %v7708_v24  ;;  %v6973_v45 = vmul.f32 %v10747_v2, %v9408_v39  ;;  %v5967_v40 = vpop.f32.mrb[189].mxu1 }
 0x7ab   : > { %v6972_v1 = vmul.f32 %v9408_v39, %v5967_v40 }
 0x7ac   : > { %v7226_v15 = vsel %vm1716_vm2, %v6973_v45, 0.0 }
 0x7ad   : > { %v7227_v5 = vadd.f32 %v7226_v15, %v7225_v11  ;;  %v7129_v50 = vsel %vm1716_vm2, %v6972_v1, 0.0  ;;  %v10750_v34 = vpop.f32.mrb[190].mxu1 }
 0x7ae   : > { %v7130_v63 = vadd.f32 %v7129_v50, %v7128_v10  ;;  %v6975_v48 = vmul.f32 %v10750_v34, %v9408_v39  ;;  %v5977_v53 = vpop.f32.mrb[191].mxu1 }
 0x7af   : > { %v6974_v23 = vmul.f32 %v9408_v39, %v5977_v53 }
 0x7b0   : > { %v7420_v52 = vsel %vm1716_vm2, %v6975_v48, 0.0 }
 0x7b1   : > { %v7421_v18 = vadd.f32 %v7420_v52, %v7419_v25  ;;  %v7323_v12 = vsel %vm1716_vm2, %v6974_v23, 0.0  ;;  %v10753_v17 = vpop.f32.mrb[192].mxu1  ;;  %v9409_v25 = vld [vmem:[%s14772_s7 + $0x28] ss:$0 sm:$0xff] }
 0x7b2   : > { %v7324_v24 = vadd.f32 %v7323_v12, %v7322_v55  ;;  %v6977_v54 = vmul.f32 %v10753_v17, %v9408_v39  ;;  %v5987_v8 = vpop.f32.mrb[193].mxu1 }
 0x7b3   : > { %v6976_v44 = vmul.f32 %v9408_v39, %v5987_v8 }
 0x7b4   : > { %v7614_v41 = vsel %vm1716_vm2, %v6977_v54, 0.0 }
 0x7b5   : > { %v7615_v11 = vadd.f32 %v7614_v41, %v7613_v14  ;;  %v7517_v4 = vsel %vm1716_vm2, %v6976_v44, 0.0  ;;  %v10756_v36 = vpop.f32.mrb[194].mxu1 }
 0x7b6   : > { %v7518_v10 = vadd.f32 %v7517_v4, %v7516_v42  ;;  %v6979_v9 = vmul.f32 %v10756_v36, %v9408_v39  ;;  %v5997_v59 = vpop.f32.mrb[195].mxu1 }
 0x7b7   : > { %v6978_v46 = vmul.f32 %v9408_v39, %v5997_v59 }
 0x7b8   : > { %v7808_v32 = vsel %vm1716_vm2, %v6979_v9, 0.0 }
 0x7b9   : > { %v7809_v55 = vadd.f32 %v7808_v32, %v7807_v28  ;;  %v7711_v61 = vsel %vm1716_vm2, %v6978_v46, 0.0  ;;  %v10759_v3 = vpop.f32.mrb[196].mxu1 }
 0x7ba   : > { %v7712_v0 = vadd.f32 %v7711_v61, %v7710_v13  ;;  %v6981_v33 = vmul.f32 %v10759_v3, %v9409_v25  ;;  %v6007_v14 = vpop.f32.mrb[197].mxu1 }
 0x7bb   : > { %v6980_v2 = vmul.f32 %v9409_v25, %v6007_v14 }
 0x7bc   : > { %v7228_v45 = vsel %vm1716_vm2, %v6981_v33, 0.0 }
 0x7bd   : > { %v7229_v42 = vadd.f32 %v7228_v45, %v7227_v5  ;;  %v7131_v40 = vsel %vm1716_vm2, %v6980_v2, 0.0  ;;  %v10762_v39 = vpop.f32.mrb[198].mxu1 }
 0x7be   : > { %v7132_v1 = vadd.f32 %v7131_v40, %v7130_v63  ;;  %v6983_v15 = vmul.f32 %v10762_v39, %v9409_v25  ;;  %v6017_v50 = vpop.f32.mrb[199].mxu1 }
 0x7bf   : > { %v6982_v34 = vmul.f32 %v9409_v25, %v6017_v50 }
 0x7c0   : > { %v7422_v48 = vsel %vm1716_vm2, %v6983_v15, 0.0 }
 0x7c1   : > { %v7423_v28 = vadd.f32 %v7422_v48, %v7421_v18  ;;  %v7325_v53 = vsel %vm1716_vm2, %v6982_v34, 0.0  ;;  %v10765_v23 = vpop.f32.mrb[200].mxu1  ;;  %v9410_v18 = vld [vmem:[%s14772_s7 + $0x29] ss:$0 sm:$0xff] }
 0x7c2   : > { %v7326_v13 = vadd.f32 %v7325_v53, %v7324_v24  ;;  %v6985_v52 = vmul.f32 %v10765_v23, %v9409_v25  ;;  %v6027_v12 = vpop.f32.mrb[201].mxu1 }
 0x7c3   : > { %v6984_v17 = vmul.f32 %v9409_v25, %v6027_v12 }
 0x7c4   : > { %v7616_v54 = vsel %vm1716_vm2, %v6985_v52, 0.0 }
 0x7c5   : > { %v7617_v5 = vadd.f32 %v7616_v54, %v7615_v11  ;;  %v7519_v8 = vsel %vm1716_vm2, %v6984_v17, 0.0  ;;  %v10768_v44 = vpop.f32.mrb[202].mxu1 }
 0x7c6   : > { %v7520_v63 = vadd.f32 %v7519_v8, %v7518_v10  ;;  %v6987_v41 = vmul.f32 %v10768_v44, %v9409_v25  ;;  %v6037_v4 = vpop.f32.mrb[203].mxu1 }
 0x7c7   : > { %v6986_v36 = vmul.f32 %v9409_v25, %v6037_v4 }
 0x7c8   : > { %v7810_v9 = vsel %vm1716_vm2, %v6987_v41, 0.0 }
 0x7c9   : > { %v7811_v24 = vadd.f32 %v7810_v9, %v7809_v55  ;;  %v7713_v59 = vsel %vm1716_vm2, %v6986_v36, 0.0  ;;  %v10771_v46 = vpop.f32.mrb[204].mxu1 }
 0x7ca   : > { %v7714_v32 = vadd.f32 %v7713_v59, %v7712_v0  ;;  %v6989_v61 = vmul.f32 %v10771_v46, %v9410_v18  ;;  %v6047_v11 = vpop.f32.mrb[205].mxu1 }
 0x7cb   : > { %v6988_v3 = vmul.f32 %v9410_v18, %v6047_v11 }
 0x7cc   : > { %v7230_v33 = vsel %vm1716_vm2, %v6989_v61, 0.0 }
 0x7cd   : > { %v7231_v10 = vadd.f32 %v7230_v33, %v7229_v42  ;;  %v7133_v14 = vsel %vm1716_vm2, %v6988_v3, 0.0  ;;  %v10774_v25 = vpop.f32.mrb[206].mxu1 }
 0x7ce   : > { %v7134_v2 = vadd.f32 %v7133_v14, %v7132_v1  ;;  %v6991_v45 = vmul.f32 %v10774_v25, %v9410_v18  ;;  %v6057_v40 = vpop.f32.mrb[207].mxu1 }
 0x7cf   : > { %v6990_v39 = vmul.f32 %v9410_v18, %v6057_v40 }
 0x7d0   : > { %v7424_v15 = vsel %vm1716_vm2, %v6991_v45, 0.0 }
 0x7d1   : > { %v7425_v55 = vadd.f32 %v7424_v15, %v7423_v28  ;;  %v7327_v50 = vsel %vm1716_vm2, %v6990_v39, 0.0  ;;  %v10777_v34 = vpop.f32.mrb[208].mxu1  ;;  %v9411_v28 = vld [vmem:[%s14772_s7 + $0x2a] ss:$0 sm:$0xff] }
 0x7d2   : > { %v7328_v0 = vadd.f32 %v7327_v50, %v7326_v13  ;;  %v6993_v48 = vmul.f32 %v10777_v34, %v9410_v18  ;;  %v6067_v53 = vpop.f32.mrb[209].mxu1 }
 0x7d3   : > { %v6992_v23 = vmul.f32 %v9410_v18, %v6067_v53 }
 0x7d4   : > { %v7618_v52 = vsel %vm1716_vm2, %v6993_v48, 0.0 }
 0x7d5   : > { %v7619_v42 = vadd.f32 %v7618_v52, %v7617_v5  ;;  %v7521_v12 = vsel %vm1716_vm2, %v6992_v23, 0.0  ;;  %v10780_v17 = vpop.f32.mrb[210].mxu1 }
 0x7d6   : > { %v7522_v1 = vadd.f32 %v7521_v12, %v7520_v63  ;;  %v6995_v54 = vmul.f32 %v10780_v17, %v9410_v18  ;;  %v6077_v8 = vpop.f32.mrb[211].mxu1 }
 0x7d7   : > { %v6994_v44 = vmul.f32 %v9410_v18, %v6077_v8 }
 0x7d8   : > { %v7812_v41 = vsel %vm1716_vm2, %v6995_v54, 0.0 }
 0x7d9   : > { %v7813_v13 = vadd.f32 %v7812_v41, %v7811_v24  ;;  %v7715_v4 = vsel %vm1716_vm2, %v6994_v44, 0.0  ;;  %v10783_v36 = vpop.f32.mrb[212].mxu1 }
 0x7da   : > { %v7716_v9 = vadd.f32 %v7715_v4, %v7714_v32  ;;  %v6997_v59 = vmul.f32 %v10783_v36, %v9411_v28  ;;  %v6087_v5 = vpop.f32.mrb[213].mxu1 }
 0x7db   : > { %v6996_v46 = vmul.f32 %v9411_v28, %v6087_v5 }
 0x7dc   : > { %v7232_v61 = vsel %vm1716_vm2, %v6997_v59, 0.0 }
 0x7dd   : > { %v7233_v63 = vadd.f32 %v7232_v61, %v7231_v10  ;;  %v7135_v11 = vsel %vm1716_vm2, %v6996_v46, 0.0  ;;  %v10786_v18 = vpop.f32.mrb[214].mxu1 }
 0x7de   : > { %v7136_v3 = vadd.f32 %v7135_v11, %v7134_v2  ;;  %v6999_v33 = vmul.f32 %v10786_v18, %v9411_v28  ;;  %v6097_v14 = vpop.f32.mrb[215].mxu1 }
 0x7df   : > { %v6998_v25 = vmul.f32 %v9411_v28, %v6097_v14 }
 0x7e0   : > { %v7426_v45 = vsel %vm1716_vm2, %v6999_v33, 0.0 }
 0x7e1   : > { %v7427_v24 = vadd.f32 %v7426_v45, %v7425_v55  ;;  %v7329_v40 = vsel %vm1716_vm2, %v6998_v25, 0.0  ;;  %v10789_v39 = vpop.f32.mrb[216].mxu1  ;;  %v9412_v55 = vld [vmem:[%s14772_s7 + $0x2b] ss:$0 sm:$0xff] }
 0x7e2   : > { %v7330_v32 = vadd.f32 %v7329_v40, %v7328_v0  ;;  %v7001_v15 = vmul.f32 %v10789_v39, %v9411_v28  ;;  %v6107_v50 = vpop.f32.mrb[217].mxu1 }
 0x7e3   : > { %v7000_v34 = vmul.f32 %v9411_v28, %v6107_v50 }
 0x7e4   : > { %v7620_v48 = vsel %vm1716_vm2, %v7001_v15, 0.0 }
 0x7e5   : > { %v7621_v10 = vadd.f32 %v7620_v48, %v7619_v42  ;;  %v7523_v53 = vsel %vm1716_vm2, %v7000_v34, 0.0  ;;  %v10792_v23 = vpop.f32.mrb[218].mxu1 }
 0x7e6   : > { %v7524_v2 = vadd.f32 %v7523_v53, %v7522_v1  ;;  %v7003_v52 = vmul.f32 %v10792_v23, %v9411_v28  ;;  %v6117_v12 = vpop.f32.mrb[219].mxu1 }
 0x7e7   : > { %v7002_v17 = vmul.f32 %v9411_v28, %v6117_v12 }
 0x7e8   : > { %v7814_v54 = vsel %vm1716_vm2, %v7003_v52, 0.0 }
 0x7e9   : > { %v7815_v0 = vadd.f32 %v7814_v54, %v7813_v13  ;;  %v7717_v8 = vsel %vm1716_vm2, %v7002_v17, 0.0  ;;  %v10795_v44 = vpop.f32.mrb[220].mxu1 }
 0x7ea   : > { %v7718_v41 = vadd.f32 %v7717_v8, %v7716_v9  ;;  %v7005_v4 = vmul.f32 %v10795_v44, %v9412_v55  ;;  %v6127_v42 = vpop.f32.mrb[221].mxu1 }
 0x7eb   : > { %v7004_v36 = vmul.f32 %v9412_v55, %v6127_v42 }
 0x7ec   : > { %v7234_v59 = vsel %vm1716_vm2, %v7005_v4, 0.0 }
 0x7ed   : > { %v7235_v1 = vadd.f32 %v7234_v59, %v7233_v63  ;;  %v7137_v5 = vsel %vm1716_vm2, %v7004_v36, 0.0  ;;  %v10798_v28 = vpop.f32.mrb[222].mxu1 }
 0x7ee   : > { %v7138_v46 = vadd.f32 %v7137_v5, %v7136_v3  ;;  %v7007_v61 = vmul.f32 %v10798_v28, %v9412_v55  ;;  %v6137_v11 = vpop.f32.mrb[223].mxu1 }
 0x7ef   : > { %v7006_v18 = vmul.f32 %v9412_v55, %v6137_v11 }
 0x7f0   : > { %v7428_v33 = vsel %vm1716_vm2, %v7007_v61, 0.0 }
 0x7f1   : > { %v7429_v13 = vadd.f32 %v7428_v33, %v7427_v24  ;;  %v7331_v14 = vsel %vm1716_vm2, %v7006_v18, 0.0  ;;  %v10801_v25 = vpop.f32.mrb[224].mxu1  ;;  %v9413_v24 = vld [vmem:[%s14772_s7 + $0x2c] ss:$0 sm:$0xff] }
 0x7f2   : > { %v7332_v9 = vadd.f32 %v7331_v14, %v7330_v32  ;;  %v7009_v45 = vmul.f32 %v10801_v25, %v9412_v55  ;;  %v6147_v40 = vpop.f32.mrb[225].mxu1 }
 0x7f3   : > { %v7008_v39 = vmul.f32 %v9412_v55, %v6147_v40 }
 0x7f4   : > { %v7622_v15 = vsel %vm1716_vm2, %v7009_v45, 0.0 }
 0x7f5   : > { %v7623_v63 = vadd.f32 %v7622_v15, %v7621_v10  ;;  %v7525_v50 = vsel %vm1716_vm2, %v7008_v39, 0.0  ;;  %v10804_v34 = vpop.f32.mrb[226].mxu1 }
 0x7f6   : > { %v7526_v3 = vadd.f32 %v7525_v50, %v7524_v2  ;;  %v7011_v48 = vmul.f32 %v10804_v34, %v9412_v55  ;;  %v6157_v53 = vpop.f32.mrb[227].mxu1 }
 0x7f7   : > { %v7010_v23 = vmul.f32 %v9412_v55, %v6157_v53 }
 0x7f8   : > { %v7816_v52 = vsel %vm1716_vm2, %v7011_v48, 0.0 }
 0x7f9   : > { %v7817_v32 = vadd.f32 %v7816_v52, %v7815_v0  ;;  %v7719_v12 = vsel %vm1716_vm2, %v7010_v23, 0.0  ;;  %v10807_v17 = vpop.f32.mrb[228].mxu1 }
 0x7fa   : > { %v7720_v54 = vadd.f32 %v7719_v12, %v7718_v41  ;;  %v7013_v8 = vmul.f32 %v10807_v17, %v9413_v24  ;;  %v6167_v10 = vpop.f32.mrb[229].mxu1 }
 0x7fb   : > { %v7012_v44 = vmul.f32 %v9413_v24, %v6167_v10 }
 0x7fc   : > { %v7236_v4 = vsel %vm1716_vm2, %v7013_v8, 0.0 }
 0x7fd   : > { %v7237_v2 = vadd.f32 %v7236_v4, %v7235_v1  ;;  %v7139_v42 = vsel %vm1716_vm2, %v7012_v44, 0.0  ;;  %v10810_v55 = vpop.f32.mrb[230].mxu1 }
 0x7fe   : > { %v7140_v36 = vadd.f32 %v7139_v42, %v7138_v46  ;;  %v7015_v59 = vmul.f32 %v10810_v55, %v9413_v24  ;;  %v6177_v5 = vpop.f32.mrb[231].mxu1 }
 0x7ff   : > { %v7014_v28 = vmul.f32 %v9413_v24, %v6177_v5 }
 0x800   : > { %v7430_v61 = vsel %vm1716_vm2, %v7015_v59, 0.0 }
 0x801   : > { %v7431_v0 = vadd.f32 %v7430_v61, %v7429_v13  ;;  %v7333_v11 = vsel %vm1716_vm2, %v7014_v28, 0.0  ;;  %v10813_v18 = vpop.f32.mrb[232].mxu1  ;;  %v9414_v13 = vld [vmem:[%s14772_s7 + $0x2d] ss:$0 sm:$0xff] }
 0x802   : > { %v7334_v41 = vadd.f32 %v7333_v11, %v7332_v9  ;;  %v7017_v33 = vmul.f32 %v10813_v18, %v9413_v24  ;;  %v6187_v14 = vpop.f32.mrb[233].mxu1 }
 0x803   : > { %v7016_v25 = vmul.f32 %v9413_v24, %v6187_v14 }
 0x804   : > { %v7624_v45 = vsel %vm1716_vm2, %v7017_v33, 0.0 }
 0x805   : > { %v7625_v1 = vadd.f32 %v7624_v45, %v7623_v63  ;;  %v7527_v40 = vsel %vm1716_vm2, %v7016_v25, 0.0  ;;  %v10816_v39 = vpop.f32.mrb[234].mxu1 }
 0x806   : > { %v7528_v46 = vadd.f32 %v7527_v40, %v7526_v3  ;;  %v7019_v15 = vmul.f32 %v10816_v39, %v9413_v24  ;;  %v6197_v50 = vpop.f32.mrb[235].mxu1 }
 0x807   : > { %v7018_v34 = vmul.f32 %v9413_v24, %v6197_v50 }
 0x808   : > { %v7818_v48 = vsel %vm1716_vm2, %v7019_v15, 0.0 }
 0x809   : > { %v7819_v9 = vadd.f32 %v7818_v48, %v7817_v32  ;;  %v7721_v53 = vsel %vm1716_vm2, %v7018_v34, 0.0  ;;  %v10819_v23 = vpop.f32.mrb[236].mxu1 }
 0x80a   : > { %v7722_v52 = vadd.f32 %v7721_v53, %v7720_v54  ;;  %v7021_v12 = vmul.f32 %v10819_v23, %v9414_v13  ;;  %v6207_v63 = vpop.f32.mrb[237].mxu1 }
 0x80b   : > { %v7020_v17 = vmul.f32 %v9414_v13, %v6207_v63 }
 0x80c   : > { %v7238_v8 = vsel %vm1716_vm2, %v7021_v12, 0.0 }
 0x80d   : > { %v7239_v3 = vadd.f32 %v7238_v8, %v7237_v2  ;;  %v7141_v10 = vsel %vm1716_vm2, %v7020_v17, 0.0  ;;  %v10822_v24 = vpop.f32.mrb[238].mxu1 }
 0x80e   : > { %v7142_v44 = vadd.f32 %v7141_v10, %v7140_v36  ;;  %v7023_v4 = vmul.f32 %v10822_v24, %v9414_v13  ;;  %v6217_v42 = vpop.f32.mrb[239].mxu1 }
 0x80f   : > { %v7022_v55 = vmul.f32 %v9414_v13, %v6217_v42 }
 0x810   : > { %v7432_v59 = vsel %vm1716_vm2, %v7023_v4, 0.0 }
 0x811   : > { %v7433_v32 = vadd.f32 %v7432_v59, %v7431_v0  ;;  %v7335_v5 = vsel %vm1716_vm2, %v7022_v55, 0.0  ;;  %v10825_v28 = vpop.f32.mrb[240].mxu1  ;;  %v9415_v0 = vld [vmem:[%s14772_s7 + $0x2e] ss:$0 sm:$0xff] }
 0x812   : > { %v7336_v54 = vadd.f32 %v7335_v5, %v7334_v41  ;;  %v7025_v61 = vmul.f32 %v10825_v28, %v9414_v13  ;;  %v6227_v11 = vpop.f32.mrb[241].mxu1 }
 0x813   : > { %v7024_v18 = vmul.f32 %v9414_v13, %v6227_v11 }
 0x814   : > { %v7626_v33 = vsel %vm1716_vm2, %v7025_v61, 0.0 }
 0x815   : > { %v7627_v2 = vadd.f32 %v7626_v33, %v7625_v1  ;;  %v7529_v14 = vsel %vm1716_vm2, %v7024_v18, 0.0  ;;  %v10828_v25 = vpop.f32.mrb[242].mxu1 }
 0x816   : > { %v7530_v36 = vadd.f32 %v7529_v14, %v7528_v46  ;;  %v7027_v45 = vmul.f32 %v10828_v25, %v9414_v13  ;;  %v6237_v40 = vpop.f32.mrb[243].mxu1 }
 0x817   : > { %v7026_v39 = vmul.f32 %v9414_v13, %v6237_v40 }
 0x818   : > { %v7820_v15 = vsel %vm1716_vm2, %v7027_v45, 0.0 }
 0x819   : > { %v7821_v41 = vadd.f32 %v7820_v15, %v7819_v9  ;;  %v7723_v50 = vsel %vm1716_vm2, %v7026_v39, 0.0  ;;  %v10831_v34 = vpop.f32.mrb[244].mxu1 }
 0x81a   : > { %v7724_v48 = vadd.f32 %v7723_v50, %v7722_v52  ;;  %v7029_v53 = vmul.f32 %v10831_v34, %v9415_v0  ;;  %v6247_v1 = vpop.f32.mrb[245].mxu1 }
 0x81b   : > { %v7028_v23 = vmul.f32 %v9415_v0, %v6247_v1 }
 0x81c   : > { %v7240_v12 = vsel %vm1716_vm2, %v7029_v53, 0.0 }
 0x81d   : > { %v7241_v46 = vadd.f32 %v7240_v12, %v7239_v3  ;;  %v7143_v63 = vsel %vm1716_vm2, %v7028_v23, 0.0  ;;  %v10834_v13 = vpop.f32.mrb[246].mxu1 }
 0x81e   : > { %v7144_v17 = vadd.f32 %v7143_v63, %v7142_v44  ;;  %v7031_v8 = vmul.f32 %v10834_v13, %v9415_v0  ;;  %v6257_v10 = vpop.f32.mrb[247].mxu1 }
 0x81f   : > { %v7030_v24 = vmul.f32 %v9415_v0, %v6257_v10 }
 0x820   : > { %v7434_v4 = vsel %vm1716_vm2, %v7031_v8, 0.0 }
 0x821   : > { %v7435_v9 = vadd.f32 %v7434_v4, %v7433_v32  ;;  %v7337_v42 = vsel %vm1716_vm2, %v7030_v24, 0.0  ;;  %v10837_v55 = vpop.f32.mrb[248].mxu1  ;;  %v9416_v32 = vld [vmem:[%s14772_s7 + $0x2f] ss:$0 sm:$0xff] }
 0x822   : > { %v7338_v52 = vadd.f32 %v7337_v42, %v7336_v54  ;;  %v7033_v59 = vmul.f32 %v10837_v55, %v9415_v0  ;;  %v6267_v5 = vpop.f32.mrb[249].mxu1 }
 0x823   : > { %v7032_v28 = vmul.f32 %v9415_v0, %v6267_v5 }
 0x824   : > { %v7628_v61 = vsel %vm1716_vm2, %v7033_v59, 0.0 }
 0x825   : > { %v7629_v3 = vadd.f32 %v7628_v61, %v7627_v2  ;;  %v7531_v11 = vsel %vm1716_vm2, %v7032_v28, 0.0  ;;  %v10840_v18 = vpop.f32.mrb[250].mxu1 }
 0x826   : > { %v7532_v44 = vadd.f32 %v7531_v11, %v7530_v36  ;;  %v7035_v33 = vmul.f32 %v10840_v18, %v9415_v0  ;;  %v6277_v14 = vpop.f32.mrb[251].mxu1 }
 0x827   : > { %v7034_v25 = vmul.f32 %v9415_v0, %v6277_v14 }
 0x828   : > { %v7822_v45 = vsel %vm1716_vm2, %v7035_v33, 0.0 }
 0x829   : > { %v7823_v54 = vadd.f32 %v7822_v45, %v7821_v41  ;;  %v7725_v40 = vsel %vm1716_vm2, %v7034_v25, 0.0  ;;  %v10843_v39 = vpop.f32.mrb[252].mxu1 }
 0x82a   : > { %v7726_v15 = vadd.f32 %v7725_v40, %v7724_v48  ;;  %v7037_v50 = vmul.f32 %v10843_v39, %v9416_v32  ;;  %v6287_v2 = vpop.f32.mrb[253].mxu1 }
 0x82b   : > { %v7036_v34 = vmul.f32 %v9416_v32, %v6287_v2 }
 0x82c   : > { %v7242_v53 = vsel %vm1716_vm2, %v7037_v50, 0.0 }
 0x82d   : > { %v7243_v36 = vadd.f32 %v7242_v53, %v7241_v46  ;;  %v7145_v1 = vsel %vm1716_vm2, %v7036_v34, 0.0  ;;  %v10846_v0 = vpop.f32.mrb[254].mxu1 }
 0x82e   : > { %v7146_v23 = vadd.f32 %v7145_v1, %v7144_v17  ;;  %v7039_v12 = vmul.f32 %v10846_v0, %v9416_v32  ;;  %v6297_v63 = vpop.f32.mrb[255].mxu1 }
 0x82f   : > { %v7038_v13 = vmul.f32 %v9416_v32, %v6297_v63 }
 0x830   : > { %v7436_v8 = vsel %vm1716_vm2, %v7039_v12, 0.0 }
 0x831   : > { %v7437_v41 = vadd.f32 %v7436_v8, %v7435_v9  ;;  %v7339_v10 = vsel %vm1716_vm2, %v7038_v13, 0.0  ;;  %v10849_v24 = vpop.f32.mrb[0].mxu1  ;;  %v9417_v9 = vld [vmem:[%s14772_s7 + $0x30] ss:$0 sm:$0xff]  ;;  %v7843_v13 = vmul.f32 0.5, %v13481_v43 }
 0x832   : > { %v7340_v48 = vadd.f32 %v7339_v10, %v7338_v52  ;;  %v7041_v4 = vmul.f32 %v10849_v24, %v9416_v32  ;;  %v6307_v42 = vpop.f32.mrb[1].mxu1 }
 0x833   : > { %v7040_v55 = vmul.f32 %v9416_v32, %v6307_v42 }
 0x834   : > { %v7630_v59 = vsel %vm1716_vm2, %v7041_v4, 0.0 }
 0x835   : > { %v7631_v46 = vadd.f32 %v7630_v59, %v7629_v3  ;;  %v7533_v5 = vsel %vm1716_vm2, %v7040_v55, 0.0  ;;  %v10852_v28 = vpop.f32.mrb[2].mxu1 }
 0x836   : > { %v7534_v17 = vadd.f32 %v7533_v5, %v7532_v44  ;;  %v7043_v61 = vmul.f32 %v10852_v28, %v9416_v32  ;;  %v6317_v11 = vpop.f32.mrb[3].mxu1  ;;  %v9418_v44 = vld [vmem:[%s14775_s3] ss:$0 sm:$0xff] }
 0x837   : > { %v7042_v18 = vmul.f32 %v9416_v32, %v6317_v11 }
 0x838   : > { %v7824_v33 = vsel %vm1716_vm2, %v7043_v61, 0.0 }
 0x839   : > { %v7825_v52 = vadd.f32 %v7824_v33, %v7823_v54  ;;  %v7727_v14 = vsel %vm1716_vm2, %v7042_v18, 0.0  ;;  %v10855_v25 = vpop.f32.mrb[4].mxu1 }
 0x83a   : > { %v7728_v45 = vadd.f32 %v7727_v14, %v7726_v15  ;;  %v7045_v40 = vmul.f32 %v10855_v25, %v9417_v9  ;;  %v6327_v3 = vpop.f32.mrb[5].mxu1 }
 0x83b   : > { %v7044_v39 = vmul.f32 %v9417_v9, %v6327_v3 }
 0x83c   : > { %v7244_v32 = vsel %vm1716_vm2, %v7045_v40, 0.0 }
 0x83d   : > { %v7245_v50 = vadd.f32 %v7244_v32, %v7243_v36  ;;  %v7147_v2 = vsel %vm1716_vm2, %v7044_v39, 0.0  ;;  %v10858_v34 = vpop.f32.mrb[6].mxu1  ;;  %v7842_v36 = vmul.f32 0.5, %v13483_v19 }
 0x83e   : > { %v7148_v53 = vadd.f32 %v7147_v2, %v7146_v23  ;;  %v7047_v1 = vmul.f32 %v10858_v34, %v9417_v9  ;;  %v6337_v54 = vpop.f32.mrb[7].mxu1  ;;  %v7847_v2 = vmul.f32 0.5, %v13505_v58  ;;  %v7849_v58 = vmul.f32 0.5, %v13517_v37  ;;  %v9419_v37 = vld [vmem:[%s14776_s6] ss:$0 sm:$0xff] }
 0x83f   : > { %v7835_v0 = vadd.f32 %v9418_v44, %v7245_v50  ;;  %v7046_v12 = vmul.f32 %v9417_v9, %v6337_v54 }
 0x840   : > { %v7834_v63 = vadd.f32 %v9418_v44, %v7148_v53  ;;  %v7438_v15 = vsel %vm1716_vm2, %v7047_v1, 0.0 }
 0x841   : > { %v7851_v8 = vmul.f32 %v7835_v0, %v12043_v6  ;;  %v7439_v10 = vadd.f32 %v7438_v15, %v7437_v41  ;;  %v7341_v24 = vsel %vm1716_vm2, %v7046_v12, 0.0  ;;  %v10861_v4 = vpop.f32.mrb[8].mxu1  ;;  %v7845_v6 = vmul.f32 0.5, %v13493_v21 }
 0x842   : > { %v7850_v42 = vmul.f32 %v7834_v63, %v12566_v30  ;;  %v7342_v23 = vadd.f32 %v7341_v24, %v7340_v48  ;;  %v7049_v55 = vmul.f32 %v10861_v4, %v9417_v9  ;;  %v6347_v59 = vpop.f32.mrb[9].mxu1  ;;  %v7844_v30 = vmul.f32 0.5, %v13495_v7 }
 0x843   : > { %v7859_v5 = vadd.f32 %v7851_v8, %v7843_v13  ;;  %v7837_v28 = vadd.f32 %v9418_v44, %v7439_v10  ;;  %v7048_v61 = vmul.f32 %v9417_v9, %v6347_v59 }
 0x844   : > { %v7836_v11 = vadd.f32 %v9418_v44, %v7342_v23  ;;  %v7632_v18 = vsel %vm1716_vm2, %v7049_v55, 0.0  ;;  %v7858_v43 = vadd.f32 %v7850_v42, %v7842_v36 }
 0x845   : > { %v7853_v41 = vmul.f32 %v7837_v28, %v12048_v16  ;;  %v7633_v33 = vadd.f32 %v7632_v18, %v7631_v46  ;;  %v7535_v14 = vsel %vm1716_vm2, %v7048_v61, 0.0  ;;  %v10864_v19 = vpop.f32.mrb[10].mxu1 }
 0x846   : > { %v7852_v48 = vmul.f32 %v7836_v11, %v12051_v20  ;;  %v7536_v25 = vadd.f32 %v7535_v14, %v7534_v17  ;;  %v7051_v40 = vmul.f32 %v10864_v19, %v9417_v9  ;;  %v6357_v3 = vpop.f32.mrb[11].mxu1  ;;  %10873 = vmatprep.mubr.msk.f32.mxu0 %vm1716_vm2, %v7858_v43  ;;  %v7846_v17 = vmul.f32 0.5, %v13507_v51 }
 0x847   : > { %v7839_v39 = vadd.f32 %v9418_v44, %v7633_v33  ;;  %v7050_v32 = vmul.f32 %v9417_v9, %v6357_v3  ;;  %10874 = vmatmul.mubr.msk.f32.vlgmr.msra.gmra.mrb[232].mxu0 %vm1716_vm2, %v7859_v5  ;;  %v7861_v21 = vadd.f32 %v7853_v41, %v7845_v6 }
 0x848   : > { %v7838_v50 = vadd.f32 %v9418_v44, %v7536_v25  ;;  %v7826_v16 = vsel %vm1716_vm2, %v7051_v40, 0.0  ;;  %v7860_v46 = vadd.f32 %v7852_v48, %v7844_v30 }
 0x849   : > { %v7855_v7 = vmul.f32 %v7839_v39, %v12054_v22  ;;  %v7827_v34 = vadd.f32 %v7826_v16, %v7825_v52  ;;  %v7729_v20 = vsel %vm1716_vm2, %v7050_v32, 0.0  ;;  %v7848_v52 = vmul.f32 0.5, %v13519_v26 }
 0x84a   : > { %v7854_v53 = vmul.f32 %v7838_v50, %v12060_v27  ;;  %v7730_v1 = vadd.f32 %v7729_v20, %v7728_v45  ;;  %10876 = vmatprep.mubr.msk.f32.mxu0 %vm1716_vm2, %v7860_v46 }
 0x84b   : > { %v7841_v9 = vadd.f32 %v9418_v44, %v7827_v34  ;;  %10877 = vmatmul.mubr.msk.f32.gmra.mrb[234].mxu0 %vm1716_vm2, %v7861_v21  ;;  %v7863_v54 = vadd.f32 %v7855_v7, %v7847_v2 }
 0x84c   : > { %v7840_v0 = vadd.f32 %v9418_v44, %v7730_v1  ;;  %v7862_v12 = vadd.f32 %v7854_v53, %v7846_v17 }
 0x84d   : > { %v7857_v22 = vmul.f32 %v7841_v9, %v12064_v29 }
 0x84e   : > { %v7856_v51 = vmul.f32 %v7840_v0, %v12067_v31  ;;  %10879 = vmatprep.mubr.msk.f32.mxu0 %vm1716_vm2, %v7862_v12 }
 0x84f   : > { %10880 = vmatmul.mubr.msk.f32.gmra.mrb[236].mxu0 %vm1716_vm2, %v7863_v54  ;;  %v7865_v27 = vadd.f32 %v7857_v22, %v7849_v58 }
 0x850   : > { %v7864_v45 = vadd.f32 %v7856_v51, %v7848_v52 }
 0x852   : > { %10882 = vmatprep.mubr.msk.f32.mxu0 %vm1716_vm2, %v7864_v45 }
 0x853   : > { %10883 = vmatmul.mubr.msk.f32.gmra.mrb[238].mxu0 %vm1716_vm2, %v7865_v27 }
 0x91a   : > { %v10875_v29 = vpop.f32.mrb[232].mxu0 }
 0x91b   : > { %v7973_v44 = vadd.f32 %v10875_v29, %v9419_v37  ;;  %v7967_v26 = vpop.f32.mrb[233].mxu0 }
 0x91c   : > { %v7968_v63 = vadd.f32 %v9419_v37, %v7967_v26 }
 0x91d   : > { %v14387_v31 = vadd.f32 %v7973_v44, %v11897_v38 }
 0x91e   : > { %v10878_v15 = vpop.f32.mrb[234].mxu0  ;;  %v14390_v13 = vadd.f32 %v7968_v63, %v11894_v35 }
 0x91f   : > { %v7983_v8 = vadd.f32 %v10878_v15, %v9419_v37  ;;  %v7977_v10 = vpop.f32.mrb[235].mxu0  ;;  %v8019_v24 = vsel %vm1716_vm2, %v14387_v31, 0.0 }
 0x920   : > { %8020 = vadd.xlane.f32.xlu1 %v8019_v24  ;;  %v7978_v42 = vadd.f32 %v9419_v37, %v7977_v10  ;;  %v8016_v38 = vsel %vm1716_vm2, %v14390_v13, 0.0 }
 0x921   : > { %v14395_v36 = vadd.f32 %v7983_v8, %v11909_v49 }
 0x922   : > { %v10881_v4 = vpop.f32.mrb[236].mxu0  ;;  %v14400_v35 = vadd.f32 %v7978_v42, %v11904_v47  ;;  %v8149_v42 = vld [vmem:[%s11437_s12 + $0x8] sm:$0xff] }
 0x923   : > { %v7987_v23 = vpop.f32.mrb[237].mxu0  ;;  %v7993_v59 = vadd.f32 %v10881_v4, %v9419_v37  ;;  %v8025_v28 = vsel %vm1716_vm2, %v14395_v36, 0.0  ;;  %v8148_v4 = vld [vmem:[%s11437_s12] sm:$0xff] }
 0x924   : > { %8017 = vadd.xlane.f32.xlu1 %v8016_v38  ;;  %v7988_v49 = vadd.f32 %v9419_v37, %v7987_v23  ;;  %v8022_v11 = vsel %vm1716_vm2, %v14400_v35, 0.0  ;;  %v11037_v23 = vpack.c.bf16 %v8149_v42, %v8148_v4  ;;  %v8150_v38 = vld [vmem:[%s11437_s12 + $0x10] sm:$0xff] }
 0x925   : > { %v14405_v61 = vadd.f32 %v7993_v59, %v11923_v57 }
 0x926   : > { %v10884_v55 = vpop.f32.mrb[238].mxu0  ;;  %v14410_v18 = vadd.f32 %v7988_v49, %v11916_v56  ;;  %11038 = vmatprep.subr.bf16.mxu0 %v11037_v23 }
 0x927   : > { %v7997_v5 = vpop.f32.mrb[239].mxu0  ;;  %v8031_v47 = vsel %vm1716_vm2, %v14405_v61, 0.0  ;;  %v8003_v6 = vadd.f32 %v10884_v55, %v9419_v37  ;;  %11040 = vmatpush3.bf16.msra.mxu0 %v11037_v23  ;;  %v8151_v55 = vld [vmem:[%s11437_s12 + $0x18] sm:$0xff] }
 0x928   : > { %8026 = vadd.xlane.f32.xlu1 %v8025_v28  ;;  %v7998_v43 = vadd.f32 %v9419_v37, %v7997_v5  ;;  %v8028_v57 = vsel %vm1716_vm2, %v14410_v18, 0.0  ;;  %v11041_v59 = vpack.c.bf16 %v8151_v55, %v8150_v38 }
 0x929   : > { %v14420_v33 = vadd.f32 %v8003_v6, %v11933_v60 }
 0x92a   : > { %v14415_v41 = vadd.f32 %v7998_v43, %v11926_v62  ;;  %11042 = vmatprep.subr.bf16.mxu0 %v11041_v59 }
 0x92b   : > { %v8037_v14 = vsel %vm1716_vm2, %v14420_v33, 0.0  ;;  %11044 = vmatpush3.bf16.msra.mxu0 %v11041_v59 }
 0x92c   : > { %8023 = vadd.xlane.f32.xlu1 %v8022_v11  ;;  %v8034_v56 = vsel %vm1716_vm2, %v14415_v41, 0.0 }
 0x930   : > { %8032 = vadd.xlane.f32.xlu1 %v8031_v47 }
 0x934   : > { %8029 = vadd.xlane.f32.xlu1 %v8028_v57 }
 0x938   : > { %8035 = vadd.xlane.f32.xlu1 %v8034_v56 }
 0x93c   : > { %8038 = vadd.xlane.f32.xlu1 %v8037_v14 }
 0x9ad   : > { %v8021_v19 = vpop.xlane.xlu1 %8020 }
 0x9ae   : > { %v8041_v30 = vmul.f32 0.03125, %v8021_v19 }
 0x9b0   : > { %v14427_v62 = vsub.f32 %v14387_v31, %v8041_v30 }
 0x9b1   : > { %v8018_v48 = vpop.xlane.xlu1 %8017 }
 0x9b2   : > { %v8040_v25 = vmul.f32 0.03125, %v8018_v48  ;;  %v8057_v40 = vmul.f32 %v14427_v62, %v14427_v62 }
 0x9b4   : > { %v14432_v60 = vsub.f32 %v14390_v13, %v8040_v25  ;;  %v8067_v3 = vsel %vm1716_vm2, %v8057_v40, 0.0 }
 0x9b5   : > { %v8027_v39 = vpop.xlane.xlu1 %8026  ;;  %8068 = vadd.xlane.f32.xlu1 %v8067_v3 }
 0x9b6   : > { %v8043_v32 = vmul.f32 0.03125, %v8027_v39  ;;  %v8056_v21 = vmul.f32 %v14432_v60, %v14432_v60  ;;  %v9428_v39 = vld [vmem:[%s14777_s22] ss:$0 sm:$0xff] }
 0x9b8   : > { %v14438_v50 = vsub.f32 %v14395_v36, %v8043_v32  ;;  %v8064_v16 = vsel %vm1716_vm2, %v8056_v21, 0.0 }
 0x9b9   : > { %v8024_v46 = vpop.xlane.xlu1 %8023  ;;  %8065 = vadd.xlane.f32.xlu1 %v8064_v16 }
 0x9ba   : > { %v8042_v2 = vmul.f32 0.03125, %v8024_v46  ;;  %v8059_v7 = vmul.f32 %v14438_v50, %v14438_v50 }
 0x9bc   : > { %v14444_v34 = vsub.f32 %v14400_v35, %v8042_v2  ;;  %v8073_v20 = vsel %vm1716_vm2, %v8059_v7, 0.0 }
 0x9bd   : > { %v8033_v17 = vpop.xlane.xlu1 %8032  ;;  %8074 = vadd.xlane.f32.xlu1 %v8073_v20 }
 0x9be   : > { %v8045_v53 = vmul.f32 0.03125, %v8033_v17  ;;  %v8058_v1 = vmul.f32 %v14444_v34, %v14444_v34 }
 0x9c0   : > { %v14450_v9 = vsub.f32 %v14405_v61, %v8045_v53  ;;  %v8070_v54 = vsel %vm1716_vm2, %v8058_v1, 0.0 }
 0x9c1   : > { %v8030_v0 = vpop.xlane.xlu1 %8029  ;;  %8071 = vadd.xlane.f32.xlu1 %v8070_v54 }
 0x9c2   : > { %v8044_v12 = vmul.f32 0.03125, %v8030_v0  ;;  %v8061_v58 = vmul.f32 %v14450_v9, %v14450_v9 }
 0x9c4   : > { %v14456_v22 = vsub.f32 %v14410_v18, %v8044_v12  ;;  %v8079_v52 = vsel %vm1716_vm2, %v8061_v58, 0.0 }
 0x9c5   : > { %8080 = vadd.xlane.f32.xlu1 %v8079_v52  ;;  %v8036_v51 = vpop.xlane.xlu1 %8035 }
 0x9c6   : > { %v8046_v27 = vmul.f32 0.03125, %v8036_v51  ;;  %v8060_v45 = vmul.f32 %v14456_v22, %v14456_v22 }
 0x9c8   : > { %v14462_v37 = vsub.f32 %v14415_v41, %v8046_v27  ;;  %v8076_v29 = vsel %vm1716_vm2, %v8060_v45, 0.0 }
 0x9c9   : > { %8077 = vadd.xlane.f32.xlu1 %v8076_v29  ;;  %v8039_v44 = vpop.xlane.xlu1 %8038 }
 0x9ca   : > { %v8047_v26 = vmul.f32 0.03125, %v8039_v44  ;;  %v8062_v63 = vmul.f32 %v14462_v37, %v14462_v37 }
 0x9cc   : > { %v14468_v15 = vsub.f32 %v14420_v33, %v8047_v26  ;;  %v8082_v8 = vsel %vm1716_vm2, %v8062_v63, 0.0 }
 0x9cd   : > { %8083 = vadd.xlane.f32.xlu1 %v8082_v8 }
 0x9ce   : > { %v8063_v10 = vmul.f32 %v14468_v15, %v14468_v15 }
 0x9d0   : > { %v8085_v24 = vsel %vm1716_vm2, %v8063_v10, 0.0 }
 0x9d1   : > { %8086 = vadd.xlane.f32.xlu1 %v8085_v24 }
 0xa42   : > { %v8069_v5 = vpop.xlane.xlu1 %8068 }
 0xa43   : > { %v8089_v28 = vmul.f32 0.03125, %v8069_v5 }
 0xa45   : > { %v8097_v49 = vadd.f32 1e-05, %v8089_v28 }
 0xa46   : > { %v8066_v11 = vpop.xlane.xlu1 %8065 }
 0xa47   : > { %11162 = vrsqrt.f32 %v8097_v49  ;;  %v8088_v43 = vmul.f32 0.03125, %v8066_v11 }
 0xa49   : > { %v8096_v47 = vadd.f32 1e-05, %v8088_v43  ;;  %v8505_v43 = vld [vmem:[%s11451_s5 + $0x8] sm:$0xff] }
 0xa4a   : > { %v8075_v6 = vpop.xlane.xlu1 %8074 }
 0xa4b   : > { %11164 = vrsqrt.f32 %v8096_v47  ;;  %v8091_v57 = vmul.f32 0.03125, %v8075_v6  ;;  %v8506_v6 = vld [vmem:[%s11451_s5 + $0x10] sm:$0xff] }
 0xa4d   : > { %v8099_v56 = vadd.f32 1e-05, %v8091_v57  ;;  %v8507_v57 = vld [vmem:[%s11451_s5 + $0x18] sm:$0xff] }
 0xa4e   : > { %v8072_v14 = vpop.xlane.xlu1 %8071 }
 0xa4f   : > { %11166 = vrsqrt.f32 %v8099_v56  ;;  %v8090_v19 = vmul.f32 0.03125, %v8072_v14  ;;  %v11049_v56 = vpack.c.bf16 %v8507_v57, %v8506_v6  ;;  %v8509_v14 = vld [vmem:[%s11451_s5 + $0x28] sm:$0xff] }
 0xa51   : > { %v11163_v30 = vpop.eup %11162  ;;  %v8098_v48 = vadd.f32 1e-05, %v8090_v19 }
 0xa52   : > { %v8081_v25 = vpop.xlane.xlu1 %8080  ;;  %v8113_v40 = vmul.f32 %v11163_v30, %v14427_v62  ;;  %v9429_v62 = vld [vmem:[%s815_s10] ss:$0 sm:$0xff]  ;;  %v8510_v30 = vld [vmem:[%s11451_s5 + $0x30] sm:$0xff] }
 0xa53   : > { %11168 = vrsqrt.f32 %v8098_v48  ;;  %v8093_v3 = vmul.f32 0.03125, %v8081_v25  ;;  %v8511_v48 = vld [vmem:[%s11451_s5 + $0x38] sm:$0xff] }
 0xa54   : > { %v8127_v2 = vmul.f32 %v9428_v39, %v8113_v40  ;;  %v11057_v25 = vpack.c.bf16 %v8511_v48, %v8510_v30  ;;  %v8512_v40 = vld [vmem:[%s11451_s5 + $0x40] sm:$0xff] }
 0xa55   : > { %v11165_v32 = vpop.eup %11164  ;;  %v8101_v21 = vadd.f32 1e-05, %v8093_v3  ;;  %v8513_v3 = vld [vmem:[%s11451_s5 + $0x48] sm:$0xff] }
 0xa56   : > { %v8078_v16 = vpop.xlane.xlu1 %8077  ;;  %v8112_v46 = vmul.f32 %v11165_v32, %v14432_v60  ;;  %v8141_v0 = vadd.f32 %v9429_v62, %v8127_v2  ;;  %v8514_v32 = vld [vmem:[%s11451_s5 + $0x50] sm:$0xff]  ;;  %v8517_v2 = vld [vmem:[%s11451_s5 + $0x68] sm:$0xff] }
 0xa57   : > { %11170 = vrsqrt.f32 %v8101_v21  ;;  %v8092_v7 = vmul.f32 0.03125, %v8078_v16  ;;  %v8515_v21 = vld [vmem:[%s11451_s5 + $0x58] sm:$0xff] }
 0xa58   : > { %v8126_v20 = vmul.f32 %v9428_v39, %v8112_v46  ;;  %v11065_v16 = vpack.c.bf16 %v8515_v21, %v8514_v32  ;;  %v8516_v46 = vld [vmem:[%s11451_s5 + $0x60] sm:$0xff] }
 0xa59   : > { %v11167_v17 = vpop.eup %11166  ;;  %v8100_v53 = vadd.f32 1e-05, %v8092_v7  ;;  %v11069_v7 = vpack.c.bf16 %v8517_v2, %v8516_v46 }
 0xa5a   : > { %v8084_v1 = vpop.xlane.xlu1 %8083  ;;  %v8140_v54 = vadd.f32 %v9429_v62, %v8126_v20  ;;  %v8115_v58 = vmul.f32 %v11167_v17, %v14438_v50  ;;  %v8519_v20 = vld [vmem:[%s11451_s5 + $0x78] sm:$0xff] }
 0xa5b   : > { %11172 = vrsqrt.f32 %v8100_v53  ;;  %v8094_v12 = vmul.f32 0.03125, %v8084_v1  ;;  %v9430_v53 = vld [vmem:[%s823_s0] ss:$0 sm:$0xff] }
 0xa5c   : > { %10893 = vmatprep.mubr.msk.f32.mxu0 %vm1716_vm2, %v8140_v54  ;;  %v8129_v29 = vmul.f32 %v9428_v39, %v8115_v58 }
 0xa5d   : > { %v11169_v60 = vpop.eup %11168  ;;  %v8102_v52 = vadd.f32 1e-05, %v8094_v12  ;;  %10894 = vmatmul.mubr.msk.f32.vlgmr.msra.gmra.mrb[240].mxu0 %vm1716_vm2, %v8141_v0 }
 0xa5e   : > { %v8087_v51 = vpop.xlane.xlu1 %8086  ;;  %v8114_v27 = vmul.f32 %v11169_v60, %v14444_v34  ;;  %v8143_v10 = vadd.f32 %v9429_v62, %v8129_v29 }
 0xa5f   : > { %11174 = vrsqrt.f32 %v8102_v52  ;;  %v8095_v45 = vmul.f32 0.03125, %v8087_v51 }
 0xa60   : > { %v8128_v44 = vmul.f32 %v9428_v39, %v8114_v27 }
 0xa61   : > { %v11171_v26 = vpop.eup %11170  ;;  %v8103_v63 = vadd.f32 1e-05, %v8095_v45 }
 0xa62   : > { %v8142_v8 = vadd.f32 %v9429_v62, %v8128_v44  ;;  %v8117_v50 = vmul.f32 %v11171_v26, %v14450_v9 }
 0xa63   : > { %11176 = vrsqrt.f32 %v8103_v63 }
 0xa64   : > { %10896 = vmatprep.mubr.msk.f32.mxu0 %vm1716_vm2, %v8142_v8  ;;  %v8131_v42 = vmul.f32 %v9428_v39, %v8117_v50 }
 0xa65   : > { %v11173_v24 = vpop.eup %11172  ;;  %10897 = vmatmul.mubr.msk.f32.gmra.mrb[242].mxu0 %vm1716_vm2, %v8143_v10 }
 0xa66   : > { %v8116_v4 = vmul.f32 %v11173_v24, %v14456_v22  ;;  %v8145_v59 = vadd.f32 %v9429_v62, %v8131_v42 }
 0xa68   : > { %v8130_v34 = vmul.f32 %v9428_v39, %v8116_v4 }
 0xa69   : > { %v11175_v23 = vpop.eup %11174 }
 0xa6a   : > { %v8144_v38 = vadd.f32 %v9429_v62, %v8130_v34  ;;  %v8118_v55 = vmul.f32 %v11175_v23, %v14462_v37  ;;  %v8504_v37 = vld [vmem:[%s11451_s5] sm:$0xff] }
 0xa6b   : > { %v11045_v47 = vpack.c.bf16 %v8505_v43, %v8504_v37 }
 0xa6c   : > { %10899 = vmatprep.mubr.msk.f32.mxu0 %vm1716_vm2, %v8144_v38  ;;  %v8132_v9 = vmul.f32 %v9428_v39, %v8118_v55 }
 0xa6d   : > { %v11177_v5 = vpop.eup %11176  ;;  %10900 = vmatmul.mubr.msk.f32.gmra.mrb[244].mxu0 %vm1716_vm2, %v8145_v59  ;;  %11046 = vmatprep.subr.bf16.mxu0 %v11045_v47 }
 0xa6e   : > { %v8146_v28 = vadd.f32 %v9429_v62, %v8132_v9  ;;  %v8119_v22 = vmul.f32 %v11177_v5, %v14468_v15  ;;  %11048 = vmatpush3.bf16.msra.mxu0 %v11045_v47  ;;  %v8508_v15 = vld [vmem:[%s11451_s5 + $0x20] sm:$0xff] }
 0xa6f   : > { %11050 = vmatprep.subr.bf16.mxu0 %v11049_v56  ;;  %v11053_v19 = vpack.c.bf16 %v8509_v14, %v8508_v15 }
 0xa70   : > { %10902 = vmatprep.mubr.msk.f32.mxu0 %vm1716_vm2, %v8146_v28  ;;  %v8133_v49 = vmul.f32 %v9428_v39, %v8119_v22  ;;  %v11061_v39 = vpack.c.bf16 %v8513_v3, %v8512_v40 }
 0xa72   : > { %v8147_v11 = vadd.f32 %v9429_v62, %v8133_v49  ;;  %11052 = vmatpush3.bf16.msra.mxu0 %v11049_v56  ;;  %v8518_v62 = vld [vmem:[%s11451_s5 + $0x70] sm:$0xff] }
 0xa73   : > { %11054 = vmatprep.subr.bf16.mxu0 %v11053_v19  ;;  %v11073_v17 = vpack.c.bf16 %v8519_v20, %v8518_v62 }
 0xa74   : > { %10903 = vmatmul.mubr.msk.f32.gmra.mrb[246].mxu0 %vm1716_vm2, %v8147_v11 }
 0xa76   : > { %11056 = vmatpush3.bf16.msra.mxu0 %v11053_v19 }
 0xa77   : > { %11058 = vmatprep.subr.bf16.mxu0 %v11057_v25 }
 0xa7a   : > { %11060 = vmatpush3.bf16.msra.mxu0 %v11057_v25 }
 0xa7b   : > { %11062 = vmatprep.subr.bf16.mxu0 %v11061_v39 }
 0xa7e   : > { %11064 = vmatpush3.bf16.msra.mxu0 %v11061_v39 }
 0xa7f   : > { %11066 = vmatprep.subr.bf16.mxu0 %v11065_v16 }
 0xa82   : > { %11068 = vmatpush3.bf16.msra.mxu0 %v11065_v16 }
 0xa83   : > { %11070 = vmatprep.subr.bf16.mxu0 %v11069_v7 }
 0xa86   : > { %11072 = vmatpush3.bf16.msra.mxu0 %v11069_v7 }
 0xa87   : > { %11074 = vmatprep.subr.bf16.mxu0 %v11073_v17 }
 0xa8a   : > { %11076 = vmatpush3.bf16.msra.mxu0 %v11073_v17 }
 0xb30   : > { %v10895_v1 = vpop.f32.mrb[240].mxu0 }
 0xb31   : > { %v14525_v54 = vadd.f32 %v10895_v1, %v9430_v53  ;;  %v8249_v0 = vpop.f32.mrb[241].mxu0 }
 0xb32   : > { %v14527_v12 = vadd.f32 %v9430_v53, %v8249_v0 }
 0xb33   : > { %v14530_v58 = vmul.f32 0.70710677, %v14525_v54 }
 0xb34   : > { %v14533_v60 = vmul.f32 0.70710677, %v14527_v12 }
 0xb35   : > { %v8305_v52 = vand.u32 2147483647, %v14530_v58  ;;  %vm8465_vm3 = vcmp.ge.f32.partialorder %v14530_v58, 0.0 }
 0xb36   : > { %v8304_v51 = vand.u32 2147483647, %v14533_v60  ;;  %vm8464_vm4 = vcmp.ge.f32.partialorder %v14533_v60, 0.0 }
 0xb37   : > { %v8313_v27 = vmul.f32 0.3275911, %v8305_v52  ;;  %v8417_v55 = vsub.f32 0.0, %v8305_v52 }
 0xb38   : > { %v8312_v45 = vmul.f32 0.3275911, %v8304_v51  ;;  %v10898_v29 = vpop.f32.mrb[242].mxu0  ;;  %v8416_v11 = vsub.f32 0.0, %v8304_v51 }
 0xb39   : > { %v8321_v44 = vadd.f32 1.0, %v8313_v27  ;;  %v14537_v26 = vadd.f32 %v10898_v29, %v9430_v53  ;;  %v8259_v63 = vpop.f32.mrb[243].mxu0  ;;  %v8425_v47 = vmul.f32 %v8417_v55, %v8305_v52 }
 0xb3a   : > { %v8320_v8 = vadd.f32 1.0, %v8312_v45  ;;  %v14539_v10 = vadd.f32 %v9430_v53, %v8259_v63  ;;  %v8424_v40 = vmul.f32 %v8416_v11, %v8304_v51 }
 0xb3b   : > { %11178 = vrcp.f32 %v8321_v44  ;;  %v14542_v50 = vmul.f32 0.70710677, %v14537_v26  ;;  %v8434_v21 = vmul.f32 1.442695, %v8425_v47  ;;  %v14583_v44 = vmul.f32 0.5, %v14525_v54 }
 0xb3c   : > { %11180 = vrcp.f32 %v8320_v8  ;;  %v14545_v24 = vmul.f32 0.70710677, %v14539_v10  ;;  %v8432_v52 = vmul.f32 1.442695, %v8424_v40  ;;  %v14587_v8 = vmul.f32 0.5, %v14527_v12 }
 0xb3d   : > { %v8307_v4 = vand.u32 2147483647, %v14542_v50  ;;  %vm8467_vm6 = vcmp.ge.f32.partialorder %v14542_v50, 0.0 }
 0xb3e   : > { %v8306_v42 = vand.u32 2147483647, %v14545_v24  ;;  %vm8466_vm5 = vcmp.ge.f32.partialorder %v14545_v24, 0.0 }
 0xb3f   : > { %v8315_v34 = vmul.f32 0.3275911, %v8307_v4  ;;  %v8419_v14 = vsub.f32 0.0, %v8307_v4 }
 0xb40   : > { %v8314_v23 = vmul.f32 0.3275911, %v8306_v42  ;;  %v10901_v38 = vpop.f32.mrb[244].mxu0  ;;  %v8418_v17 = vsub.f32 0.0, %v8306_v42 }
 0xb41   : > { %v8323_v59 = vadd.f32 1.0, %v8315_v34  ;;  %v14549_v9 = vadd.f32 %v10901_v38, %v9430_v53  ;;  %v8269_v5 = vpop.f32.mrb[245].mxu0  ;;  %v8427_v20 = vmul.f32 %v8419_v14, %v8307_v4 }
 0xb42   : > { %v8322_v28 = vadd.f32 1.0, %v8314_v23  ;;  %v14551_v22 = vadd.f32 %v9430_v53, %v8269_v5  ;;  %v8426_v38 = vmul.f32 %v8418_v17, %v8306_v42 }
 0xb43   : > { %v14554_v49 = vmul.f32 0.70710677, %v14549_v9  ;;  %v8438_v23 = vmul.f32 1.442695, %v8427_v20 }
 0xb44   : > { %11182 = vrcp.f32 %v8322_v28  ;;  %v14557_v37 = vmul.f32 0.70710677, %v14551_v22 }
 0xb45   : > { %v14559_v43 = vpop.eup %11178  ;;  %11184 = vrcp.f32 %v8323_v59  ;;  %v8309_v6 = vand.u32 2147483647, %v14554_v49  ;;  %vm8469_vm7 = vcmp.ge.f32.partialorder %v14554_v49, 0.0  ;;  %v8293_v49 = vmul.f32 0.5, %v14549_v9 }
 0xb46   : > { %v14562_v57 = vpop.eup %11180  ;;  %v8345_v56 = vmul.f32 1.0614054, %v14559_v43  ;;  %v8308_v15 = vand.u32 2147483647, %v14557_v37  ;;  %vm8468_vm8 = vcmp.ge.f32.partialorder %v14557_v37, 0.0 }
 0xb47   : > { %v8317_v19 = vmul.f32 0.3275911, %v8309_v6  ;;  %v10904_v30 = vpop.f32.mrb[246].mxu0  ;;  %v8344_v48 = vmul.f32 1.0614054, %v14562_v57  ;;  %v8421_v27 = vsub.f32 0.0, %v8309_v6 }
 0xb48   : > { %v8353_v25 = vadd.f32 -1.4531521, %v8345_v56  ;;  %v8316_v3 = vmul.f32 0.3275911, %v8308_v15  ;;  %v14567_v39 = vadd.f32 %v10904_v30, %v9430_v53  ;;  %v8279_v32 = vpop.f32.mrb[247].mxu0  ;;  %v8420_v28 = vsub.f32 0.0, %v8308_v15 }
 0xb49   : > { %v8325_v16 = vadd.f32 1.0, %v8317_v19  ;;  %v14569_v46 = vadd.f32 %v9430_v53, %v8279_v32  ;;  %v8352_v2 = vadd.f32 -1.4531521, %v8344_v48  ;;  %v8429_v11 = vmul.f32 %v8421_v27, %v8309_v6 }
 0xb4a   : > { %v8361_v7 = vmul.f32 %v14559_v43, %v8353_v25  ;;  %v8324_v62 = vadd.f32 1.0, %v8316_v3  ;;  %v14573_v1 = vmul.f32 0.70710677, %v14567_v39  ;;  %v14599_v19 = vmul.f32 0.5, %v14539_v10 }
 0xb4b   : > { %11186 = vrcp.f32 %v8325_v16  ;;  %v14576_v51 = vmul.f32 0.70710677, %v14569_v46  ;;  %v8360_v45 = vmul.f32 %v14562_v57, %v8352_v2  ;;  %v8436_v48 = vmul.f32 1.442695, %v8426_v38 }
 0xb4c   : > { %v8369_v0 = vadd.f32 1.4214138, %v8361_v7  ;;  %11188 = vrcp.f32 %v8324_v62  ;;  %v8311_v53 = vand.u32 2147483647, %v14573_v1  ;;  %v8428_v32 = vmul.f32 %v8420_v28, %v8308_v15 }
 0xb4d   : > { %11190 = vpow2.f32 %v8434_v21  ;;  %v14590_v4 = vand.u32 2147483647, %v14576_v51  ;;  %v8368_v59 = vadd.f32 1.4214138, %v8360_v45  ;;  %v8442_v16 = vmul.f32 1.442695, %v8429_v11 }
 0xb4e   : > { %v14580_v29 = vpop.eup %11182  ;;  %v8377_v63 = vmul.f32 %v14559_v43, %v8369_v0  ;;  %v8319_v55 = vmul.f32 0.3275911, %v8311_v53  ;;  %11192 = vpow2.f32 %v8432_v52  ;;  %v8423_v20 = vsub.f32 0.0, %v8311_v53 }
 0xb4f   : > { %v14592_v34 = vpop.eup %11184  ;;  %v8318_v54 = vmul.f32 0.3275911, %v14590_v4  ;;  %v8376_v56 = vmul.f32 %v14562_v57, %v8368_v59  ;;  %v8346_v12 = vmul.f32 1.0614054, %v14580_v29  ;;  %v8422_v59 = vsub.f32 0.0, %v14590_v4 }
 0xb50   : > { %v8385_v5 = vadd.f32 -0.28449672, %v8377_v63  ;;  %v8327_v47 = vadd.f32 1.0, %v8319_v55  ;;  %v8347_v42 = vmul.f32 1.0614054, %v14592_v34  ;;  %vm8470_vm9 = vcmp.ge.f32.partialorder %v14576_v51, 0.0 }
 0xb51   : > { %v8326_v30 = vadd.f32 1.0, %v8318_v54  ;;  %v8384_v25 = vadd.f32 -0.28449672, %v8376_v56  ;;  %v8354_v40 = vadd.f32 -1.4531521, %v8346_v12  ;;  %vm8471_vm10 = vcmp.ge.f32.partialorder %v14573_v1, 0.0 }
 0xb52   : > { %v8393_v14 = vmul.f32 %v14559_v43, %v8385_v5  ;;  %11194 = vrcp.f32 %v8327_v47  ;;  %v8355_v6 = vadd.f32 -1.4531521, %v8347_v42  ;;  %v8431_v47 = vmul.f32 %v8423_v20, %v8311_v53  ;;  %v9439_v1 = vld [vmem:[%s831_s23] ss:$0 sm:$0xff] }
 0xb53   : > { %11196 = vrcp.f32 %v8326_v30  ;;  %v8392_v10 = vmul.f32 %v14562_v57, %v8384_v25  ;;  %v8362_v2 = vmul.f32 %v14580_v29, %v8354_v40  ;;  %v8294_v9 = vmul.f32 0.5, %v14569_v46 }
 0xb54   : > { %v8401_v3 = vadd.f32 0.2548296, %v8393_v14  ;;  %11198 = vpow2.f32 %v8438_v23  ;;  %v8363_v17 = vmul.f32 %v14592_v34, %v8355_v6  ;;  %v8440_v23 = vmul.f32 1.442695, %v8428_v32 }
 0xb55   : > { %v14602_v21 = vpop.eup %11186  ;;  %11200 = vpow2.f32 %v8436_v48  ;;  %v8400_v52 = vadd.f32 0.2548296, %v8392_v10  ;;  %v8370_v27 = vadd.f32 1.4214138, %v8362_v2  ;;  %v8446_v2 = vmul.f32 1.442695, %v8431_v47 }
 0xb56   : > { %v14607_v7 = vpop.eup %11188  ;;  %v8409_v62 = vmul.f32 %v14559_v43, %v8401_v3  ;;  %v8349_v15 = vmul.f32 1.0614054, %v14602_v21  ;;  %v8371_v38 = vadd.f32 1.4214138, %v8363_v17  ;;  %11202 = vpow2.f32 %v8442_v16 }
 0xb57   : > { %v11191_v0 = vpop.eup %11190  ;;  %v8348_v45 = vmul.f32 1.0614054, %v14607_v7  ;;  %v8408_v43 = vmul.f32 %v14562_v57, %v8400_v52  ;;  %v8378_v5 = vmul.f32 %v14580_v29, %v8370_v27  ;;  %11204 = vpow2.f32 %v8440_v23 }
 0xb58   : > { %v8449_v63 = vmul.f32 %v11191_v0, %v8409_v62  ;;  %v8357_v55 = vadd.f32 -1.4531521, %v8349_v15  ;;  %v11193_v54 = vpop.eup %11192  ;;  %v8379_v56 = vmul.f32 %v14592_v34, %v8371_v38  ;;  %v8430_v3 = vmul.f32 %v8422_v59, %v14590_v4 }
 0xb59   : > { %v8356_v28 = vadd.f32 -1.4531521, %v8348_v45  ;;  %v8448_v14 = vmul.f32 %v11193_v54, %v8408_v43  ;;  %v8386_v30 = vadd.f32 -0.28449672, %v8378_v5 }
 0xb5a   : > { %v8457_v11 = vsub.f32 1.0, %v8449_v63  ;;  %v8365_v12 = vmul.f32 %v14602_v21, %v8357_v55  ;;  %v8387_v25 = vadd.f32 -0.28449672, %v8379_v56 }
 0xb5b   : > { %v8364_v42 = vmul.f32 %v14607_v7, %v8356_v28  ;;  %v8456_v32 = vsub.f32 1.0, %v8448_v14  ;;  %v8394_v53 = vmul.f32 %v14580_v29, %v8386_v30 }
 0xb5c   : > { %v8473_v48 = vsub.f32 0.0, %v8457_v11  ;;  %v8373_v40 = vadd.f32 1.4214138, %v8365_v12  ;;  %v14620_v57 = vpop.eup %11194  ;;  %v8395_v62 = vmul.f32 %v14592_v34, %v8387_v25 }
 0xb5d   : > { %v8372_v6 = vadd.f32 1.4214138, %v8364_v42  ;;  %v14624_v10 = vpop.eup %11196  ;;  %v8472_v15 = vsub.f32 0.0, %v8456_v32  ;;  %v8402_v0 = vadd.f32 0.2548296, %v8394_v53 }
 0xb5e   : > { %v8481_v16 = vsel %vm8465_vm3, %v8457_v11, %v8473_v48  ;;  %v8381_v20 = vmul.f32 %v14602_v21, %v8373_v40  ;;  %v11199_v17 = vpop.eup %11198  ;;  %v8351_v4 = vmul.f32 1.0614054, %v14620_v57  ;;  %v8403_v27 = vadd.f32 0.2548296, %v8395_v62 }
 0xb5f   : > { %v8380_v52 = vmul.f32 %v14607_v7, %v8372_v6  ;;  %v8350_v63 = vmul.f32 1.0614054, %v14624_v10  ;;  %v11201_v23 = vpop.eup %11200  ;;  %v8489_v38 = vadd.f32 1.0, %v8481_v16  ;;  %v8480_v58 = vsel %vm8464_vm4, %v8456_v32, %v8472_v15 }
 0xb60   : > { %v8389_v45 = vadd.f32 -0.28449672, %v8381_v20  ;;  %v8410_v55 = vmul.f32 %v14580_v29, %v8402_v0  ;;  %v8488_v43 = vadd.f32 1.0, %v8480_v58  ;;  %v8411_v5 = vmul.f32 %v14592_v34, %v8403_v27  ;;  %v11203_v48 = vpop.eup %11202 }
 0xb61   : > { %v8388_v59 = vadd.f32 -0.28449672, %v8380_v52  ;;  %v8358_v54 = vadd.f32 -1.4531521, %v8350_v63  ;;  %v8444_v11 = vmul.f32 1.442695, %v8430_v3  ;;  %v8497_v29 = vmul.f32 %v8489_v38, %v14583_v44  ;;  %v11205_v32 = vpop.eup %11204 }
 0xb62   : > { %v8397_v28 = vmul.f32 %v14602_v21, %v8389_v45  ;;  %v8450_v47 = vmul.f32 %v11201_v23, %v8410_v55  ;;  %v8359_v12 = vadd.f32 -1.4531521, %v8351_v4  ;;  %v8496_v14 = vmul.f32 %v8488_v43, %v14587_v8 }
 0xb63   : > { %v8396_v56 = vmul.f32 %v14607_v7, %v8388_v59  ;;  %v8451_v30 = vmul.f32 %v11199_v17, %v8411_v5  ;;  %v8366_v60 = vmul.f32 %v14624_v10, %v8358_v54  ;;  %11206 = vpow2.f32 %v8444_v11 }
 0xb64   : > { %v8405_v42 = vadd.f32 0.2548296, %v8397_v28  ;;  %v8458_v25 = vsub.f32 1.0, %v8450_v47  ;;  %v8367_v34 = vmul.f32 %v14620_v57, %v8359_v12  ;;  %10937 = vmatprep.mubr.f32.mxu0 %v8496_v14  ;;  %11208 = vpow2.f32 %v8446_v2 }
 0xb65   : > { %v8404_v40 = vadd.f32 0.2548296, %v8396_v56  ;;  %v8459_v3 = vsub.f32 1.0, %v8451_v30  ;;  %v8374_v6 = vadd.f32 1.4214138, %v8366_v60  ;;  %10938 = vmatmul.mubr.f32.vlgmr.msra.gmra.mrb[248].mxu0 %v8497_v29  ;;  %v8291_v45 = vmul.f32 0.5, %v14537_v26 }
 0xb66   : > { %v8413_v53 = vmul.f32 %v14602_v21, %v8405_v42  ;;  %v8474_v8 = vsub.f32 0.0, %v8458_v25  ;;  %v8375_v62 = vadd.f32 1.4214138, %v8367_v34  ;;  %v8295_v34 = vmul.f32 0.5, %v14567_v39 }
 0xb67   : > { %v8412_v16 = vmul.f32 %v14607_v7, %v8404_v40  ;;  %v8475_v44 = vsub.f32 0.0, %v8459_v3  ;;  %v8382_v17 = vmul.f32 %v14624_v10, %v8374_v6 }
 0xb68   : > { %v8453_v20 = vmul.f32 %v11203_v48, %v8413_v53  ;;  %v8482_v15 = vsel %vm8466_vm5, %v8458_v25, %v8474_v8  ;;  %v8383_v0 = vmul.f32 %v14620_v57, %v8375_v62 }
 0xb69   : > { %v8452_v24 = vmul.f32 %v11205_v32, %v8412_v16  ;;  %v8490_v52 = vadd.f32 1.0, %v8482_v15  ;;  %v8483_v21 = vsel %vm8467_vm6, %v8459_v3, %v8475_v44  ;;  %v8390_v27 = vadd.f32 -0.28449672, %v8382_v17 }
 0xb6a   : > { %v8461_v4 = vsub.f32 1.0, %v8453_v20  ;;  %v8491_v63 = vadd.f32 1.0, %v8483_v21  ;;  %v8391_v23 = vadd.f32 -0.28449672, %v8383_v0 }
 0xb6b   : > { %v8460_v7 = vsub.f32 1.0, %v8452_v24  ;;  %v8498_v2 = vmul.f32 %v8490_v52, %v14599_v19  ;;  %v8398_v58 = vmul.f32 %v14624_v10, %v8390_v27  ;;  %v8292_v19 = vmul.f32 0.5, %v14551_v22 }
 0xb6c   : > { %v8477_v38 = vsub.f32 0.0, %v8461_v4  ;;  %v8499_v50 = vmul.f32 %v8491_v63, %v8291_v45  ;;  %v8399_v59 = vmul.f32 %v14620_v57, %v8391_v23 }
 0xb6d   : > { %v8476_v55 = vsub.f32 0.0, %v8460_v7  ;;  %10940 = vmatprep.mubr.f32.mxu0 %v8498_v2  ;;  %v8406_v5 = vadd.f32 0.2548296, %v8398_v58  ;;  %v11207_v56 = vpop.eup %11206 }
 0xb6e   : > { %v8485_v43 = vsel %vm8469_vm7, %v8461_v4, %v8477_v38  ;;  %10941 = vmatmul.mubr.f32.gmra.mrb[250].mxu0 %v8499_v50  ;;  %v8407_v54 = vadd.f32 0.2548296, %v8399_v59  ;;  %v11209_v14 = vpop.eup %11208 }
 0xb6f   : > { %v8484_v26 = vsel %vm8468_vm8, %v8460_v7, %v8476_v55  ;;  %v8493_v28 = vadd.f32 1.0, %v8485_v43  ;;  %v8414_v47 = vmul.f32 %v14624_v10, %v8406_v5 }
 0xb70   : > { %v8492_v11 = vadd.f32 1.0, %v8484_v26  ;;  %v8415_v12 = vmul.f32 %v14620_v57, %v8407_v54 }
 0xb71   : > { %v8454_v37 = vmul.f32 %v11207_v56, %v8414_v47  ;;  %v8501_v42 = vmul.f32 %v8493_v28, %v8293_v49 }
 0xb72   : > { %v8500_v30 = vmul.f32 %v8492_v11, %v8292_v19  ;;  %v8455_v60 = vmul.f32 %v11209_v14, %v8415_v12 }
 0xb73   : > { %v8462_v48 = vsub.f32 1.0, %v8454_v37 }
 0xb74   : > { %10943 = vmatprep.mubr.f32.mxu0 %v8500_v30  ;;  %v8463_v29 = vsub.f32 1.0, %v8455_v60 }
 0xb75   : > { %10944 = vmatmul.mubr.f32.gmra.mrb[252].mxu0 %v8501_v42  ;;  %v8478_v25 = vsub.f32 0.0, %v8462_v48 }
 0xb76   : > { %v8479_v22 = vsub.f32 0.0, %v8463_v29 }
 0xb77   : > { %v8486_v10 = vsel %vm8470_vm9, %v8462_v48, %v8478_v25 }
 0xb78   : > { %v8494_v57 = vadd.f32 1.0, %v8486_v10  ;;  %v8487_v40 = vsel %vm8471_vm10, %v8463_v29, %v8479_v22 }
 0xb79   : > { %v8495_v32 = vadd.f32 1.0, %v8487_v40 }
 0xb7a   : > { %v8502_v3 = vmul.f32 %v8494_v57, %v8294_v9 }
 0xb7b   : > { %v8503_v53 = vmul.f32 %v8495_v32, %v8295_v34 }
 0xb7c   : > { %10946 = vmatprep.mubr.f32.mxu0 %v8502_v3 }
 0xb7d   : > { %10947 = vmatmul.mubr.f32.gmra.mrb[254].mxu0 %v8503_v53 }
 0xc38   : > { %v10939_v51 = vpop.f32.mrb[248].mxu0 }
 0xc39   : > { %v8599_v46 = vadd.f32 %v10939_v51, %v9439_v1  ;;  %v8593_v6 = vpop.f32.mrb[249].mxu0 }
 0xc3a   : > { %v8594_v8 = vadd.f32 %v9439_v1, %v8593_v6 }
 0xc3b   : > { %v8633_v16 = vadd.f32 %v8599_v46, %v14387_v31 }
 0xc3c   : > { %v8632_v39 = vadd.f32 %v8594_v8, %v14390_v13 }
 0xc3d   : > { %8641 = vst.msk [vmem:[%s11456_s28 + $0x8] sm:$0xff] %vm1716_vm2, %v8633_v16 }
 0xc3e   : > { %8640 = vst.msk [vmem:[%s11456_s28] sm:$0xff] %vm1716_vm2, %v8632_v39 }
 0xc41   : > { %v10942_v62 = vpop.f32.mrb[250].mxu0 }
 0xc42   : > { %v8609_v44 = vadd.f32 %v10942_v62, %v9439_v1  ;;  %v8603_v20 = vpop.f32.mrb[251].mxu0 }
 0xc43   : > { %v8604_v17 = vadd.f32 %v9439_v1, %v8603_v20 }
 0xc44   : > { %v8635_v15 = vadd.f32 %v8609_v44, %v14395_v36 }
 0xc45   : > { %v8634_v24 = vadd.f32 %v8604_v17, %v14400_v35 }
 0xc46   : > { %8643 = vst.msk [vmem:[%s11456_s28 + $0x18] sm:$0xff] %vm1716_vm2, %v8635_v15 }
 0xc47   : > { %8642 = vst.msk [vmem:[%s11456_s28 + $0x10] sm:$0xff] %vm1716_vm2, %v8634_v24 }
 0xc48   : > { %v10945_v31 = vpop.f32.mrb[252].mxu0 }
 0xc49   : > { %v8619_v13 = vadd.f32 %v10945_v31, %v9439_v1  ;;  %v8613_v0 = vpop.f32.mrb[253].mxu0 }
 0xc4a   : > { %v8614_v52 = vadd.f32 %v9439_v1, %v8613_v0 }
 0xc4b   : > { %v8637_v21 = vadd.f32 %v8619_v13, %v14405_v61 }
 0xc4c   : > { %v8636_v4 = vadd.f32 %v8614_v52, %v14410_v18 }
 0xc4d   : > { %8645 = vst.msk [vmem:[%s11456_s28 + $0x28] sm:$0xff] %vm1716_vm2, %v8637_v21 }
 0xc4e   : > { %8644 = vst.msk [vmem:[%s11456_s28 + $0x20] sm:$0xff] %vm1716_vm2, %v8636_v4 }
 0xc50   : > { %v10948_v36 = vpop.f32.mrb[254].mxu0 }
 0xc51   : > { %v8629_v35 = vadd.f32 %v10948_v36, %v9439_v1  ;;  %v8623_v27 = vpop.f32.mrb[255].mxu0 }
 0xc52   : > { %v8624_v45 = vadd.f32 %v9439_v1, %v8623_v27 }
 0xc53   : > { %v8639_v63 = vadd.f32 %v8629_v35, %v14420_v33 }
 0xc54   : > { %v8638_v7 = vadd.f32 %v8624_v45, %v14415_v41 }
 0xc55   : > { %8647 = vst.msk [vmem:[%s11456_s28 + $0x38] sm:$0xff] %vm1716_vm2, %v8639_v63 }
 0xc56   : > { %8646 = vst.msk [vmem:[%s11456_s28 + $0x30] sm:$0xff] %vm1716_vm2, %v8638_v7 }
 0xc57 PF: > { %s14778_s23 = sld [smem:[#allocation5_spill]]  ;;  %s14779_s1 = sld [smem:[#allocation3_spill]] }
 0xc58   : > { %s14780_s22 = sld [smem:[#allocation4_spill]]  ;;  %s14782_s24 = sld [smem:[#allocation7_spill]] }
 0xc5d   : > { %s30_s2 = sadd.s32 1, %s14778_s23   ;;  %s14781_s23 = sld [smem:[#allocation6_spill]] }
 0xc5e   : > { %p27_p8 = scmp.ge.s32.totalorder %s30_s2, 6  }
 0xc60   :  { %29 = sbr.rel (!%p27_p8) target bundleno = 13 (0xd), region = 170 }

</bundles_post_ra>
